<compile_context>
chip_gen: v5e
topology: v5e:2x2
jax: 0.10.0
libtpu: 0.0.40
codegen_flags: <defaults>
</compile_context>

<pallas_src>
import jax
import jax.numpy as jnp
from jax.experimental import pallas as pl
from jax.experimental.pallas import tpu as pltpu


# ---------------------------------------------------------------------------
# Kernel factory (Bblk / Ta0 / SEQ are baked in as Python constants)
# ---------------------------------------------------------------------------
def _make_kernel(bblk, ta0, seq):
    ra = bblk * ta0            # audio rows per grid step (samples stacked)
    mvr = bblk * seq           # rows of the visual block (== road block)
    rvr = 2 * mvr              # fused visual+road rows
    va_s1 = ta0 - 6            # valid audio rows / sample after stage 1
    va_fin = ta0 - 12          # valid audio rows / sample after stage 2

    # ----- small row-shift helpers (applied to (rows, Cout) conv OUTPUTS, so
    #       the wide Cin=1024 inputs are never copied/padded) -----
    def _shift_up(z, k):       # out[r] = z[r + k], zero-filled tail
        pad = jnp.zeros((k, z.shape[1]), z.dtype)
        return jnp.concatenate([z[k:], pad], axis=0)

    def _shift_down(z, k):     # out[r] = z[r - k], zero-filled head
        pad = jnp.zeros((k, z.shape[1]), z.dtype)
        return jnp.concatenate([pad, z[:-k]], axis=0)

    def _row_meta(n, period, rows_axis):
        """Per-row (sample index, within-sample position) as float32."""
        shp = (n, 1) if rows_axis else (1, n)
        dim = 0 if rows_axis else 1
        idx = jax.lax.broadcasted_iota(jnp.int32, shp, dim).astype(jnp.float32)
        samp = jnp.floor(idx * (1.0 / period))
        return samp, idx - samp * period

    # ----- conv blocks (per-tap Ref reads, one bf16 cast, f32 accumulate) ----
    def _conv_valid_pool(x, w_ref, shift_ref):
        """Conv1d(k=3,'valid') + folded BN + ReLU + MaxPool1d(2,1) (audio)."""
        xb = x.astype(jnp.bfloat16)
        z0 = jnp.dot(xb, w_ref[0], preferred_element_type=jnp.float32)
        z1 = jnp.dot(xb, w_ref[1], preferred_element_type=jnp.float32)
        z2 = jnp.dot(xb, w_ref[2], preferred_element_type=jnp.float32)
        y = z0 + _shift_up(z1, 1) + _shift_up(z2, 2)       # y[r]=x[r..r+2]*w
        y = jnp.maximum(y + shift_ref[...], 0.0)           # BN shift + ReLU
        # MaxPool1d(2,1): y >= 0 so the zero-filled last row is harmless;
        # rows past each sample's valid length are junk and never consumed.
        return jnp.maximum(y, _shift_up(y, 1))

    def _conv_same_pair(x, w_ref, shift_ref, not_first, not_last):
        """Fused visual+road Conv1d(k=3,'same') + folded BN + ReLU."""
        xb = x.astype(jnp.bfloat16)
        z0 = jnp.dot(xb, w_ref[0], preferred_element_type=jnp.float32)
        z1 = jnp.dot(xb, w_ref[1], preferred_element_type=jnp.float32)
        z2 = jnp.dot(xb, w_ref[2], preferred_element_type=jnp.float32)
        y = z1 + not_first * _shift_down(z0, 1) + not_last * _shift_up(z2, 1)
        return jnp.maximum(y + shift_ref[...], 0.0)

    # ----- 'ia' attention-map column sums, batched + block-diagonal masked ---
    def _attn_colsum(xk, xq, m, tk, tq, k_valid=None, q_valid=None):
        """sum_q softmax_k((x_q Wq)(x_k Wk)^T / sqrt(d))  ->  (Rk, 1).

        Samples are stacked along rows; cross-sample pairs are masked.  m is
        the pre-folded Wk Wq^T / sqrt(d), zero-padded to (128,128) so the
        garbage channel halves of the fused v/r carry never leak in."""
        rk, rq = xk.shape[0], xq.shape[0]
        kp = jnp.dot(xk, m, preferred_element_type=jnp.float32)        # (Rk,128)
        s = jax.lax.dot_general(kp, xq, (((1,), (1,)), ((), ())),
                                preferred_element_type=jnp.float32)    # (Rk,Rq)
        ksamp, ktpos = _row_meta(rk, tk, True)
        qsamp, qtpos = _row_meta(rq, tq, False)
        mask = ksamp == qsamp
        if k_valid is not None:
            mask = jnp.logical_and(mask, ktpos < (k_valid - 0.5))
        s = jnp.where(mask, s, -1e30)
        smax = jnp.max(s, axis=0, keepdims=True)
        e = jnp.exp(s - smax)
        p = e / jnp.sum(e, axis=0, keepdims=True)                      # softmax over keys
        if q_valid is not None:
            p = p * (qtpos < (q_valid - 0.5)).astype(jnp.float32)
        return jnp.sum(p, axis=1, keepdims=True)                       # (Rk, 1)

    # ----- per-sample mean pooling expressed as a tiny matmul -----
    def _pool_matrix(rows, period, valid_len, row_offset):
        b_idx = jax.lax.broadcasted_iota(jnp.int32, (bblk, rows), 0).astype(jnp.float32)
        r_idx = jax.lax.broadcasted_iota(jnp.int32, (bblk, rows), 1).astype(jnp.float32)
        rel = r_idx - float(row_offset)
        samp = jnp.floor(rel * (1.0 / period))
        tpos = rel - samp * period
        ok = jnp.logical_and(samp == b_idx, tpos < (valid_len - 0.5))
        ok = jnp.logical_and(ok, rel > -0.5)
        return jnp.where(ok, 1.0 / valid_len, 0.0)

    # ----- the fused forward kernel (one grid step == Bblk samples) -----
    def kernel(xa_ref, xvr_ref,
               a0w, a0s, a1w, a1s, a2w, a2s, a3w, a3s,
               vr0w, vr0s, vr1w, vr1s, vr2w, vr2s, vr3w, vr3s,
               attn_ref, cls_w_ref, cls_b_ref, o_ref):
        xa = xa_ref[0]                     # (ra, 10)    audio rows
        xvr = xvr_ref[0]                   # (rvr, 1024) visual rows then road rows

        # per-sample boundary masks for the 'same' convs (reused by 4 layers)
        _, tpos_vr = _row_meta(rvr, seq, True)
        not_first = (tpos_vr > 0.5).astype(jnp.float32)
        not_last = (tpos_vr < (seq - 1.5)).astype(jnp.float32)

        # ---- forward_stage1 ----
        a = _conv_valid_pool(xa, a0w, a0s)                             # (ra, 64)
        a = _conv_valid_pool(a, a1w, a1s)                              # (ra, 128)
        z = _conv_same_pair(xvr, vr0w, vr0s, not_first, not_last)      # (rvr, 128)
        z = _conv_same_pair(z, vr1w, vr1s, not_first, not_last)        # (rvr, 128)

        # ---- 'ia' intermediate-attention fusion ----
        zv = z[0:mvr, :]                   # visual rows (valid channels 0:64)
        zr = z[mvr:rvr, :]                 # road rows   (valid channels 64:128)
        h_av = _attn_colsum(zv, a, attn_ref[0], seq, ta0, q_valid=va_s1)
        h_va = _attn_colsum(a, zv, attn_ref[1], ta0, seq, k_valid=va_s1)
        h_aro = _attn_colsum(zr, a, attn_ref[2], seq, ta0, q_valid=va_s1)
        h_vro = _attn_colsum(zv, zr, attn_ref[3], seq, seq)
        h_roa = _attn_colsum(a, zr, attn_ref[4], ta0, seq, k_valid=va_s1)
        h_rov = _attn_colsum(zr, zv, attn_ref[5], seq, seq)
        a = a + h_va + h_roa                                           # broadcast over C
        z = z + jnp.concatenate([h_av + h_rov, h_aro + h_vro], axis=0)

        # ---- forward_stage2 ----
        a = _conv_valid_pool(a, a2w, a2s)                              # (ra, 256)
        a = _conv_valid_pool(a, a3w, a3s)                              # (ra, 128)
        z = _conv_same_pair(z, vr2w, vr2s, not_first, not_last)        # (rvr, 256)
        z = _conv_same_pair(z, vr3w, vr3s, not_first, not_last)        # (rvr, 256)

        # ---- mean pool per sample + fused classifier (lane-dense output) ----
        pa = jnp.dot(_pool_matrix(ra, ta0, va_fin, 0), a,
                     preferred_element_type=jnp.float32)               # (bblk, 128)
        pv = jnp.dot(_pool_matrix(rvr, seq, seq, 0), z,
                     preferred_element_type=jnp.float32)               # (bblk, 256)
        pr = jnp.dot(_pool_matrix(rvr, seq, seq, mvr), z,
                     preferred_element_type=jnp.float32)               # (bblk, 256)
        feats = jnp.concatenate([pa, pv, pr], axis=1)                  # (bblk, 640)
        out = jnp.dot(feats, cls_w_ref[...],
                      preferred_element_type=jnp.float32) + cls_b_ref[...]
        o_ref[0] = out                                                 # (bblk, 128)

    return kernel


# ---------------------------------------------------------------------------
# Host-side wrapper
# ---------------------------------------------------------------------------
def multimodal_cnn_ia_forward(params, x_audio, x_visual_feat, x_road_feat, *,
                              seq_length, block_size=None):
    B, ta0, ca = x_audio.shape
    assert ca == 10, "audio input must have 10 channels (channels-last)"
    assert ta0 >= 13, "audio length must be >= 13"
    assert x_visual_feat.shape == x_road_feat.shape
    assert x_visual_feat.shape[0] == B * seq_length
    feat = x_visual_feat.shape[-1]
    num_classes = params["num_classes"]

    if block_size is None:   # keep grid length >= 2 when possible (megacore)
        block_size = 1 if B == 1 else max(d for d in range(1, B) if B % d == 0)
    assert B % block_size == 0
    bblk = block_size
    G = B // bblk
    mvr = bblk * seq_length

    # stack samples along rows; fuse visual + road along rows too
    xa = x_audio.reshape(G, bblk * ta0, ca)
    xv = x_visual_feat.reshape(G, mvr, feat)
    xr = x_road_feat.reshape(G, mvr, feat)
    xvr = jnp.concatenate([xv, xr], axis=1)                 # (G, 2*mvr, feat)

    names = []
    for i in range(4):
        names += [f"a{i}_w", f"a{i}_s"]
    for i in range(4):
        names += [f"vr{i}_w", f"vr{i}_s"]
    names += ["attn", "cls_w", "cls_b"]
    weights = [params[n] for n in names]

    def const_spec(arr):
        nd = arr.ndim
        return pl.BlockSpec(tuple(arr.shape), lambda g, _nd=nd: (0,) * _nd)

    in_specs = [
        pl.BlockSpec((1, bblk * ta0, ca), lambda g: (g, 0, 0)),
        pl.BlockSpec((1, 2 * mvr, feat), lambda g: (g, 0, 0)),
    ] + [const_spec(w) for w in weights]

    out = pl.pallas_call(
        _make_kernel(bblk, ta0, seq_length),
        out_shape=jax.ShapeDtypeStruct((G, bblk, 128), jnp.float32),
        grid=(G,),
        in_specs=in_specs,
        out_specs=pl.BlockSpec((1, bblk, 128), lambda g: (g, 0, 0)),
        compiler_params=pltpu.CompilerParams(
            dimension_semantics=("parallel",)),
    )(xa, xvr, *weights)
    return out.reshape(B, 128)[:, :num_classes]


# ---------------------------------------------------------------------------
# Deterministic parameter construction (inference-mode BN folded into weights)
# ---------------------------------------------------------------------------
def _conv_bn_params(key, cin, cout, eps=1e-5):
    k1, k2, k3, k4, k5 = jax.random.split(key, 5)
    w = jax.random.normal(k1, (3, cin, cout), jnp.float32) / float(3 * cin) ** 0.5
    bias = 0.01 * jax.random.normal(k2, (cout,), jnp.float32)
    gamma = 1.0 + 0.1 * jax.random.normal(k3, (cout,), jnp.float32)
    beta = 0.1 * jax.random.normal(k4, (cout,), jnp.float32)
    mean = 0.1 * jax.random.normal(k5, (cout,), jnp.float32)
    var = jnp.ones((cout,), jnp.float32)
    scale = gamma / jnp.sqrt(var + eps)
    w_folded = w * scale                                   # fold BN scale into conv weight
    shift = (beta + (bias - mean) * scale).reshape(1, cout)
    return w_folded, shift


def init_params(key, num_classes=8):
    keys = jax.random.split(key, 24)
    a_defs = [(10, 64), (64, 128), (128, 256), (256, 128)]
    vr_defs = [(1024, 64), (64, 64), (64, 128), (128, 128)]
    a = [_conv_bn_params(keys[i], ci, co) for i, (ci, co) in enumerate(a_defs)]
    v = [_conv_bn_params(keys[4 + i], ci, co) for i, (ci, co) in enumerate(vr_defs)]
    r = [_conv_bn_params(keys[8 + i], ci, co) for i, (ci, co) in enumerate(vr_defs)]

    p = {"num_classes": num_classes}
    for i in range(4):
        p[f"a{i}_w"] = a[i][0].astype(jnp.bfloat16)
        p[f"a{i}_s"] = a[i][1]

    # fuse visual + road: layer 0 concatenated along Cout (shared 1024-ch input),
    # later layers block-diagonal so the two branches never mix.
    def blockdiag(wv, wr):
        kk, ci, co = wv.shape
        _, ci2, co2 = wr.shape
        out = jnp.zeros((kk, ci + ci2, co + co2), jnp.float32)
        out = out.at[:, :ci, :co].set(wv)
        out = out.at[:, ci:, co:].set(wr)
        return out

    vr_w = [jnp.concatenate([v[0][0], r[0][0]], axis=-1)]
    vr_w += [blockdiag(v[i][0], r[i][0]) for i in (1, 2, 3)]
    vr_s = [jnp.concatenate([v[i][1], r[i][1]], axis=-1) for i in range(4)]
    for i in range(4):
        p[f"vr{i}_w"] = vr_w[i].astype(jnp.bfloat16)
        p[f"vr{i}_s"] = vr_s[i]

    # 'ia' Attention (num_heads=1, qkv_bias=False): fold Wk Wq^T / sqrt(d), keep
    # in f32, zero-pad into (128,128) slots selecting each stream's valid
    # channel range (audio: 0:128, visual: 0:64, road: 64:128).
    def attn_fold(k_, cq, ck, out_dim):
        kq, kk = jax.random.split(k_)
        wq = jax.random.normal(kq, (cq, out_dim), jnp.float32) / float(cq) ** 0.5
        wk = jax.random.normal(kk, (ck, out_dim), jnp.float32) / float(ck) ** 0.5
        return (wk @ wq.T) / float(out_dim) ** 0.5          # (ck, cq)

    dim_a, dim_v, dim_r = 128, 64, 64
    a_off, v_off, r_off = 0, 0, 64
    specs = [  # (ck, k_off, cq, q_off, out_dim)
        (dim_v, v_off, dim_a, a_off, dim_a),    # av1  (k=v, q=a)
        (dim_a, a_off, dim_v, v_off, dim_v),    # va1  (k=a, q=v)
        (dim_r, r_off, dim_a, a_off, dim_a),    # aro1 (k=r, q=a)
        (dim_v, v_off, dim_r, r_off, dim_r),    # vro1 (k=v, q=r)
        (dim_a, a_off, dim_r, r_off, dim_r),    # roa1 (k=a, q=r)
        (dim_r, r_off, dim_v, v_off, dim_v),    # rov1 (k=r, q=v)
    ]
    attn = jnp.zeros((6, 128, 128), jnp.float32)
    for i, (ck, koff, cq, qoff, od) in enumerate(specs):
        m = attn_fold(keys[12 + i], cq=cq, ck=ck, out_dim=od)
        attn = attn.at[i, koff:koff + ck, qoff:qoff + cq].set(m)
    p["attn"] = attn

    # classifier Linear(384 -> num_classes) packed lane-dense against the
    # in-kernel [pa(128) | pooled_v(256) | pooled_r(256)] feature layout.
    kcw, kcb = jax.random.split(keys[18])
    cls_w = jax.random.normal(kcw, (384, num_classes), jnp.float32) / 384.0 ** 0.5
    cls_b = 0.01 * jax.random.normal(kcb, (num_classes,), jnp.float32)
    w_pack = jnp.zeros((640, 128), jnp.float32)
    w_pack = w_pack.at[0:128, :num_classes].set(cls_w[0:128])       # audio
    w_pack = w_pack.at[128:256, :num_classes].set(cls_w[128:256])   # video (pv cols 0:128)
    w_pack = w_pack.at[512:640, :num_classes].set(cls_w[256:384])   # road  (pr cols 128:256)
    p["cls_w"] = w_pack
    p["cls_b"] = jnp.zeros((1, 128), jnp.float32).at[0, :num_classes].set(cls_b)
    return p


# ---------------------------------------------------------------------------
if __name__ == "__main__":
    key = jax.random.PRNGKey(0)
    B = 8                 # n_samples
    SEQ = 8               # seq_length / im_per_sample
    LA = 24               # audio time length (stage1: 24->18, stage2: 18->12)
    NUM_CLASSES = 8
    FEAT = 1024           # EfficientFace feature dim (stages_out_channels[-1])

    kp, ka, kv, kr = jax.random.split(key, 4)
    params = init_params(kp, num_classes=NUM_CLASSES)

    # audio in (B, T, C) channels-last (torch: (B, 10, T))
    x_audio = jax.random.normal(ka, (B, LA, 10), jnp.float32)
    # per-frame 1024-d features (output of forward_features) for visual/road
    x_visual_feat = jax.random.normal(kv, (B * SEQ, FEAT), jnp.float32)
    x_road_feat = jax.random.normal(kr, (B * SEQ, FEAT), jnp.float32)

    out = multimodal_cnn_ia_forward(params, x_audio, x_visual_feat, x_road_feat,
                                    seq_length=SEQ, block_size=4)
    jax.block_until_ready(out)
    assert out.shape == (B, NUM_CLASSES), out.shape
    assert bool(jnp.all(jnp.isfinite(out)))
    print("KERNEL_OK")
</pallas_src>

<mosaic_0001>
module attributes {stable_mosaic.version = 11 : i64} {
  func.func @kernel(%arg0: i32, %arg1: memref<1x96x10xf32, #tpu.memory_space<vmem>>, %arg2: memref<1x64x1024xf32, #tpu.memory_space<vmem>>, %arg3: memref<3x10x64xbf16, #tpu.memory_space<vmem>>, %arg4: memref<1x64xf32, #tpu.memory_space<vmem>>, %arg5: memref<3x64x128xbf16, #tpu.memory_space<vmem>>, %arg6: memref<1x128xf32, #tpu.memory_space<vmem>>, %arg7: memref<3x128x256xbf16, #tpu.memory_space<vmem>>, %arg8: memref<1x256xf32, #tpu.memory_space<vmem>>, %arg9: memref<3x256x128xbf16, #tpu.memory_space<vmem>>, %arg10: memref<1x128xf32, #tpu.memory_space<vmem>>, %arg11: memref<3x1024x128xbf16, #tpu.memory_space<vmem>>, %arg12: memref<1x128xf32, #tpu.memory_space<vmem>>, %arg13: memref<3x128x128xbf16, #tpu.memory_space<vmem>>, %arg14: memref<1x128xf32, #tpu.memory_space<vmem>>, %arg15: memref<3x128x256xbf16, #tpu.memory_space<vmem>>, %arg16: memref<1x256xf32, #tpu.memory_space<vmem>>, %arg17: memref<3x256x256xbf16, #tpu.memory_space<vmem>>, %arg18: memref<1x256xf32, #tpu.memory_space<vmem>>, %arg19: memref<6x128x128xf32, #tpu.memory_space<vmem>>, %arg20: memref<640x128xf32, #tpu.memory_space<vmem>>, %arg21: memref<1x128xf32, #tpu.memory_space<vmem>>, %arg22: memref<1x4x128xf32, #tpu.memory_space<vmem>>) attributes {dimension_semantics = [#tpu.dimension_semantics<parallel>], iteration_bounds = array<i64: 2>, scalar_prefetch = 0 : i64, scratch_operands = 0 : i64, tpu.core_type = #tpu.core_type<tc>, window_params = [{transform_indices = @transform_0, window_bounds = array<i64: 1, 96, 10>}, {transform_indices = @transform_1, window_bounds = array<i64: 1, 64, 1024>}, {pipeline_mode = #tpu.pipeline_mode<synchronous>, transform_indices = @transform_2, window_bounds = array<i64: 3, 10, 64>}, {pipeline_mode = #tpu.pipeline_mode<synchronous>, transform_indices = @transform_3, window_bounds = array<i64: 1, 64>}, {pipeline_mode = #tpu.pipeline_mode<synchronous>, transform_indices = @transform_4, window_bounds = array<i64: 3, 64, 128>}, {pipeline_mode = #tpu.pipeline_mode<synchronous>, transform_indices = @transform_5, window_bounds = array<i64: 1, 128>}, {pipeline_mode = #tpu.pipeline_mode<synchronous>, transform_indices = @transform_6, window_bounds = array<i64: 3, 128, 256>}, {pipeline_mode = #tpu.pipeline_mode<synchronous>, transform_indices = @transform_7, window_bounds = array<i64: 1, 256>}, {pipeline_mode = #tpu.pipeline_mode<synchronous>, transform_indices = @transform_8, window_bounds = array<i64: 3, 256, 128>}, {pipeline_mode = #tpu.pipeline_mode<synchronous>, transform_indices = @transform_9, window_bounds = array<i64: 1, 128>}, {pipeline_mode = #tpu.pipeline_mode<synchronous>, transform_indices = @transform_10, window_bounds = array<i64: 3, 1024, 128>}, {pipeline_mode = #tpu.pipeline_mode<synchronous>, transform_indices = @transform_11, window_bounds = array<i64: 1, 128>}, {pipeline_mode = #tpu.pipeline_mode<synchronous>, transform_indices = @transform_12, window_bounds = array<i64: 3, 128, 128>}, {pipeline_mode = #tpu.pipeline_mode<synchronous>, transform_indices = @transform_13, window_bounds = array<i64: 1, 128>}, {pipeline_mode = #tpu.pipeline_mode<synchronous>, transform_indices = @transform_14, window_bounds = array<i64: 3, 128, 256>}, {pipeline_mode = #tpu.pipeline_mode<synchronous>, transform_indices = @transform_15, window_bounds = array<i64: 1, 256>}, {pipeline_mode = #tpu.pipeline_mode<synchronous>, transform_indices = @transform_16, window_bounds = array<i64: 3, 256, 256>}, {pipeline_mode = #tpu.pipeline_mode<synchronous>, transform_indices = @transform_17, window_bounds = array<i64: 1, 256>}, {pipeline_mode = #tpu.pipeline_mode<synchronous>, transform_indices = @transform_18, window_bounds = array<i64: 6, 128, 128>}, {pipeline_mode = #tpu.pipeline_mode<synchronous>, transform_indices = @transform_19, window_bounds = array<i64: 640, 128>}, {pipeline_mode = #tpu.pipeline_mode<synchronous>, transform_indices = @transform_20, window_bounds = array<i64: 1, 128>}, {transform_indices = @transform_21, window_bounds = array<i64: 1, 4, 128>}]} {
    %c0 = arith.constant 0 : index
    %c0_0 = arith.constant 0 : index
    %c0_1 = arith.constant 0 : index
    %0 = vector.load %arg1[%c0, %c0_0, %c0_1] : memref<1x96x10xf32, #tpu.memory_space<vmem>>, vector<1x96x10xf32>
    %1 = vector.shape_cast %0 : vector<1x96x10xf32> to vector<96x10xf32>
    %c0_2 = arith.constant 0 : index
    %c0_3 = arith.constant 0 : index
    %c0_4 = arith.constant 0 : index
    %2 = vector.load %arg2[%c0_2, %c0_3, %c0_4] : memref<1x64x1024xf32, #tpu.memory_space<vmem>>, vector<1x64x1024xf32>
    %3 = vector.shape_cast %2 : vector<1x64x1024xf32> to vector<64x1024xf32>
    %4 = tpu.iota {dimensions = array<i32: 0>} : vector<64x1xi32>
    %5 = arith.sitofp %4 : vector<64x1xi32> to vector<64x1xf32>
    %cst = arith.constant 1.250000e-01 : f32
    %6 = vector.broadcast %cst : f32 to vector<64x1xf32>
    %7 = arith.mulf %5, %6 : vector<64x1xf32>
    %8 = math.floor %7 : vector<64x1xf32>
    %cst_5 = arith.constant 8.000000e+00 : f32
    %9 = vector.broadcast %cst_5 : f32 to vector<64x1xf32>
    %10 = arith.mulf %8, %9 : vector<64x1xf32>
    %11 = arith.subf %5, %10 : vector<64x1xf32>
    %cst_6 = arith.constant 5.000000e-01 : f32
    %12 = vector.broadcast %cst_6 : f32 to vector<64x1xf32>
    %13 = arith.cmpf ogt, %11, %12 : vector<64x1xf32>
    %14 = arith.extui %13 : vector<64x1xi1> to vector<64x1xi32>
    %15 = arith.sitofp %14 : vector<64x1xi32> to vector<64x1xf32>
    %cst_7 = arith.constant 6.500000e+00 : f32
    %16 = vector.broadcast %cst_7 : f32 to vector<64x1xf32>
    %17 = arith.cmpf olt, %11, %16 : vector<64x1xf32>
    %18 = arith.extui %17 : vector<64x1xi1> to vector<64x1xi32>
    %19 = arith.sitofp %18 : vector<64x1xi32> to vector<64x1xf32>
    %20 = arith.truncf %1 : vector<96x10xf32> to vector<96x10xbf16>
    %c0_8 = arith.constant 0 : index
    %c0_9 = arith.constant 0 : index
    %c0_10 = arith.constant 0 : index
    %21 = vector.load %arg3[%c0_8, %c0_9, %c0_10] : memref<3x10x64xbf16, #tpu.memory_space<vmem>>, vector<1x10x64xbf16>
    %22 = vector.shape_cast %21 : vector<1x10x64xbf16> to vector<10x64xbf16>
    %cst_11 = arith.constant dense<0.000000e+00> : vector<96x64xf32>
    %23 = tpu.matmul %20, %22, %cst_11 {dimension_numbers = #tpu.dot_dimension_numbers<[1], [0], [0], [1], [0, 0, 1, 1], [], []>} : vector<96x10xbf16>, vector<10x64xbf16>, vector<96x64xf32> -> vector<96x64xf32>
    %c1 = arith.constant 1 : index
    %c0_12 = arith.constant 0 : index
    %c0_13 = arith.constant 0 : index
    %24 = vector.load %arg3[%c1, %c0_12, %c0_13] : memref<3x10x64xbf16, #tpu.memory_space<vmem>>, vector<1x10x64xbf16>
    %25 = vector.shape_cast %24 : vector<1x10x64xbf16> to vector<10x64xbf16>
    %cst_14 = arith.constant dense<0.000000e+00> : vector<96x64xf32>
    %26 = tpu.matmul %20, %25, %cst_14 {dimension_numbers = #tpu.dot_dimension_numbers<[1], [0], [0], [1], [0, 0, 1, 1], [], []>} : vector<96x10xbf16>, vector<10x64xbf16>, vector<96x64xf32> -> vector<96x64xf32>
    %c2 = arith.constant 2 : index
    %c0_15 = arith.constant 0 : index
    %c0_16 = arith.constant 0 : index
    %27 = vector.load %arg3[%c2, %c0_15, %c0_16] : memref<3x10x64xbf16, #tpu.memory_space<vmem>>, vector<1x10x64xbf16>
    %28 = vector.shape_cast %27 : vector<1x10x64xbf16> to vector<10x64xbf16>
    %cst_17 = arith.constant dense<0.000000e+00> : vector<96x64xf32>
    %29 = tpu.matmul %20, %28, %cst_17 {dimension_numbers = #tpu.dot_dimension_numbers<[1], [0], [0], [1], [0, 0, 1, 1], [], []>} : vector<96x10xbf16>, vector<10x64xbf16>, vector<96x64xf32> -> vector<96x64xf32>
    %cst_18 = arith.constant 0.000000e+00 : f32
    %30 = vector.broadcast %cst_18 : f32 to vector<1x64xf32>
    %31 = vector.extract_strided_slice %26 {offsets = [1, 0], sizes = [95, 64], strides = [1, 1]} : vector<96x64xf32> to vector<95x64xf32>
    %32 = tpu.concatenate %31, %30 in 0 : vector<95x64xf32>, vector<1x64xf32> -> vector<96x64xf32>
    %33 = arith.addf %23, %32 : vector<96x64xf32>
    %cst_19 = arith.constant 0.000000e+00 : f32
    %34 = vector.broadcast %cst_19 : f32 to vector<2x64xf32>
    %35 = vector.extract_strided_slice %29 {offsets = [2, 0], sizes = [94, 64], strides = [1, 1]} : vector<96x64xf32> to vector<94x64xf32>
    %36 = tpu.concatenate %35, %34 in 0 : vector<94x64xf32>, vector<2x64xf32> -> vector<96x64xf32>
    %37 = arith.addf %33, %36 : vector<96x64xf32>
    %c0_20 = arith.constant 0 : index
    %c0_21 = arith.constant 0 : index
    %38 = vector.load %arg4[%c0_20, %c0_21] : memref<1x64xf32, #tpu.memory_space<vmem>>, vector<1x64xf32>
    %39 = vector.broadcast %38 : vector<1x64xf32> to vector<96x64xf32>
    %40 = arith.addf %37, %39 : vector<96x64xf32>
    %cst_22 = arith.constant 0.000000e+00 : f32
    %41 = vector.broadcast %cst_22 : f32 to vector<96x64xf32>
    %42 = arith.maximumf %40, %41 : vector<96x64xf32>
    %cst_23 = arith.constant 0.000000e+00 : f32
    %43 = vector.broadcast %cst_23 : f32 to vector<1x64xf32>
    %44 = vector.extract_strided_slice %42 {offsets = [1, 0], sizes = [95, 64], strides = [1, 1]} : vector<96x64xf32> to vector<95x64xf32>
    %45 = tpu.concatenate %44, %43 in 0 : vector<95x64xf32>, vector<1x64xf32> -> vector<96x64xf32>
    %46 = arith.maximumf %42, %45 : vector<96x64xf32>
    %47 = arith.truncf %46 : vector<96x64xf32> to vector<96x64xbf16>
    %c0_24 = arith.constant 0 : index
    %c0_25 = arith.constant 0 : index
    %c0_26 = arith.constant 0 : index
    %48 = vector.load %arg5[%c0_24, %c0_25, %c0_26] : memref<3x64x128xbf16, #tpu.memory_space<vmem>>, vector<1x64x128xbf16>
    %49 = vector.shape_cast %48 : vector<1x64x128xbf16> to vector<64x128xbf16>
    %cst_27 = arith.constant dense<0.000000e+00> : vector<96x128xf32>
    %50 = tpu.matmul %47, %49, %cst_27 {dimension_numbers = #tpu.dot_dimension_numbers<[1], [0], [0], [1], [0, 0, 1, 1], [], []>} : vector<96x64xbf16>, vector<64x128xbf16>, vector<96x128xf32> -> vector<96x128xf32>
    %c1_28 = arith.constant 1 : index
    %c0_29 = arith.constant 0 : index
    %c0_30 = arith.constant 0 : index
    %51 = vector.load %arg5[%c1_28, %c0_29, %c0_30] : memref<3x64x128xbf16, #tpu.memory_space<vmem>>, vector<1x64x128xbf16>
    %52 = vector.shape_cast %51 : vector<1x64x128xbf16> to vector<64x128xbf16>
    %cst_31 = arith.constant dense<0.000000e+00> : vector<96x128xf32>
    %53 = tpu.matmul %47, %52, %cst_31 {dimension_numbers = #tpu.dot_dimension_numbers<[1], [0], [0], [1], [0, 0, 1, 1], [], []>} : vector<96x64xbf16>, vector<64x128xbf16>, vector<96x128xf32> -> vector<96x128xf32>
    %c2_32 = arith.constant 2 : index
    %c0_33 = arith.constant 0 : index
    %c0_34 = arith.constant 0 : index
    %54 = vector.load %arg5[%c2_32, %c0_33, %c0_34] : memref<3x64x128xbf16, #tpu.memory_space<vmem>>, vector<1x64x128xbf16>
    %55 = vector.shape_cast %54 : vector<1x64x128xbf16> to vector<64x128xbf16>
    %cst_35 = arith.constant dense<0.000000e+00> : vector<96x128xf32>
    %56 = tpu.matmul %47, %55, %cst_35 {dimension_numbers = #tpu.dot_dimension_numbers<[1], [0], [0], [1], [0, 0, 1, 1], [], []>} : vector<96x64xbf16>, vector<64x128xbf16>, vector<96x128xf32> -> vector<96x128xf32>
    %cst_36 = arith.constant 0.000000e+00 : f32
    %57 = vector.broadcast %cst_36 : f32 to vector<1x128xf32>
    %58 = vector.extract_strided_slice %53 {offsets = [1, 0], sizes = [95, 128], strides = [1, 1]} : vector<96x128xf32> to vector<95x128xf32>
    %59 = tpu.concatenate %58, %57 in 0 : vector<95x128xf32>, vector<1x128xf32> -> vector<96x128xf32>
    %60 = arith.addf %50, %59 : vector<96x128xf32>
    %cst_37 = arith.constant 0.000000e+00 : f32
    %61 = vector.broadcast %cst_37 : f32 to vector<2x128xf32>
    %62 = vector.extract_strided_slice %56 {offsets = [2, 0], sizes = [94, 128], strides = [1, 1]} : vector<96x128xf32> to vector<94x128xf32>
    %63 = tpu.concatenate %62, %61 in 0 : vector<94x128xf32>, vector<2x128xf32> -> vector<96x128xf32>
    %64 = arith.addf %60, %63 : vector<96x128xf32>
    %c0_38 = arith.constant 0 : index
    %c0_39 = arith.constant 0 : index
    %65 = vector.load %arg6[%c0_38, %c0_39] : memref<1x128xf32, #tpu.memory_space<vmem>>, vector<1x128xf32>
    %66 = vector.broadcast %65 : vector<1x128xf32> to vector<96x128xf32>
    %67 = arith.addf %64, %66 : vector<96x128xf32>
    %cst_40 = arith.constant 0.000000e+00 : f32
    %68 = vector.broadcast %cst_40 : f32 to vector<96x128xf32>
    %69 = arith.maximumf %67, %68 : vector<96x128xf32>
    %cst_41 = arith.constant 0.000000e+00 : f32
    %70 = vector.broadcast %cst_41 : f32 to vector<1x128xf32>
    %71 = vector.extract_strided_slice %69 {offsets = [1, 0], sizes = [95, 128], strides = [1, 1]} : vector<96x128xf32> to vector<95x128xf32>
    %72 = tpu.concatenate %71, %70 in 0 : vector<95x128xf32>, vector<1x128xf32> -> vector<96x128xf32>
    %73 = arith.maximumf %69, %72 : vector<96x128xf32>
    %74 = arith.truncf %3 : vector<64x1024xf32> to vector<64x1024xbf16>
    %c0_42 = arith.constant 0 : index
    %c0_43 = arith.constant 0 : index
    %c0_44 = arith.constant 0 : index
    %75 = vector.load %arg11[%c0_42, %c0_43, %c0_44] : memref<3x1024x128xbf16, #tpu.memory_space<vmem>>, vector<1x1024x128xbf16>
    %76 = vector.shape_cast %75 : vector<1x1024x128xbf16> to vector<1024x128xbf16>
    %cst_45 = arith.constant dense<0.000000e+00> : vector<64x128xf32>
    %77 = tpu.matmul %74, %76, %cst_45 {dimension_numbers = #tpu.dot_dimension_numbers<[1], [0], [0], [1], [0, 0, 1, 1], [], []>} : vector<64x1024xbf16>, vector<1024x128xbf16>, vector<64x128xf32> -> vector<64x128xf32>
    %c1_46 = arith.constant 1 : index
    %c0_47 = arith.constant 0 : index
    %c0_48 = arith.constant 0 : index
    %78 = vector.load %arg11[%c1_46, %c0_47, %c0_48] : memref<3x1024x128xbf16, #tpu.memory_space<vmem>>, vector<1x1024x128xbf16>
    %79 = vector.shape_cast %78 : vector<1x1024x128xbf16> to vector<1024x128xbf16>
    %cst_49 = arith.constant dense<0.000000e+00> : vector<64x128xf32>
    %80 = tpu.matmul %74, %79, %cst_49 {dimension_numbers = #tpu.dot_dimension_numbers<[1], [0], [0], [1], [0, 0, 1, 1], [], []>} : vector<64x1024xbf16>, vector<1024x128xbf16>, vector<64x128xf32> -> vector<64x128xf32>
    %c2_50 = arith.constant 2 : index
    %c0_51 = arith.constant 0 : index
    %c0_52 = arith.constant 0 : index
    %81 = vector.load %arg11[%c2_50, %c0_51, %c0_52] : memref<3x1024x128xbf16, #tpu.memory_space<vmem>>, vector<1x1024x128xbf16>
    %82 = vector.shape_cast %81 : vector<1x1024x128xbf16> to vector<1024x128xbf16>
    %cst_53 = arith.constant dense<0.000000e+00> : vector<64x128xf32>
    %83 = tpu.matmul %74, %82, %cst_53 {dimension_numbers = #tpu.dot_dimension_numbers<[1], [0], [0], [1], [0, 0, 1, 1], [], []>} : vector<64x1024xbf16>, vector<1024x128xbf16>, vector<64x128xf32> -> vector<64x128xf32>
    %cst_54 = arith.constant 0.000000e+00 : f32
    %84 = vector.broadcast %cst_54 : f32 to vector<1x128xf32>
    %85 = vector.extract_strided_slice %77 {offsets = [0, 0], sizes = [63, 128], strides = [1, 1]} : vector<64x128xf32> to vector<63x128xf32>
    %86 = tpu.concatenate %84, %85 in 0 : vector<1x128xf32>, vector<63x128xf32> -> vector<64x128xf32>
    %87 = vector.broadcast %15 : vector<64x1xf32> to vector<64x128xf32>
    %88 = arith.mulf %87, %86 : vector<64x128xf32>
    %89 = arith.addf %80, %88 : vector<64x128xf32>
    %cst_55 = arith.constant 0.000000e+00 : f32
    %90 = vector.broadcast %cst_55 : f32 to vector<1x128xf32>
    %91 = vector.extract_strided_slice %83 {offsets = [1, 0], sizes = [63, 128], strides = [1, 1]} : vector<64x128xf32> to vector<63x128xf32>
    %92 = tpu.concatenate %91, %90 in 0 : vector<63x128xf32>, vector<1x128xf32> -> vector<64x128xf32>
    %93 = vector.broadcast %19 : vector<64x1xf32> to vector<64x128xf32>
    %94 = arith.mulf %93, %92 : vector<64x128xf32>
    %95 = arith.addf %89, %94 : vector<64x128xf32>
    %c0_56 = arith.constant 0 : index
    %c0_57 = arith.constant 0 : index
    %96 = vector.load %arg12[%c0_56, %c0_57] : memref<1x128xf32, #tpu.memory_space<vmem>>, vector<1x128xf32>
    %97 = vector.broadcast %96 : vector<1x128xf32> to vector<64x128xf32>
    %98 = arith.addf %95, %97 : vector<64x128xf32>
    %cst_58 = arith.constant 0.000000e+00 : f32
    %99 = vector.broadcast %cst_58 : f32 to vector<64x128xf32>
    %100 = arith.maximumf %98, %99 : vector<64x128xf32>
    %101 = arith.truncf %100 : vector<64x128xf32> to vector<64x128xbf16>
    %c0_59 = arith.constant 0 : index
    %c0_60 = arith.constant 0 : index
    %c0_61 = arith.constant 0 : index
    %102 = vector.load %arg13[%c0_59, %c0_60, %c0_61] : memref<3x128x128xbf16, #tpu.memory_space<vmem>>, vector<1x128x128xbf16>
    %103 = vector.shape_cast %102 : vector<1x128x128xbf16> to vector<128x128xbf16>
    %cst_62 = arith.constant dense<0.000000e+00> : vector<64x128xf32>
    %104 = tpu.matmul %101, %103, %cst_62 {dimension_numbers = #tpu.dot_dimension_numbers<[1], [0], [0], [1], [0, 0, 1, 1], [], []>} : vector<64x128xbf16>, vector<128x128xbf16>, vector<64x128xf32> -> vector<64x128xf32>
    %c1_63 = arith.constant 1 : index
    %c0_64 = arith.constant 0 : index
    %c0_65 = arith.constant 0 : index
    %105 = vector.load %arg13[%c1_63, %c0_64, %c0_65] : memref<3x128x128xbf16, #tpu.memory_space<vmem>>, vector<1x128x128xbf16>
    %106 = vector.shape_cast %105 : vector<1x128x128xbf16> to vector<128x128xbf16>
    %cst_66 = arith.constant dense<0.000000e+00> : vector<64x128xf32>
    %107 = tpu.matmul %101, %106, %cst_66 {dimension_numbers = #tpu.dot_dimension_numbers<[1], [0], [0], [1], [0, 0, 1, 1], [], []>} : vector<64x128xbf16>, vector<128x128xbf16>, vector<64x128xf32> -> vector<64x128xf32>
    %c2_67 = arith.constant 2 : index
    %c0_68 = arith.constant 0 : index
    %c0_69 = arith.constant 0 : index
    %108 = vector.load %arg13[%c2_67, %c0_68, %c0_69] : memref<3x128x128xbf16, #tpu.memory_space<vmem>>, vector<1x128x128xbf16>
    %109 = vector.shape_cast %108 : vector<1x128x128xbf16> to vector<128x128xbf16>
    %cst_70 = arith.constant dense<0.000000e+00> : vector<64x128xf32>
    %110 = tpu.matmul %101, %109, %cst_70 {dimension_numbers = #tpu.dot_dimension_numbers<[1], [0], [0], [1], [0, 0, 1, 1], [], []>} : vector<64x128xbf16>, vector<128x128xbf16>, vector<64x128xf32> -> vector<64x128xf32>
    %cst_71 = arith.constant 0.000000e+00 : f32
    %111 = vector.broadcast %cst_71 : f32 to vector<1x128xf32>
    %112 = vector.extract_strided_slice %104 {offsets = [0, 0], sizes = [63, 128], strides = [1, 1]} : vector<64x128xf32> to vector<63x128xf32>
    %113 = tpu.concatenate %111, %112 in 0 : vector<1x128xf32>, vector<63x128xf32> -> vector<64x128xf32>
    %114 = vector.broadcast %15 : vector<64x1xf32> to vector<64x128xf32>
    %115 = arith.mulf %114, %113 : vector<64x128xf32>
    %116 = arith.addf %107, %115 : vector<64x128xf32>
    %cst_72 = arith.constant 0.000000e+00 : f32
    %117 = vector.broadcast %cst_72 : f32 to vector<1x128xf32>
    %118 = vector.extract_strided_slice %110 {offsets = [1, 0], sizes = [63, 128], strides = [1, 1]} : vector<64x128xf32> to vector<63x128xf32>
    %119 = tpu.concatenate %118, %117 in 0 : vector<63x128xf32>, vector<1x128xf32> -> vector<64x128xf32>
    %120 = vector.broadcast %19 : vector<64x1xf32> to vector<64x128xf32>
    %121 = arith.mulf %120, %119 : vector<64x128xf32>
    %122 = arith.addf %116, %121 : vector<64x128xf32>
    %c0_73 = arith.constant 0 : index
    %c0_74 = arith.constant 0 : index
    %123 = vector.load %arg14[%c0_73, %c0_74] : memref<1x128xf32, #tpu.memory_space<vmem>>, vector<1x128xf32>
    %124 = vector.broadcast %123 : vector<1x128xf32> to vector<64x128xf32>
    %125 = arith.addf %122, %124 : vector<64x128xf32>
    %cst_75 = arith.constant 0.000000e+00 : f32
    %126 = vector.broadcast %cst_75 : f32 to vector<64x128xf32>
    %127 = arith.maximumf %125, %126 : vector<64x128xf32>
    %128 = vector.extract_strided_slice %127 {offsets = [0, 0], sizes = [32, 128], strides = [1, 1]} : vector<64x128xf32> to vector<32x128xf32>
    %129 = vector.extract_strided_slice %127 {offsets = [32, 0], sizes = [32, 128], strides = [1, 1]} : vector<64x128xf32> to vector<32x128xf32>
    %c0_76 = arith.constant 0 : index
    %c0_77 = arith.constant 0 : index
    %c0_78 = arith.constant 0 : index
    %130 = vector.load %arg19[%c0_76, %c0_77, %c0_78] : memref<6x128x128xf32, #tpu.memory_space<vmem>>, vector<1x128x128xf32>
    %131 = vector.shape_cast %130 : vector<1x128x128xf32> to vector<128x128xf32>
    %cst_79 = arith.constant dense<0.000000e+00> : vector<32x128xf32>
    %132 = tpu.matmul %128, %131, %cst_79 {dimension_numbers = #tpu.dot_dimension_numbers<[1], [0], [0], [1], [0, 0, 1, 1], [], []>} : vector<32x128xf32>, vector<128x128xf32>, vector<32x128xf32> -> vector<32x128xf32>
    %cst_80 = arith.constant dense<0.000000e+00> : vector<32x96xf32>
    %133 = tpu.matmul %132, %73, %cst_80 {dimension_numbers = #tpu.dot_dimension_numbers<[1], [1], [0], [0], [0, 0, 1, 0], [], []>} : vector<32x128xf32>, vector<96x128xf32>, vector<32x96xf32> -> vector<32x96xf32>
    %134 = tpu.iota {dimensions = array<i32: 0>} : vector<32x1xi32>
    %135 = arith.sitofp %134 : vector<32x1xi32> to vector<32x1xf32>
    %cst_81 = arith.constant 1.250000e-01 : f32
    %136 = vector.broadcast %cst_81 : f32 to vector<32x1xf32>
    %137 = arith.mulf %135, %136 : vector<32x1xf32>
    %138 = math.floor %137 : vector<32x1xf32>
    %139 = tpu.iota {dimensions = array<i32: 1>} : vector<1x96xi32>
    %140 = arith.sitofp %139 : vector<1x96xi32> to vector<1x96xf32>
    %cst_82 = arith.constant 0.0416666679 : f32
    %141 = vector.broadcast %cst_82 : f32 to vector<1x96xf32>
    %142 = arith.mulf %140, %141 : vector<1x96xf32>
    %143 = math.floor %142 : vector<1x96xf32>
    %cst_83 = arith.constant 2.400000e+01 : f32
    %144 = vector.broadcast %cst_83 : f32 to vector<1x96xf32>
    %145 = arith.mulf %143, %144 : vector<1x96xf32>
    %146 = arith.subf %140, %145 : vector<1x96xf32>
    %147 = vector.broadcast %138 : vector<32x1xf32> to vector<32x96xf32>
    %148 = vector.broadcast %143 : vector<1x96xf32> to vector<32x96xf32>
    %149 = arith.cmpf oeq, %147, %148 : vector<32x96xf32>
    %cst_84 = arith.constant -1.000000e+30 : f32
    %150 = vector.broadcast %cst_84 : f32 to vector<32x96xf32>
    %151 = arith.select %149, %133, %150 : vector<32x96xi1>, vector<32x96xf32>
    %cst_85 = arith.constant dense<0xFF800000> : vector<96xf32>
    %152 = vector.multi_reduction <maximumf>, %151, %cst_85 [0] : vector<32x96xf32> to vector<96xf32>
    %153 = vector.shape_cast %152 : vector<96xf32> to vector<1x96xf32>
    %154 = vector.broadcast %153 : vector<1x96xf32> to vector<32x96xf32>
    %155 = arith.subf %151, %154 : vector<32x96xf32>
    %156 = math.exp %155 : vector<32x96xf32>
    %cst_86 = arith.constant dense<0.000000e+00> : vector<96xf32>
    %157 = vector.multi_reduction <add>, %156, %cst_86 [0] : vector<32x96xf32> to vector<96xf32>
    %158 = vector.shape_cast %157 : vector<96xf32> to vector<1x96xf32>
    %159 = vector.broadcast %158 : vector<1x96xf32> to vector<32x96xf32>
    %160 = arith.divf %156, %159 : vector<32x96xf32>
    %cst_87 = arith.constant 1.750000e+01 : f32
    %161 = vector.broadcast %cst_87 : f32 to vector<1x96xf32>
    %162 = arith.cmpf olt, %146, %161 : vector<1x96xf32>
    %163 = arith.extui %162 : vector<1x96xi1> to vector<1x96xi32>
    %164 = arith.sitofp %163 : vector<1x96xi32> to vector<1x96xf32>
    %165 = vector.broadcast %164 : vector<1x96xf32> to vector<32x96xf32>
    %166 = arith.mulf %160, %165 : vector<32x96xf32>
    %cst_88 = arith.constant dense<0.000000e+00> : vector<32xf32>
    %167 = vector.multi_reduction <add>, %166, %cst_88 [1] : vector<32x96xf32> to vector<32xf32>
    %168 = vector.shape_cast %167 : vector<32xf32> to vector<32x1xf32>
    %c1_89 = arith.constant 1 : index
    %c0_90 = arith.constant 0 : index
    %c0_91 = arith.constant 0 : index
    %169 = vector.load %arg19[%c1_89, %c0_90, %c0_91] : memref<6x128x128xf32, #tpu.memory_space<vmem>>, vector<1x128x128xf32>
    %170 = vector.shape_cast %169 : vector<1x128x128xf32> to vector<128x128xf32>
    %cst_92 = arith.constant dense<0.000000e+00> : vector<96x128xf32>
    %171 = tpu.matmul %73, %170, %cst_92 {dimension_numbers = #tpu.dot_dimension_numbers<[1], [0], [0], [1], [0, 0, 1, 1], [], []>} : vector<96x128xf32>, vector<128x128xf32>, vector<96x128xf32> -> vector<96x128xf32>
    %cst_93 = arith.constant dense<0.000000e+00> : vector<96x32xf32>
    %172 = tpu.matmul %171, %128, %cst_93 {dimension_numbers = #tpu.dot_dimension_numbers<[1], [1], [0], [0], [0, 0, 1, 0], [], []>} : vector<96x128xf32>, vector<32x128xf32>, vector<96x32xf32> -> vector<96x32xf32>
    %173 = tpu.iota {dimensions = array<i32: 0>} : vector<96x1xi32>
    %174 = arith.sitofp %173 : vector<96x1xi32> to vector<96x1xf32>
    %cst_94 = arith.constant 0.0416666679 : f32
    %175 = vector.broadcast %cst_94 : f32 to vector<96x1xf32>
    %176 = arith.mulf %174, %175 : vector<96x1xf32>
    %177 = math.floor %176 : vector<96x1xf32>
    %cst_95 = arith.constant 2.400000e+01 : f32
    %178 = vector.broadcast %cst_95 : f32 to vector<96x1xf32>
    %179 = arith.mulf %177, %178 : vector<96x1xf32>
    %180 = arith.subf %174, %179 : vector<96x1xf32>
    %181 = tpu.iota {dimensions = array<i32: 1>} : vector<1x32xi32>
    %182 = arith.sitofp %181 : vector<1x32xi32> to vector<1x32xf32>
    %cst_96 = arith.constant 1.250000e-01 : f32
    %183 = vector.broadcast %cst_96 : f32 to vector<1x32xf32>
    %184 = arith.mulf %182, %183 : vector<1x32xf32>
    %185 = math.floor %184 : vector<1x32xf32>
    %186 = vector.broadcast %177 : vector<96x1xf32> to vector<96x32xf32>
    %187 = vector.broadcast %185 : vector<1x32xf32> to vector<96x32xf32>
    %188 = arith.cmpf oeq, %186, %187 : vector<96x32xf32>
    %cst_97 = arith.constant 1.750000e+01 : f32
    %189 = vector.broadcast %cst_97 : f32 to vector<96x1xf32>
    %190 = arith.cmpf olt, %180, %189 : vector<96x1xf32>
    %191 = vector.broadcast %190 : vector<96x1xi1> to vector<96x32xi1>
    %192 = arith.andi %188, %191 : vector<96x32xi1>
    %cst_98 = arith.constant -1.000000e+30 : f32
    %193 = vector.broadcast %cst_98 : f32 to vector<96x32xf32>
    %194 = arith.select %192, %172, %193 : vector<96x32xi1>, vector<96x32xf32>
    %cst_99 = arith.constant dense<0xFF800000> : vector<32xf32>
    %195 = vector.multi_reduction <maximumf>, %194, %cst_99 [0] : vector<96x32xf32> to vector<32xf32>
    %196 = vector.shape_cast %195 : vector<32xf32> to vector<1x32xf32>
    %197 = vector.broadcast %196 : vector<1x32xf32> to vector<96x32xf32>
    %198 = arith.subf %194, %197 : vector<96x32xf32>
    %199 = math.exp %198 : vector<96x32xf32>
    %cst_100 = arith.constant dense<0.000000e+00> : vector<32xf32>
    %200 = vector.multi_reduction <add>, %199, %cst_100 [0] : vector<96x32xf32> to vector<32xf32>
    %201 = vector.shape_cast %200 : vector<32xf32> to vector<1x32xf32>
    %202 = vector.broadcast %201 : vector<1x32xf32> to vector<96x32xf32>
    %203 = arith.divf %199, %202 : vector<96x32xf32>
    %cst_101 = arith.constant dense<0.000000e+00> : vector<96xf32>
    %204 = vector.multi_reduction <add>, %203, %cst_101 [1] : vector<96x32xf32> to vector<96xf32>
    %205 = vector.shape_cast %204 : vector<96xf32> to vector<96x1xf32>
    %c2_102 = arith.constant 2 : index
    %c0_103 = arith.constant 0 : index
    %c0_104 = arith.constant 0 : index
    %206 = vector.load %arg19[%c2_102, %c0_103, %c0_104] : memref<6x128x128xf32, #tpu.memory_space<vmem>>, vector<1x128x128xf32>
    %207 = vector.shape_cast %206 : vector<1x128x128xf32> to vector<128x128xf32>
    %cst_105 = arith.constant dense<0.000000e+00> : vector<32x128xf32>
    %208 = tpu.matmul %129, %207, %cst_105 {dimension_numbers = #tpu.dot_dimension_numbers<[1], [0], [0], [1], [0, 0, 1, 1], [], []>} : vector<32x128xf32>, vector<128x128xf32>, vector<32x128xf32> -> vector<32x128xf32>
    %cst_106 = arith.constant dense<0.000000e+00> : vector<32x96xf32>
    %209 = tpu.matmul %208, %73, %cst_106 {dimension_numbers = #tpu.dot_dimension_numbers<[1], [1], [0], [0], [0, 0, 1, 0], [], []>} : vector<32x128xf32>, vector<96x128xf32>, vector<32x96xf32> -> vector<32x96xf32>
    %210 = tpu.iota {dimensions = array<i32: 0>} : vector<32x1xi32>
    %211 = arith.sitofp %210 : vector<32x1xi32> to vector<32x1xf32>
    %cst_107 = arith.constant 1.250000e-01 : f32
    %212 = vector.broadcast %cst_107 : f32 to vector<32x1xf32>
    %213 = arith.mulf %211, %212 : vector<32x1xf32>
    %214 = math.floor %213 : vector<32x1xf32>
    %215 = tpu.iota {dimensions = array<i32: 1>} : vector<1x96xi32>
    %216 = arith.sitofp %215 : vector<1x96xi32> to vector<1x96xf32>
    %cst_108 = arith.constant 0.0416666679 : f32
    %217 = vector.broadcast %cst_108 : f32 to vector<1x96xf32>
    %218 = arith.mulf %216, %217 : vector<1x96xf32>
    %219 = math.floor %218 : vector<1x96xf32>
    %cst_109 = arith.constant 2.400000e+01 : f32
    %220 = vector.broadcast %cst_109 : f32 to vector<1x96xf32>
    %221 = arith.mulf %219, %220 : vector<1x96xf32>
    %222 = arith.subf %216, %221 : vector<1x96xf32>
    %223 = vector.broadcast %214 : vector<32x1xf32> to vector<32x96xf32>
    %224 = vector.broadcast %219 : vector<1x96xf32> to vector<32x96xf32>
    %225 = arith.cmpf oeq, %223, %224 : vector<32x96xf32>
    %cst_110 = arith.constant -1.000000e+30 : f32
    %226 = vector.broadcast %cst_110 : f32 to vector<32x96xf32>
    %227 = arith.select %225, %209, %226 : vector<32x96xi1>, vector<32x96xf32>
    %cst_111 = arith.constant dense<0xFF800000> : vector<96xf32>
    %228 = vector.multi_reduction <maximumf>, %227, %cst_111 [0] : vector<32x96xf32> to vector<96xf32>
    %229 = vector.shape_cast %228 : vector<96xf32> to vector<1x96xf32>
    %230 = vector.broadcast %229 : vector<1x96xf32> to vector<32x96xf32>
    %231 = arith.subf %227, %230 : vector<32x96xf32>
    %232 = math.exp %231 : vector<32x96xf32>
    %cst_112 = arith.constant dense<0.000000e+00> : vector<96xf32>
    %233 = vector.multi_reduction <add>, %232, %cst_112 [0] : vector<32x96xf32> to vector<96xf32>
    %234 = vector.shape_cast %233 : vector<96xf32> to vector<1x96xf32>
    %235 = vector.broadcast %234 : vector<1x96xf32> to vector<32x96xf32>
    %236 = arith.divf %232, %235 : vector<32x96xf32>
    %cst_113 = arith.constant 1.750000e+01 : f32
    %237 = vector.broadcast %cst_113 : f32 to vector<1x96xf32>
    %238 = arith.cmpf olt, %222, %237 : vector<1x96xf32>
    %239 = arith.extui %238 : vector<1x96xi1> to vector<1x96xi32>
    %240 = arith.sitofp %239 : vector<1x96xi32> to vector<1x96xf32>
    %241 = vector.broadcast %240 : vector<1x96xf32> to vector<32x96xf32>
    %242 = arith.mulf %236, %241 : vector<32x96xf32>
    %cst_114 = arith.constant dense<0.000000e+00> : vector<32xf32>
    %243 = vector.multi_reduction <add>, %242, %cst_114 [1] : vector<32x96xf32> to vector<32xf32>
    %244 = vector.shape_cast %243 : vector<32xf32> to vector<32x1xf32>
    %c3 = arith.constant 3 : index
    %c0_115 = arith.constant 0 : index
    %c0_116 = arith.constant 0 : index
    %245 = vector.load %arg19[%c3, %c0_115, %c0_116] : memref<6x128x128xf32, #tpu.memory_space<vmem>>, vector<1x128x128xf32>
    %246 = vector.shape_cast %245 : vector<1x128x128xf32> to vector<128x128xf32>
    %cst_117 = arith.constant dense<0.000000e+00> : vector<32x128xf32>
    %247 = tpu.matmul %128, %246, %cst_117 {dimension_numbers = #tpu.dot_dimension_numbers<[1], [0], [0], [1], [0, 0, 1, 1], [], []>} : vector<32x128xf32>, vector<128x128xf32>, vector<32x128xf32> -> vector<32x128xf32>
    %cst_118 = arith.constant dense<0.000000e+00> : vector<32x32xf32>
    %248 = tpu.matmul %247, %129, %cst_118 {dimension_numbers = #tpu.dot_dimension_numbers<[1], [1], [0], [0], [0, 0, 1, 0], [], []>} : vector<32x128xf32>, vector<32x128xf32>, vector<32x32xf32> -> vector<32x32xf32>
    %249 = tpu.iota {dimensions = array<i32: 0>} : vector<32x1xi32>
    %250 = arith.sitofp %249 : vector<32x1xi32> to vector<32x1xf32>
    %cst_119 = arith.constant 1.250000e-01 : f32
    %251 = vector.broadcast %cst_119 : f32 to vector<32x1xf32>
    %252 = arith.mulf %250, %251 : vector<32x1xf32>
    %253 = math.floor %252 : vector<32x1xf32>
    %254 = tpu.iota {dimensions = array<i32: 1>} : vector<1x32xi32>
    %255 = arith.sitofp %254 : vector<1x32xi32> to vector<1x32xf32>
    %cst_120 = arith.constant 1.250000e-01 : f32
    %256 = vector.broadcast %cst_120 : f32 to vector<1x32xf32>
    %257 = arith.mulf %255, %256 : vector<1x32xf32>
    %258 = math.floor %257 : vector<1x32xf32>
    %259 = vector.broadcast %253 : vector<32x1xf32> to vector<32x32xf32>
    %260 = vector.broadcast %258 : vector<1x32xf32> to vector<32x32xf32>
    %261 = arith.cmpf oeq, %259, %260 : vector<32x32xf32>
    %cst_121 = arith.constant -1.000000e+30 : f32
    %262 = vector.broadcast %cst_121 : f32 to vector<32x32xf32>
    %263 = arith.select %261, %248, %262 : vector<32x32xi1>, vector<32x32xf32>
    %cst_122 = arith.constant dense<0xFF800000> : vector<32xf32>
    %264 = vector.multi_reduction <maximumf>, %263, %cst_122 [0] : vector<32x32xf32> to vector<32xf32>
    %265 = vector.shape_cast %264 : vector<32xf32> to vector<1x32xf32>
    %266 = vector.broadcast %265 : vector<1x32xf32> to vector<32x32xf32>
    %267 = arith.subf %263, %266 : vector<32x32xf32>
    %268 = math.exp %267 : vector<32x32xf32>
    %cst_123 = arith.constant dense<0.000000e+00> : vector<32xf32>
    %269 = vector.multi_reduction <add>, %268, %cst_123 [0] : vector<32x32xf32> to vector<32xf32>
    %270 = vector.shape_cast %269 : vector<32xf32> to vector<1x32xf32>
    %271 = vector.broadcast %270 : vector<1x32xf32> to vector<32x32xf32>
    %272 = arith.divf %268, %271 : vector<32x32xf32>
    %cst_124 = arith.constant dense<0.000000e+00> : vector<32xf32>
    %273 = vector.multi_reduction <add>, %272, %cst_124 [1] : vector<32x32xf32> to vector<32xf32>
    %274 = vector.shape_cast %273 : vector<32xf32> to vector<32x1xf32>
    %c4 = arith.constant 4 : index
    %c0_125 = arith.constant 0 : index
    %c0_126 = arith.constant 0 : index
    %275 = vector.load %arg19[%c4, %c0_125, %c0_126] : memref<6x128x128xf32, #tpu.memory_space<vmem>>, vector<1x128x128xf32>
    %276 = vector.shape_cast %275 : vector<1x128x128xf32> to vector<128x128xf32>
    %cst_127 = arith.constant dense<0.000000e+00> : vector<96x128xf32>
    %277 = tpu.matmul %73, %276, %cst_127 {dimension_numbers = #tpu.dot_dimension_numbers<[1], [0], [0], [1], [0, 0, 1, 1], [], []>} : vector<96x128xf32>, vector<128x128xf32>, vector<96x128xf32> -> vector<96x128xf32>
    %cst_128 = arith.constant dense<0.000000e+00> : vector<96x32xf32>
    %278 = tpu.matmul %277, %129, %cst_128 {dimension_numbers = #tpu.dot_dimension_numbers<[1], [1], [0], [0], [0, 0, 1, 0], [], []>} : vector<96x128xf32>, vector<32x128xf32>, vector<96x32xf32> -> vector<96x32xf32>
    %279 = tpu.iota {dimensions = array<i32: 0>} : vector<96x1xi32>
    %280 = arith.sitofp %279 : vector<96x1xi32> to vector<96x1xf32>
    %cst_129 = arith.constant 0.0416666679 : f32
    %281 = vector.broadcast %cst_129 : f32 to vector<96x1xf32>
    %282 = arith.mulf %280, %281 : vector<96x1xf32>
    %283 = math.floor %282 : vector<96x1xf32>
    %cst_130 = arith.constant 2.400000e+01 : f32
    %284 = vector.broadcast %cst_130 : f32 to vector<96x1xf32>
    %285 = arith.mulf %283, %284 : vector<96x1xf32>
    %286 = arith.subf %280, %285 : vector<96x1xf32>
    %287 = tpu.iota {dimensions = array<i32: 1>} : vector<1x32xi32>
    %288 = arith.sitofp %287 : vector<1x32xi32> to vector<1x32xf32>
    %cst_131 = arith.constant 1.250000e-01 : f32
    %289 = vector.broadcast %cst_131 : f32 to vector<1x32xf32>
    %290 = arith.mulf %288, %289 : vector<1x32xf32>
    %291 = math.floor %290 : vector<1x32xf32>
    %292 = vector.broadcast %283 : vector<96x1xf32> to vector<96x32xf32>
    %293 = vector.broadcast %291 : vector<1x32xf32> to vector<96x32xf32>
    %294 = arith.cmpf oeq, %292, %293 : vector<96x32xf32>
    %cst_132 = arith.constant 1.750000e+01 : f32
    %295 = vector.broadcast %cst_132 : f32 to vector<96x1xf32>
    %296 = arith.cmpf olt, %286, %295 : vector<96x1xf32>
    %297 = vector.broadcast %296 : vector<96x1xi1> to vector<96x32xi1>
    %298 = arith.andi %294, %297 : vector<96x32xi1>
    %cst_133 = arith.constant -1.000000e+30 : f32
    %299 = vector.broadcast %cst_133 : f32 to vector<96x32xf32>
    %300 = arith.select %298, %278, %299 : vector<96x32xi1>, vector<96x32xf32>
    %cst_134 = arith.constant dense<0xFF800000> : vector<32xf32>
    %301 = vector.multi_reduction <maximumf>, %300, %cst_134 [0] : vector<96x32xf32> to vector<32xf32>
    %302 = vector.shape_cast %301 : vector<32xf32> to vector<1x32xf32>
    %303 = vector.broadcast %302 : vector<1x32xf32> to vector<96x32xf32>
    %304 = arith.subf %300, %303 : vector<96x32xf32>
    %305 = math.exp %304 : vector<96x32xf32>
    %cst_135 = arith.constant dense<0.000000e+00> : vector<32xf32>
    %306 = vector.multi_reduction <add>, %305, %cst_135 [0] : vector<96x32xf32> to vector<32xf32>
    %307 = vector.shape_cast %306 : vector<32xf32> to vector<1x32xf32>
    %308 = vector.broadcast %307 : vector<1x32xf32> to vector<96x32xf32>
    %309 = arith.divf %305, %308 : vector<96x32xf32>
    %cst_136 = arith.constant dense<0.000000e+00> : vector<96xf32>
    %310 = vector.multi_reduction <add>, %309, %cst_136 [1] : vector<96x32xf32> to vector<96xf32>
    %311 = vector.shape_cast %310 : vector<96xf32> to vector<96x1xf32>
    %c5 = arith.constant 5 : index
    %c0_137 = arith.constant 0 : index
    %c0_138 = arith.constant 0 : index
    %312 = vector.load %arg19[%c5, %c0_137, %c0_138] : memref<6x128x128xf32, #tpu.memory_space<vmem>>, vector<1x128x128xf32>
    %313 = vector.shape_cast %312 : vector<1x128x128xf32> to vector<128x128xf32>
    %cst_139 = arith.constant dense<0.000000e+00> : vector<32x128xf32>
    %314 = tpu.matmul %129, %313, %cst_139 {dimension_numbers = #tpu.dot_dimension_numbers<[1], [0], [0], [1], [0, 0, 1, 1], [], []>} : vector<32x128xf32>, vector<128x128xf32>, vector<32x128xf32> -> vector<32x128xf32>
    %cst_140 = arith.constant dense<0.000000e+00> : vector<32x32xf32>
    %315 = tpu.matmul %314, %128, %cst_140 {dimension_numbers = #tpu.dot_dimension_numbers<[1], [1], [0], [0], [0, 0, 1, 0], [], []>} : vector<32x128xf32>, vector<32x128xf32>, vector<32x32xf32> -> vector<32x32xf32>
    %316 = tpu.iota {dimensions = array<i32: 0>} : vector<32x1xi32>
    %317 = arith.sitofp %316 : vector<32x1xi32> to vector<32x1xf32>
    %cst_141 = arith.constant 1.250000e-01 : f32
    %318 = vector.broadcast %cst_141 : f32 to vector<32x1xf32>
    %319 = arith.mulf %317, %318 : vector<32x1xf32>
    %320 = math.floor %319 : vector<32x1xf32>
    %321 = tpu.iota {dimensions = array<i32: 1>} : vector<1x32xi32>
    %322 = arith.sitofp %321 : vector<1x32xi32> to vector<1x32xf32>
    %cst_142 = arith.constant 1.250000e-01 : f32
    %323 = vector.broadcast %cst_142 : f32 to vector<1x32xf32>
    %324 = arith.mulf %322, %323 : vector<1x32xf32>
    %325 = math.floor %324 : vector<1x32xf32>
    %326 = vector.broadcast %320 : vector<32x1xf32> to vector<32x32xf32>
    %327 = vector.broadcast %325 : vector<1x32xf32> to vector<32x32xf32>
    %328 = arith.cmpf oeq, %326, %327 : vector<32x32xf32>
    %cst_143 = arith.constant -1.000000e+30 : f32
    %329 = vector.broadcast %cst_143 : f32 to vector<32x32xf32>
    %330 = arith.select %328, %315, %329 : vector<32x32xi1>, vector<32x32xf32>
    %cst_144 = arith.constant dense<0xFF800000> : vector<32xf32>
    %331 = vector.multi_reduction <maximumf>, %330, %cst_144 [0] : vector<32x32xf32> to vector<32xf32>
    %332 = vector.shape_cast %331 : vector<32xf32> to vector<1x32xf32>
    %333 = vector.broadcast %332 : vector<1x32xf32> to vector<32x32xf32>
    %334 = arith.subf %330, %333 : vector<32x32xf32>
    %335 = math.exp %334 : vector<32x32xf32>
    %cst_145 = arith.constant dense<0.000000e+00> : vector<32xf32>
    %336 = vector.multi_reduction <add>, %335, %cst_145 [0] : vector<32x32xf32> to vector<32xf32>
    %337 = vector.shape_cast %336 : vector<32xf32> to vector<1x32xf32>
    %338 = vector.broadcast %337 : vector<1x32xf32> to vector<32x32xf32>
    %339 = arith.divf %335, %338 : vector<32x32xf32>
    %cst_146 = arith.constant dense<0.000000e+00> : vector<32xf32>
    %340 = vector.multi_reduction <add>, %339, %cst_146 [1] : vector<32x32xf32> to vector<32xf32>
    %341 = vector.shape_cast %340 : vector<32xf32> to vector<32x1xf32>
    %342 = vector.broadcast %205 : vector<96x1xf32> to vector<96x128xf32>
    %343 = arith.addf %73, %342 : vector<96x128xf32>
    %344 = vector.broadcast %311 : vector<96x1xf32> to vector<96x128xf32>
    %345 = arith.addf %343, %344 : vector<96x128xf32>
    %346 = arith.addf %168, %341 : vector<32x1xf32>
    %347 = arith.addf %244, %274 : vector<32x1xf32>
    %348 = tpu.concatenate %346, %347 in 0 : vector<32x1xf32>, vector<32x1xf32> -> vector<64x1xf32>
    %349 = vector.broadcast %348 : vector<64x1xf32> to vector<64x128xf32>
    %350 = arith.addf %127, %349 : vector<64x128xf32>
    %351 = arith.truncf %345 : vector<96x128xf32> to vector<96x128xbf16>
    %c0_147 = arith.constant 0 : index
    %c0_148 = arith.constant 0 : index
    %c0_149 = arith.constant 0 : index
    %352 = vector.load %arg7[%c0_147, %c0_148, %c0_149] : memref<3x128x256xbf16, #tpu.memory_space<vmem>>, vector<1x128x256xbf16>
    %353 = vector.shape_cast %352 : vector<1x128x256xbf16> to vector<128x256xbf16>
    %cst_150 = arith.constant dense<0.000000e+00> : vector<96x256xf32>
    %354 = tpu.matmul %351, %353, %cst_150 {dimension_numbers = #tpu.dot_dimension_numbers<[1], [0], [0], [1], [0, 0, 1, 1], [], []>} : vector<96x128xbf16>, vector<128x256xbf16>, vector<96x256xf32> -> vector<96x256xf32>
    %c1_151 = arith.constant 1 : index
    %c0_152 = arith.constant 0 : index
    %c0_153 = arith.constant 0 : index
    %355 = vector.load %arg7[%c1_151, %c0_152, %c0_153] : memref<3x128x256xbf16, #tpu.memory_space<vmem>>, vector<1x128x256xbf16>
    %356 = vector.shape_cast %355 : vector<1x128x256xbf16> to vector<128x256xbf16>
    %cst_154 = arith.constant dense<0.000000e+00> : vector<96x256xf32>
    %357 = tpu.matmul %351, %356, %cst_154 {dimension_numbers = #tpu.dot_dimension_numbers<[1], [0], [0], [1], [0, 0, 1, 1], [], []>} : vector<96x128xbf16>, vector<128x256xbf16>, vector<96x256xf32> -> vector<96x256xf32>
    %c2_155 = arith.constant 2 : index
    %c0_156 = arith.constant 0 : index
    %c0_157 = arith.constant 0 : index
    %358 = vector.load %arg7[%c2_155, %c0_156, %c0_157] : memref<3x128x256xbf16, #tpu.memory_space<vmem>>, vector<1x128x256xbf16>
    %359 = vector.shape_cast %358 : vector<1x128x256xbf16> to vector<128x256xbf16>
    %cst_158 = arith.constant dense<0.000000e+00> : vector<96x256xf32>
    %360 = tpu.matmul %351, %359, %cst_158 {dimension_numbers = #tpu.dot_dimension_numbers<[1], [0], [0], [1], [0, 0, 1, 1], [], []>} : vector<96x128xbf16>, vector<128x256xbf16>, vector<96x256xf32> -> vector<96x256xf32>
    %cst_159 = arith.constant 0.000000e+00 : f32
    %361 = vector.broadcast %cst_159 : f32 to vector<1x256xf32>
    %362 = vector.extract_strided_slice %357 {offsets = [1, 0], sizes = [95, 256], strides = [1, 1]} : vector<96x256xf32> to vector<95x256xf32>
    %363 = tpu.concatenate %362, %361 in 0 : vector<95x256xf32>, vector<1x256xf32> -> vector<96x256xf32>
    %364 = arith.addf %354, %363 : vector<96x256xf32>
    %cst_160 = arith.constant 0.000000e+00 : f32
    %365 = vector.broadcast %cst_160 : f32 to vector<2x256xf32>
    %366 = vector.extract_strided_slice %360 {offsets = [2, 0], sizes = [94, 256], strides = [1, 1]} : vector<96x256xf32> to vector<94x256xf32>
    %367 = tpu.concatenate %366, %365 in 0 : vector<94x256xf32>, vector<2x256xf32> -> vector<96x256xf32>
    %368 = arith.addf %364, %367 : vector<96x256xf32>
    %c0_161 = arith.constant 0 : index
    %c0_162 = arith.constant 0 : index
    %369 = vector.load %arg8[%c0_161, %c0_162] : memref<1x256xf32, #tpu.memory_space<vmem>>, vector<1x256xf32>
    %370 = vector.broadcast %369 : vector<1x256xf32> to vector<96x256xf32>
    %371 = arith.addf %368, %370 : vector<96x256xf32>
    %cst_163 = arith.constant 0.000000e+00 : f32
    %372 = vector.broadcast %cst_163 : f32 to vector<96x256xf32>
    %373 = arith.maximumf %371, %372 : vector<96x256xf32>
    %cst_164 = arith.constant 0.000000e+00 : f32
    %374 = vector.broadcast %cst_164 : f32 to vector<1x256xf32>
    %375 = vector.extract_strided_slice %373 {offsets = [1, 0], sizes = [95, 256], strides = [1, 1]} : vector<96x256xf32> to vector<95x256xf32>
    %376 = tpu.concatenate %375, %374 in 0 : vector<95x256xf32>, vector<1x256xf32> -> vector<96x256xf32>
    %377 = arith.maximumf %373, %376 : vector<96x256xf32>
    %378 = arith.truncf %377 : vector<96x256xf32> to vector<96x256xbf16>
    %c0_165 = arith.constant 0 : index
    %c0_166 = arith.constant 0 : index
    %c0_167 = arith.constant 0 : index
    %379 = vector.load %arg9[%c0_165, %c0_166, %c0_167] : memref<3x256x128xbf16, #tpu.memory_space<vmem>>, vector<1x256x128xbf16>
    %380 = vector.shape_cast %379 : vector<1x256x128xbf16> to vector<256x128xbf16>
    %cst_168 = arith.constant dense<0.000000e+00> : vector<96x128xf32>
    %381 = tpu.matmul %378, %380, %cst_168 {dimension_numbers = #tpu.dot_dimension_numbers<[1], [0], [0], [1], [0, 0, 1, 1], [], []>} : vector<96x256xbf16>, vector<256x128xbf16>, vector<96x128xf32> -> vector<96x128xf32>
    %c1_169 = arith.constant 1 : index
    %c0_170 = arith.constant 0 : index
    %c0_171 = arith.constant 0 : index
    %382 = vector.load %arg9[%c1_169, %c0_170, %c0_171] : memref<3x256x128xbf16, #tpu.memory_space<vmem>>, vector<1x256x128xbf16>
    %383 = vector.shape_cast %382 : vector<1x256x128xbf16> to vector<256x128xbf16>
    %cst_172 = arith.constant dense<0.000000e+00> : vector<96x128xf32>
    %384 = tpu.matmul %378, %383, %cst_172 {dimension_numbers = #tpu.dot_dimension_numbers<[1], [0], [0], [1], [0, 0, 1, 1], [], []>} : vector<96x256xbf16>, vector<256x128xbf16>, vector<96x128xf32> -> vector<96x128xf32>
    %c2_173 = arith.constant 2 : index
    %c0_174 = arith.constant 0 : index
    %c0_175 = arith.constant 0 : index
    %385 = vector.load %arg9[%c2_173, %c0_174, %c0_175] : memref<3x256x128xbf16, #tpu.memory_space<vmem>>, vector<1x256x128xbf16>
    %386 = vector.shape_cast %385 : vector<1x256x128xbf16> to vector<256x128xbf16>
    %cst_176 = arith.constant dense<0.000000e+00> : vector<96x128xf32>
    %387 = tpu.matmul %378, %386, %cst_176 {dimension_numbers = #tpu.dot_dimension_numbers<[1], [0], [0], [1], [0, 0, 1, 1], [], []>} : vector<96x256xbf16>, vector<256x128xbf16>, vector<96x128xf32> -> vector<96x128xf32>
    %cst_177 = arith.constant 0.000000e+00 : f32
    %388 = vector.broadcast %cst_177 : f32 to vector<1x128xf32>
    %389 = vector.extract_strided_slice %384 {offsets = [1, 0], sizes = [95, 128], strides = [1, 1]} : vector<96x128xf32> to vector<95x128xf32>
    %390 = tpu.concatenate %389, %388 in 0 : vector<95x128xf32>, vector<1x128xf32> -> vector<96x128xf32>
    %391 = arith.addf %381, %390 : vector<96x128xf32>
    %cst_178 = arith.constant 0.000000e+00 : f32
    %392 = vector.broadcast %cst_178 : f32 to vector<2x128xf32>
    %393 = vector.extract_strided_slice %387 {offsets = [2, 0], sizes = [94, 128], strides = [1, 1]} : vector<96x128xf32> to vector<94x128xf32>
    %394 = tpu.concatenate %393, %392 in 0 : vector<94x128xf32>, vector<2x128xf32> -> vector<96x128xf32>
    %395 = arith.addf %391, %394 : vector<96x128xf32>
    %c0_179 = arith.constant 0 : index
    %c0_180 = arith.constant 0 : index
    %396 = vector.load %arg10[%c0_179, %c0_180] : memref<1x128xf32, #tpu.memory_space<vmem>>, vector<1x128xf32>
    %397 = vector.broadcast %396 : vector<1x128xf32> to vector<96x128xf32>
    %398 = arith.addf %395, %397 : vector<96x128xf32>
    %cst_181 = arith.constant 0.000000e+00 : f32
    %399 = vector.broadcast %cst_181 : f32 to vector<96x128xf32>
    %400 = arith.maximumf %398, %399 : vector<96x128xf32>
    %cst_182 = arith.constant 0.000000e+00 : f32
    %401 = vector.broadcast %cst_182 : f32 to vector<1x128xf32>
    %402 = vector.extract_strided_slice %400 {offsets = [1, 0], sizes = [95, 128], strides = [1, 1]} : vector<96x128xf32> to vector<95x128xf32>
    %403 = tpu.concatenate %402, %401 in 0 : vector<95x128xf32>, vector<1x128xf32> -> vector<96x128xf32>
    %404 = arith.maximumf %400, %403 : vector<96x128xf32>
    %405 = arith.truncf %350 : vector<64x128xf32> to vector<64x128xbf16>
    %c0_183 = arith.constant 0 : index
    %c0_184 = arith.constant 0 : index
    %c0_185 = arith.constant 0 : index
    %406 = vector.load %arg15[%c0_183, %c0_184, %c0_185] : memref<3x128x256xbf16, #tpu.memory_space<vmem>>, vector<1x128x256xbf16>
    %407 = vector.shape_cast %406 : vector<1x128x256xbf16> to vector<128x256xbf16>
    %cst_186 = arith.constant dense<0.000000e+00> : vector<64x256xf32>
    %408 = tpu.matmul %405, %407, %cst_186 {dimension_numbers = #tpu.dot_dimension_numbers<[1], [0], [0], [1], [0, 0, 1, 1], [], []>} : vector<64x128xbf16>, vector<128x256xbf16>, vector<64x256xf32> -> vector<64x256xf32>
    %c1_187 = arith.constant 1 : index
    %c0_188 = arith.constant 0 : index
    %c0_189 = arith.constant 0 : index
    %409 = vector.load %arg15[%c1_187, %c0_188, %c0_189] : memref<3x128x256xbf16, #tpu.memory_space<vmem>>, vector<1x128x256xbf16>
    %410 = vector.shape_cast %409 : vector<1x128x256xbf16> to vector<128x256xbf16>
    %cst_190 = arith.constant dense<0.000000e+00> : vector<64x256xf32>
    %411 = tpu.matmul %405, %410, %cst_190 {dimension_numbers = #tpu.dot_dimension_numbers<[1], [0], [0], [1], [0, 0, 1, 1], [], []>} : vector<64x128xbf16>, vector<128x256xbf16>, vector<64x256xf32> -> vector<64x256xf32>
    %c2_191 = arith.constant 2 : index
    %c0_192 = arith.constant 0 : index
    %c0_193 = arith.constant 0 : index
    %412 = vector.load %arg15[%c2_191, %c0_192, %c0_193] : memref<3x128x256xbf16, #tpu.memory_space<vmem>>, vector<1x128x256xbf16>
    %413 = vector.shape_cast %412 : vector<1x128x256xbf16> to vector<128x256xbf16>
    %cst_194 = arith.constant dense<0.000000e+00> : vector<64x256xf32>
    %414 = tpu.matmul %405, %413, %cst_194 {dimension_numbers = #tpu.dot_dimension_numbers<[1], [0], [0], [1], [0, 0, 1, 1], [], []>} : vector<64x128xbf16>, vector<128x256xbf16>, vector<64x256xf32> -> vector<64x256xf32>
    %cst_195 = arith.constant 0.000000e+00 : f32
    %415 = vector.broadcast %cst_195 : f32 to vector<1x256xf32>
    %416 = vector.extract_strided_slice %408 {offsets = [0, 0], sizes = [63, 256], strides = [1, 1]} : vector<64x256xf32> to vector<63x256xf32>
    %417 = tpu.concatenate %415, %416 in 0 : vector<1x256xf32>, vector<63x256xf32> -> vector<64x256xf32>
    %418 = vector.broadcast %15 : vector<64x1xf32> to vector<64x256xf32>
    %419 = arith.mulf %418, %417 : vector<64x256xf32>
    %420 = arith.addf %411, %419 : vector<64x256xf32>
    %cst_196 = arith.constant 0.000000e+00 : f32
    %421 = vector.broadcast %cst_196 : f32 to vector<1x256xf32>
    %422 = vector.extract_strided_slice %414 {offsets = [1, 0], sizes = [63, 256], strides = [1, 1]} : vector<64x256xf32> to vector<63x256xf32>
    %423 = tpu.concatenate %422, %421 in 0 : vector<63x256xf32>, vector<1x256xf32> -> vector<64x256xf32>
    %424 = vector.broadcast %19 : vector<64x1xf32> to vector<64x256xf32>
    %425 = arith.mulf %424, %423 : vector<64x256xf32>
    %426 = arith.addf %420, %425 : vector<64x256xf32>
    %c0_197 = arith.constant 0 : index
    %c0_198 = arith.constant 0 : index
    %427 = vector.load %arg16[%c0_197, %c0_198] : memref<1x256xf32, #tpu.memory_space<vmem>>, vector<1x256xf32>
    %428 = vector.broadcast %427 : vector<1x256xf32> to vector<64x256xf32>
    %429 = arith.addf %426, %428 : vector<64x256xf32>
    %cst_199 = arith.constant 0.000000e+00 : f32
    %430 = vector.broadcast %cst_199 : f32 to vector<64x256xf32>
    %431 = arith.maximumf %429, %430 : vector<64x256xf32>
    %432 = arith.truncf %431 : vector<64x256xf32> to vector<64x256xbf16>
    %c0_200 = arith.constant 0 : index
    %c0_201 = arith.constant 0 : index
    %c0_202 = arith.constant 0 : index
    %433 = vector.load %arg17[%c0_200, %c0_201, %c0_202] : memref<3x256x256xbf16, #tpu.memory_space<vmem>>, vector<1x256x256xbf16>
    %434 = vector.shape_cast %433 : vector<1x256x256xbf16> to vector<256x256xbf16>
    %cst_203 = arith.constant dense<0.000000e+00> : vector<64x256xf32>
    %435 = tpu.matmul %432, %434, %cst_203 {dimension_numbers = #tpu.dot_dimension_numbers<[1], [0], [0], [1], [0, 0, 1, 1], [], []>} : vector<64x256xbf16>, vector<256x256xbf16>, vector<64x256xf32> -> vector<64x256xf32>
    %c1_204 = arith.constant 1 : index
    %c0_205 = arith.constant 0 : index
    %c0_206 = arith.constant 0 : index
    %436 = vector.load %arg17[%c1_204, %c0_205, %c0_206] : memref<3x256x256xbf16, #tpu.memory_space<vmem>>, vector<1x256x256xbf16>
    %437 = vector.shape_cast %436 : vector<1x256x256xbf16> to vector<256x256xbf16>
    %cst_207 = arith.constant dense<0.000000e+00> : vector<64x256xf32>
    %438 = tpu.matmul %432, %437, %cst_207 {dimension_numbers = #tpu.dot_dimension_numbers<[1], [0], [0], [1], [0, 0, 1, 1], [], []>} : vector<64x256xbf16>, vector<256x256xbf16>, vector<64x256xf32> -> vector<64x256xf32>
    %c2_208 = arith.constant 2 : index
    %c0_209 = arith.constant 0 : index
    %c0_210 = arith.constant 0 : index
    %439 = vector.load %arg17[%c2_208, %c0_209, %c0_210] : memref<3x256x256xbf16, #tpu.memory_space<vmem>>, vector<1x256x256xbf16>
    %440 = vector.shape_cast %439 : vector<1x256x256xbf16> to vector<256x256xbf16>
    %cst_211 = arith.constant dense<0.000000e+00> : vector<64x256xf32>
    %441 = tpu.matmul %432, %440, %cst_211 {dimension_numbers = #tpu.dot_dimension_numbers<[1], [0], [0], [1], [0, 0, 1, 1], [], []>} : vector<64x256xbf16>, vector<256x256xbf16>, vector<64x256xf32> -> vector<64x256xf32>
    %cst_212 = arith.constant 0.000000e+00 : f32
    %442 = vector.broadcast %cst_212 : f32 to vector<1x256xf32>
    %443 = vector.extract_strided_slice %435 {offsets = [0, 0], sizes = [63, 256], strides = [1, 1]} : vector<64x256xf32> to vector<63x256xf32>
    %444 = tpu.concatenate %442, %443 in 0 : vector<1x256xf32>, vector<63x256xf32> -> vector<64x256xf32>
    %445 = vector.broadcast %15 : vector<64x1xf32> to vector<64x256xf32>
    %446 = arith.mulf %445, %444 : vector<64x256xf32>
    %447 = arith.addf %438, %446 : vector<64x256xf32>
    %cst_213 = arith.constant 0.000000e+00 : f32
    %448 = vector.broadcast %cst_213 : f32 to vector<1x256xf32>
    %449 = vector.extract_strided_slice %441 {offsets = [1, 0], sizes = [63, 256], strides = [1, 1]} : vector<64x256xf32> to vector<63x256xf32>
    %450 = tpu.concatenate %449, %448 in 0 : vector<63x256xf32>, vector<1x256xf32> -> vector<64x256xf32>
    %451 = vector.broadcast %19 : vector<64x1xf32> to vector<64x256xf32>
    %452 = arith.mulf %451, %450 : vector<64x256xf32>
    %453 = arith.addf %447, %452 : vector<64x256xf32>
    %c0_214 = arith.constant 0 : index
    %c0_215 = arith.constant 0 : index
    %454 = vector.load %arg18[%c0_214, %c0_215] : memref<1x256xf32, #tpu.memory_space<vmem>>, vector<1x256xf32>
    %455 = vector.broadcast %454 : vector<1x256xf32> to vector<64x256xf32>
    %456 = arith.addf %453, %455 : vector<64x256xf32>
    %cst_216 = arith.constant 0.000000e+00 : f32
    %457 = vector.broadcast %cst_216 : f32 to vector<64x256xf32>
    %458 = arith.maximumf %456, %457 : vector<64x256xf32>
    %459 = tpu.iota {dimensions = array<i32: 0>} : vector<4x96xi32>
    %460 = arith.sitofp %459 : vector<4x96xi32> to vector<4x96xf32>
    %461 = tpu.iota {dimensions = array<i32: 1>} : vector<4x96xi32>
    %462 = arith.sitofp %461 : vector<4x96xi32> to vector<4x96xf32>
    %cst_217 = arith.constant 0.000000e+00 : f32
    %463 = vector.broadcast %cst_217 : f32 to vector<4x96xf32>
    %464 = arith.subf %462, %463 : vector<4x96xf32>
    %cst_218 = arith.constant 0.0416666679 : f32
    %465 = vector.broadcast %cst_218 : f32 to vector<4x96xf32>
    %466 = arith.mulf %464, %465 : vector<4x96xf32>
    %467 = math.floor %466 : vector<4x96xf32>
    %cst_219 = arith.constant 2.400000e+01 : f32
    %468 = vector.broadcast %cst_219 : f32 to vector<4x96xf32>
    %469 = arith.mulf %467, %468 : vector<4x96xf32>
    %470 = arith.subf %464, %469 : vector<4x96xf32>
    %471 = arith.cmpf oeq, %467, %460 : vector<4x96xf32>
    %cst_220 = arith.constant 1.150000e+01 : f32
    %472 = vector.broadcast %cst_220 : f32 to vector<4x96xf32>
    %473 = arith.cmpf olt, %470, %472 : vector<4x96xf32>
    %474 = arith.andi %471, %473 : vector<4x96xi1>
    %cst_221 = arith.constant -5.000000e-01 : f32
    %475 = vector.broadcast %cst_221 : f32 to vector<4x96xf32>
    %476 = arith.cmpf ogt, %464, %475 : vector<4x96xf32>
    %477 = arith.andi %474, %476 : vector<4x96xi1>
    %cst_222 = arith.constant 0.0833333358 : f32
    %cst_223 = arith.constant 0.000000e+00 : f32
    %478 = vector.broadcast %cst_222 : f32 to vector<4x96xf32>
    %479 = vector.broadcast %cst_223 : f32 to vector<4x96xf32>
    %480 = arith.select %477, %478, %479 : vector<4x96xi1>, vector<4x96xf32>
    %cst_224 = arith.constant dense<0.000000e+00> : vector<4x128xf32>
    %481 = tpu.matmul %480, %404, %cst_224 {dimension_numbers = #tpu.dot_dimension_numbers<[1], [0], [0], [1], [0, 0, 1, 1], [], []>} : vector<4x96xf32>, vector<96x128xf32>, vector<4x128xf32> -> vector<4x128xf32>
    %482 = tpu.iota {dimensions = array<i32: 0>} : vector<4x64xi32>
    %483 = arith.sitofp %482 : vector<4x64xi32> to vector<4x64xf32>
    %484 = tpu.iota {dimensions = array<i32: 1>} : vector<4x64xi32>
    %485 = arith.sitofp %484 : vector<4x64xi32> to vector<4x64xf32>
    %cst_225 = arith.constant 0.000000e+00 : f32
    %486 = vector.broadcast %cst_225 : f32 to vector<4x64xf32>
    %487 = arith.subf %485, %486 : vector<4x64xf32>
    %cst_226 = arith.constant 1.250000e-01 : f32
    %488 = vector.broadcast %cst_226 : f32 to vector<4x64xf32>
    %489 = arith.mulf %487, %488 : vector<4x64xf32>
    %490 = math.floor %489 : vector<4x64xf32>
    %cst_227 = arith.constant 8.000000e+00 : f32
    %491 = vector.broadcast %cst_227 : f32 to vector<4x64xf32>
    %492 = arith.mulf %490, %491 : vector<4x64xf32>
    %493 = arith.subf %487, %492 : vector<4x64xf32>
    %494 = arith.cmpf oeq, %490, %483 : vector<4x64xf32>
    %cst_228 = arith.constant 7.500000e+00 : f32
    %495 = vector.broadcast %cst_228 : f32 to vector<4x64xf32>
    %496 = arith.cmpf olt, %493, %495 : vector<4x64xf32>
    %497 = arith.andi %494, %496 : vector<4x64xi1>
    %cst_229 = arith.constant -5.000000e-01 : f32
    %498 = vector.broadcast %cst_229 : f32 to vector<4x64xf32>
    %499 = arith.cmpf ogt, %487, %498 : vector<4x64xf32>
    %500 = arith.andi %497, %499 : vector<4x64xi1>
    %cst_230 = arith.constant 1.250000e-01 : f32
    %cst_231 = arith.constant 0.000000e+00 : f32
    %501 = vector.broadcast %cst_230 : f32 to vector<4x64xf32>
    %502 = vector.broadcast %cst_231 : f32 to vector<4x64xf32>
    %503 = arith.select %500, %501, %502 : vector<4x64xi1>, vector<4x64xf32>
    %cst_232 = arith.constant dense<0.000000e+00> : vector<4x256xf32>
    %504 = tpu.matmul %503, %458, %cst_232 {dimension_numbers = #tpu.dot_dimension_numbers<[1], [0], [0], [1], [0, 0, 1, 1], [], []>} : vector<4x64xf32>, vector<64x256xf32>, vector<4x256xf32> -> vector<4x256xf32>
    %505 = tpu.iota {dimensions = array<i32: 0>} : vector<4x64xi32>
    %506 = arith.sitofp %505 : vector<4x64xi32> to vector<4x64xf32>
    %507 = tpu.iota {dimensions = array<i32: 1>} : vector<4x64xi32>
    %508 = arith.sitofp %507 : vector<4x64xi32> to vector<4x64xf32>
    %cst_233 = arith.constant 3.200000e+01 : f32
    %509 = vector.broadcast %cst_233 : f32 to vector<4x64xf32>
    %510 = arith.subf %508, %509 : vector<4x64xf32>
    %cst_234 = arith.constant 1.250000e-01 : f32
    %511 = vector.broadcast %cst_234 : f32 to vector<4x64xf32>
    %512 = arith.mulf %510, %511 : vector<4x64xf32>
    %513 = math.floor %512 : vector<4x64xf32>
    %cst_235 = arith.constant 8.000000e+00 : f32
    %514 = vector.broadcast %cst_235 : f32 to vector<4x64xf32>
    %515 = arith.mulf %513, %514 : vector<4x64xf32>
    %516 = arith.subf %510, %515 : vector<4x64xf32>
    %517 = arith.cmpf oeq, %513, %506 : vector<4x64xf32>
    %cst_236 = arith.constant 7.500000e+00 : f32
    %518 = vector.broadcast %cst_236 : f32 to vector<4x64xf32>
    %519 = arith.cmpf olt, %516, %518 : vector<4x64xf32>
    %520 = arith.andi %517, %519 : vector<4x64xi1>
    %cst_237 = arith.constant -5.000000e-01 : f32
    %521 = vector.broadcast %cst_237 : f32 to vector<4x64xf32>
    %522 = arith.cmpf ogt, %510, %521 : vector<4x64xf32>
    %523 = arith.andi %520, %522 : vector<4x64xi1>
    %cst_238 = arith.constant 1.250000e-01 : f32
    %cst_239 = arith.constant 0.000000e+00 : f32
    %524 = vector.broadcast %cst_238 : f32 to vector<4x64xf32>
    %525 = vector.broadcast %cst_239 : f32 to vector<4x64xf32>
    %526 = arith.select %523, %524, %525 : vector<4x64xi1>, vector<4x64xf32>
    %cst_240 = arith.constant dense<0.000000e+00> : vector<4x256xf32>
    %527 = tpu.matmul %526, %458, %cst_240 {dimension_numbers = #tpu.dot_dimension_numbers<[1], [0], [0], [1], [0, 0, 1, 1], [], []>} : vector<4x64xf32>, vector<64x256xf32>, vector<4x256xf32> -> vector<4x256xf32>
    %528 = tpu.concatenate %481, %504, %527 in 1 : vector<4x128xf32>, vector<4x256xf32>, vector<4x256xf32> -> vector<4x640xf32>
    %c0_241 = arith.constant 0 : index
    %c0_242 = arith.constant 0 : index
    %529 = vector.load %arg20[%c0_241, %c0_242] : memref<640x128xf32, #tpu.memory_space<vmem>>, vector<640x128xf32>
    %cst_243 = arith.constant dense<0.000000e+00> : vector<4x128xf32>
    %530 = tpu.matmul %528, %529, %cst_243 {dimension_numbers = #tpu.dot_dimension_numbers<[1], [0], [0], [1], [0, 0, 1, 1], [], []>} : vector<4x640xf32>, vector<640x128xf32>, vector<4x128xf32> -> vector<4x128xf32>
    %c0_244 = arith.constant 0 : index
    %c0_245 = arith.constant 0 : index
    %531 = vector.load %arg21[%c0_244, %c0_245] : memref<1x128xf32, #tpu.memory_space<vmem>>, vector<1x128xf32>
    %532 = vector.broadcast %531 : vector<1x128xf32> to vector<4x128xf32>
    %533 = arith.addf %530, %532 : vector<4x128xf32>
    %c0_246 = arith.constant 0 : index
    %c0_247 = arith.constant 0 : index
    %c0_248 = arith.constant 0 : index
    %534 = vector.load %arg22[%c0_246, %c0_247, %c0_248] : memref<1x4x128xf32, #tpu.memory_space<vmem>>, vector<1x4x128xf32>
    %535 = vector.shape_cast %534 : vector<1x4x128xf32> to vector<4x128xf32>
    %536 = vector.shape_cast %533 : vector<4x128xf32> to vector<1x4x128xf32>
    tpu.vector_store %arg22[%c0_246, %c0_247, %c0_248], %536 {strides = array<i32>} : memref<1x4x128xf32, #tpu.memory_space<vmem>>, vector<1x4x128xf32>,
    return
  }
  func.func @transform_0(%arg0: i32) -> (i32, i32, i32) {
    %c0_i32 = arith.constant 0 : i32
    %c0_i32_0 = arith.constant 0 : i32
    %c0_i32_1 = arith.constant 0 : i32
    return %arg0, %c0_i32, %c0_i32_0 : i32, i32, i32
  }
  func.func @transform_1(%arg0: i32) -> (i32, i32, i32) {
    %c0_i32 = arith.constant 0 : i32
    %c0_i32_0 = arith.constant 0 : i32
    %c0_i32_1 = arith.constant 0 : i32
    return %arg0, %c0_i32, %c0_i32_0 : i32, i32, i32
  }
  func.func @transform_2(%arg0: i32) -> (i32, i32, i32) {
    %c0_i32 = arith.constant 0 : i32
    %c0_i32_0 = arith.constant 0 : i32
    %c0_i32_1 = arith.constant 0 : i32
    %c0_i32_2 = arith.constant 0 : i32
    return %c0_i32, %c0_i32_0, %c0_i32_1 : i32, i32, i32
  }
  func.func @transform_3(%arg0: i32) -> (i32, i32) {
    %c0_i32 = arith.constant 0 : i32
    %c0_i32_0 = arith.constant 0 : i32
    %c0_i32_1 = arith.constant 0 : i32
    return %c0_i32, %c0_i32_0 : i32, i32
  }
  func.func @transform_4(%arg0: i32) -> (i32, i32, i32) {
    %c0_i32 = arith.constant 0 : i32
    %c0_i32_0 = arith.constant 0 : i32
    %c0_i32_1 = arith.constant 0 : i32
    %c0_i32_2 = arith.constant 0 : i32
    return %c0_i32, %c0_i32_0, %c0_i32_1 : i32, i32, i32
  }
  func.func @transform_5(%arg0: i32) -> (i32, i32) {
    %c0_i32 = arith.constant 0 : i32
    %c0_i32_0 = arith.constant 0 : i32
    %c0_i32_1 = arith.constant 0 : i32
    return %c0_i32, %c0_i32_0 : i32, i32
  }
  func.func @transform_6(%arg0: i32) -> (i32, i32, i32) {
    %c0_i32 = arith.constant 0 : i32
    %c0_i32_0 = arith.constant 0 : i32
    %c0_i32_1 = arith.constant 0 : i32
    %c0_i32_2 = arith.constant 0 : i32
    return %c0_i32, %c0_i32_0, %c0_i32_1 : i32, i32, i32
  }
  func.func @transform_7(%arg0: i32) -> (i32, i32) {
    %c0_i32 = arith.constant 0 : i32
    %c0_i32_0 = arith.constant 0 : i32
    %c0_i32_1 = arith.constant 0 : i32
    return %c0_i32, %c0_i32_0 : i32, i32
  }
  func.func @transform_8(%arg0: i32) -> (i32, i32, i32) {
    %c0_i32 = arith.constant 0 : i32
    %c0_i32_0 = arith.constant 0 : i32
    %c0_i32_1 = arith.constant 0 : i32
    %c0_i32_2 = arith.constant 0 : i32
    return %c0_i32, %c0_i32_0, %c0_i32_1 : i32, i32, i32
  }
  func.func @transform_9(%arg0: i32) -> (i32, i32) {
    %c0_i32 = arith.constant 0 : i32
    %c0_i32_0 = arith.constant 0 : i32
    %c0_i32_1 = arith.constant 0 : i32
    return %c0_i32, %c0_i32_0 : i32, i32
  }
  func.func @transform_10(%arg0: i32) -> (i32, i32, i32) {
    %c0_i32 = arith.constant 0 : i32
    %c0_i32_0 = arith.constant 0 : i32
    %c0_i32_1 = arith.constant 0 : i32
    %c0_i32_2 = arith.constant 0 : i32
    return %c0_i32, %c0_i32_0, %c0_i32_1 : i32, i32, i32
  }
  func.func @transform_11(%arg0: i32) -> (i32, i32) {
    %c0_i32 = arith.constant 0 : i32
    %c0_i32_0 = arith.constant 0 : i32
    %c0_i32_1 = arith.constant 0 : i32
    return %c0_i32, %c0_i32_0 : i32, i32
  }
  func.func @transform_12(%arg0: i32) -> (i32, i32, i32) {
    %c0_i32 = arith.constant 0 : i32
    %c0_i32_0 = arith.constant 0 : i32
    %c0_i32_1 = arith.constant 0 : i32
    %c0_i32_2 = arith.constant 0 : i32
    return %c0_i32, %c0_i32_0, %c0_i32_1 : i32, i32, i32
  }
  func.func @transform_13(%arg0: i32) -> (i32, i32) {
    %c0_i32 = arith.constant 0 : i32
    %c0_i32_0 = arith.constant 0 : i32
    %c0_i32_1 = arith.constant 0 : i32
    return %c0_i32, %c0_i32_0 : i32, i32
  }
  func.func @transform_14(%arg0: i32) -> (i32, i32, i32) {
    %c0_i32 = arith.constant 0 : i32
    %c0_i32_0 = arith.constant 0 : i32
    %c0_i32_1 = arith.constant 0 : i32
    %c0_i32_2 = arith.constant 0 : i32
    return %c0_i32, %c0_i32_0, %c0_i32_1 : i32, i32, i32
  }
  func.func @transform_15(%arg0: i32) -> (i32, i32) {
    %c0_i32 = arith.constant 0 : i32
    %c0_i32_0 = arith.constant 0 : i32
    %c0_i32_1 = arith.constant 0 : i32
    return %c0_i32, %c0_i32_0 : i32, i32
  }
  func.func @transform_16(%arg0: i32) -> (i32, i32, i32) {
    %c0_i32 = arith.constant 0 : i32
    %c0_i32_0 = arith.constant 0 : i32
    %c0_i32_1 = arith.constant 0 : i32
    %c0_i32_2 = arith.constant 0 : i32
    return %c0_i32, %c0_i32_0, %c0_i32_1 : i32, i32, i32
  }
  func.func @transform_17(%arg0: i32) -> (i32, i32) {
    %c0_i32 = arith.constant 0 : i32
    %c0_i32_0 = arith.constant 0 : i32
    %c0_i32_1 = arith.constant 0 : i32
    return %c0_i32, %c0_i32_0 : i32, i32
  }
  func.func @transform_18(%arg0: i32) -> (i32, i32, i32) {
    %c0_i32 = arith.constant 0 : i32
    %c0_i32_0 = arith.constant 0 : i32
    %c0_i32_1 = arith.constant 0 : i32
    %c0_i32_2 = arith.constant 0 : i32
    return %c0_i32, %c0_i32_0, %c0_i32_1 : i32, i32, i32
  }
  func.func @transform_19(%arg0: i32) -> (i32, i32) {
    %c0_i32 = arith.constant 0 : i32
    %c0_i32_0 = arith.constant 0 : i32
    %c0_i32_1 = arith.constant 0 : i32
    return %c0_i32, %c0_i32_0 : i32, i32
  }
  func.func @transform_20(%arg0: i32) -> (i32, i32) {
    %c0_i32 = arith.constant 0 : i32
    %c0_i32_0 = arith.constant 0 : i32
    %c0_i32_1 = arith.constant 0 : i32
    return %c0_i32, %c0_i32_0 : i32, i32
  }
  func.func @transform_21(%arg0: i32) -> (i32, i32, i32) {
    %c0_i32 = arith.constant 0 : i32
    %c0_i32_0 = arith.constant 0 : i32
    %c0_i32_1 = arith.constant 0 : i32
    return %arg0, %c0_i32, %c0_i32_0 : i32, i32, i32
  }
}

</mosaic_0001>

<bundles_post_ra>
// kernel: tpu_custom_call.1
= control target key start
LH: loop header
LB: loop body
LE: loop exit
PB: predicated region body
PF: predicated region fallthrough
CT: control target
= control target key end

     0   :  { %s16984_s0 = inlined_call_operand.vmem [shape: f32[2,96,10], index: 0, kind: input, shape index: {}]   ;;  %s16985_s1 = inlined_call_operand.hbm [shape: f32[2,64,1024], index: 1, kind: input, shape index: {}]   ;;  %s16986_s2 = inlined_call_operand.vmem [shape: bf16[3,10,64], index: 2, kind: input, shape index: {}]   ;;  %s16987_s3 = inlined_call_operand.vmem [shape: f32[1,64], index: 3, kind: input, shape index: {}]   ;;  %s16988_s4 = inlined_call_operand.hbm [shape: bf16[3,64,128], index: 4, kind: input, shape index: {}]   ;;  %s16989_s5 = inlined_call_operand.vmem [shape: f32[1,128], index: 5, kind: input, shape index: {}]   ;;  %s16990_s6 = inlined_call_operand.hbm [shape: bf16[3,128,256], index: 6, kind: input, shape index: {}]   ;;  %s16991_s7 = inlined_call_operand.vmem [shape: f32[1,256], index: 7, kind: input, shape index: {}]   ;;  %s16992_s8 = inlined_call_operand.hbm [shape: bf16[3,256,128], index: 8, kind: input, shape index: {}]   ;;  %s16993_s9 = inlined_call_operand.vmem [shape: f32[1,128], index: 9, kind: input, shape index: {}]   ;;  %s16994_s10 = inlined_call_operand.hbm [shape: bf16[3,1024,128], index: 10, kind: input, shape index: {}]   ;;  %s16995_s11 = inlined_call_operand.vmem [shape: f32[1,128], index: 11, kind: input, shape index: {}]   ;;  %s16996_s12 = inlined_call_operand.vmem [shape: bf16[3,128,128], index: 12, kind: input, shape index: {}]   ;;  %s16997_s13 = inlined_call_operand.vmem [shape: f32[1,128], index: 13, kind: input, shape index: {}]   ;;  %s16998_s14 = inlined_call_operand.hbm [shape: bf16[3,128,256], index: 14, kind: input, shape index: {}]   ;;  %s16999_s15 = inlined_call_operand.vmem [shape: f32[1,256], index: 15, kind: input, shape index: {}]   ;;  %s17000_s16 = inlined_call_operand.hbm [shape: bf16[3,256,256], index: 16, kind: input, shape index: {}]   ;;  %s17001_s17 = inlined_call_operand.vmem [shape: f32[1,256], index: 17, kind: input, shape index: {}]   ;;  %s17002_s18 = inlined_call_operand.hbm [shape: f32[6,128,128], index: 18, kind: input, shape index: {}]   ;;  %s17003_s19 = inlined_call_operand.hbm [shape: f32[640,128], index: 19, kind: input, shape index: {}]   ;;  %s17004_s20 = inlined_call_operand.vmem [shape: f32[1,128], index: 20, kind: input, shape index: {}]   ;;  %s17005_s21 = inlined_call_operand.hbm [shape: f32[2,4,128], index: 21, kind: output, shape index: {}]  }
   0x1   :  { %17202 = sst [smem:[#allocation70_spill]] %s16984_s0 }
   0x2   :  { %17203 = sst [smem:[#allocation71_spill]] %s16985_s1 }
   0x3   :  { %17204 = sst [smem:[#allocation72_spill]] %s16986_s2 }
   0x4   :  { %17205 = sst [smem:[#allocation73_spill]] %s16987_s3 }
   0x5   :  { %17206 = sst [smem:[#allocation74_spill]] %s16988_s4 }
   0x6   :  { %17207 = sst [smem:[#allocation75_spill]] %s16989_s5 }
   0x7   :  { %17208 = sst [smem:[#allocation76_spill]] %s16990_s6 }
   0x8   :  { %17209 = sst [smem:[#allocation77_spill]] %s16992_s8 }
   0x9   :  { %17210 = sst [smem:[#allocation78_spill]] %s16993_s9 }
   0xa   :  { %17211 = sst [smem:[#allocation79_spill]] %s16994_s10 }
   0xb   :  { %17212 = sst [smem:[#allocation80_spill]] %s16998_s14 }
   0xc   :  { %17213 = sst [smem:[#allocation81_spill]] %s16999_s15 }
   0xd   :  { %17214 = sst [smem:[#allocation82_spill]] %s17000_s16 }
   0xe   :  { %17215 = sst [smem:[#allocation83_spill]] %s17001_s17 }
   0xf   :  { %17216 = sst [smem:[#allocation84_spill]] %s17002_s18 }
  0x10   :  { %17217 = sst [smem:[#allocation85_spill]] %s17003_s19 }
  0x11   :  { %17218 = sst [smem:[#allocation86_spill]] %s17004_s20 }
  0x12   :  { %17219 = sst [smem:[#allocation87_spill]] %s17005_s21 }
  0x13   :  { %26 = vsyncpa [#allocation3], 0 }
  0x14   :  { %28 = vsyncpa [#allocation3 + $0x1], 0 }
  0x15   :  { %29 = vsyncpa [#allocation6], 0 }
  0x16   :  { %30 = vsyncpa [#allocation9], 0 }
  0x17   :  { %31 = vsyncpa [#allocation12], 0 }
  0x18   :  { %32 = vsyncpa [#allocation15], 0 }
  0x19   :  { %33 = vsyncpa [#allocation4], 0 }
  0x1a   :  { %35 = vsyncpa [#allocation4 + $0x1], 0  ;;  %s13243_s2 = smov 0   ;;  %s13245_s25 = smov 0  }
  0x1b   :  { %s13247_s26 = smov 0   ;;  %s13249_s27 = smov 0  }
  0x1c LB: > { %s17220_s29 = sld [smem:[#allocation74_spill]]  ;;  %s13267_s4 = sadd.s32 4294967295, %s13116_s27   ;;  %s13116_s27 = sphi %s13249_s27, %s17867_s27   ;;  %s13112_s26 = sphi %s13247_s26, %s17866_s26   ;;  %s13108_s25 = sphi %s13245_s25, %s17865_s25   ;;  %s13104_s2 = sphi %s13243_s2, %s17864_s2  }
  0x1d   : > { %p10046_p0 = scmp.ge.s32.totalorder %s13116_s27, 1  ;;  %p88_p1 = scmp.eq.s32.totalorder %s13267_s4, 0 }
  0x1e   : > { %p523_p2 = scmp.lt.s32.totalorder %s13116_s27, 3  ;;  %s13118_s5 = smov [#allocation5]  }
  0x1f   : > { %s542_s22 = sshll.u32 %s13118_s5, 4  ;;  %s17222_s8 = sld [smem:[#allocation77_spill]]  ;;  %s543_s22 = int_to_ptr.vmem [resolvable:$true] %s542_s22 }
  0x20   : > { %p13272_p3 = pnand %p10046_p0, %p523_p2  ;;  %s13119_s28 = smov [#allocation8]  }
  0x21   : > { %s17010_s5 = smov 64   ;;  %s13121_s21 = smov 4  }
  0x22   : > { %s540_s0 = sshll.u32 %s17220_s29, 4  ;;  %p12564_p4 = pneg %p13272_p3  ;;  %s541_s0 = int_to_ptr.hbm [resolvable:$true] %s540_s0 }
  0x23   : > { %s576_s29 = sshll.u32 %s13119_s28, 4  ;;  %s17224_s14 = sld [smem:[#allocation80_spill]]  ;;  %s577_s29 = int_to_ptr.vmem [resolvable:$true] %s576_s29 }
  0x24   : > { %p13284_p6 = pnand %p12564_p4, %p88_p1  ;;  %s13122_s28 = smov [#allocation11]  }
  0x25   : > { %s574_s24 = sshll.u32 %s17222_s8, 4  ;;  %s616_s20 = sshll.u32 %s13122_s28, 4  ;;  %s575_s24 = int_to_ptr.hbm [resolvable:$true] %s574_s24  ;;  %s617_s20 = int_to_ptr.vmem [resolvable:$true] %s616_s20 }
  0x26   : > { %12567 = dma.hbm_to_vmem [thread:$0]  (!%p13284_p6), %s541_s0, 1536, %s543_s22, [#allocation6], %s17010_s5, %s17010_s5, %s13121_s21  }
  0x27   : > { %12573 = dma.hbm_to_vmem [thread:$0]  (!%p13284_p6), %s575_s24, 6144, %s577_s29, [#allocation9], %s17010_s5, %s17010_s5, %s13121_s21  }
  0x28   : > { %s17225_s18 = sld [smem:[#allocation84_spill]]  ;;  %s13123_s0 = smov 128  }
  0x29   : > { %s614_s8 = sshll.u32 %s17224_s14, 4  ;;  %s13124_s22 = smov 8   ;;  %s615_s8 = int_to_ptr.hbm [resolvable:$true] %s614_s8 }
  0x2a   : > { %12579 = dma.hbm_to_vmem [thread:$0]  (!%p13284_p6), %s615_s8, 6144, %s617_s20, [#allocation12], %s13123_s0, %s13123_s0, %s13124_s22  }
  0x2b   : > { %s13125_s24 = smov [#allocation14]   ;;  %s17226_s6 = sld [smem:[#allocation76_spill]] }
  0x2c   : > { %s650_s29 = sshll.u32 %s13125_s24, 4  ;;  %s17227_s10 = sld [smem:[#allocation79_spill]]  ;;  %s651_s29 = int_to_ptr.vmem [resolvable:$true] %s650_s29 }
  0x2d   : > { %s13126_s8 = smov [#allocation7]   ;;  %s13127_s24 = smov [#allocation10]  }
  0x2e   : > { %s648_s9 = sshll.u32 %s17225_s18, 4  ;;  %s559_s20 = sshll.u32 %s13126_s8, 4  ;;  %s649_s9 = int_to_ptr.hbm [resolvable:$true] %s648_s9  ;;  %s560_s20 = int_to_ptr.vmem [resolvable:$true] %s559_s20 }
  0x2f   : > { %12585 = dma.hbm_to_vmem [thread:$0]  (!%p13284_p6), %s649_s9, 12288, %s651_s29, [#allocation15], %s13123_s0, %s13123_s0, %s13124_s22  }
  0x30   : > { %s593_s23 = sshll.u32 %s13127_s24, 4  ;;  %s17228_s16 = sld [smem:[#allocation82_spill]]  ;;  %s594_s23 = int_to_ptr.vmem [resolvable:$true] %s593_s23 }
  0x31   : > { %s557_s28 = sshll.u32 %s17226_s6, 4  ;;  %s17229_s15 = smov 64   ;;  %s558_s28 = int_to_ptr.hbm [resolvable:$true] %s557_s28 }
  0x32   : > { %s591_s5 = sshll.u32 %s17227_s10, 4  ;;  %s17230_s19 = sld [smem:[#allocation85_spill]]  ;;  %s592_s5 = int_to_ptr.hbm [resolvable:$true] %s591_s5 }
  0x33   : > { %12570 = dma.hbm_to_vmem [thread:$0]  (!%p13284_p6), %s558_s28, 6144, %s560_s20, [#allocation6], %s13123_s0, %s13123_s0, %s13124_s22  }
  0x34   : > { %12576 = dma.hbm_to_vmem [thread:$0]  (!%p13284_p6), %s592_s5, 24576, %s594_s23, [#allocation9], %s17229_s15, %s17229_s15, %s13121_s21  }
  0x35   : > { %s13128_s20 = smov [#allocation13]   ;;  %s13129_s21 = smov [#allocation16]  }
  0x36   : > { %s631_s29 = sshll.u32 %s17228_s16, 4  ;;  %s633_s24 = sshll.u32 %s13128_s20, 4  ;;  %s632_s29 = int_to_ptr.hbm [resolvable:$true] %s631_s29  ;;  %s634_s24 = int_to_ptr.vmem [resolvable:$true] %s633_s24 }
  0x37   : > { %12582 = dma.hbm_to_vmem [thread:$0]  (!%p13284_p6), %s632_s29, 12288, %s634_s24, [#allocation12], %s13123_s0, %s13123_s0, %s13124_s22  }
  0x38   : > { %s662_s8 = sshll.u32 %s17230_s19, 4  ;;  %s664_s5 = sshll.u32 %s13129_s21, 4  ;;  %s663_s8 = int_to_ptr.hbm [resolvable:$true] %s662_s8  ;;  %s665_s5 = int_to_ptr.vmem [resolvable:$true] %s664_s5 }
  0x39   : > { %12588 = dma.hbm_to_vmem [thread:$0]  (!%p13284_p6), %s663_s8, 10240, %s665_s5, [#allocation15], %s13123_s0, %s13123_s0, %s13124_s22  }
  0x3a   : > { %s10045_s23 = sadd.s32 4294967294, %s13116_s27   ;;  %s13348_s1 = sadd.s32 1, %s13116_s27  }
  0x3b   : > { %s71_s9 = ssub.s32 %s13116_s27, %s13348_s1  ;;  %s74_s17 = sadd.s32 1, %s13112_s26 }
  0x3c   : > { %p72_p7 = scmp.eq.s32.totalorder %s71_s9, 0  ;;  %p81_p8 = scmp.ne.s32.totalorder %s13112_s26, %s13108_s25 }
  0x3d   : > { %p82_p9 = scmp.eq.s32.totalorder %s13116_s27, 0  ;;  %p87_p10 = scmp.ne.s32.totalorder %s13108_s25, %s13104_s2 }
  0x3e   : > { %s13359_s29 = scalar_select %p72_p7, %s13112_s26, %s74_s17  }
  0x3f   : > { %p13361_p11 = por %p82_p9, %p81_p8  ;;  %p13367_p12 = por %p88_p1, %p87_p10 }
  0x40   : > { %p510_p13 = scmp.eq.s32.totalorder %s13267_s4, 1  ;;  %p516_p0 = scmp.eq.s32.totalorder %s10045_s23, 1 }
  0x41   : > { %p12605_p2 = scmp.lt.s32.totalorder %s13116_s27, 2  ;;  %s689_s22 = sand.u32 1, %s13112_s26  }
  0x42   : > { %p13374_p4 = por %p510_p13, %p81_p8  ;;  %p13378_p6 = por %p516_p0, %p87_p10 }
  0x43   : > { %s10056_s20 = sshll.u32 %s689_s22, 9  ;;  %s12054_s24 = sshll.u32 %s13116_s27, 9 }
  0x44   : > { %s17235_s9 = sld [smem:[#allocation71_spill]]  ;;  %s693_s6 = scalar_lea.vmem [#allocation2], %s10056_s20 }
  0x45   : > { %s701_s10 = sshll.u32 %s693_s6, 4  ;;  %p13388_p7 = pnand %p12605_p2, %p13361_p11  ;;  %s702_s10 = int_to_ptr.vmem [resolvable:$true] %s701_s10 }
  0x46   : > { %s690_s16 = scalar_lea.sflag [#allocation3], %s689_s22 }
  0x47   : > { %p13008_p9 = pneg %p13388_p7 }
  0x4a   : > { %s698_s17 = scalar_lea.hbm %s17235_s9, %s12054_s24  ;;  %s13011_s24 = scalar_lea.hbm %s17235_s9, 1024 }
  0x4b   : > { %s699_s14 = sshll.u32 %s698_s17, 4  ;;  %s700_s14 = int_to_ptr.hbm [resolvable:$true] %s699_s14 }
  0x4c   : > { %s13004_s18 = sshra.s32 %s700_s14, 4  ;;  %s13005_s18 = int_to_ptr.hbm [resolvable:$true] %s13004_s18 }
  0x4d   : > { %s13006_s19 = scalar_lea.hbm %s13005_s18, 512  ;;  %p13012_p11 = scmp.lt.s32.totalorder %s13005_s18, %s17235_s9 }
  0x4e   : > { %p13007_p8 = scmp.ne.s32.totalorder %s13005_s18, %s13006_s19  ;;  %p13013_p0 = scmp.lt.s32.totalorder %s13011_s24, %s13006_s19 }
  0x50   : > { %p13009_p10 = pnand %p13008_p9, %p13007_p8  ;;  %p13014_p2 = por %p13013_p0, %p13012_p11 }
  0x52   : > { %p13010_p13 = pneg %p13009_p10 }
  0x54   : > { %p13015_p5 = pnand %p13014_p2, %p13010_p13 }
  0x56   : > { %13018 = shalt.err (!%p13015_p5)
}
  0x57   : > { %s13130_s22 = smov 1024   ;;  %713 = sbr.rel (%p13272_p3) target bundleno = 3080 (0xc08), region = 104 }
  0x58   : > { %12592 = dma.hbm_to_vmem [thread:$0]  (!%p13388_p7), %s700_s14, 8192, %s702_s10, %s690_s16, %s13130_s22, %s13130_s22, %s17229_s15  }
  0x5c   : > { %s13406_s5 = sand.u32 1, %s13108_s25  }
  0x5d   : > { %s10060_s17 = sshll.u32 %s13406_s5, 9  ;;  %s716_s18 = scalar_lea.sflag [#allocation3], %s13406_s5 }
  0x5e   : > { %s13410_s19 = scalar_lea.vmem [#allocation2], %s10060_s17 }
  0x5f   : > { %13079 = dma.done.wait (%p13367_p12), %s716_s18, 8192  }
  0x60   : > { %13081 = vsyncadd (%p13367_p12), %s716_s18, 4294959104 }
  0x61   : > { %13083 = dma.done.wait (%p88_p1), [#allocation6], 7680  }
  0x62   : > { %13085 = vsyncadd (%p88_p1), [#allocation6], 4294959616 }
  0x63   : > { %13087 = dma.done.wait (%p88_p1), [#allocation9], 30720  }
  0x64   : > { %13089 = vsyncadd (%p88_p1), [#allocation9], 4294936576 }
  0x65   : > { %13091 = dma.done.wait (%p88_p1), [#allocation12], 18432  }
  0x66   : > { %13093 = vsyncadd (%p88_p1), [#allocation12], 4294948864 }
  0x67   : > { %13095 = dma.done.wait (%p88_p1), [#allocation15], 22528  }
  0x68   : > { %13097 = vsyncadd (%p88_p1), [#allocation15], 4294944768  ;;  %p824_p3 = scmp.lt.s32.totalorder %s13267_s4, 1  ;;  %vm1038_vm0 = vcmask 1044480   ;;  %s17237_s15 = sld [smem:[#allocation70_spill]]  ;;  %vm1019_vm1 = vcmask 80896  }
  0x69   : > { %s17238_s6 = sld [smem:[#allocation72_spill]]  ;;  %v12077_v27 = vld [vmem:[#allocation10 + $0x38] sm:$0xff]  ;;  %v12076_v28 = vld [vmem:[#allocation10 + $0x30] sm:$0xff]  ;;  %v12075_v29 = vld [vmem:[#allocation10 + $0x28] sm:$0xff]  ;;  %vm17112_vm2 = vcmask 1045504   ;;  %vm17113_vm3 = vcmask 1046528  }
  0x6a   : > { %s825_s10 = scalar_select %p824_p3, %s13267_s4, 1  ;;  %v12074_v32 = vld [vmem:[#allocation10 + $0x20] sm:$0xff]  ;;  %v12073_v34 = vld [vmem:[#allocation10 + $0x18] sm:$0xff]  ;;  %v12072_v35 = vld [vmem:[#allocation10 + $0x10] sm:$0xff]  ;;  %vm17110_vm4 = vcmask 523264   ;;  %vm17111_vm5 = vcmask 1040384  }
  0x6b   : > { %v12071_v36 = vld [vmem:[#allocation10 + $0x8] sm:$0xff]  ;;  %v12070_v37 = vld [vmem:[#allocation10] sm:$0xff]  ;;  %v12093_v41 = vld [vmem:[#allocation10 + $0xb8] sm:$0xff]  ;;  %s17239_s23 = sld [smem:[#allocation73_spill]]  ;;  %s9872_s18 = scalar_lea.sflag [#allocation4], %s13406_s5 }
  0x6c   : > { %s12527_s14 = smul.u32 96, %s825_s10  ;;  %v842_v38 = vld [vmem:[%s13410_s19] sm:$0xff]  ;;  %v12092_v42 = vld [vmem:[#allocation10 + $0xb0] sm:$0xff]  ;;  %v12091_v43 = vld [vmem:[#allocation10 + $0xa8] sm:$0xff]  ;;  %s17250_s21 = sld [smem:[#allocation75_spill]] }
  0x6d   : > { %v850_v39 = vld [vmem:[%s13410_s19 + $0x40] sm:$0xff]  ;;  %v12089_v50 = vld [vmem:[#allocation10 + $0x98] sm:$0xff]  ;;  %v12088_v55 = vld [vmem:[#allocation10 + $0x90] sm:$0xff]  ;;  %s17845_s10 = sld [smem:[#allocation83_spill]] }
  0x6e   : > { %s13437_s0 = scalar_lea.vmem %s17237_s15, %s12527_s14  ;;  %v13492_v40 = vpack.c.bf16 %v850_v39, %v842_v38  ;;  %v858_v44 = vld [vmem:[%s13410_s19 + $0x80] sm:$0xff]  ;;  %v12065_v51 = vld [vmem:[#allocation5 + $0x38] sm:$0xff]  ;;  %v12064_v58 = vld [vmem:[#allocation5 + $0x30] sm:$0xff]  ;;  %s17861_s30 = sld [smem:[#allocation86_spill]] }
  0x6f   : > { %v10091_v0 = vld [vmem:[%s17238_s6 + $0x8] sm:$0xf]  ;;  %v12056_v1 = vld [vmem:[%s17238_s6 + $0x8] sm:$0x10]  ;;  %v10103_v2 = vld [vmem:[%s17238_s6 + $0x10] sm:$0xf]  ;;  %1446 = vmatpush.bf16.msra.mxu3 %v12065_v51 }
  0x70   : > { %v10092_v3 = vor.u32 %v12056_v1, %v10091_v0  ;;  %v12057_v4 = vld [vmem:[%s17238_s6 + $0x10] sm:$0x10]  ;;  %v830_v5 = vld [vmem:[%s13437_s0] sm:$0xff]  ;;  %v831_v6 = vld [vmem:[%s13437_s0 + $0x8] sm:$0xff]  ;;  %s12051_s15 = sshll.u32 %s13267_s4, 2  ;;  %s17862_s24 = sld [smem:[#allocation87_spill]] }
  0x71   : > { %v10104_v7 = vor.u32 %v12057_v4, %v10103_v2  ;;  %v840_v8 = vld [vmem:[%s13437_s0 + $0x50] sm:$0xff]  ;;  %v841_v9 = vld [vmem:[%s13437_s0 + $0x58] sm:$0xff]  ;;  %v10113_v10 = vld [vmem:[%s17238_s6] sm:$0xf]  ;;  %v1003_v12 = vpack.c.bf16 %v831_v6, %v830_v5 }
  0x72   : > { %v1040_v11 = vsel %vm1038_vm0, %v10092_v3, 0  ;;  %v12055_v13 = vld [vmem:[%s17238_s6] sm:$0x10]  ;;  %v1008_v15 = vpack.c.bf16 %v841_v9, %v840_v8  ;;  %v832_v18 = vld [vmem:[%s13437_s0 + $0x10] sm:$0xff]  ;;  %v833_v19 = vld [vmem:[%s13437_s0 + $0x18] sm:$0xff] }
  0x73   : > { %1049 = vmatpush.bf16.msra.mxu0 %v1040_v11  ;;  %v1090_v14 = vsel %vm1038_vm0, %v10104_v7, 0  ;;  %v10114_v16 = vor.u32 %v12055_v13, %v10113_v10  ;;  %v1004_v20 = vpack.c.bf16 %v833_v19, %v832_v18  ;;  %v834_v21 = vld [vmem:[%s13437_s0 + $0x20] sm:$0xff]  ;;  %v835_v22 = vld [vmem:[%s13437_s0 + $0x28] sm:$0xff]  ;;  %v836_v24 = vld [vmem:[%s13437_s0 + $0x30] sm:$0xff]  ;;  %1447 = vmatpush.bf16.msra.mxu3 %v12064_v58 }
  0x74   : > { %1099 = vmatpush.bf16.msra.mxu1 %v1090_v14  ;;  %12526 = vmatpush.bf16.msra.mxu2 %v1090_v14  ;;  %v1005_v23 = vpack.c.bf16 %v835_v22, %v834_v21  ;;  %v837_v25 = vld [vmem:[%s13437_s0 + $0x38] sm:$0xff]  ;;  %v838_v30 = vld [vmem:[%s13437_s0 + $0x40] sm:$0xff]  ;;  %v839_v31 = vld [vmem:[%s13437_s0 + $0x48] sm:$0xff] }
  0x75   : > { %v1186_v17 = vsel %vm1038_vm0, %v10114_v16, 0  ;;  %v1006_v26 = vpack.c.bf16 %v837_v25, %v836_v24  ;;  %v1007_v33 = vpack.c.bf16 %v839_v31, %v838_v30  ;;  %v866_v45 = vld [vmem:[%s13410_s19 + $0xc0] sm:$0xff]  ;;  %v12069_v52 = vld [vmem:[#allocation5 + $0x58] sm:$0xff]  ;;  %v12068_v59 = vld [vmem:[#allocation5 + $0x50] sm:$0xff] }
  0x76   : > { %10093 = vmatmul.msk.bf16.vlgmr.msra.gmra.mxu0 %vm1019_vm1, %v1003_v12  ;;  %v12090_v46 = vld [vmem:[#allocation10 + $0xa0] sm:$0xff]  ;;  %v13499_v48 = vpack.c.bf16 %v866_v45, %v858_v44  ;;  %v12061_v53 = vld [vmem:[#allocation5 + $0x18] sm:$0xff]  ;;  %v12060_v60 = vld [vmem:[#allocation5 + $0x10] sm:$0xff] }
  0x77   : > { %10105 = vmatmul.msk.bf16.vlgmr.msra.gmra.mxu1 %vm1019_vm1, %v1003_v12  ;;  %10110 = vmatmul.msk.bf16.vlgmr.msra.gmra.mxu2 %vm1019_vm1, %v1008_v15  ;;  %v12087_v61 = vld [vmem:[#allocation10 + $0x88] sm:$0xff]  ;;  %v874_v62 = vld [vmem:[%s13410_s19 + $0x100] sm:$0xff]  ;;  %v844_v58 = vld [vmem:[%s13410_s19 + $0x10] sm:$0xff] }
  0x78   : > { %1195 = vmatpush.bf16.msrb.mxu2 %v1186_v17  ;;  %1518 = vmatpush.bf16.msrb.mxu0 %v12069_v52  ;;  %v882_v63 = vld [vmem:[%s13410_s19 + $0x140] sm:$0xff]  ;;  %v12063_v0 = vld [vmem:[#allocation5 + $0x28] sm:$0xff] }
  0x79   : > { %1629 = vmatpush.bf16.msrb.mxu1 %v12061_v53  ;;  %v12067_v1 = vld [vmem:[#allocation5 + $0x48] sm:$0xff]  ;;  %v12086_v4 = vld [vmem:[#allocation10 + $0x80] sm:$0xff]  ;;  %v13512_v8 = vpack.c.bf16 %v882_v63, %v874_v62  ;;  %1448 = vmatpush.bf16.msra.mxu3 %v12063_v0 }
  0x7a   : > { %v12059_v2 = vld [vmem:[#allocation5 + $0x8] sm:$0xff]  ;;  %v12062_v10 = vld [vmem:[#allocation5 + $0x20] sm:$0xff] }
  0x7b   : > { %v12066_v11 = vld [vmem:[#allocation5 + $0x40] sm:$0xff] }
  0x7c   : > { %2356 = vmatpush.bf16.msra.mxu2 %v12077_v27  ;;  %1519 = vmatpush.bf16.msrb.mxu0 %v12068_v59  ;;  %v890_v24 = vld [vmem:[%s13410_s19 + $0x180] sm:$0xff]  ;;  %v852_v59 = vld [vmem:[%s13410_s19 + $0x50] sm:$0xff] }
  0x7d   : > { %1630 = vmatpush.bf16.msrb.mxu1 %v12060_v60  ;;  %1449 = vmatpush.bf16.msra.mxu3 %v12062_v10  ;;  %v898_v25 = vld [vmem:[%s13410_s19 + $0x1c0] sm:$0xff] }
  0x7e   : > { %v13528_v31 = vpack.c.bf16 %v898_v25, %v890_v24  ;;  %v12124_v25 = vld [vmem:[#allocation10 + $0x1b0] sm:$0xff] }
  0x80   : > { %2357 = vmatpush.bf16.msra.mxu2 %v12076_v28  ;;  %1520 = vmatpush.bf16.msrb.mxu0 %v12067_v1 }
  0x81   : > { %1631 = vmatpush.bf16.msrb.mxu1 %v12059_v2 }
  0x84   : > { %2358 = vmatpush.bf16.msra.mxu2 %v12075_v29  ;;  %1521 = vmatpush.bf16.msrb.mxu0 %v12066_v11 }
  0x86   : > { %10094 = vmatmul.msk.bf16.gmra.mxu0 %vm1019_vm1, %v1004_v20 }
  0x87   : > { %10106 = vmatmul.msk.bf16.gmra.mxu1 %vm1019_vm1, %v1004_v20  ;;  %10115 = vmatmul.msk.bf16.vlgmr.msrb.gmra.mxu2 %vm1019_vm1, %v1003_v12  ;;  %v12058_v12 = vld [vmem:[#allocation5] sm:$0xff] }
  0x88   : > { %2359 = vmatpush.bf16.msra.mxu2 %v12074_v32  ;;  %1632 = vmatpush.bf16.msrb.mxu1 %v12058_v12 }
  0x8c   : > { %2360 = vmatpush.bf16.msra.mxu2 %v12073_v34 }
  0x90   : > { %2361 = vmatpush.bf16.msra.mxu2 %v12072_v35  ;;  %v13535_v35 = vld [vmem:[%s17239_s23] ss:$0 sm:$0xff]  ;;  %s17701_s23 = sld [smem:[#allocation78_spill]] }
  0x94   : > { %2362 = vmatpush.bf16.msra.mxu2 %v12071_v36 }
  0x96   : > { %10095 = vmatmul.msk.bf16.gmra.mxu0 %vm1019_vm1, %v1005_v23 }
  0x97   : > { %10107 = vmatmul.msk.bf16.gmra.mxu1 %vm1019_vm1, %v1005_v23  ;;  %10116 = vmatmul.msk.bf16.gmra.mxu2 %vm1019_vm1, %v1004_v20 }
  0x98   : > { %2363 = vmatpush.bf16.msra.mxu2 %v12070_v37 }
  0x9c   : > { %2414 = vmatpush.bf16.msrb.mxu2 %v12093_v41 }
  0xa0   : > { %2415 = vmatpush.bf16.msrb.mxu2 %v12092_v42 }
  0xa4   : > { %2416 = vmatpush.bf16.msrb.mxu2 %v12091_v43 }
  0xa6   : > { %10096 = vmatmul.msk.bf16.gmra.mxu0 %vm1019_vm1, %v1006_v26 }
  0xa7   : > { %10108 = vmatmul.msk.bf16.gmra.mxu1 %vm1019_vm1, %v1006_v26  ;;  %10117 = vmatmul.msk.bf16.gmra.mxu2 %vm1019_vm1, %v1005_v23 }
  0xa8   : > { %2417 = vmatpush.bf16.msrb.mxu2 %v12090_v46 }
  0xac   : > { %2418 = vmatpush.bf16.msrb.mxu2 %v12089_v50 }
  0xb0   : > { %2419 = vmatpush.bf16.msrb.mxu2 %v12088_v55 }
  0xb4   : > { %2420 = vmatpush.bf16.msrb.mxu2 %v12087_v61 }
  0xb6   : > { %10097 = vmatmul.msk.bf16.gmra.mxu0 %vm1019_vm1, %v1007_v33 }
  0xb7   : > { %10109 = vmatmul.msk.bf16.gmra.mxu1 %vm1019_vm1, %v1007_v33  ;;  %10118 = vmatmul.msk.bf16.gmra.mxu2 %vm1019_vm1, %v1006_v26 }
  0xb8   : > { %2421 = vmatpush.bf16.msrb.mxu2 %v12086_v4  ;;  %v13549_v4 = vpack.c.bf16 %v852_v59, %v844_v58  ;;  %v12121_v58 = vld [vmem:[#allocation10 + $0x198] sm:$0xff] }
  0xc6   : > { %10098 = vmatmul.msk.bf16.gmra.mxu0 %vm1019_vm1, %v1008_v15 }
  0xc7   : > { %10119 = vmatmul.msk.bf16.gmra.mxu2 %vm1019_vm1, %v1007_v33 }
  0xd7   : > { %10120 = vmatmul.msk.bf16.gmra.mxu2 %vm1019_vm1, %v1008_v15 }
  0xe7   : > { %2364 = vmatmul.bf16.vlgmr.msra.gmra.mxu2 %v13492_v40 }
  0xf3   : > { %v13497_v47 = vpop.f32.mrf.mxu0 }
  0xf4   : > { %v13501_v49 = vpop.f32.mrf.mxu1  ;;  %v1144_v16 = vrot.slane %v13497_v47, 1 }
  0xf5   : > { %v1240_v20 = vrot.slane %v13501_v49, 2 }
  0xf7   : > { %2369 = vmatmul.bf16.gmra.mxu2 %v13499_v48 }
  0xfa   : > { %v13504_v54 = vpop.f32.mrf.mxu2 }
  0xfb   : > { %v1053_v56 = vpop.f32.mrf.mxu0  ;;  %v1259_v5 = vrot.slane %v13504_v54, 2 }
  0xfc   : > { %v1103_v57 = vpop.f32.mrf.mxu1  ;;  %v1145_v17 = vrot.slane %v1053_v56, 1 }
  0xfd   : > { %v1241_v21 = vrot.slane %v1103_v57, 2 }
  0xfe   : > { %v1146_v23 = vsel %vm17113_vm3, %v1144_v16, %v1145_v17 }
  0xff   : > { %v1242_v32 = vsel %vm17112_vm2, %v1240_v20, %v1241_v21 }
 0x102   : > { %v13508_v3 = vpop.f32.mrf.mxu2 }
 0x103   : > { %v1261_v6 = vrot.slane %v13508_v3, 2  ;;  %v1056_v7 = vpop.f32.mrf.mxu0  ;;  %v12110_v3 = vld [vmem:[#allocation10 + $0x140] sm:$0xff] }
 0x104   : > { %v1106_v9 = vpop.f32.mrf.mxu1  ;;  %v1147_v19 = vrot.slane %v1056_v7, 1 }
 0x105   : > { %v13519_v13 = vsel %vm17112_vm2, %v1259_v5, %v1261_v6  ;;  %v1243_v22 = vrot.slane %v1106_v9, 2 }
 0x106   : > { %v1148_v27 = vsel %vm17113_vm3, %v1145_v17, %v1147_v19  ;;  %v12125_v17 = vld [vmem:[#allocation10 + $0x1b8] sm:$0xff] }
 0x107   : > { %2374 = vmatmul.bf16.gmra.mxu2 %v13512_v8  ;;  %v1244_v33 = vsel %vm17112_vm2, %v1241_v21, %v1243_v22 }
 0x108   : > { %2530 = vmatpush.bf16.msra.mxu2 %v12125_v17  ;;  %v884_v17 = vld [vmem:[%s13410_s19 + $0x150] sm:$0xff] }
 0x10a   : > { %v1197_v14 = vpop.f32.mrf.mxu2 }
 0x10b   : > { %v1058_v15 = vpop.f32.mrf.mxu0  ;;  %v1198_v26 = vadd.f32 %v1197_v14, %v1146_v23 }
 0x10c   : > { %v1108_v18 = vpop.f32.mrf.mxu1  ;;  %v1149_v38 = vrot.slane %v1058_v15, 1  ;;  %2531 = vmatpush.bf16.msra.mxu2 %v12124_v25 }
 0x10d   : > { %v1276_v34 = vadd.f32 %v1242_v32, %v1198_v26  ;;  %v1245_v41 = vrot.slane %v1108_v18, 2 }
 0x10e   : > { %v1150_v43 = vsel %vm17113_vm3, %v1147_v19, %v1149_v38 }
 0x10f   : > { %v1292_v42 = vadd.f32 %v13535_v35, %v1276_v34  ;;  %v1246_v49 = vsel %vm17112_vm2, %v1243_v22, %v1245_v41 }
 0x111   : > { %v1304_v50 = vmax.f32 %v1292_v42, 0.0 }
 0x112   : > { %v1199_v28 = vpop.f32.mrf.mxu2 }
 0x113   : > { %v1200_v29 = vadd.f32 %v1199_v28, %v1148_v27  ;;  %v1061_v30 = vpop.f32.mrf.mxu0  ;;  %v1328_v60 = vrot.slane %v1304_v50, 1 }
 0x114   : > { %v1111_v37 = vpop.f32.mrf.mxu1  ;;  %v1151_v52 = vrot.slane %v1061_v30, 1 }
 0x115   : > { %v1277_v36 = vadd.f32 %v1244_v33, %v1200_v29  ;;  %v1247_v57 = vrot.slane %v1111_v37, 2  ;;  %v12123_v33 = vld [vmem:[#allocation10 + $0x1a8] sm:$0xff]  ;;  %v868_v37 = vld [vmem:[%s13410_s19 + $0xd0] sm:$0xff] }
 0x116   : > { %v1152_v62 = vsel %vm17113_vm3, %v1149_v38, %v1151_v52  ;;  %2532 = vmatpush.bf16.msra.mxu2 %v12123_v33 }
 0x117   : > { %v1293_v39 = vadd.f32 %v13535_v35, %v1277_v36  ;;  %2379 = vmatmul.bf16.gmra.mxu2 %v13528_v31  ;;  %v1248_v9 = vsel %vm17112_vm2, %v1245_v41, %v1247_v57  ;;  %v860_v36 = vld [vmem:[%s13410_s19 + $0x90] sm:$0xff] }
 0x119   : > { %v1305_v45 = vmax.f32 %v1293_v39, 0.0 }
 0x11a   : > { %v1202_v44 = vpop.f32.mrf.mxu2 }
 0x11b   : > { %v1203_v46 = vadd.f32 %v1202_v44, %v1150_v43  ;;  %v1063_v47 = vpop.f32.mrf.mxu0  ;;  %v1329_v53 = vrot.slane %v1305_v45, 1 }
 0x11c   : > { %v1113_v56 = vpop.f32.mrf.mxu1  ;;  %v1153_v12 = vrot.slane %v1063_v47, 1  ;;  %v12122_v47 = vld [vmem:[#allocation10 + $0x1a0] sm:$0xff] }
 0x11d   : > { %v1278_v51 = vadd.f32 %v1246_v49, %v1203_v46  ;;  %v1330_v7 = vsel %vm17113_vm3, %v1328_v60, %v1329_v53  ;;  %v1249_v18 = vrot.slane %v1113_v56, 2  ;;  %2533 = vmatpush.bf16.msra.mxu2 %v12122_v47 }
 0x11e   : > { %v1364_v14 = vmax.f32 %v1304_v50, %v1330_v7  ;;  %v1154_v21 = vsel %vm17113_vm3, %v1151_v52, %v1153_v12 }
 0x11f   : > { %v13543_v55 = vadd.f32 %v13535_v35, %v1278_v51  ;;  %v1250_v26 = vsel %vm17112_vm2, %v1247_v57, %v1249_v18 }
 0x121   : > { %v1306_v61 = vmax.f32 %v13543_v55, 0.0  ;;  %2534 = vmatpush.bf16.msra.mxu2 %v12121_v58 }
 0x122   : > { %v1204_v63 = vpop.f32.mrf.mxu2 }
 0x123   : > { %v1331_v0 = vrot.slane %v1306_v61, 1  ;;  %v1205_v1 = vadd.f32 %v1204_v63, %v1152_v62  ;;  %v1066_v2 = vpop.f32.mrf.mxu0 }
 0x124   : > { %v1116_v20 = vpop.f32.mrf.mxu1  ;;  %v1155_v29 = vrot.slane %v1066_v2, 1 }
 0x125   : > { %v1279_v10 = vadd.f32 %v1248_v9, %v1205_v1  ;;  %v1332_v11 = vsel %vm17113_vm3, %v1329_v53, %v1331_v0  ;;  %v1251_v34 = vrot.slane %v1116_v20, 2  ;;  %v12120_v1 = vld [vmem:[#allocation10 + $0x190] sm:$0xff] }
 0x126   : > { %v1365_v15 = vmax.f32 %v1305_v45, %v1332_v11  ;;  %v1156_v39 = vsel %vm17113_vm3, %v1153_v12, %v1155_v29  ;;  %v13568_v45 = vpack.c.bf16 %v868_v37, %v860_v36  ;;  %2535 = vmatpush.bf16.msra.mxu2 %v12120_v1  ;;  %v12082_v1 = vld [vmem:[#allocation10 + $0x60] sm:$0xff] }
 0x127   : > { %v1295_v16 = vadd.f32 %v13535_v35, %v1279_v10  ;;  %2422 = vmatmul.bf16.vlgmr.msrb.gmra.mxu2 %v13549_v4  ;;  %v1252_v49 = vsel %vm17112_vm2, %v1249_v18, %v1251_v34 }
 0x128   : > { %v1376_v19 = vpack.c.bf16 %v1365_v15, %v1364_v14  ;;  %v12119_v14 = vld [vmem:[#allocation10 + $0x188] sm:$0xff] }
 0x129   : > { %v1307_v23 = vmax.f32 %v1295_v16, 0.0  ;;  %v876_v16 = vld [vmem:[%s13410_s19 + $0x110] sm:$0xff] }
 0x12a   : > { %v1207_v22 = vpop.f32.mrf.mxu2  ;;  %10137 = vmatmul.msk.bf16.vlgmr.msra.gmra.mxu3 %vm17110_vm4, %v1376_v19  ;;  %10159 = vmatmul.msk.bf16.vlgmr.msrb.gmra.mxu0 %vm17110_vm4, %v1376_v19 }
 0x12b   : > { %v1208_v24 = vadd.f32 %v1207_v22, %v1154_v21  ;;  %10181 = vmatmul.msk.bf16.vlgmr.msrb.gmra.mxu1 %vm17110_vm4, %v1376_v19  ;;  %v1068_v28 = vpop.f32.mrf.mxu0  ;;  %v1333_v30 = vrot.slane %v1307_v23, 1  ;;  %2536 = vmatpush.bf16.msra.mxu2 %v12119_v14 }
 0x12c   : > { %v1118_v43 = vpop.f32.mrf.mxu1  ;;  %v1157_v52 = vrot.slane %v1068_v28, 1 }
 0x12d   : > { %v1280_v27 = vadd.f32 %v1250_v26, %v1208_v24  ;;  %v1334_v46 = vsel %vm17113_vm3, %v1331_v0, %v1333_v30  ;;  %v1253_v59 = vrot.slane %v1118_v43, 2  ;;  %v13589_v24 = vpack.c.bf16 %v884_v17, %v876_v16  ;;  %v12085_v26 = vld [vmem:[#allocation10 + $0x78] sm:$0xff]  ;;  %v12106_v17 = vld [vmem:[#allocation10 + $0x120] sm:$0xff] }
 0x12e   : > { %v1366_v53 = vmax.f32 %v1306_v61, %v1334_v46  ;;  %v1158_v62 = vsel %vm17113_vm3, %v1155_v29, %v1157_v52  ;;  %2385 = vmatpush.bf16.msrb.mxu3 %v12085_v26 }
 0x12f   : > { %v13562_v32 = vadd.f32 %v13535_v35, %v1280_v27  ;;  %v1254_v2 = vsel %vm17112_vm2, %v1251_v34, %v1253_v59  ;;  %v12118_v27 = vld [vmem:[#allocation10 + $0x180] sm:$0xff] }
 0x130   : > { %2537 = vmatpush.bf16.msra.mxu2 %v12118_v27 }
 0x131   : > { %v1308_v38 = vmax.f32 %v13562_v32, 0.0 }
 0x132   : > { %v1209_v41 = vpop.f32.mrf.mxu2 }
 0x133   : > { %v1335_v42 = vrot.slane %v1308_v38, 1  ;;  %v1210_v44 = vadd.f32 %v1209_v41, %v1156_v39  ;;  %v1071_v57 = vpop.f32.mrf.mxu0 }
 0x134   : > { %v1121_v7 = vpop.f32.mrf.mxu1  ;;  %v1159_v10 = vrot.slane %v1071_v57, 1 }
 0x135   : > { %v1281_v50 = vadd.f32 %v1252_v49, %v1210_v44  ;;  %v1336_v51 = vsel %vm17113_vm3, %v1333_v30, %v1335_v42  ;;  %v1255_v15 = vrot.slane %v1121_v7, 2  ;;  %v12109_v44 = vld [vmem:[#allocation10 + $0x138] sm:$0xff]  ;;  %v12084_v49 = vld [vmem:[#allocation10 + $0x70] sm:$0xff] }
 0x136   : > { %v1367_v55 = vmax.f32 %v1307_v23, %v1336_v51  ;;  %v1160_v20 = vsel %vm17113_vm3, %v1157_v52, %v1159_v10  ;;  %2472 = vmatpush.bf16.msra.mxu0 %v12109_v44  ;;  %v12108_v52 = vld [vmem:[#allocation10 + $0x130] sm:$0xff]  ;;  %2386 = vmatpush.bf16.msrb.mxu3 %v12084_v49  ;;  %v12103_v44 = vld [vmem:[#allocation10 + $0x108] sm:$0xff] }
 0x137   : > { %v1297_v56 = vadd.f32 %v13535_v35, %v1281_v50  ;;  %2427 = vmatmul.bf16.gmra.mxu2 %v13568_v45  ;;  %v1256_v28 = vsel %vm17112_vm2, %v1253_v59, %v1255_v15  ;;  %v12117_v50 = vld [vmem:[#allocation10 + $0x178] sm:$0xff] }
 0x138   : > { %v1377_v60 = vpack.c.bf16 %v1367_v55, %v1366_v53  ;;  %2501 = vmatpush.bf16.msra.mxu1 %v12117_v50  ;;  %v12116_v55 = vld [vmem:[#allocation10 + $0x170] sm:$0xff] }
 0x139   : > { %v1309_v61 = vmax.f32 %v1297_v56, 0.0  ;;  %v12083_v56 = vld [vmem:[#allocation10 + $0x68] sm:$0xff] }
 0x13a   : > { %v1212_v63 = vpop.f32.mrf.mxu2  ;;  %10138 = vmatmul.msk.bf16.gmra.mxu3 %vm17110_vm4, %v1377_v60  ;;  %10160 = vmatmul.msk.bf16.gmra.mxu0 %vm17110_vm4, %v1377_v60 }
 0x13b   : > { %v1213_v0 = vadd.f32 %v1212_v63, %v1158_v62  ;;  %10182 = vmatmul.msk.bf16.gmra.mxu1 %vm17110_vm4, %v1377_v60  ;;  %v1337_v11 = vrot.slane %v1309_v61, 1  ;;  %v1073_v19 = vpop.f32.mrf.mxu0  ;;  %v892_v60 = vld [vmem:[%s13410_s19 + $0x190] sm:$0xff]  ;;  %2473 = vmatpush.bf16.msra.mxu0 %v12108_v52  ;;  %v12107_v63 = vld [vmem:[#allocation10 + $0x128] sm:$0xff] }
 0x13c   : > { %v1161_v32 = vrot.slane %v1073_v19, 1  ;;  %v1123_v36 = vpop.f32.mrf.mxu1  ;;  %v900_v62 = vld [vmem:[%s13410_s19 + $0x1d0] sm:$0xff]  ;;  %2502 = vmatpush.bf16.msra.mxu1 %v12116_v55  ;;  %2387 = vmatpush.bf16.msrb.mxu3 %v12083_v56  ;;  %v12078_v55 = vld [vmem:[#allocation10 + $0x40] sm:$0xff] }
 0x13d   : > { %v1282_v9 = vadd.f32 %v1254_v2, %v1213_v0  ;;  %v1338_v25 = vsel %vm17113_vm3, %v1335_v42, %v1337_v11  ;;  %v1257_v41 = vrot.slane %v1123_v36, 2  ;;  %v12115_v0 = vld [vmem:[#allocation10 + $0x168] sm:$0xff]  ;;  %v13610_v14 = vpack.c.bf16 %v900_v62, %v892_v60  ;;  %v12112_v36 = vld [vmem:[#allocation10 + $0x150] sm:$0xff]  ;;  %v12102_v56 = vld [vmem:[#allocation10 + $0x100] sm:$0xff] }
 0x13e   : > { %v1368_v33 = vmax.f32 %v1308_v38, %v1338_v25  ;;  %v1162_v42 = vsel %vm17113_vm3, %v1159_v10, %v1161_v32 }
 0x13f   : > { %v13581_v12 = vadd.f32 %v13535_v35, %v1282_v9  ;;  %v1258_v51 = vsel %vm17112_vm2, %v1255_v15, %v1257_v41  ;;  %v1260_v16 = vsel %vm17112_vm2, %v1257_v41, %v1259_v5  ;;  %2474 = vmatpush.bf16.msra.mxu0 %v12107_v63  ;;  %v848_v41 = vld [vmem:[%s13410_s19 + $0x30] sm:$0xff] }
 0x140   : > { %2503 = vmatpush.bf16.msra.mxu1 %v12115_v0  ;;  %2388 = vmatpush.bf16.msrb.mxu3 %v12082_v1  ;;  %v12221_v0 = vld [vmem:[#allocation10 + $0x4b8] sm:$0xff] }
 0x141   : > { %v1310_v18 = vmax.f32 %v13581_v12, 0.0  ;;  %v12105_v12 = vld [vmem:[#allocation10 + $0x118] sm:$0xff]  ;;  %3288 = vmatpush.bf16.msrb.mxu2 %v12221_v0  ;;  %v12211_v0 = vld [vmem:[#allocation10 + $0x468] sm:$0xff] }
 0x142   : > { %v1214_v21 = vpop.f32.mrf.mxu2 }
 0x143   : > { %v1339_v22 = vrot.slane %v1310_v18, 1  ;;  %v1215_v23 = vadd.f32 %v1214_v21, %v1160_v20  ;;  %v1076_v47 = vpop.f32.mrf.mxu0  ;;  %2475 = vmatpush.bf16.msra.mxu0 %v12106_v17 }
 0x144   : > { %v1163_v57 = vrot.slane %v1076_v47, 1  ;;  %v12111_v47 = vld [vmem:[#allocation10 + $0x148] sm:$0xff] }
 0x145   : > { %v1283_v29 = vadd.f32 %v1256_v28, %v1215_v23  ;;  %v1340_v30 = vsel %vm17113_vm3, %v1337_v11, %v1339_v22  ;;  %v12081_v28 = vld [vmem:[#allocation10 + $0x58] sm:$0xff] }
 0x146   : > { %v1369_v34 = vmax.f32 %v1309_v61, %v1340_v30  ;;  %v1164_v2 = vsel %vm17113_vm3, %v1161_v32, %v1163_v57  ;;  %v12113_v30 = vld [vmem:[#allocation10 + $0x158] sm:$0xff]  ;;  %2389 = vmatpush.bf16.msrb.mxu3 %v12081_v28  ;;  %v12080_v32 = vld [vmem:[#allocation10 + $0x50] sm:$0xff]  ;;  %v843_v28 = vld [vmem:[%s13410_s19 + $0x8] sm:$0xff] }
 0x147   : > { %v1299_v37 = vadd.f32 %v13535_v35, %v1283_v29  ;;  %2432 = vmatmul.bf16.gmra.mxu2 %v13589_v24  ;;  %2476 = vmatpush.bf16.msra.mxu0 %v12105_v12 }
 0x148   : > { %v1378_v39 = vpack.c.bf16 %v1369_v34, %v1368_v33  ;;  %v12104_v33 = vld [vmem:[#allocation10 + $0x110] sm:$0xff] }
 0x149   : > { %v1311_v46 = vmax.f32 %v1299_v37, 0.0 }
 0x14a   : > { %v1217_v43 = vpop.f32.mrf.mxu2  ;;  %10139 = vmatmul.msk.bf16.gmra.mxu3 %vm17110_vm4, %v1378_v39  ;;  %10161 = vmatmul.msk.bf16.gmra.mxu0 %vm17110_vm4, %v1378_v39 }
 0x14b   : > { %v1218_v38 = vadd.f32 %v1217_v43, %v1162_v42  ;;  %10183 = vmatmul.msk.bf16.gmra.mxu1 %vm17110_vm4, %v1378_v39  ;;  %v1341_v58 = vrot.slane %v1311_v46, 1  ;;  %v1078_v10 = vpop.f32.mrf.mxu0  ;;  %v856_v42 = vld [vmem:[%s13410_s19 + $0x70] sm:$0xff]  ;;  %2390 = vmatpush.bf16.msrb.mxu3 %v12080_v32  ;;  %v12079_v43 = vld [vmem:[#allocation10 + $0x48] sm:$0xff]  ;;  %v854_v32 = vld [vmem:[%s13410_s19 + $0x60] sm:$0xff] }
 0x14c   : > { %v1165_v21 = vrot.slane %v1078_v10, 1  ;;  %2477 = vmatpush.bf16.msra.mxu0 %v12104_v33  ;;  %v847_v33 = vld [vmem:[%s13410_s19 + $0x28] sm:$0xff] }
 0x14d   : > { %v1284_v53 = vadd.f32 %v1258_v51, %v1218_v38  ;;  %v1342_v15 = vsel %vm17113_vm3, %v1339_v22, %v1341_v58  ;;  %v12114_v22 = vld [vmem:[#allocation10 + $0x160] sm:$0xff] }
 0x14e   : > { %v1370_v23 = vmax.f32 %v1310_v18, %v1342_v15  ;;  %2504 = vmatpush.bf16.msra.mxu1 %v12114_v22  ;;  %v1166_v5 = vsel %vm17113_vm3, %v1163_v57, %v1165_v21  ;;  %v1179_v38 = vsel %vm17113_vm3, %v1165_v21, 0.0  ;;  %v864_v15 = vld [vmem:[%s13410_s19 + $0xb0] sm:$0xff]  ;;  %v12215_v22 = vld [vmem:[#allocation10 + $0x488] sm:$0xff] }
 0x14f   : > { %v13602_v59 = vadd.f32 %v13535_v35, %v1284_v53  ;;  %v1275_v53 = vsel %vm17112_vm2, %v1261_v6, 0.0  ;;  %2391 = vmatpush.bf16.msrb.mxu3 %v12079_v43  ;;  %v12205_v43 = vld [vmem:[#allocation10 + $0x438] sm:$0xff] }
 0x150   : > { %2478 = vmatpush.bf16.msra.mxu0 %v12103_v44  ;;  %v12213_v44 = vld [vmem:[#allocation10 + $0x478] sm:$0xff] }
 0x151   : > { %v1312_v61 = vmax.f32 %v13602_v59, 0.0 }
 0x152   : > { %v1219_v7 = vpop.f32.mrf.mxu2  ;;  %2505 = vmatpush.bf16.msra.mxu1 %v12113_v30  ;;  %v846_v30 = vld [vmem:[%s13410_s19 + $0x20] sm:$0xff] }
 0x153   : > { %v1343_v9 = vrot.slane %v1312_v61, 1  ;;  %v1220_v11 = vadd.f32 %v1219_v7, %v1164_v2  ;;  %2392 = vmatpush.bf16.msrb.mxu3 %v12078_v55  ;;  %v12203_v55 = vld [vmem:[#allocation10 + $0x428] sm:$0xff] }
 0x154   : > { %2479 = vmatpush.bf16.msra.mxu0 %v12102_v56 }
 0x155   : > { %v1285_v19 = vadd.f32 %v1260_v16, %v1220_v11  ;;  %v1344_v20 = vsel %vm17113_vm3, %v1341_v58, %v1343_v9  ;;  %v872_v16 = vld [vmem:[%s13410_s19 + $0xf0] sm:$0xff] }
 0x156   : > { %v1371_v25 = vmax.f32 %v1311_v46, %v1344_v20  ;;  %2506 = vmatpush.bf16.msra.mxu1 %v12112_v36  ;;  %v13652_v21 = vpack.c.bf16 %v872_v16, %v864_v15  ;;  %v12096_v15 = vld [vmem:[#allocation10 + $0xd0] sm:$0xff] }
 0x157   : > { %v1301_v26 = vadd.f32 %v13535_v35, %v1285_v19  ;;  %2437 = vmatmul.bf16.gmra.mxu2 %v13610_v14  ;;  %v12218_v19 = vld [vmem:[#allocation10 + $0x4a0] sm:$0xff]  ;;  %v12200_v16 = vld [vmem:[#allocation10 + $0x410] sm:$0xff] }
 0x158   : > { %v1379_v54 = vpack.c.bf16 %v1371_v25, %v1370_v23  ;;  %v12217_v23 = vld [vmem:[#allocation10 + $0x498] sm:$0xff]  ;;  %3230 = vmatpush.bf16.msrb.mxu0 %v12205_v43 }
 0x159   : > { %v1313_v18 = vmax.f32 %v1301_v26, 0.0  ;;  %v12216_v26 = vld [vmem:[#allocation10 + $0x490] sm:$0xff] }
 0x15a   : > { %v1222_v27 = vpop.f32.mrf.mxu2  ;;  %10140 = vmatmul.msk.bf16.gmra.mxu3 %vm17110_vm4, %v1379_v54  ;;  %10162 = vmatmul.msk.bf16.gmra.mxu0 %vm17110_vm4, %v1379_v54 }
 0x15b   : > { %v1223_v29 = vadd.f32 %v1222_v27, %v1166_v5  ;;  %10184 = vmatmul.msk.bf16.gmra.mxu1 %vm17110_vm4, %v1379_v54  ;;  %v1345_v37 = vrot.slane %v1313_v18, 1  ;;  %v880_v54 = vld [vmem:[%s13410_s19 + $0x130] sm:$0xff]  ;;  %v12214_v27 = vld [vmem:[#allocation10 + $0x480] sm:$0xff] }
 0x15c   : > { %2507 = vmatpush.bf16.msra.mxu1 %v12111_v47  ;;  %v888_v5 = vld [vmem:[%s13410_s19 + $0x170] sm:$0xff] }
 0x15d   : > { %v1286_v34 = vadd.f32 %v13519_v13, %v1223_v29  ;;  %v13630_v13 = vpack.c.bf16 %v856_v42, %v848_v41  ;;  %v1346_v52 = vsel %vm17113_vm3, %v1343_v9, %v1345_v37  ;;  %v12219_v9 = vld [vmem:[#allocation10 + $0x4a8] sm:$0xff]  ;;  %v12101_v42 = vld [vmem:[#allocation10 + $0xf8] sm:$0xff]  ;;  %v12204_v47 = vld [vmem:[#allocation10 + $0x430] sm:$0xff] }
 0x15e   : > { %v1372_v60 = vmax.f32 %v1312_v61, %v1346_v52  ;;  %v851_v29 = vld [vmem:[%s13410_s19 + $0x48] sm:$0xff]  ;;  %2443 = vmatpush.bf16.msra.mxu3 %v12101_v42  ;;  %3231 = vmatpush.bf16.msrb.mxu0 %v12204_v47  ;;  %v12198_v42 = vld [vmem:[#allocation10 + $0x400] sm:$0xff] }
 0x15f   : > { %v1302_v39 = vadd.f32 %v13535_v35, %v1286_v34  ;;  %v855_v34 = vld [vmem:[%s13410_s19 + $0x68] sm:$0xff]  ;;  %v13672_v36 = vpack.c.bf16 %v851_v29, %v843_v28 }
 0x160   : > { %2508 = vmatpush.bf16.msra.mxu1 %v12110_v3  ;;  %v887_v28 = vld [vmem:[%s13410_s19 + $0x168] sm:$0xff] }
 0x161   : > { %v1314_v46 = vmax.f32 %v1302_v39, 0.0  ;;  %v13677_v39 = vpack.c.bf16 %v855_v34, %v847_v33  ;;  %v12094_v34 = vld [vmem:[#allocation10 + $0xc0] sm:$0xff] }
 0x162   : > { %v1224_v49 = vpop.f32.mrf.mxu2  ;;  %3232 = vmatpush.bf16.msrb.mxu0 %v12203_v55  ;;  %v12251_v55 = vld [vmem:[#allocation10 + $0x5a8] sm:$0xff] }
 0x163   : > { %v1347_v50 = vrot.slane %v1314_v46, 1  ;;  %v1225_v51 = vadd.f32 %v1224_v49, %v1179_v38  ;;  %17240 = vst [vmem:[#allocation24_spill] sm:$0xff] %v13677_v39  ;;  %v896_v38 = vld [vmem:[%s13410_s19 + $0x1b0] sm:$0xff] }
 0x164   : > { %3259 = vmatpush.bf16.msrb.mxu1 %v12213_v44  ;;  %v904_v49 = vld [vmem:[%s13410_s19 + $0x1f0] sm:$0xff] }
 0x165   : > { %v1287_v57 = vadd.f32 %v1275_v53, %v1225_v51  ;;  %v1348_v58 = vsel %vm17113_vm3, %v1345_v37, %v1347_v50  ;;  %v13674_v37 = vpack.c.bf16 %v854_v32, %v846_v30  ;;  %v859_v51 = vld [vmem:[%s13410_s19 + $0x88] sm:$0xff]  ;;  %v13689_v56 = vpack.c.bf16 %v904_v49, %v896_v38  ;;  %v12206_v38 = vld [vmem:[#allocation10 + $0x440] sm:$0xff]  ;;  %v12252_v49 = vld [vmem:[#allocation10 + $0x5b0] sm:$0xff] }
 0x166   : > { %v1373_v62 = vmax.f32 %v1313_v18, %v1348_v58  ;;  %v13665_v18 = vpack.c.bf16 %v888_v5, %v880_v54  ;;  %v12099_v53 = vld [vmem:[#allocation10 + $0xe8] sm:$0xff]  ;;  %v862_v58 = vld [vmem:[%s13410_s19 + $0xa0] sm:$0xff] }
 0x167   : > { %v1303_v63 = vadd.f32 %v13535_v35, %v1287_v57  ;;  %2538 = vmatmul.bf16.vlgmr.msra.gmra.mxu2 %v13630_v13  ;;  %v12220_v35 = vld [vmem:[#allocation10 + $0x4b0] sm:$0xff]  ;;  %v867_v57 = vld [vmem:[%s13410_s19 + $0xc8] sm:$0xff]  ;;  %v878_v54 = vld [vmem:[%s13410_s19 + $0x120] sm:$0xff] }
 0x168   : > { %v1380_v1 = vpack.c.bf16 %v1373_v62, %v1372_v60  ;;  %3289 = vmatpush.bf16.msrb.mxu2 %v12220_v35  ;;  %v870_v60 = vld [vmem:[%s13410_s19 + $0xe0] sm:$0xff]  ;;  %v863_v62 = vld [vmem:[%s13410_s19 + $0xa8] sm:$0xff]  ;;  %v13696_v3 = vpack.c.bf16 %v867_v57, %v859_v51 }
 0x169   : > { %v1315_v6 = vmax.f32 %v1303_v63, 0.0  ;;  %v871_v63 = vld [vmem:[%s13410_s19 + $0xe8] sm:$0xff]  ;;  %v886_v5 = vld [vmem:[%s13410_s19 + $0x160] sm:$0xff] }
 0x16a   : > { %10141 = vmatmul.msk.bf16.gmra.mxu3 %vm17110_vm4, %v1380_v1  ;;  %10163 = vmatmul.msk.bf16.gmra.mxu0 %vm17110_vm4, %v1380_v1  ;;  %v13643_v59 = vpop.f32.mrf.mxu2  ;;  %v13701_v35 = vpack.c.bf16 %v871_v63, %v863_v62  ;;  %v12207_v30 = vld [vmem:[#allocation10 + $0x448] sm:$0xff]  ;;  %v13718_v33 = vpack.c.bf16 %v886_v5, %v878_v54  ;;  %v12249_v54 = vld [vmem:[#allocation10 + $0x598] sm:$0xff] }
 0x16b   : > { %v1349_v61 = vrot.slane %v1315_v6, 1  ;;  %10185 = vmatmul.msk.bf16.gmra.mxu1 %vm17110_vm4, %v1380_v1  ;;  %v13698_v1 = vpack.c.bf16 %v870_v60, %v862_v58  ;;  %v891_v63 = vld [vmem:[%s13410_s19 + $0x188] sm:$0xff] }
 0x16c   : > { %3290 = vmatpush.bf16.msrb.mxu2 %v12219_v9  ;;  %17243 = vst [vmem:[#allocation27_spill] sm:$0xff] %v13701_v35  ;;  %v12201_v9 = vld [vmem:[#allocation10 + $0x418] sm:$0xff] }
 0x16d   : > { %v1350_v2 = vsel %vm17113_vm3, %v1347_v50, %v1349_v61  ;;  %v1363_v7 = vsel %vm17113_vm3, %v1349_v61, 0.0  ;;  %v12212_v50 = vld [vmem:[#allocation10 + $0x470] sm:$0xff]  ;;  %17242 = vst [vmem:[#allocation26_spill] sm:$0xff] %v13698_v1  ;;  %v12202_v61 = vld [vmem:[#allocation10 + $0x420] sm:$0xff] }
 0x16e   : > { %v1374_v10 = vmax.f32 %v1314_v46, %v1350_v2  ;;  %v1375_v11 = vmax.f32 %v1315_v6, %v1363_v7  ;;  %v12100_v46 = vld [vmem:[#allocation10 + $0xf0] sm:$0xff]  ;;  %3260 = vmatpush.bf16.msrb.mxu1 %v12212_v50  ;;  %v12098_v6 = vld [vmem:[#allocation10 + $0xe0] sm:$0xff]  ;;  %3233 = vmatpush.bf16.msrb.mxu0 %v12202_v61  ;;  %v12097_v7 = vld [vmem:[#allocation10 + $0xd8] sm:$0xff] }
 0x16f   : > { %2444 = vmatpush.bf16.msra.mxu3 %v12100_v46  ;;  %v12210_v2 = vld [vmem:[#allocation10 + $0x460] sm:$0xff]  ;;  %v12253_v46 = vld [vmem:[#allocation10 + $0x5b8] sm:$0xff] }
 0x170   : > { %v1381_v17 = vpack.c.bf16 %v1375_v11, %v1374_v10  ;;  %3291 = vmatpush.bf16.msrb.mxu2 %v12218_v19  ;;  %v12209_v11 = vld [vmem:[#allocation10 + $0x458] sm:$0xff]  ;;  %v875_v19 = vld [vmem:[%s13410_s19 + $0x108] sm:$0xff]  ;;  %v902_v61 = vld [vmem:[%s13410_s19 + $0x1e0] sm:$0xff] }
 0x172   : > { %v13650_v20 = vpop.f32.mrf.mxu2  ;;  %3261 = vmatpush.bf16.msrb.mxu1 %v12211_v0  ;;  %3234 = vmatpush.bf16.msrb.mxu0 %v12201_v9  ;;  %v899_v0 = vld [vmem:[%s13410_s19 + $0x1c8] sm:$0xff] }
 0x173   : > { %2445 = vmatpush.bf16.msra.mxu3 %v12099_v53  ;;  %v903_v9 = vld [vmem:[%s13410_s19 + $0x1e8] sm:$0xff] }
 0x174   : > { %3292 = vmatpush.bf16.msrb.mxu2 %v12217_v23  ;;  %v12095_v23 = vld [vmem:[#allocation10 + $0xc8] sm:$0xff] }
 0x176   : > { %3262 = vmatpush.bf16.msrb.mxu1 %v12210_v2  ;;  %3235 = vmatpush.bf16.msrb.mxu0 %v12200_v16  ;;  %v12250_v2 = vld [vmem:[#allocation10 + $0x5a0] sm:$0xff] }
 0x177   : > { %2543 = vmatmul.bf16.gmra.mxu2 %v13652_v21  ;;  %2446 = vmatpush.bf16.msra.mxu3 %v12098_v6  ;;  %v894_v6 = vld [vmem:[%s13410_s19 + $0x1a0] sm:$0xff] }
 0x178   : > { %3293 = vmatpush.bf16.msrb.mxu2 %v12216_v26  ;;  %v12199_v26 = vld [vmem:[#allocation10 + $0x408] sm:$0xff] }
 0x17a   : > { %10142 = vmatmul.msk.bf16.gmra.mxu3 %vm17110_vm4, %v1381_v17  ;;  %10164 = vmatmul.msk.bf16.gmra.mxu0 %vm17110_vm4, %v1381_v17  ;;  %v13657_v25 = vpop.f32.mrf.mxu2 }
 0x17b   : > { %10186 = vmatmul.msk.bf16.gmra.mxu1 %vm17110_vm4, %v1381_v17  ;;  %2447 = vmatpush.bf16.msra.mxu3 %v12097_v7  ;;  %v12208_v17 = vld [vmem:[#allocation10 + $0x450] sm:$0xff]  ;;  %v895_v7 = vld [vmem:[%s13410_s19 + $0x1a8] sm:$0xff] }
 0x17c   : > { %3294 = vmatpush.bf16.msrb.mxu2 %v12215_v22  ;;  %3263 = vmatpush.bf16.msrb.mxu1 %v12209_v11  ;;  %v883_v22 = vld [vmem:[%s13410_s19 + $0x148] sm:$0xff] }
 0x17d   : > { %3236 = vmatpush.bf16.msrb.mxu0 %v12199_v26  ;;  %v13716_v32 = vpack.c.bf16 %v883_v22, %v875_v19  ;;  %v13737_v19 = vpack.c.bf16 %v899_v0, %v891_v63  ;;  %v13742_v22 = vpack.c.bf16 %v903_v9, %v895_v7  ;;  %v12246_v7 = vld [vmem:[#allocation10 + $0x580] sm:$0xff] }
 0x17f   : > { %2448 = vmatpush.bf16.msra.mxu3 %v12096_v15  ;;  %17247 = vst [vmem:[#allocation31_spill] sm:$0xff] %v13737_v19 }
 0x180   : > { %3295 = vmatpush.bf16.msrb.mxu2 %v12214_v27  ;;  %v879_v27 = vld [vmem:[%s13410_s19 + $0x128] sm:$0xff]  ;;  %3264 = vmatpush.bf16.msrb.mxu1 %v12208_v17  ;;  %17249 = vst [vmem:[#allocation33_spill] sm:$0xff] %v13742_v22 }
 0x181   : > { %v13721_v44 = vpack.c.bf16 %v887_v28, %v879_v27  ;;  %3237 = vmatpush.bf16.msrb.mxu0 %v12198_v42 }
 0x182   : > { %v13663_v12 = vpop.f32.mrf.mxu2 }
 0x183   : > { %2449 = vmatpush.bf16.msra.mxu3 %v12095_v23  ;;  %17246 = vst [vmem:[#allocation30_spill] sm:$0xff] %v13721_v44  ;;  %v13739_v23 = vpack.c.bf16 %v902_v61, %v894_v6  ;;  %v845_v61 = vld [vmem:[%s13410_s19 + $0x18] sm:$0xff] }
 0x184   : > { %3265 = vmatpush.bf16.msrb.mxu1 %v12207_v30  ;;  %3404 = vmatpush.bf16.msra.mxu2 %v12253_v46 }
 0x185   : > { %17248 = vst [vmem:[#allocation32_spill] sm:$0xff] %v13739_v23 }
 0x187   : > { %2548 = vmatmul.bf16.gmra.mxu2 %v13665_v18  ;;  %2450 = vmatpush.bf16.msra.mxu3 %v12094_v34 }
 0x188   : > { %3266 = vmatpush.bf16.msrb.mxu1 %v12206_v38  ;;  %3405 = vmatpush.bf16.msra.mxu2 %v12252_v49  ;;  %v13754_v38 = vld [vmem:[%s17250_s21] ss:$0 sm:$0xff]  ;;  %s17731_s21 = sld [smem:[#allocation81_spill]] }
 0x18a   : > { %2393 = vmatmul.bf16.vlgmr.msrb.gmra.mxu3 %v13672_v36  ;;  %2480 = vmatmul.bf16.vlgmr.msra.gmra.mxu0 %v13674_v37  ;;  %v13681_v41 = vpop.f32.mrf.mxu2 }
 0x18b   : > { %2509 = vmatmul.bf16.vlgmr.msra.gmra.mxu1 %v13677_v39 }
 0x18c   : > { %3406 = vmatpush.bf16.msra.mxu2 %v12251_v55 }
 0x190   : > { %3407 = vmatpush.bf16.msra.mxu2 %v12250_v2  ;;  %v853_v2 = vld [vmem:[%s13410_s19 + $0x58] sm:$0xff] }
 0x192   : > { %v13687_v52 = vpop.f32.mrf.mxu2 }
 0x193   : > { %17241 = vst [vmem:[#allocation25_spill] sm:$0xff] %v13687_v52 }
 0x194   : > { %3408 = vmatpush.bf16.msra.mxu2 %v12249_v54  ;;  %v13764_v54 = vpack.c.bf16 %v853_v2, %v845_v61 }
 0x197   : > { %2553 = vmatmul.bf16.gmra.mxu2 %v13689_v56 }
 0x19a   : > { %2398 = vmatmul.bf16.gmra.mxu3 %v13696_v3  ;;  %2485 = vmatmul.bf16.gmra.mxu0 %v13698_v1  ;;  %v13706_v10 = vpop.f32.mrf.mxu2 }
 0x19b   : > { %2514 = vmatmul.bf16.gmra.mxu1 %v13701_v35  ;;  %17244 = vst [vmem:[#allocation28_spill] sm:$0xff] %v13706_v10 }
 0x1a2   : > { %v13714_v29 = vpop.f32.mrf.mxu2 }
 0x1a3   : > { %17245 = vst [vmem:[#allocation29_spill] sm:$0xff] %v13714_v29 }
 0x1a7   : > { %v1523_v43 = vpop.f32.mrf.mxu0  ;;  %3296 = vmatmul.bf16.vlgmr.msrb.gmra.mxu2 %v13549_v4 }
 0x1a8   : > { %v1634_v47 = vpop.f32.mrf.mxu1  ;;  %v1676_v57 = vrot.slane %v1523_v43, 2  ;;  %v12248_v43 = vld [vmem:[#allocation10 + $0x590] sm:$0xff] }
 0x1a9   : > { %3409 = vmatpush.bf16.msra.mxu2 %v12248_v43 }
 0x1aa   : > { %2403 = vmatmul.bf16.gmra.mxu3 %v13716_v32  ;;  %2490 = vmatmul.bf16.gmra.mxu0 %v13718_v33  ;;  %v13726_v50 = vpop.f32.mrf.mxu2 }
 0x1ab   : > { %2519 = vmatmul.bf16.gmra.mxu1 %v13721_v44 }
 0x1ad   : > { %v1451_v51 = vpop.f32.mrf.mxu3 }
 0x1ae   : > { %v1565_v16 = vrot.slane %v1451_v51, 1 }
 0x1af   : > { %v1525_v53 = vpop.f32.mrf.mxu0 }
 0x1b0   : > { %v1677_v58 = vrot.slane %v1525_v53, 2  ;;  %v1636_v60 = vpop.f32.mrf.mxu1  ;;  %v12247_v53 = vld [vmem:[#allocation10 + $0x588] sm:$0xff] }
 0x1b1   : > { %3410 = vmatpush.bf16.msra.mxu2 %v12247_v53  ;;  %v12133_v53 = vld [vmem:[#allocation10 + $0x1f8] sm:$0xff] }
 0x1b2   : > { %v1678_v62 = vsel %vm17112_vm2, %v1676_v57, %v1677_v58  ;;  %v13735_v11 = vpop.f32.mrf.mxu2  ;;  %2559 = vmatpush.bf16.msrb.mxu3 %v12133_v53 }
 0x1b5   : > { %v1453_v15 = vpop.f32.mrf.mxu3  ;;  %3411 = vmatpush.bf16.msra.mxu2 %v12246_v7  ;;  %v12132_v7 = vld [vmem:[#allocation10 + $0x1f0] sm:$0xff] }
 0x1b6   : > { %v1566_v17 = vrot.slane %v1453_v15, 1  ;;  %2560 = vmatpush.bf16.msrb.mxu3 %v12132_v7 }
 0x1b7   : > { %v1528_v26 = vpop.f32.mrf.mxu0  ;;  %3301 = vmatmul.bf16.gmra.mxu2 %v13568_v45 }
 0x1b8   : > { %v1567_v5 = vsel %vm17113_vm3, %v1565_v16, %v1566_v17  ;;  %v1679_v27 = vrot.slane %v1528_v26, 2  ;;  %v1639_v28 = vpop.f32.mrf.mxu1 }
 0x1b9   : > { %v1635_v30 = vadd.f32 %v1634_v47, %v1567_v5 }
 0x1ba   : > { %v1680_v34 = vsel %vm17112_vm2, %v1677_v58, %v1679_v27  ;;  %2408 = vmatmul.bf16.gmra.mxu3 %v13737_v19  ;;  %2495 = vmatmul.bf16.gmra.mxu0 %v13739_v23  ;;  %v13749_v46 = vpop.f32.mrf.mxu2 }
 0x1bb   : > { %v1712_v42 = vadd.f32 %v1678_v62, %v1635_v30  ;;  %2524 = vmatmul.bf16.gmra.mxu1 %v13742_v22 }
 0x1bd   : > { %v1456_v47 = vpop.f32.mrf.mxu3  ;;  %v1728_v62 = vadd.f32 %v13754_v38, %v1712_v42 }
 0x1be   : > { %v1568_v49 = vrot.slane %v1456_v47, 1 }
 0x1bf   : > { %v1530_v51 = vpop.f32.mrf.mxu0  ;;  %v1740_v15 = vmax.f32 %v1728_v62, 0.0 }
 0x1c0   : > { %v1569_v55 = vsel %vm17113_vm3, %v1566_v17, %v1568_v49  ;;  %v1681_v57 = vrot.slane %v1530_v51, 2  ;;  %v1641_v58 = vpop.f32.mrf.mxu1 }
 0x1c1   : > { %v1637_v63 = vadd.f32 %v1636_v60, %v1569_v55  ;;  %v1764_v42 = vrot.slane %v1740_v15, 1  ;;  %v12237_v55 = vld [vmem:[#allocation10 + $0x538] sm:$0xff] }
 0x1c2   : > { %v1682_v0 = vsel %vm17112_vm2, %v1679_v27, %v1681_v57  ;;  %v13761_v9 = vpop.f32.mrf.mxu2  ;;  %3346 = vmatpush.bf16.msra.mxu0 %v12237_v55 }
 0x1c3   : > { %v1713_v6 = vadd.f32 %v1680_v34, %v1637_v63 }
 0x1c5   : > { %v1729_v16 = vadd.f32 %v13754_v38, %v1713_v6  ;;  %v1458_v26 = vpop.f32.mrf.mxu3  ;;  %v12245_v6 = vld [vmem:[#allocation10 + $0x578] sm:$0xff] }
 0x1c6   : > { %v1570_v17 = vrot.slane %v1458_v26, 1  ;;  %3375 = vmatpush.bf16.msra.mxu1 %v12245_v6 }
 0x1c7   : > { %v1741_v5 = vmax.f32 %v1729_v16, 0.0  ;;  %v1533_v30 = vpop.f32.mrf.mxu0  ;;  %3306 = vmatmul.bf16.gmra.mxu2 %v13589_v24  ;;  %v12236_v16 = vld [vmem:[#allocation10 + $0x530] sm:$0xff] }
 0x1c8   : > { %v1571_v60 = vsel %vm17113_vm3, %v1568_v49, %v1570_v17  ;;  %v1683_v27 = vrot.slane %v1533_v30, 2  ;;  %v13768_v34 = vpop.f32.mrf.mxu1  ;;  %3347 = vmatpush.bf16.msra.mxu0 %v12236_v16 }
 0x1c9   : > { %v1765_v43 = vrot.slane %v1741_v5, 1  ;;  %v1640_v47 = vadd.f32 %v1639_v28, %v1571_v60 }
 0x1ca   : > { %v1684_v51 = vsel %vm17112_vm2, %v1681_v57, %v1683_v27  ;;  %2451 = vmatmul.bf16.vlgmr.msra.gmra.mxu3 %v13764_v54  ;;  %3238 = vmatmul.bf16.vlgmr.msrb.gmra.mxu0 %v13492_v40  ;;  %v13775_v49 = vpop.f32.mrf.mxu2 }
 0x1cb   : > { %v1714_v62 = vadd.f32 %v1682_v0, %v1640_v47  ;;  %3267 = vmatmul.bf16.vlgmr.msrb.gmra.mxu1 %v13672_v36  ;;  %v1766_v63 = vsel %vm17113_vm3, %v1764_v42, %v1765_v43 }
 0x1cc   : > { %v13777_v61 = vmax.f32 %v1740_v15, %v1766_v63  ;;  %v12244_v15 = vld [vmem:[#allocation10 + $0x570] sm:$0xff]  ;;  %v12235_v63 = vld [vmem:[#allocation10 + $0x528] sm:$0xff] }
 0x1cd   : > { %v1730_v28 = vadd.f32 %v13754_v38, %v1714_v62  ;;  %v1461_v57 = vpop.f32.mrf.mxu3  ;;  %3376 = vmatpush.bf16.msra.mxu1 %v12244_v15  ;;  %v12131_v62 = vld [vmem:[#allocation10 + $0x1e8] sm:$0xff]  ;;  %3348 = vmatpush.bf16.msra.mxu0 %v12235_v63 }
 0x1ce   : > { %17251 = vst [vmem:[#allocation34_spill] sm:$0xff] %v13777_v61  ;;  %v1572_v2 = vrot.slane %v1461_v57, 1  ;;  %v861_v57 = vld [vmem:[%s13410_s19 + $0x98] sm:$0xff]  ;;  %2561 = vmatpush.bf16.msrb.mxu3 %v12131_v62 }
 0x1cf   : > { %v1742_v0 = vmax.f32 %v1730_v28, 0.0  ;;  %v1535_v26 = vpop.f32.mrf.mxu0  ;;  %v869_v28 = vld [vmem:[%s13410_s19 + $0xd8] sm:$0xff] }
 0x1d0   : > { %v1573_v30 = vsel %vm17113_vm3, %v1570_v17, %v1572_v2  ;;  %v1685_v60 = vrot.slane %v1535_v26, 2  ;;  %v13781_v42 = vpop.f32.mrf.mxu1  ;;  %v12243_v17 = vld [vmem:[#allocation10 + $0x568] sm:$0xff] }
 0x1d1   : > { %v1767_v47 = vrot.slane %v1742_v0, 1  ;;  %v1642_v53 = vadd.f32 %v1641_v58, %v1573_v30  ;;  %3377 = vmatpush.bf16.msra.mxu1 %v12243_v17  ;;  %v12130_v30 = vld [vmem:[#allocation10 + $0x1e0] sm:$0xff]  ;;  %v12233_v17 = vld [vmem:[#allocation10 + $0x518] sm:$0xff] }
 0x1d2   : > { %v1686_v55 = vsel %vm17112_vm2, %v1683_v27, %v1685_v60  ;;  %v13787_v29 = vpop.f32.mrf.mxu2  ;;  %v13792_v27 = vpack.c.bf16 %v869_v28, %v861_v57  ;;  %2562 = vmatpush.bf16.msrb.mxu3 %v12130_v30  ;;  %v12129_v28 = vld [vmem:[#allocation10 + $0x1d8] sm:$0xff] }
 0x1d3   : > { %v1715_v6 = vadd.f32 %v1684_v51, %v1642_v53  ;;  %v1768_v61 = vsel %vm17113_vm3, %v1765_v43, %v1767_v47  ;;  %17252 = vst [vmem:[#allocation35_spill] sm:$0xff] %v13787_v29  ;;  %v12234_v51 = vld [vmem:[#allocation10 + $0x520] sm:$0xff]  ;;  %v12241_v30 = vld [vmem:[#allocation10 + $0x558] sm:$0xff] }
 0x1d4   : > { %v13789_v7 = vmax.f32 %v1741_v5, %v1768_v61  ;;  %3349 = vmatpush.bf16.msra.mxu0 %v12234_v51  ;;  %v12242_v5 = vld [vmem:[#allocation10 + $0x560] sm:$0xff] }
 0x1d5   : > { %v1731_v16 = vadd.f32 %v13754_v38, %v1715_v6  ;;  %v1463_v58 = vpop.f32.mrf.mxu3  ;;  %3378 = vmatpush.bf16.msra.mxu1 %v12242_v5 }
 0x1d6   : > { %17253 = vst [vmem:[#allocation36_spill] sm:$0xff] %v13789_v7  ;;  %v1574_v26 = vrot.slane %v1463_v58, 1  ;;  %2563 = vmatpush.bf16.msrb.mxu3 %v12129_v28  ;;  %v12232_v7 = vld [vmem:[#allocation10 + $0x510] sm:$0xff] }
 0x1d7   : > { %v1743_v15 = vmax.f32 %v1731_v16, 0.0  ;;  %v1538_v53 = vpop.f32.mrf.mxu0  ;;  %3311 = vmatmul.bf16.gmra.mxu2 %v13610_v14  ;;  %v12240_v28 = vld [vmem:[#allocation10 + $0x550] sm:$0xff] }
 0x1d8   : > { %v1575_v43 = vsel %vm17113_vm3, %v1572_v2, %v1574_v26  ;;  %v1687_v62 = vrot.slane %v1538_v53, 2  ;;  %v13796_v63 = vpop.f32.mrf.mxu1  ;;  %3350 = vmatpush.bf16.msra.mxu0 %v12233_v17 }
 0x1d9   : > { %v1769_v61 = vrot.slane %v1743_v15, 1  ;;  %v1645_v6 = vadd.f32 %v13768_v34, %v1575_v43  ;;  %v12128_v43 = vld [vmem:[#allocation10 + $0x1d0] sm:$0xff]  ;;  %3379 = vmatpush.bf16.msra.mxu1 %v12241_v30  ;;  %v12239_v30 = vld [vmem:[#allocation10 + $0x548] sm:$0xff] }
 0x1da   : > { %v1688_v57 = vsel %vm17112_vm2, %v1685_v60, %v1687_v62  ;;  %2456 = vmatmul.bf16.gmra.mxu3 %v13792_v27  ;;  %3243 = vmatmul.bf16.gmra.mxu0 %v13499_v48  ;;  %v13804_v58 = vpop.f32.mrf.mxu2 }
 0x1db   : > { %v1716_v16 = vadd.f32 %v1686_v55, %v1645_v6  ;;  %3272 = vmatmul.bf16.gmra.mxu1 %v13696_v3  ;;  %v1770_v2 = vsel %vm17113_vm3, %v1767_v47, %v1769_v61  ;;  %17254 = vst [vmem:[#allocation37_spill] sm:$0xff] %v13804_v58  ;;  %2564 = vmatpush.bf16.msrb.mxu3 %v12128_v43  ;;  %v877_v58 = vld [vmem:[%s13410_s19 + $0x118] sm:$0xff] }
 0x1dc   : > { %v13806_v51 = vmax.f32 %v1742_v0, %v1770_v2  ;;  %3351 = vmatpush.bf16.msra.mxu0 %v12232_v7 }
 0x1dd   : > { %v1732_v34 = vadd.f32 %v13754_v38, %v1716_v16  ;;  %v1466_v60 = vpop.f32.mrf.mxu3  ;;  %v12127_v16 = vld [vmem:[#allocation10 + $0x1c8] sm:$0xff]  ;;  %3380 = vmatpush.bf16.msra.mxu1 %v12240_v28 }
 0x1de   : > { %17255 = vst [vmem:[#allocation38_spill] sm:$0xff] %v13806_v51  ;;  %v1576_v53 = vrot.slane %v1466_v60, 1  ;;  %v12231_v60 = vld [vmem:[#allocation10 + $0x508] sm:$0xff] }
 0x1df   : > { %v1744_v55 = vmax.f32 %v1732_v34, 0.0  ;;  %v1540_v6 = vpop.f32.mrf.mxu0  ;;  %v885_v34 = vld [vmem:[%s13410_s19 + $0x158] sm:$0xff]  ;;  %2565 = vmatpush.bf16.msrb.mxu3 %v12127_v16 }
 0x1e0   : > { %v1577_v47 = vsel %vm17113_vm3, %v1574_v26, %v1576_v53  ;;  %v1689_v5 = vrot.slane %v1540_v6, 2  ;;  %v1651_v10 = vpop.f32.mrf.mxu1  ;;  %3352 = vmatpush.bf16.msra.mxu0 %v12231_v60 }
 0x1e1   : > { %v1771_v0 = vrot.slane %v1744_v55, 1  ;;  %v1647_v2 = vadd.f32 %v13781_v42, %v1577_v47  ;;  %v12126_v47 = vld [vmem:[#allocation10 + $0x1c0] sm:$0xff]  ;;  %3381 = vmatpush.bf16.msra.mxu1 %v12239_v30 }
 0x1e2   : > { %v1690_v17 = vsel %vm17112_vm2, %v1687_v62, %v1689_v5  ;;  %v13815_v26 = vpop.f32.mrf.mxu2  ;;  %v13820_v62 = vpack.c.bf16 %v885_v34, %v877_v58 }
 0x1e3   : > { %v1717_v51 = vadd.f32 %v1688_v57, %v1647_v2  ;;  %v1772_v29 = vsel %vm17113_vm3, %v1769_v61, %v1771_v0  ;;  %17256 = vst [vmem:[#allocation39_spill] sm:$0xff] %v13815_v26  ;;  %v12230_v57 = vld [vmem:[#allocation10 + $0x500] sm:$0xff]  ;;  %v12157_v61 = vld [vmem:[#allocation10 + $0x2b8] sm:$0xff]  ;;  %2566 = vmatpush.bf16.msrb.mxu3 %v12126_v47 }
 0x1e4   : > { %v13817_v43 = vmax.f32 %v1743_v15, %v1772_v29  ;;  %v12238_v29 = vld [vmem:[#allocation10 + $0x540] sm:$0xff]  ;;  %3353 = vmatpush.bf16.msra.mxu0 %v12230_v57  ;;  %3945 = vmatpush.bf16.msrb.mxu2 %v12157_v61 }
 0x1e5   : > { %v1733_v6 = vadd.f32 %v13754_v38, %v1717_v51  ;;  %v1468_v42 = vpop.f32.mrf.mxu3  ;;  %3382 = vmatpush.bf16.msra.mxu1 %v12238_v29 }
 0x1e6   : > { %17257 = vst [vmem:[#allocation40_spill] sm:$0xff] %v13817_v43  ;;  %v1578_v7 = vrot.slane %v1468_v42, 1  ;;  %v12154_v43 = vld [vmem:[#allocation10 + $0x2a0] sm:$0xff] }
 0x1e7   : > { %v1745_v2 = vmax.f32 %v1733_v6, 0.0  ;;  %v1543_v52 = vpop.f32.mrf.mxu0  ;;  %3412 = vmatmul.bf16.vlgmr.msra.gmra.mxu2 %v13630_v13 }
 0x1e8   : > { %v1579_v28 = vsel %vm17113_vm3, %v1576_v53, %v1578_v7  ;;  %v1691_v16 = vrot.slane %v1543_v52, 2  ;;  %v1654_v26 = vpop.f32.mrf.mxu1  ;;  %v12156_v53 = vld [vmem:[#allocation10 + $0x2b0] sm:$0xff] }
 0x1e9   : > { %v1773_v15 = vrot.slane %v1745_v2, 1  ;;  %v1650_v51 = vadd.f32 %v13796_v63, %v1579_v28  ;;  %3946 = vmatpush.bf16.msrb.mxu2 %v12156_v53 }
 0x1ea   : > { %v1692_v58 = vsel %vm17112_vm2, %v1689_v5, %v1691_v16  ;;  %2461 = vmatmul.bf16.gmra.mxu3 %v13820_v62  ;;  %3248 = vmatmul.bf16.gmra.mxu0 %v13512_v8  ;;  %v13830_v34 = vpop.f32.mrf.mxu2 }
 0x1eb   : > { %v1718_v60 = vadd.f32 %v1690_v17, %v1650_v51  ;;  %3277 = vmatmul.bf16.gmra.mxu1 %v13716_v32  ;;  %v1774_v52 = vsel %vm17113_vm3, %v1771_v0, %v1773_v15  ;;  %17258 = vst [vmem:[#allocation41_spill] sm:$0xff] %v13830_v34  ;;  %v12155_v17 = vld [vmem:[#allocation10 + $0x2a8] sm:$0xff]  ;;  %v893_v51 = vld [vmem:[%s13410_s19 + $0x198] sm:$0xff] }
 0x1ec   : > { %v13832_v63 = vmax.f32 %v1744_v55, %v1774_v52  ;;  %v901_v34 = vld [vmem:[%s13410_s19 + $0x1d8] sm:$0xff] }
 0x1ed   : > { %v1734_v30 = vadd.f32 %v13754_v38, %v1718_v60  ;;  %v1471_v5 = vpop.f32.mrf.mxu3  ;;  %3947 = vmatpush.bf16.msrb.mxu2 %v12155_v17 }
 0x1ee   : > { %17259 = vst [vmem:[#allocation42_spill] sm:$0xff] %v13832_v63  ;;  %v1580_v6 = vrot.slane %v1471_v5, 1  ;;  %v13842_v63 = vpack.c.bf16 %v901_v34, %v893_v51  ;;  %v12152_v34 = vld [vmem:[#allocation10 + $0x290] sm:$0xff] }
 0x1ef   : > { %v1746_v42 = vmax.f32 %v1734_v30, 0.0  ;;  %v1545_v47 = vpop.f32.mrf.mxu0 }
 0x1f0   : > { %v1581_v57 = vsel %vm17113_vm3, %v1578_v7, %v1580_v6  ;;  %v1656_v61 = vpop.f32.mrf.mxu1  ;;  %v1693_v30 = vrot.slane %v1545_v47, 2 }
 0x1f1   : > { %v1775_v28 = vrot.slane %v1746_v42, 1  ;;  %v1652_v0 = vadd.f32 %v1651_v10, %v1581_v57  ;;  %3948 = vmatpush.bf16.msrb.mxu2 %v12154_v43 }
 0x1f2   : > { %v13844_v7 = vpop.f32.mrf.mxu2 }
 0x1f3   : > { %v1719_v29 = vadd.f32 %v1692_v58, %v1652_v0  ;;  %v1776_v55 = vsel %vm17113_vm3, %v1773_v15, %v1775_v28  ;;  %17261 = vst [vmem:[#allocation44_spill] sm:$0xff] %v13844_v7  ;;  %v12153_v58 = vld [vmem:[#allocation10 + $0x298] sm:$0xff] }
 0x1f4   : > { %v13839_v52 = vmax.f32 %v1745_v2, %v1776_v55 }
 0x1f5   : > { %v1735_v60 = vadd.f32 %v13754_v38, %v1719_v29  ;;  %v1473_v53 = vpop.f32.mrf.mxu3  ;;  %3949 = vmatpush.bf16.msrb.mxu2 %v12153_v58  ;;  %v1694_v29 = vsel %vm17112_vm2, %v1691_v16, %v1693_v30  ;;  %v12151_v58 = vld [vmem:[#allocation10 + $0x288] sm:$0xff] }
 0x1f6   : > { %17260 = vst [vmem:[#allocation43_spill] sm:$0xff] %v13839_v52  ;;  %v1582_v5 = vrot.slane %v1473_v53, 1  ;;  %v849_v52 = vld [vmem:[%s13410_s19 + $0x38] sm:$0xff] }
 0x1f7   : > { %v1747_v10 = vmax.f32 %v1735_v60, 0.0  ;;  %v1548_v17 = vpop.f32.mrf.mxu0  ;;  %3417 = vmatmul.bf16.gmra.mxu2 %v13652_v21 }
 0x1f8   : > { %v1583_v57 = vsel %vm17113_vm3, %v1580_v6, %v1582_v5  ;;  %v1659_v15 = vpop.f32.mrf.mxu1 }
 0x1f9   : > { %v1777_v2 = vrot.slane %v1747_v10, 1  ;;  %v1655_v0 = vadd.f32 %v1654_v26, %v1583_v57  ;;  %3950 = vmatpush.bf16.msrb.mxu2 %v12152_v34  ;;  %v1695_v26 = vrot.slane %v1548_v17, 2  ;;  %v857_v34 = vld [vmem:[%s13410_s19 + $0x78] sm:$0xff] }
 0x1fa   : > { %2466 = vmatmul.bf16.gmra.mxu3 %v13842_v63  ;;  %3253 = vmatmul.bf16.gmra.mxu0 %v13528_v31 }
 0x1fb   : > { %v1720_v43 = vadd.f32 %v1694_v29, %v1655_v0  ;;  %3282 = vmatmul.bf16.gmra.mxu1 %v13737_v19  ;;  %v1778_v47 = vsel %vm17113_vm3, %v1775_v28, %v1777_v2  ;;  %v13857_v29 = vpop.f32.mrf.mxu2  ;;  %v13868_v19 = vpack.c.bf16 %v857_v34, %v849_v52  ;;  %v12141_v34 = vld [vmem:[#allocation10 + $0x238] sm:$0xff] }
 0x1fc   : > { %v13853_v51 = vmax.f32 %v1746_v42, %v1778_v47  ;;  %17263 = vst [vmem:[#allocation46_spill] sm:$0xff] %v13857_v29  ;;  %v12150_v42 = vld [vmem:[#allocation10 + $0x280] sm:$0xff]  ;;  %3887 = vmatpush.bf16.msrb.mxu0 %v12141_v34 }
 0x1fd   : > { %v1736_v6 = vadd.f32 %v13754_v38, %v1720_v43  ;;  %v1476_v55 = vpop.f32.mrf.mxu3  ;;  %3951 = vmatpush.bf16.msrb.mxu2 %v12151_v58  ;;  %v1696_v43 = vsel %vm17112_vm2, %v1693_v30, %v1695_v26 }
 0x1fe   : > { %17262 = vst [vmem:[#allocation45_spill] sm:$0xff] %v13853_v51  ;;  %v1584_v16 = vrot.slane %v1476_v55, 1 }
 0x1ff   : > { %v1748_v60 = vmax.f32 %v1736_v6, 0.0  ;;  %v1550_v53 = vpop.f32.mrf.mxu0 }
 0x200   : > { %v1585_v57 = vsel %vm17113_vm3, %v1582_v5, %v1584_v16  ;;  %v1661_v0 = vpop.f32.mrf.mxu1  ;;  %v1697_v51 = vrot.slane %v1550_v53, 2 }
 0x201   : > { %v1779_v7 = vrot.slane %v1748_v60, 1  ;;  %v1657_v28 = vadd.f32 %v1656_v61, %v1585_v57  ;;  %3952 = vmatpush.bf16.msrb.mxu2 %v12150_v42 }
 0x202   : > { %v1698_v53 = vsel %vm17112_vm2, %v1695_v26, %v1697_v51  ;;  %v1711_v52 = vsel %vm17112_vm2, %v1697_v51, 0.0  ;;  %v12189_v26 = vld [vmem:[#allocation10 + $0x3b8] sm:$0xff] }
 0x203   : > { %v1721_v47 = vadd.f32 %v1696_v43, %v1657_v28  ;;  %v1780_v17 = vsel %vm17113_vm3, %v1777_v2, %v1779_v7  ;;  %v13882_v42 = vpop.f32.mrf.mxu2 }
 0x204   : > { %v13863_v55 = vmax.f32 %v1747_v10, %v1780_v17  ;;  %17265 = vst [vmem:[#allocation48_spill] sm:$0xff] %v13882_v42 }
 0x205   : > { %v13866_v6 = vadd.f32 %v13754_v38, %v1721_v47  ;;  %v1478_v5 = vpop.f32.mrf.mxu3  ;;  %v12229_v47 = vld [vmem:[#allocation10 + $0x4f8] sm:$0xff]  ;;  %4061 = vmatpush.bf16.msra.mxu2 %v12189_v26 }
 0x206   : > { %17264 = vst [vmem:[#allocation47_spill] sm:$0xff] %v13863_v55  ;;  %v1586_v29 = vrot.slane %v1478_v5, 1  ;;  %3317 = vmatpush.bf16.msra.mxu3 %v12229_v47 }
 0x207   : > { %v1749_v61 = vmax.f32 %v13866_v6, 0.0  ;;  %v13871_v58 = vpop.f32.mrf.mxu0  ;;  %3422 = vmatmul.bf16.gmra.mxu2 %v13665_v18 }
 0x208   : > { %v1587_v30 = vsel %vm17113_vm3, %v1584_v16, %v1586_v29  ;;  %v1600_v10 = vsel %vm17113_vm3, %v1586_v29, 0.0  ;;  %v13876_v2 = vpop.f32.mrf.mxu1 }
 0x209   : > { %v1781_v57 = vrot.slane %v1749_v61, 1  ;;  %v1660_v28 = vadd.f32 %v1659_v15, %v1587_v30  ;;  %v1662_v43 = vadd.f32 %v1661_v0, %v1600_v10  ;;  %v12149_v15 = vld [vmem:[#allocation10 + $0x278] sm:$0xff]  ;;  %v12228_v30 = vld [vmem:[#allocation10 + $0x4f0] sm:$0xff] }
 0x20a   : > { %2567 = vmatmul.bf16.vlgmr.msrb.gmra.mxu3 %v13868_v19  ;;  %3354 = vmatmul.bf16.vlgmr.msra.gmra.mxu0 %v13674_v37  ;;  %v12140_v10 = vld [vmem:[#allocation10 + $0x230] sm:$0xff] }
 0x20b   : > { %v1722_v16 = vadd.f32 %v1698_v53, %v1660_v28  ;;  %v1723_v17 = vadd.f32 %v1711_v52, %v1662_v43  ;;  %3383 = vmatmul.bf16.vlgmr.msra.gmra.mxu1 %v13677_v39  ;;  %v1782_v29 = vsel %vm17113_vm3, %v1779_v7, %v1781_v57  ;;  %3318 = vmatpush.bf16.msra.mxu3 %v12228_v30  ;;  %v12148_v53 = vld [vmem:[#allocation10 + $0x270] sm:$0xff]  ;;  %v12227_v52 = vld [vmem:[#allocation10 + $0x4e8] sm:$0xff] }
 0x20c   : > { %v13886_v0 = vmax.f32 %v1748_v60, %v1782_v29  ;;  %3916 = vmatpush.bf16.msrb.mxu1 %v12149_v15  ;;  %3888 = vmatpush.bf16.msrb.mxu0 %v12140_v10  ;;  %v873_v29 = vld [vmem:[%s13410_s19 + $0xf8] sm:$0xff]  ;;  %v12147_v30 = vld [vmem:[#allocation10 + $0x268] sm:$0xff] }
 0x20d   : > { %v1738_v51 = vadd.f32 %v13754_v38, %v1722_v16  ;;  %v13890_v6 = vadd.f32 %v13754_v38, %v1723_v17  ;;  %v13892_v5 = vpop.f32.mrf.mxu3  ;;  %v12188_v38 = vld [vmem:[#allocation10 + $0x3b0] sm:$0xff]  ;;  %v12139_v16 = vld [vmem:[#allocation10 + $0x228] sm:$0xff]  ;;  %v865_v17 = vld [vmem:[%s13410_s19 + $0xb8] sm:$0xff] }
 0x20e   : > { %17266 = vst [vmem:[#allocation49_spill] sm:$0xff] %v13886_v0  ;;  %4062 = vmatpush.bf16.msra.mxu2 %v12188_v38  ;;  %v12187_v10 = vld [vmem:[#allocation10 + $0x3a8] sm:$0xff]  ;;  %v12226_v38 = vld [vmem:[#allocation10 + $0x4e0] sm:$0xff] }
 0x20f   : > { %v1750_v7 = vmax.f32 %v1738_v51, 0.0  ;;  %v17021_v28 = vmax.f32 %v13890_v6, 0.0  ;;  %v13895_v43 = vpop.f32.mrf.mxu0  ;;  %v13908_v51 = vpop.f32.mrf.mxu2  ;;  %3319 = vmatpush.bf16.msra.mxu3 %v12227_v52  ;;  %v12186_v52 = vld [vmem:[#allocation10 + $0x3a0] sm:$0xff] }
 0x210   : > { %17267 = vst [vmem:[#allocation50_spill] sm:$0xff] %v13895_v43  ;;  %v13897_v60 = vpop.f32.mrf.mxu1  ;;  %3917 = vmatpush.bf16.msrb.mxu1 %v12148_v53  ;;  %3889 = vmatpush.bf16.msrb.mxu0 %v12139_v16  ;;  %v13916_v53 = vpack.c.bf16 %v873_v29, %v865_v17  ;;  %v12145_v16 = vld [vmem:[#allocation10 + $0x258] sm:$0xff] }
 0x211   : > { %17268 = vst [vmem:[#allocation51_spill] sm:$0xff] %v13897_v60  ;;  %v1783_v47 = vrot.slane %v1750_v7, 1  ;;  %v13901_v34 = vrot.slane %v17021_v28, 1  ;;  %v12138_v60 = vld [vmem:[#allocation10 + $0x220] sm:$0xff]  ;;  %v12185_v17 = vld [vmem:[#allocation10 + $0x398] sm:$0xff] }
 0x212   : > { %17269 = vst [vmem:[#allocation52_spill] sm:$0xff] %v13908_v51  ;;  %4063 = vmatpush.bf16.msra.mxu2 %v12187_v10  ;;  %v889_v51 = vld [vmem:[%s13410_s19 + $0x178] sm:$0xff] }
 0x213   : > { %v1786_v15 = vsel %vm17113_vm3, %v1783_v47, %v13901_v34  ;;  %v1784_v26 = vsel %vm17113_vm3, %v1781_v57, %v1783_v47  ;;  %3320 = vmatpush.bf16.msra.mxu3 %v12226_v38  ;;  %v12137_v47 = vld [vmem:[#allocation10 + $0x218] sm:$0xff]  ;;  %v12144_v38 = vld [vmem:[#allocation10 + $0x250] sm:$0xff] }
 0x214   : > { %v13910_v39 = vmax.f32 %v1750_v7, %v1786_v15  ;;  %v13912_v28 = vmax.f32 %v1749_v61, %v1784_v26  ;;  %3918 = vmatpush.bf16.msrb.mxu1 %v12147_v30  ;;  %3890 = vmatpush.bf16.msrb.mxu0 %v12138_v60  ;;  %v12146_v7 = vld [vmem:[#allocation10 + $0x260] sm:$0xff]  ;;  %v12225_v61 = vld [vmem:[#allocation10 + $0x4d8] sm:$0xff]  ;;  %v12224_v15 = vld [vmem:[#allocation10 + $0x4d0] sm:$0xff] }
 0x215   : > { %v13914_v42 = vpop.f32.mrf.mxu3  ;;  %v12136_v26 = vld [vmem:[#allocation10 + $0x210] sm:$0xff] }
 0x216   : > { %17270 = vst [vmem:[#allocation53_spill] sm:$0xff] %v13910_v39  ;;  %4064 = vmatpush.bf16.msra.mxu2 %v12186_v52  ;;  %v12223_v52 = vld [vmem:[#allocation10 + $0x4c8] sm:$0xff] }
 0x217   : > { %17271 = vst [vmem:[#allocation54_spill] sm:$0xff] %v13912_v28  ;;  %v13918_v43 = vpop.f32.mrf.mxu0  ;;  %3427 = vmatmul.bf16.gmra.mxu2 %v13689_v56  ;;  %3321 = vmatpush.bf16.msra.mxu3 %v12225_v61  ;;  %v13928_v60 = vpop.f32.mrf.mxu2  ;;  %v12135_v61 = vld [vmem:[#allocation10 + $0x208] sm:$0xff] }
 0x218   : > { %v13921_v57 = vpop.f32.mrf.mxu1  ;;  %3919 = vmatpush.bf16.msrb.mxu1 %v12146_v7  ;;  %3891 = vmatpush.bf16.msrb.mxu0 %v12137_v47  ;;  %17272 = vst [vmem:[#allocation55_spill] sm:$0xff] %v13928_v60  ;;  %v12184_v7 = vld [vmem:[#allocation10 + $0x390] sm:$0xff]  ;;  %v12143_v47 = vld [vmem:[#allocation10 + $0x248] sm:$0xff] }
 0x219   : > { %v12183_v60 = vld [vmem:[#allocation10 + $0x388] sm:$0xff] }
 0x21a   : > { %2572 = vmatmul.bf16.gmra.mxu3 %v13916_v53  ;;  %3359 = vmatmul.bf16.gmra.mxu0 %v13698_v1 }
 0x21b   : > { %3388 = vmatmul.bf16.gmra.mxu1 %v13701_v35  ;;  %4065 = vmatpush.bf16.msra.mxu2 %v12185_v17  ;;  %v881_v35 = vld [vmem:[%s13410_s19 + $0x138] sm:$0xff] }
 0x21c   : > { %3920 = vmatpush.bf16.msrb.mxu1 %v12145_v16  ;;  %3322 = vmatpush.bf16.msra.mxu3 %v12224_v15  ;;  %v13938_v17 = vpack.c.bf16 %v889_v51, %v881_v35  ;;  %v12134_v16 = vld [vmem:[#allocation10 + $0x200] sm:$0xff]  ;;  %v12277_v35 = vld [vmem:[%s16996_s12 + $0x78] sm:$0xff]  ;;  %v12276_v51 = vld [vmem:[%s16996_s12 + $0x70] sm:$0xff] }
 0x21d   : > { %v13926_v29 = vpop.f32.mrf.mxu3  ;;  %3892 = vmatpush.bf16.msrb.mxu0 %v12136_v26 }
 0x21f   : > { %v13930_v30 = vpop.f32.mrf.mxu0  ;;  %4066 = vmatpush.bf16.msra.mxu2 %v12184_v7  ;;  %v12182_v7 = vld [vmem:[#allocation10 + $0x380] sm:$0xff] }
 0x220   : > { %17273 = vst [vmem:[#allocation56_spill] sm:$0xff] %v13930_v30  ;;  %v13932_v10 = vpop.f32.mrf.mxu1  ;;  %3921 = vmatpush.bf16.msrb.mxu1 %v12144_v38  ;;  %3323 = vmatpush.bf16.msra.mxu3 %v12223_v52  ;;  %v13945_v30 = vpop.f32.mrf.mxu2  ;;  %v12142_v38 = vld [vmem:[#allocation10 + $0x240] sm:$0xff] }
 0x221   : > { %17274 = vst [vmem:[#allocation57_spill] sm:$0xff] %v13932_v10  ;;  %3893 = vmatpush.bf16.msrb.mxu0 %v12135_v61  ;;  %v12222_v10 = vld [vmem:[#allocation10 + $0x4c0] sm:$0xff]  ;;  %v12275_v61 = vld [vmem:[%s16996_s12 + $0x68] sm:$0xff] }
 0x222   : > { %17275 = vst [vmem:[#allocation58_spill] sm:$0xff] %v13945_v30 }
 0x223   : > { %4067 = vmatpush.bf16.msra.mxu2 %v12183_v60 }
 0x224   : > { %3922 = vmatpush.bf16.msrb.mxu1 %v12143_v47  ;;  %3324 = vmatpush.bf16.msra.mxu3 %v12222_v10  ;;  %v12173_v10 = vld [vmem:[#allocation10 + $0x338] sm:$0xff] }
 0x225   : > { %v13936_v1 = vpop.f32.mrf.mxu3  ;;  %3894 = vmatpush.bf16.msrb.mxu0 %v12134_v16  ;;  %v897_v16 = vld [vmem:[%s13410_s19 + $0x1b8] sm:$0xff] }
 0x227   : > { %v13940_v15 = vpop.f32.mrf.mxu0  ;;  %3953 = vmatmul.bf16.vlgmr.msrb.gmra.mxu2 %v13549_v4 }
 0x228   : > { %v13943_v26 = vpop.f32.mrf.mxu1  ;;  %3923 = vmatpush.bf16.msrb.mxu1 %v12142_v38  ;;  %4068 = vmatpush.bf16.msra.mxu2 %v12182_v7  ;;  %v13965_v47 = vpop.f32.mrf.mxu2  ;;  %v905_v38 = vld [vmem:[%s13410_s19 + $0x1f8] sm:$0xff]  ;;  %v12172_v7 = vld [vmem:[#allocation10 + $0x330] sm:$0xff]  ;;  %s10069_s19 = sshll.u32 %s13406_s5, 2 }
 0x229   : > { %4003 = vmatpush.bf16.msra.mxu0 %v12173_v10  ;;  %17277 = vst [vmem:[#allocation60_spill] sm:$0xff] %v13965_v47  ;;  %v13974_v30 = vpack.c.bf16 %v905_v38, %v897_v16  ;;  %v12171_v10 = vld [vmem:[#allocation10 + $0x328] sm:$0xff]  ;;  %v12170_v16 = vld [vmem:[#allocation10 + $0x320] sm:$0xff]  ;;  %s823_s3 = scalar_lea.vmem [#allocation17], %s10069_s19 }
 0x22a   : > { %2577 = vmatmul.bf16.gmra.mxu3 %v13938_v17  ;;  %3364 = vmatmul.bf16.gmra.mxu0 %v13718_v33  ;;  %s9884_s22 = sshll.u32 %s823_s3, 4  ;;  %s9885_s22 = int_to_ptr.vmem [resolvable:$true] %s9884_s22 }
 0x22b   : > { %3393 = vmatmul.bf16.gmra.mxu1 %v13721_v44  ;;  %v12274_v44 = vld [vmem:[%s16996_s12 + $0x60] sm:$0xff]  ;;  %17278 = vst [vmem:[#allocation61_spill] sm:$0xff] %v13974_v30 }
 0x22c   : > { %4483 = vmatpush.bf16.msrb.mxu2 %v12277_v35 }
 0x22d   : > { %v13953_v4 = vpop.f32.mrf.mxu3  ;;  %4004 = vmatpush.bf16.msra.mxu0 %v12172_v7 }
 0x22f   : > { %v13958_v60 = vpop.f32.mrf.mxu0 }
 0x230   : > { %v13960_v52 = vpop.f32.mrf.mxu1  ;;  %4484 = vmatpush.bf16.msrb.mxu2 %v12276_v51  ;;  %v3297_v38 = vpop.f32.mrf.mxu2 }
 0x231   : > { %17276 = vst [vmem:[#allocation59_spill] sm:$0xff] %v13960_v52  ;;  %4005 = vmatpush.bf16.msra.mxu0 %v12171_v10  ;;  %v12169_v10 = vld [vmem:[#allocation10 + $0x318] sm:$0xff] }
 0x234   : > { %4485 = vmatpush.bf16.msrb.mxu2 %v12275_v61  ;;  %v12273_v61 = vld [vmem:[%s16996_s12 + $0x58] sm:$0xff] }
 0x235   : > { %v13969_v35 = vpop.f32.mrf.mxu3  ;;  %4006 = vmatpush.bf16.msra.mxu0 %v12170_v16 }
 0x237   : > { %v13976_v51 = vpop.f32.mrf.mxu0  ;;  %3958 = vmatmul.bf16.gmra.mxu2 %v13568_v45  ;;  %v12272_v45 = vld [vmem:[%s16996_s12 + $0x50] sm:$0xff] }
 0x238   : > { %17279 = vst [vmem:[#allocation62_spill] sm:$0xff] %v13976_v51  ;;  %v13979_v52 = vpop.f32.mrf.mxu1  ;;  %4486 = vmatpush.bf16.msrb.mxu2 %v12274_v44  ;;  %v3299_v16 = vpop.f32.mrf.mxu2  ;;  %v12166_v51 = vld [vmem:[#allocation10 + $0x300] sm:$0xff] }
 0x239   : > { %17280 = vst [vmem:[#allocation63_spill] sm:$0xff] %v13979_v52  ;;  %4007 = vmatpush.bf16.msra.mxu0 %v12169_v10 }
 0x23a   : > { %2582 = vmatmul.bf16.gmra.mxu3 %v13974_v30  ;;  %3369 = vmatmul.bf16.gmra.mxu0 %v13739_v23  ;;  %v12168_v23 = vld [vmem:[#allocation10 + $0x310] sm:$0xff] }
 0x23b   : > { %3398 = vmatmul.bf16.gmra.mxu1 %v13742_v22  ;;  %v12271_v22 = vld [vmem:[%s16996_s12 + $0x48] sm:$0xff] }
 0x23c   : > { %4487 = vmatpush.bf16.msrb.mxu2 %v12273_v61  ;;  %v12270_v61 = vld [vmem:[%s16996_s12 + $0x40] sm:$0xff] }
 0x23d   : > { %v13987_v7 = vpop.f32.mrf.mxu3  ;;  %4008 = vmatpush.bf16.msra.mxu0 %v12168_v23  ;;  %v12261_v23 = vld [vmem:[#allocation10 + $0x5f8] sm:$0xff] }
 0x23e   : > { %3433 = vmatpush.bf16.msrb.mxu3 %v12261_v23  ;;  %v12267_v23 = vld [vmem:[%s16996_s12 + $0x28] sm:$0xff] }
 0x23f   : > { %v13992_v44 = vpop.f32.mrf.mxu0 }
 0x240   : > { %17281 = vst [vmem:[#allocation64_spill] sm:$0xff] %v13992_v44  ;;  %v13994_v47 = vpop.f32.mrf.mxu1  ;;  %4488 = vmatpush.bf16.msrb.mxu2 %v12272_v45  ;;  %v2395_v45 = vadd.f32 %v13892_v5, %v13643_v59  ;;  %v12269_v59 = vld [vmem:[%s16996_s12 + $0x38] sm:$0xff] }
 0x241   : > { %17282 = vst [vmem:[#allocation65_spill] sm:$0xff] %v13994_v47  ;;  %v12167_v47 = vld [vmem:[#allocation10 + $0x308] sm:$0xff] }
 0x242   : > { %4009 = vmatpush.bf16.msra.mxu0 %v12167_v47 }
 0x244   : > { %4489 = vmatpush.bf16.msrb.mxu2 %v12271_v22 }
 0x245   : > { %v13999_v30 = vpop.f32.mrf.mxu3 }
 0x246   : > { %4010 = vmatpush.bf16.msra.mxu0 %v12166_v51 }
 0x247   : > { %v3239_v44 = vpop.f32.mrf.mxu0  ;;  %3963 = vmatmul.bf16.gmra.mxu2 %v13589_v24  ;;  %v2424_v24 = vadd.f32 %v13726_v50, %v2395_v45  ;;  %v12268_v50 = vld [vmem:[%s16996_s12 + $0x30] sm:$0xff]  ;;  %v12259_v45 = vld [vmem:[#allocation10 + $0x5e8] sm:$0xff] }
 0x248   : > { %v3268_v10 = vpop.f32.mrf.mxu1  ;;  %4490 = vmatpush.bf16.msrb.mxu2 %v12270_v61 }
 0x249   : > { %v3269_v52 = vadd.f32 %v3268_v10, %v3239_v44  ;;  %v12260_v44 = vld [vmem:[#allocation10 + $0x5f0] sm:$0xff] }
 0x24a   : > { %3325 = vmatmul.bf16.vlgmr.msra.gmra.mxu3 %v13764_v54  ;;  %3895 = vmatmul.bf16.vlgmr.msrb.gmra.mxu0 %v13492_v40 }
 0x24b   : > { %v14009_v22 = vadd.f32 %v3297_v38, %v3269_v52  ;;  %3924 = vmatmul.bf16.vlgmr.msrb.gmra.mxu1 %v13672_v36  ;;  %4255 = vmatpush.bf16.msrb.mxu0 %v12269_v59  ;;  %v2397_v52 = vadd.f32 %v13914_v42, %v13650_v20  ;;  %v3302_v36 = vpop.f32.mrf.mxu2 }
 0x24c   : > { %3434 = vmatpush.bf16.msrb.mxu3 %v12260_v44 }
 0x24d   : > { %v2452_v5 = vpop.f32.mrf.mxu3  ;;  %v2426_v51 = vadd.f32 %v13735_v11, %v2397_v52  ;;  %v12266_v11 = vld [vmem:[%s16996_s12 + $0x20] sm:$0xff]  ;;  %v12257_v52 = vld [vmem:[#allocation10 + $0x5d8] sm:$0xff] }
 0x24e   : > { %v14016_v47 = vadd.f32 %v2452_v5, %v2424_v24  ;;  %v12258_v24 = vld [vmem:[#allocation10 + $0x5e0] sm:$0xff]  ;;  %v2400_v5 = vadd.f32 %v13926_v29, %v13657_v25  ;;  %v12265_v25 = vld [vmem:[%s16996_s12 + $0x18] sm:$0xff] }
 0x24f   : > { %v3241_v40 = vpop.f32.mrf.mxu0  ;;  %4256 = vmatpush.bf16.msrb.mxu0 %v12268_v50 }
 0x250   : > { %v3270_v38 = vpop.f32.mrf.mxu1  ;;  %3435 = vmatpush.bf16.msrb.mxu3 %v12259_v45 }
 0x251   : > { %v3271_v61 = vadd.f32 %v3270_v38, %v3241_v40 }
 0x253   : > { %v14023_v10 = vadd.f32 %v3299_v16, %v3271_v61  ;;  %4257 = vmatpush.bf16.msrb.mxu0 %v12267_v23  ;;  %v3304_v40 = vpop.f32.mrf.mxu2  ;;  %v12256_v61 = vld [vmem:[#allocation10 + $0x5d0] sm:$0xff]  ;;  %v1799_v23 = vsel %vm17113_vm3, %v13901_v34, 0.0 }
 0x254   : > { %3436 = vmatpush.bf16.msrb.mxu3 %v12258_v24 }
 0x255   : > { %v2454_v20 = vpop.f32.mrf.mxu3 }
 0x256   : > { %v14029_v42 = vadd.f32 %v2454_v20, %v2426_v51  ;;  %v12255_v51 = vld [vmem:[#allocation10 + $0x5c8] sm:$0xff] }
 0x257   : > { %v3244_v59 = vpop.f32.mrf.mxu0  ;;  %3968 = vmatmul.bf16.gmra.mxu2 %v13610_v14  ;;  %4258 = vmatpush.bf16.msrb.mxu0 %v12266_v11  ;;  %v2429_v14 = vadd.f32 %v13749_v46, %v2400_v5  ;;  %v17283_v5 = vmax.f32 %v13890_v6, 0.0  ;;  %v12262_v6 = vld [vmem:[%s16996_s12] sm:$0xff] }
 0x258   : > { %v3273_v16 = vpop.f32.mrf.mxu1  ;;  %3437 = vmatpush.bf16.msrb.mxu3 %v12257_v52 }
 0x259   : > { %v3274_v44 = vadd.f32 %v3273_v16, %v3244_v59  ;;  %v14063_v16 = vmax.f32 %v17283_v5, %v1799_v23  ;;  %v17287_v23 = vld [vmem:[#allocation28_spill] sm:$0xff]  ;;  %v17288_v5 = vld [vmem:[#allocation31_spill] sm:$0xff] }
 0x25a   : > { %3330 = vmatmul.bf16.gmra.mxu3 %v13792_v27  ;;  %3900 = vmatmul.bf16.gmra.mxu0 %v13499_v48  ;;  %v2402_v48 = vadd.f32 %v13936_v1, %v13663_v12  ;;  %v12263_v12 = vld [vmem:[%s16996_s12 + $0x8] sm:$0xff] }
 0x25b   : > { %v14039_v38 = vadd.f32 %v3302_v36, %v3274_v44  ;;  %3929 = vmatmul.bf16.gmra.mxu1 %v13696_v3  ;;  %4259 = vmatpush.bf16.msrb.mxu0 %v12265_v25  ;;  %v12264_v3 = vld [vmem:[%s16996_s12 + $0x10] sm:$0xff]  ;;  %v3307_v59 = vpop.f32.mrf.mxu2  ;;  %17284 = vst [vmem:[#allocation66_spill] sm:$0xff] %v14063_v16  ;;  %v12254_v44 = vld [vmem:[#allocation10 + $0x5c0] sm:$0xff] }
 0x25c   : > { %3438 = vmatpush.bf16.msrb.mxu3 %v12256_v61  ;;  %v2431_v24 = vadd.f32 %v13761_v9, %v2402_v48  ;;  %v2405_v9 = vadd.f32 %v13953_v4, %v13681_v41  ;;  %v17285_v61 = vld [vmem:[#allocation25_spill] sm:$0xff] }
 0x25d   : > { %v2457_v29 = vpop.f32.mrf.mxu3 }
 0x25e   : > { %v14046_v50 = vadd.f32 %v2457_v29, %v2429_v14 }
 0x25f   : > { %v3246_v45 = vpop.f32.mrf.mxu0  ;;  %4260 = vmatpush.bf16.msrb.mxu0 %v12264_v3 }
 0x260   : > { %v3275_v36 = vpop.f32.mrf.mxu1  ;;  %3439 = vmatpush.bf16.msrb.mxu3 %v12255_v51 }
 0x261   : > { %v3276_v46 = vadd.f32 %v3275_v36, %v3246_v45  ;;  %v2407_v45 = vadd.f32 %v13969_v35, %v17285_v61  ;;  %v2482_v61 = vadd.f32 %v13871_v58, %v14016_v47  ;;  %v17296_v58 = vld [vmem:[#allocation50_spill] sm:$0xff] }
 0x262   : > { %v2484_v47 = vadd.f32 %v17296_v58, %v14029_v42  ;;  %v2487_v42 = vadd.f32 %v13918_v43, %v14046_v50  ;;  %v12180_v43 = vld [vmem:[#allocation10 + $0x370] sm:$0xff]  ;;  %v12161_v50 = vld [vmem:[#allocation10 + $0x2d8] sm:$0xff] }
 0x263   : > { %v14055_v20 = vadd.f32 %v3304_v40, %v3276_v46  ;;  %4261 = vmatpush.bf16.msrb.mxu0 %v12263_v12  ;;  %v3309_v25 = vpop.f32.mrf.mxu2  ;;  %v17305_v58 = vld [vmem:[#allocation26_spill] sm:$0xff] }
 0x264   : > { %3440 = vmatpush.bf16.msrb.mxu3 %v12254_v44  ;;  %v17289_v44 = vld [vmem:[#allocation45_spill] sm:$0xff] }
 0x265   : > { %v2459_v1 = vpop.f32.mrf.mxu3 }
 0x266   : > { %v14065_v11 = vadd.f32 %v2459_v1, %v2431_v24  ;;  %v2410_v24 = vadd.f32 %v13987_v7, %v17287_v23  ;;  %v17291_v7 = vld [vmem:[#allocation29_spill] sm:$0xff]  ;;  %v17297_v23 = vld [vmem:[#allocation38_spill] sm:$0xff] }
 0x267   : > { %v3249_v34 = vpop.f32.mrf.mxu0  ;;  %4069 = vmatmul.bf16.vlgmr.msra.gmra.mxu2 %v13630_v13  ;;  %4262 = vmatpush.bf16.msrb.mxu0 %v12262_v6  ;;  %v2434_v13 = vadd.f32 %v13775_v49, %v2405_v9  ;;  %v2412_v6 = vadd.f32 %v13999_v30, %v17291_v7  ;;  %v17295_v30 = vld [vmem:[#allocation40_spill] sm:$0xff] }
 0x268   : > { %5205 = vmatpush.xpose.msra.mxu2 %v14063_v16  ;;  %v3278_v40 = vpop.f32.mrf.mxu1 }
 0x269   : > { %v3279_v52 = vadd.f32 %v3278_v40, %v3249_v34  ;;  %v17290_v34 = vld [vmem:[#allocation37_spill] sm:$0xff] }
 0x26a   : > { %3335 = vmatmul.bf16.gmra.mxu3 %v13820_v62  ;;  %3905 = vmatmul.bf16.gmra.mxu0 %v13512_v8 }
 0x26b   : > { %v14076_v14 = vadd.f32 %v3307_v59, %v3279_v52  ;;  %3934 = vmatmul.bf16.gmra.mxu1 %v13716_v32  ;;  %v17286_v32 = vld [vmem:[#allocation35_spill] sm:$0xff]  ;;  %v3312_v59 = vpop.f32.mrf.mxu2 }
 0x26c   : > { %5206 = vmatpush.xpose.msra.mxu2 %v13910_v39  ;;  %v2436_v3 = vadd.f32 %v17286_v32, %v2407_v45  ;;  %v17293_v45 = vld [vmem:[#allocation42_spill] sm:$0xff] }
 0x26d   : > { %v2462_v41 = vpop.f32.mrf.mxu3 }
 0x26e   : > { %v14081_v4 = vadd.f32 %v2462_v41, %v2434_v13  ;;  %v17292_v13 = vld [vmem:[#allocation43_spill] sm:$0xff] }
 0x26f   : > { %v3251_v29 = vpop.f32.mrf.mxu0 }
 0x270   : > { %5207 = vmatpush.xpose.msra.mxu2 %v13912_v28  ;;  %v3280_v8 = vpop.f32.mrf.mxu1 }
 0x271   : > { %v3281_v48 = vadd.f32 %v3280_v8, %v3251_v29  ;;  %v17294_v8 = vld [vmem:[#allocation39_spill] sm:$0xff] }
 0x273   : > { %v14086_v36 = vadd.f32 %v3309_v25, %v3281_v48  ;;  %v2441_v48 = vadd.f32 %v17294_v8, %v2412_v6  ;;  %v12181_v6 = vld [vmem:[#allocation10 + $0x378] sm:$0xff]  ;;  %v2516_v8 = vadd.f32 %v13921_v57, %v2487_v42  ;;  %v12179_v57 = vld [vmem:[#allocation10 + $0x368] sm:$0xff]  ;;  %v2492_v42 = vadd.f32 %v13940_v15, %v14081_v4 }
 0x274   : > { %5208 = vmatpush.xpose.msra.mxu2 %v13886_v0  ;;  %4032 = vmatpush.bf16.msra.mxu1 %v12181_v6  ;;  %v12177_v6 = vld [vmem:[#allocation10 + $0x358] sm:$0xff] }
 0x275   : > { %v2464_v46 = vpop.f32.mrf.mxu3 }
 0x276   : > { %v14090_v49 = vadd.f32 %v2464_v46, %v2436_v3  ;;  %v2511_v46 = vadd.f32 %v13876_v2, %v2482_v61  ;;  %v17299_v2 = vld [vmem:[#allocation36_spill] sm:$0xff] }
 0x277   : > { %v3254_v51 = vpop.f32.mrf.mxu0  ;;  %4074 = vmatmul.bf16.gmra.mxu2 %v13652_v21  ;;  %v2439_v21 = vadd.f32 %v17290_v34, %v2410_v24  ;;  %v17298_v24 = vld [vmem:[#allocation41_spill] sm:$0xff]  ;;  %v12163_v34 = vld [vmem:[#allocation10 + $0x2e8] sm:$0xff] }
 0x278   : > { %5209 = vmatpush.xpose.msra.mxu2 %v13863_v55  ;;  %v3283_v35 = vpop.f32.mrf.mxu1  ;;  %4033 = vmatpush.bf16.msra.mxu1 %v12180_v43  ;;  %v2521_v43 = vadd.f32 %v13943_v26, %v2492_v42  ;;  %v2494_v4 = vadd.f32 %v13958_v60, %v14090_v49  ;;  %v17310_v60 = vld [vmem:[#allocation62_spill] sm:$0xff] }
 0x279   : > { %v3284_v12 = vadd.f32 %v3283_v35, %v3254_v51  ;;  %v12165_v51 = vld [vmem:[#allocation10 + $0x2f8] sm:$0xff]  ;;  %v2540_v35 = vadd.f32 %v17298_v24, %v2511_v46 }
 0x27a   : > { %3340 = vmatmul.bf16.gmra.mxu3 %v13842_v63  ;;  %3910 = vmatmul.bf16.gmra.mxu0 %v13528_v31  ;;  %v3314_v31 = vpop.f32.mrf.mxu2  ;;  %v17304_v46 = vld [vmem:[#allocation46_spill] sm:$0xff] }
 0x27b   : > { %v14098_v1 = vadd.f32 %v3312_v59, %v3284_v12  ;;  %3939 = vmatmul.bf16.gmra.mxu1 %v17288_v5  ;;  %3974 = vmatpush.bf16.msra.mxu3 %v12165_v51  ;;  %v12164_v12 = vld [vmem:[#allocation10 + $0x2f0] sm:$0xff]  ;;  %v2545_v51 = vadd.f32 %v17304_v46, %v2516_v8 }
 0x27c   : > { %5210 = vmatpush.xpose.msra.mxu2 %v17289_v44  ;;  %4034 = vmatpush.bf16.msra.mxu1 %v12179_v57  ;;  %v17309_v57 = vld [vmem:[#allocation59_spill] sm:$0xff] }
 0x27d   : > { %v2467_v9 = vpop.f32.mrf.mxu3 }
 0x27e   : > { %v14103_v40 = vadd.f32 %v2467_v9, %v2439_v21  ;;  %v17301_v21 = vld [vmem:[#allocation34_spill] sm:$0xff]  ;;  %v17302_v9 = vld [vmem:[#allocation44_spill] sm:$0xff] }
 0x27f   : > { %v3256_v52 = vpop.f32.mrf.mxu0  ;;  %3975 = vmatpush.bf16.msra.mxu3 %v12164_v12  ;;  %v17306_v12 = vld [vmem:[#allocation57_spill] sm:$0xff] }
 0x280   : > { %5211 = vmatpush.xpose.msra.mxu2 %v17292_v13  ;;  %v3285_v41 = vpop.f32.mrf.mxu1  ;;  %v2497_v49 = vadd.f32 %v17310_v60, %v14103_v40  ;;  %v17316_v40 = vld [vmem:[#allocation58_spill] sm:$0xff] }
 0x281   : > { %v3286_v25 = vadd.f32 %v3285_v41, %v3256_v52 }
 0x283   : > { %v14108_v29 = vadd.f32 %v3314_v31, %v3286_v25  ;;  %3976 = vmatpush.bf16.msra.mxu3 %v12163_v34  ;;  %v12162_v25 = vld [vmem:[#allocation10 + $0x2e0] sm:$0xff]  ;;  %v12159_v34 = vld [vmem:[#allocation10 + $0x2c8] sm:$0xff] }
 0x284   : > { %5212 = vmatpush.xpose.msra.mxu2 %v17293_v45 }
 0x285   : > { %v2469_v32 = vpop.f32.mrf.mxu3 }
 0x286   : > { %v14114_v3 = vadd.f32 %v2469_v32, %v2441_v48 }
 0x287   : > { %4079 = vmatmul.bf16.gmra.mxu2 %v13665_v18  ;;  %3977 = vmatpush.bf16.msra.mxu3 %v12162_v25  ;;  %v12158_v25 = vld [vmem:[#allocation10 + $0x2c0] sm:$0xff] }
 0x288   : > { %5213 = vmatpush.xpose.msra.mxu2 %v17295_v30 }
 0x28a   : > { %3441 = vmatmul.bf16.vlgmr.msrb.gmra.mxu3 %v13868_v19  ;;  %4011 = vmatmul.bf16.vlgmr.msra.gmra.mxu0 %v13674_v37  ;;  %v17300_v37 = vld [vmem:[#allocation51_spill] sm:$0xff] }
 0x28b   : > { %4629 = vmatpush.xpose.msra.mxu0 %v14063_v16  ;;  %v2513_v5 = vadd.f32 %v17300_v37, %v2484_v47  ;;  %3978 = vmatpush.bf16.msra.mxu3 %v12161_v50  ;;  %v17308_v50 = vld [vmem:[#allocation52_spill] sm:$0xff] }
 0x28c   : > { %5214 = vmatpush.xpose.msra.mxu2 %v17297_v23 }
 0x28d   : > { %v2568_v18 = vpop.f32.mrf.mxu3  ;;  %v2542_v7 = vadd.f32 %v17302_v9, %v2513_v5  ;;  %v12178_v5 = vld [vmem:[#allocation10 + $0x360] sm:$0xff]  ;;  %v17307_v9 = vld [vmem:[#allocation48_spill] sm:$0xff] }
 0x28e   : > { %v14126_v59 = vadd.f32 %v2568_v18, %v2540_v35  ;;  %v12160_v35 = vld [vmem:[#allocation10 + $0x2d0] sm:$0xff]  ;;  %4035 = vmatpush.bf16.msra.mxu1 %v12178_v5 }
 0x28f   : > { %4630 = vmatpush.xpose.msra.mxu0 %v13910_v39  ;;  %3979 = vmatpush.bf16.msra.mxu3 %v12160_v35  ;;  %v17311_v35 = vld [vmem:[#allocation55_spill] sm:$0xff] }
 0x290   : > { %5215 = vmatpush.xpose.msra.mxu2 %v17299_v2  ;;  %v17029_v31 = vrot.slane %v14126_v59, 7 }
 0x292   : > { %4036 = vmatpush.bf16.msra.mxu1 %v12177_v6  ;;  %v17315_v6 = vld [vmem:[#allocation64_spill] sm:$0xff] }
 0x293   : > { %4631 = vmatpush.xpose.msra.mxu0 %v13912_v28  ;;  %3980 = vmatpush.bf16.msra.mxu3 %v12159_v34  ;;  %v17313_v34 = vld [vmem:[#allocation63_spill] sm:$0xff]  ;;  %v17332_v28 = vrot.slane %v14126_v59, 7 }
 0x294   : > { %5216 = vmatpush.xpose.msra.mxu2 %v17301_v21  ;;  %v2526_v42 = vadd.f32 %v17313_v34, %v2497_v49  ;;  %v12194_v34 = vld [vmem:[#allocation10 + $0x3e0] sm:$0xff] }
 0x295   : > { %v2570_v52 = vpop.f32.mrf.mxu3 }
 0x296   : > { %v2571_v41 = vadd.f32 %v2570_v52, %v2542_v7 }
 0x297   : > { %4632 = vmatpush.xpose.msra.mxu0 %v13886_v0  ;;  %4084 = vmatmul.bf16.gmra.mxu2 %v13689_v56  ;;  %v17303_v56 = vld [vmem:[#allocation56_spill] sm:$0xff]  ;;  %v3494_v0 = vsel %vm17111_vm5, 0.0, %v17332_v28  ;;  %v12280_v28 = vld [vmem:[%s16996_s12 + $0x90] sm:$0xff] }
 0x298   : > { %v3472_v61 = vrot.slane %v2571_v41, 7  ;;  %v2489_v32 = vadd.f32 %v17303_v56, %v14065_v11  ;;  %3981 = vmatpush.bf16.msra.mxu3 %v12158_v25  ;;  %v2550_v56 = vadd.f32 %v17308_v50, %v2521_v43  ;;  %v17317_v25 = vld [vmem:[#allocation32_spill] sm:$0xff] }
 0x29a   : > { %3446 = vmatmul.bf16.gmra.mxu3 %v13916_v53  ;;  %v14144_v48 = vsel %vm17111_vm5, %v17029_v31, %v3472_v61  ;;  %4016 = vmatmul.bf16.gmra.mxu0 %v17305_v58  ;;  %v2518_v37 = vadd.f32 %v17306_v12, %v2489_v32  ;;  %v12175_v32 = vld [vmem:[#allocation10 + $0x348] sm:$0xff]  ;;  %v2523_v58 = vadd.f32 %v17309_v57, %v2494_v4  ;;  %v17318_v4 = vld [vmem:[#allocation65_spill] sm:$0xff] }
 0x29b   : > { %4633 = vmatpush.xpose.msra.mxu0 %v13863_v55  ;;  %v17312_v12 = vld [vmem:[#allocation24_spill] sm:$0xff]  ;;  %v17053_v55 = vmov 0.0  }
 0x29c   : > { %v2547_v7 = vadd.f32 %v17307_v9, %v2518_v37  ;;  %v17314_v9 = vld [vmem:[#allocation61_spill] sm:$0xff] }
 0x29d   : > { %v2573_v47 = vpop.f32.mrf.mxu3 }
 0x29e   : > { %v2574_v24 = vadd.f32 %v2573_v47, %v2545_v51  ;;  %v12174_v47 = vld [vmem:[#allocation10 + $0x340] sm:$0xff] }
 0x29f   : > { %4634 = vmatpush.xpose.msra.mxu0 %v17289_v44 }
 0x2a0   : > { %v3474_v18 = vrot.slane %v2574_v24, 7 }
 0x2a2   : > { %v14154_v11 = vsel %vm17111_vm5, %v3472_v61, %v3474_v18  ;;  %v12176_v61 = vld [vmem:[#allocation10 + $0x350] sm:$0xff] }
 0x2a3   : > { %4635 = vmatpush.xpose.msra.mxu0 %v17292_v13  ;;  %4037 = vmatpush.bf16.msra.mxu1 %v12176_v61 }
 0x2a5   : > { %v2575_v52 = vpop.f32.mrf.mxu3 }
 0x2a6   : > { %v2576_v41 = vadd.f32 %v2575_v52, %v2547_v7  ;;  %v2499_v52 = vadd.f32 %v17315_v6, %v14114_v3  ;;  %v12197_v3 = vld [vmem:[#allocation10 + $0x3f8] sm:$0xff]  ;;  %v3413_v6 = vpop.f32.mrf.mxu2 }
 0x2a7   : > { %4636 = vmatpush.xpose.msra.mxu0 %v17293_v45  ;;  %4038 = vmatpush.bf16.msra.mxu1 %v12175_v32  ;;  %v17319_v32 = vld [vmem:[#allocation60_spill] sm:$0xff] }
 0x2a8   : > { %v3476_v8 = vrot.slane %v2576_v41, 7  ;;  %v2555_v41 = vadd.f32 %v17316_v40, %v2526_v42  ;;  %v2528_v50 = vadd.f32 %v17318_v4, %v2499_v52  ;;  %4090 = vmatpush.bf16.msrb.mxu3 %v12197_v3  ;;  %v12193_v42 = vld [vmem:[#allocation10 + $0x3d8] sm:$0xff]  ;;  %v12192_v40 = vld [vmem:[#allocation10 + $0x3d0] sm:$0xff]  ;;  %v12190_v4 = vld [vmem:[#allocation10 + $0x3c0] sm:$0xff] }
 0x2aa   : > { %3451 = vmatmul.bf16.gmra.mxu3 %v13938_v17  ;;  %v14164_v15 = vsel %vm17111_vm5, %v3474_v18, %v3476_v8  ;;  %4021 = vmatmul.bf16.gmra.mxu0 %v13718_v33  ;;  %v2552_v33 = vadd.f32 %v17311_v35, %v2523_v58  ;;  %v12196_v35 = vld [vmem:[#allocation10 + $0x3f0] sm:$0xff] }
 0x2ab   : > { %4637 = vmatpush.xpose.msra.mxu0 %v17295_v30  ;;  %4039 = vmatpush.bf16.msra.mxu1 %v12174_v47 }
 0x2ac   : > { %4091 = vmatpush.bf16.msrb.mxu3 %v12196_v35 }
 0x2ad   : > { %v2578_v46 = vpop.f32.mrf.mxu3 }
 0x2ae   : > { %v2579_v26 = vadd.f32 %v2578_v46, %v2550_v56  ;;  %4040 = vmatmul.bf16.vlgmr.msra.gmra.mxu1 %v17312_v12  ;;  %v2557_v46 = vadd.f32 %v17319_v32, %v2528_v50  ;;  %v3415_v50 = vpop.f32.mrf.mxu2 }
 0x2af   : > { %4638 = vmatpush.xpose.msra.mxu0 %v17297_v23 }
 0x2b0   : > { %v3478_v51 = vrot.slane %v2579_v26, 7 }
 0x2b2   : > { %v14174_v24 = vsel %vm17111_vm5, %v3476_v8, %v3478_v51 }
 0x2b3   : > { %4639 = vmatpush.xpose.msra.mxu0 %v17299_v2 }
 0x2b5   : > { %v2580_v18 = vpop.f32.mrf.mxu3 }
 0x2b6   : > { %v2581_v37 = vadd.f32 %v2580_v18, %v2552_v33  ;;  %v12195_v33 = vld [vmem:[#allocation10 + $0x3e8] sm:$0xff]  ;;  %v3355_v18 = vpop.f32.mrf.mxu0 }
 0x2b7   : > { %4640 = vmatpush.xpose.msra.mxu0 %v17301_v21  ;;  %4092 = vmatpush.bf16.msrb.mxu3 %v12195_v33 }
 0x2b8   : > { %v3480_v5 = vrot.slane %v2581_v37, 7  ;;  %v17321_v37 = vld [vmem:[#allocation30_spill] sm:$0xff] }
 0x2ba   : > { %3456 = vmatmul.bf16.gmra.mxu3 %v17314_v9  ;;  %v14185_v7 = vsel %vm17111_vm5, %v3478_v51, %v3480_v5  ;;  %4026 = vmatmul.bf16.gmra.mxu0 %v17317_v25  ;;  %v17320_v51 = vld [vmem:[#allocation27_spill] sm:$0xff]  ;;  %v12191_v25 = vld [vmem:[#allocation10 + $0x3c8] sm:$0xff] }
 0x2bb   : > { %4093 = vmatpush.bf16.msrb.mxu3 %v12194_v34 }
 0x2bd   : > { %v2583_v8 = vpop.f32.mrf.mxu3 }
 0x2be   : > { %v2584_v43 = vadd.f32 %v2583_v8, %v2555_v41  ;;  %4045 = vmatmul.bf16.gmra.mxu1 %v17320_v51  ;;  %v3357_v41 = vpop.f32.mrf.mxu0 }
 0x2bf   : > { %4094 = vmatpush.bf16.msrb.mxu3 %v12193_v42 }
 0x2c0   : > { %v3482_v61 = vrot.slane %v2584_v43, 7 }
 0x2c2   : > { %v14193_v56 = vsel %vm17111_vm5, %v3480_v5, %v3482_v61 }
 0x2c3   : > { %4095 = vmatpush.bf16.msrb.mxu3 %v12192_v40 }
 0x2c5   : > { %v2585_v26 = vpop.f32.mrf.mxu3 }
 0x2c6   : > { %v2586_v57 = vadd.f32 %v2585_v26, %v2557_v46  ;;  %v3418_v26 = vpop.f32.mrf.mxu2 }
 0x2c7   : > { %4096 = vmatpush.bf16.msrb.mxu3 %v12191_v25 }
 0x2c8   : > { %v3484_v58 = vrot.slane %v2586_v57, 7 }
 0x2ca   : > { %3982 = vmatmul.bf16.vlgmr.msra.gmra.mxu3 %v13764_v54  ;;  %v14199_v47 = vsel %vm17111_vm5, %v3482_v61, %v3484_v58  ;;  %v3384_v54 = vpop.f32.mrf.mxu1  ;;  %v17322_v61 = vld [vmem:[#allocation33_spill] sm:$0xff] }
 0x2cb   : > { %4097 = vmatpush.bf16.msrb.mxu3 %v12190_v4 }
 0x2cd   : > { %v3326_v60 = vpop.f32.mrf.mxu3 }
 0x2ce   : > { %v3327_v49 = vadd.f32 %v3326_v60, %v14009_v22  ;;  %4050 = vmatmul.bf16.gmra.mxu1 %v17321_v37  ;;  %v3420_v60 = vpop.f32.mrf.mxu2 }
 0x2d0   : > { %v3356_v42 = vadd.f32 %v3355_v18, %v3327_v49 }
 0x2d2   : > { %v3386_v8 = vpop.f32.mrf.mxu1  ;;  %v3385_v25 = vadd.f32 %v3384_v54, %v3356_v42 }
 0x2d4   : > { %v3414_v4 = vadd.f32 %v3413_v6, %v3385_v25 }
 0x2d5   : > { %v3328_v12 = vpop.f32.mrf.mxu3 }
 0x2d6   : > { %v3329_v5 = vadd.f32 %v3328_v12, %v14023_v10  ;;  %v3423_v37 = vpop.f32.mrf.mxu2 }
 0x2da   : > { %3987 = vmatmul.bf16.gmra.mxu3 %v13792_v27  ;;  %v3360_v27 = vpop.f32.mrf.mxu0  ;;  %v3389_v32 = vpop.f32.mrf.mxu1 }
 0x2dd   : > { %v3331_v52 = vpop.f32.mrf.mxu3 }
 0x2de   : > { %v3332_v22 = vadd.f32 %v3331_v52, %v14039_v38  ;;  %4055 = vmatmul.bf16.gmra.mxu1 %v17322_v61 }
 0x2e2   : > { %v3362_v51 = vpop.f32.mrf.mxu0  ;;  %v3391_v3 = vpop.f32.mrf.mxu1 }
 0x2e5   : > { %v3333_v43 = vpop.f32.mrf.mxu3 }
 0x2e6   : > { %v3334_v10 = vadd.f32 %v3333_v43, %v14055_v20 }
 0x2ea   : > { %3992 = vmatmul.bf16.gmra.mxu3 %v13820_v62  ;;  %v3365_v20 = vpop.f32.mrf.mxu0  ;;  %v3394_v12 = vpop.f32.mrf.mxu1 }
 0x2ed   : > { %v3336_v46 = vpop.f32.mrf.mxu3 }
 0x2ee   : > { %v3337_v38 = vadd.f32 %v3336_v46, %v14076_v14  ;;  %v3361_v46 = vadd.f32 %v3360_v27, %v3332_v22 }
 0x2f2   : > { %v3367_v14 = vpop.f32.mrf.mxu0  ;;  %v3396_v52 = vpop.f32.mrf.mxu1 }
 0x2f5   : > { %v3338_v57 = vpop.f32.mrf.mxu3 }
 0x2f6   : > { %v3339_v58 = vadd.f32 %v3338_v57, %v14086_v36  ;;  %v3358_v36 = vadd.f32 %v3357_v41, %v3329_v5  ;;  %v3363_v5 = vadd.f32 %v3362_v51, %v3334_v10 }
 0x2f8   : > { %v3387_v43 = vadd.f32 %v3386_v8, %v3358_v36 }
 0x2fa   : > { %3997 = vmatmul.bf16.gmra.mxu3 %v13842_v63  ;;  %v3425_v63 = vpop.f32.mrf.mxu2  ;;  %v3370_v61 = vpop.f32.mrf.mxu0  ;;  %v3416_v57 = vadd.f32 %v3415_v50, %v3387_v43  ;;  %v3392_v50 = vadd.f32 %v3391_v3, %v3363_v5 }
 0x2fd   : > { %v3341_v35 = vpop.f32.mrf.mxu3 }
 0x2fe   : > { %v3342_v33 = vadd.f32 %v3341_v35, %v14098_v1  ;;  %v3399_v35 = vpop.f32.mrf.mxu1 }
 0x302   : > { %v3428_v49 = vpop.f32.mrf.mxu2  ;;  %v3372_v18 = vpop.f32.mrf.mxu0 }
 0x305   : > { %v3343_v62 = vpop.f32.mrf.mxu3 }
 0x306   : > { %v14214_v34 = vadd.f32 %v3343_v62, %v14108_v29  ;;  %v3390_v29 = vadd.f32 %v3389_v32, %v3361_v46  ;;  %v3401_v22 = vpop.f32.mrf.mxu1  ;;  %v3366_v32 = vadd.f32 %v3365_v20, %v3337_v38 }
 0x308   : > { %v3419_v54 = vadd.f32 %v3418_v26, %v3390_v29  ;;  %v3368_v26 = vadd.f32 %v3367_v14, %v3339_v58 }
 0x30a   : > { %4098 = vmatmul.bf16.vlgmr.msrb.gmra.mxu3 %v13868_v19  ;;  %v14224_v42 = vpop.f32.mrf.mxu0 }
 0x30d   : > { %v3442_v40 = vpop.f32.mrf.mxu3 }
 0x30e   : > { %v3443_v1 = vadd.f32 %v3442_v40, %v3414_v4  ;;  %v3395_v40 = vadd.f32 %v3394_v12, %v3366_v32  ;;  %v14226_v43 = vpop.f32.mrf.mxu1  ;;  %v3397_v4 = vadd.f32 %v3396_v52, %v3368_v26  ;;  %v3373_v52 = vadd.f32 %v3372_v18, %v14214_v34 }
 0x310   : > { %v4127_v62 = vrot.slane %v3443_v1, 1  ;;  %v3424_v51 = vadd.f32 %v3423_v37, %v3395_v40  ;;  %v3371_v1 = vadd.f32 %v3370_v61, %v3342_v33  ;;  %v17034_v40 = vlaneseq }
 0x312   : > { %v3400_v58 = vadd.f32 %v3399_v35, %v3371_v1 }
 0x315   : > { %v3444_v31 = vpop.f32.mrf.mxu3 }
 0x316   : > { %v3445_v16 = vadd.f32 %v3444_v31, %v3416_v57  ;;  %v3430_v31 = vpop.f32.mrf.mxu2  ;;  %v14239_v46 = vpop.f32.mrf.mxu1 }
 0x318   : > { %v4128_v39 = vrot.slane %v3445_v16, 1  ;;  %v3421_v16 = vadd.f32 %v3420_v60, %v3392_v50  ;;  %v14234_v60 = vpop.f32.mrf.mxu0 }
 0x31a   : > { %4103 = vmatmul.bf16.gmra.mxu3 %v13916_v53  ;;  %v14219_v19 = vsel %vm17113_vm3, %v4127_v62, %v4128_v39 }
 0x31d   : > { %v3447_v41 = vpop.f32.mrf.mxu3 }
 0x31e   : > { %v3448_v6 = vadd.f32 %v3447_v41, %v3419_v54  ;;  %v3429_v54 = vadd.f32 %v3428_v49, %v3400_v58  ;;  %v14250_v41 = vpop.f32.mrf.mxu1 }
 0x320   : > { %v4130_v8 = vrot.slane %v3448_v6, 1  ;;  %v14243_v14 = vpop.f32.mrf.mxu0  ;;  %v3402_v6 = vadd.f32 %v3401_v22, %v3373_v52 }
 0x322   : > { %v14222_v27 = vsel %vm17113_vm3, %v4128_v39, %v4130_v8  ;;  %v14232_v39 = vpop.f32.mrf.mxu2 }
 0x325   : > { %v3449_v53 = vpop.f32.mrf.mxu3 }
 0x326   : > { %v3450_v36 = vadd.f32 %v3449_v53, %v3421_v16  ;;  %v14261_v53 = vpop.f32.mrf.mxu1 }
 0x328   : > { %v4132_v25 = vrot.slane %v3450_v36, 1  ;;  %v14257_v50 = vpop.f32.mrf.mxu0 }
 0x32a   : > { %4108 = vmatmul.bf16.gmra.mxu3 %v13938_v17  ;;  %v14230_v10 = vsel %vm17113_vm3, %v4130_v8, %v4132_v25  ;;  %v3426_v17 = vadd.f32 %v3425_v63, %v3397_v4  ;;  %v14241_v62 = vpop.f32.mrf.mxu2 }
 0x32d   : > { %v3452_v3 = vpop.f32.mrf.mxu3 }
 0x32e   : > { %v3453_v38 = vadd.f32 %v3452_v3, %v3424_v51 }
 0x330   : > { %v4134_v20 = vrot.slane %v3453_v38, 1  ;;  %v14271_v22 = vpop.f32.mrf.mxu0 }
 0x332   : > { %v14237_v12 = vsel %vm17113_vm3, %v4132_v25, %v4134_v20  ;;  %v14252_v8 = vpop.f32.mrf.mxu2  ;;  %v14278_v25 = vshrl.u32 %v17034_v40, 7 }
 0x334   : > { %v14287_v38 = vcvt.s32.f32 %v14278_v25  ;;  %v911_v59 = vadd.s32 32, %v14278_v25 }
 0x335   : > { %v3454_v57 = vpop.f32.mrf.mxu3 }
 0x336   : > { %v3455_v29 = vadd.f32 %v3454_v57, %v3426_v17  ;;  %17326 = vst [vmem:[#allocation31_spill] sm:$0xff] %v14287_v38  ;;  %v923_v4 = vmul.f32 0.125, %v14287_v38  ;;  %v908_v17 = vadd.s32 8, %v14278_v25 }
 0x338   : > { %v4136_v37 = vrot.slane %v3455_v29, 1  ;;  %v14284_v3 = vpop.f32.mrf.mxu0  ;;  %v12285_v29 = vld [vmem:[%s16996_s12 + $0xb8] sm:$0xff]  ;;  %v14300_v58 = vfloor.f32 %v923_v4  ;;  %v14304_v52 = vcvt.s32.f32 %v908_v17 }
 0x339   : > { %4366 = vmatpush.bf16.msrb.mxu1 %v12285_v29 }
 0x33a   : > { %4113 = vmatmul.bf16.gmra.mxu3 %v17314_v9  ;;  %v14247_v5 = vsel %vm17113_vm3, %v4134_v20, %v4136_v37  ;;  %v3431_v9 = vadd.f32 %v3430_v31, %v3402_v6  ;;  %v14269_v18 = vpop.f32.mrf.mxu2  ;;  %v14275_v31 = vpop.f32.mrf.mxu1  ;;  %17327 = vst [vmem:[#allocation37_spill] sm:$0xff] %v14300_v58  ;;  %v924_v6 = vmul.f32 0.125, %v14304_v52 }
 0x33b   : > { %17328 = vst [vmem:[#allocation29_spill] sm:$0xff] %v14304_v52 }
 0x33c   : > { %v14324_v29 = vfloor.f32 %v924_v6  ;;  %v910_v6 = vadd.s32 24, %v14278_v25 }
 0x33d   : > { %v3457_v33 = vpop.f32.mrf.mxu3 }
 0x33e   : > { %v3458_v63 = vadd.f32 %v3457_v33, %v3429_v54  ;;  %v12284_v54 = vld [vmem:[%s16996_s12 + $0xb0] sm:$0xff]  ;;  %v939_v33 = vmul.f32 8.0, %v14300_v58  ;;  %17329 = vst [vmem:[#allocation39_spill] sm:$0xff] %v14324_v29 }
 0x33f   : > { %4367 = vmatpush.bf16.msrb.mxu1 %v12284_v54  ;;  %v12282_v54 = vld [vmem:[%s16996_s12 + $0xa0] sm:$0xff] }
 0x340   : > { %v4138_v61 = vrot.slane %v3458_v63, 1  ;;  %v14320_v4 = vsub.f32 %v14287_v38, %v939_v33  ;;  %v940_v33 = vmul.f32 8.0, %v14324_v29 }
 0x342   : > { %v14255_v35 = vsel %vm17113_vm3, %v4136_v37, %v4138_v61  ;;  %v14280_v26 = vpop.f32.mrf.mxu2  ;;  %v14289_v20 = vpop.f32.mrf.mxu1  ;;  %vm955_vm6 = vcmp.gt.f32.partialorder %v14320_v4, 0.5  ;;  %v14351_v29 = vsub.f32 %v14304_v52, %v940_v33  ;;  %v14370_v52 = vcvt.s32.f32 %v911_v59 }
 0x343   : > { %17323 = vst [vmem:[#allocation25_spill] sm:$0xff] %v14255_v35  ;;  %v14302_v37 = vpop.f32.mrf.mxu0  ;;  %v14348_v44 = vsel %vm955_vm6, 1.0, %v17053_v55  ;;  %vm979_vm10 = vcmp.lt.f32.partialorder %v14320_v4, 6.5 }
 0x344   : > { %17333 = vst [vmem:[#allocation51_spill] sm:$0xff] %v14348_v44  ;;  %v3495_v23 = vmul.f32 %v14348_v44, %v3494_v0  ;;  %vm956_vm7 = vcmp.gt.f32.partialorder %v14351_v29, 0.5  ;;  %v12279_v0 = vld [vmem:[%s16996_s12 + $0x88] sm:$0xff]  ;;  %v17337_v44 = vmov 0.0   ;;  %vm980_vm12 = vcmp.lt.f32.partialorder %v14351_v29, 6.5 }
 0x345   : > { %v3459_v32 = vpop.f32.mrf.mxu3  ;;  %v14376_v2 = vsel %vm956_vm7, 1.0, %v17337_v44 }
 0x346   : > { %v14259_v16 = vadd.f32 %v3459_v32, %v3431_v9  ;;  %v909_v9 = vadd.s32 16, %v14278_v25  ;;  %v12283_v32 = vld [vmem:[%s16996_s12 + $0xa8] sm:$0xff]  ;;  %v3897_v33 = vadd.f32 %v14224_v42, %v3495_v23  ;;  %17338 = vst [vmem:[#allocation26_spill] sm:$0xff] %v14376_v2  ;;  %v3496_v59 = vmul.f32 %v14376_v2, %v14144_v48 }
 0x347   : > { %4368 = vmatpush.bf16.msrb.mxu1 %v12283_v32  ;;  %v12281_v32 = vld [vmem:[%s16996_s12 + $0x98] sm:$0xff] }
 0x348   : > { %17324 = vst [vmem:[#allocation35_spill] sm:$0xff] %v14259_v16  ;;  %v17035_v34 = vrot.slane %v14259_v16, 1  ;;  %v14326_v40 = vcvt.s32.f32 %v909_v9  ;;  %v3926_v21 = vadd.f32 %v14226_v43, %v3897_v33  ;;  %v927_v16 = vmul.f32 0.125, %v14370_v52 }
 0x34a   : > { %v14267_v49 = vsel %vm17113_vm3, %v4138_v61, %v17035_v34  ;;  %v14295_v57 = vpop.f32.mrf.mxu2  ;;  %v14310_v63 = vpop.f32.mrf.mxu1  ;;  %17330 = vst [vmem:[#allocation50_spill] sm:$0xff] %v14326_v40  ;;  %v925_v38 = vmul.f32 0.125, %v14326_v40  ;;  %v3955_v33 = vadd.f32 %v14232_v39, %v3926_v21  ;;  %v935_v48 = vfloor.f32 %v927_v16 }
 0x34b   : > { %17325 = vst [vmem:[#allocation28_spill] sm:$0xff] %v14267_v49  ;;  %v14328_v34 = vpop.f32.mrf.mxu0  ;;  %4369 = vmatpush.bf16.msrb.mxu1 %v12282_v54  ;;  %v14355_v54 = vcvt.s32.f32 %v910_v6  ;;  %v12278_v49 = vld [vmem:[%s16996_s12 + $0x80] sm:$0xff] }
 0x34c   : > { %v14353_v13 = vfloor.f32 %v925_v38 }
 0x34d   : > { %v14273_v36 = vpop.f32.mrf.mxu3  ;;  %17335 = vst [vmem:[#allocation56_spill] sm:$0xff] %v14355_v54  ;;  %v926_v6 = vmul.f32 0.125, %v14355_v54 }
 0x34e   : > { %17334 = vst [vmem:[#allocation44_spill] sm:$0xff] %v14353_v13  ;;  %v941_v38 = vmul.f32 8.0, %v14353_v13 }
 0x34f   : > { %4370 = vmatpush.bf16.msrb.mxu1 %v12281_v32  ;;  %v14382_v42 = vfloor.f32 %v926_v6 }
 0x350   : > { %v14380_v23 = vsub.f32 %v14326_v40, %v941_v38  ;;  %v3899_v38 = vadd.f32 %v14234_v60, %v3496_v59  ;;  %v3984_v40 = vadd.f32 %v14273_v36, %v3955_v33  ;;  %v913_v60 = vadd.s32 48, %v14278_v25 }
 0x351   : > { %17339 = vst [vmem:[#allocation57_spill] sm:$0xff] %v14382_v42  ;;  %v942_v6 = vmul.f32 8.0, %v14382_v42 }
 0x352   : > { %v14322_v17 = vpop.f32.mrf.mxu2  ;;  %v14339_v9 = vpop.f32.mrf.mxu1  ;;  %vm957_vm8 = vcmp.gt.f32.partialorder %v14380_v23, 0.5  ;;  %vm981_vm14 = vcmp.lt.f32.partialorder %v14380_v23, 6.5 }
 0x353   : > { %17331 = vst [vmem:[#allocation41_spill] sm:$0xff] %v14339_v9  ;;  %v4012_v30 = vpop.f32.mrf.mxu0  ;;  %4371 = vmatpush.bf16.msrb.mxu1 %v12280_v28  ;;  %v912_v28 = vadd.s32 40, %v14278_v25  ;;  %v14401_v2 = vsel %vm957_vm8, 1.0, %v17337_v44  ;;  %v3928_v9 = vadd.f32 %v14239_v46, %v3899_v38  ;;  %v14405_v21 = vsub.f32 %v14355_v54, %v942_v6 }
 0x354   : > { %17341 = vst [vmem:[#allocation52_spill] sm:$0xff] %v14401_v2  ;;  %v4013_v16 = vadd.f32 %v4012_v30, %v3984_v40  ;;  %v14416_v38 = vcvt.s32.f32 %v913_v60  ;;  %v14481_v23 = vsel %vm981_vm14, 1.0, %v17337_v44 }
 0x355   : > { %v14282_v51 = vpop.f32.mrf.mxu3  ;;  %v3957_v33 = vadd.f32 %v14241_v62, %v3928_v9  ;;  %vm958_vm9 = vcmp.gt.f32.partialorder %v14405_v21, 0.5  ;;  %v914_v9 = vadd.s32 56, %v14278_v25  ;;  %17347 = vst [vmem:[#allocation61_spill] sm:$0xff] %v14481_v23  ;;  %vm982_vm0 = vcmp.lt.f32.partialorder %v14405_v21, 6.5 }
 0x356   : > { %v14424_v30 = vsel %vm958_vm9, 1.0, %v17337_v44  ;;  %v929_v40 = vmul.f32 0.125, %v14416_v38 }
 0x357   : > { %4372 = vmatpush.bf16.msrb.mxu1 %v12279_v0  ;;  %v14397_v0 = vcvt.s32.f32 %v912_v28  ;;  %v943_v28 = vmul.f32 8.0, %v935_v48  ;;  %17342 = vst [vmem:[#allocation59_spill] sm:$0xff] %v14424_v30 }
 0x359   : > { %v928_v39 = vmul.f32 0.125, %v14397_v0  ;;  %v14419_v54 = vsub.f32 %v14370_v52, %v943_v28 }
 0x35a   : > { %v14357_v45 = vpop.f32.mrf.mxu2  ;;  %v4041_v32 = vpop.f32.mrf.mxu1 }
 0x35b   : > { %17336 = vst [vmem:[#allocation46_spill] sm:$0xff] %v14357_v45  ;;  %v4014_v35 = vpop.f32.mrf.mxu0  ;;  %4373 = vmatpush.bf16.msrb.mxu1 %v12278_v49  ;;  %v3497_v49 = vmul.f32 %v14401_v2, %v14154_v11  ;;  %v936_v46 = vfloor.f32 %v928_v39  ;;  %v3986_v11 = vadd.f32 %v14282_v51, %v3957_v33  ;;  %v14430_v39 = vsel %vm979_vm10, 1.0, %v17337_v44 }
 0x35c   : > { %17343 = vst [vmem:[#allocation62_spill] sm:$0xff] %v14430_v39  ;;  %vm959_vm11 = vcmp.gt.f32.partialorder %v14419_v54, 0.5  ;;  %v4151_v28 = vmul.f32 %v14430_v39, %v14219_v19  ;;  %vm983_vm6 = vcmp.lt.f32.partialorder %v14419_v54, 6.5 }
 0x35d   : > { %v14292_v1 = vpop.f32.mrf.mxu3  ;;  %v3902_v42 = vadd.f32 %v14243_v14, %v3497_v49  ;;  %v944_v14 = vmul.f32 8.0, %v936_v46  ;;  %v4015_v4 = vadd.f32 %v4014_v35, %v3986_v11  ;;  %v14445_v46 = vcvt.s32.f32 %v914_v9 }
 0x35e   : > { %v14517_v54 = vsel %vm983_vm6, 1.0, %v17337_v44 }
 0x35f   : > { %v3931_v62 = vadd.f32 %v14250_v41, %v3902_v42  ;;  %v14443_v33 = vsub.f32 %v14397_v0, %v944_v14  ;;  %v930_v14 = vmul.f32 0.125, %v14445_v46  ;;  %17351 = vst [vmem:[#allocation65_spill] sm:$0xff] %v14517_v54 }
 0x361   : > { %v3960_v49 = vadd.f32 %v14252_v8, %v3931_v62  ;;  %vm960_vm13 = vcmp.gt.f32.partialorder %v14443_v33, 0.5  ;;  %vm984_vm7 = vcmp.lt.f32.partialorder %v14443_v33, 6.5  ;;  %v17356_v33 = vld [vmem:[#allocation25_spill] sm:$0xff] }
 0x362   : > { %v4070_v13 = vpop.f32.mrf.mxu2  ;;  %v4043_v45 = vpop.f32.mrf.mxu1 }
 0x363   : > { %v4017_v6 = vpop.f32.mrf.mxu0  ;;  %v4044_v35 = vadd.f32 %v4043_v45, %v4015_v4 }
 0x365   : > { %v14312_v61 = vpop.f32.mrf.mxu3 }
 0x36a   : > { %v4072_v59 = vpop.f32.mrf.mxu2  ;;  %v4046_v48 = vpop.f32.mrf.mxu1 }
 0x36b   : > { %v4073_v45 = vadd.f32 %v4072_v59, %v4044_v35 }
 0x36d   : > { %v14334_v58 = vpop.f32.mrf.mxu3 }
 0x372   : > { %v4048_v29 = vpop.f32.mrf.mxu1 }
 0x375   : > { %v14364_v55 = vpop.f32.mrf.mxu3 }
 0x37d   : > { %v14391_v43 = vpop.f32.mrf.mxu3 }
 0x37e   : > { %17340 = vst [vmem:[#allocation48_spill] sm:$0xff] %v14391_v43  ;;  %v4042_v43 = vadd.f32 %v4041_v32, %v4013_v16  ;;  %v3498_v32 = vmul.f32 %v14424_v30, %v14164_v15  ;;  %v14440_v16 = vsel %vm959_vm11, 1.0, %v17337_v44  ;;  %v937_v15 = vfloor.f32 %v929_v40 }
 0x37f   : > { %17344 = vst [vmem:[#allocation55_spill] sm:$0xff] %v14440_v16  ;;  %v3499_v19 = vmul.f32 %v14440_v16, %v14174_v24  ;;  %v14454_v40 = vsel %vm980_vm12, 1.0, %v17337_v44 }
 0x380   : > { %v4071_v51 = vadd.f32 %v4070_v13, %v4042_v43  ;;  %v3904_v41 = vadd.f32 %v14257_v50, %v3498_v32  ;;  %v4075_v13 = vpop.f32.mrf.mxu2  ;;  %v3989_v43 = vadd.f32 %v14292_v1, %v3960_v49  ;;  %v4019_v50 = vpop.f32.mrf.mxu0  ;;  %v945_v62 = vmul.f32 8.0, %v937_v15  ;;  %17345 = vst [vmem:[#allocation24_spill] sm:$0xff] %v14454_v40  ;;  %v14460_v1 = vld [vmem:[%s16995_s11] ss:$0 sm:$0xff] }
 0x381   : > { %v4152_v4 = vmul.f32 %v14454_v40, %v14222_v27 }
 0x382   : > { %v3933_v11 = vadd.f32 %v14261_v53, %v3904_v41  ;;  %v4018_v9 = vadd.f32 %v4017_v6, %v3989_v43  ;;  %v3907_v53 = vadd.f32 %v14271_v22, %v3499_v19  ;;  %v14470_v59 = vsub.f32 %v14416_v38, %v945_v62 }
 0x383   : > { %v938_v6 = vfloor.f32 %v930_v14 }
 0x384   : > { %v3962_v24 = vadd.f32 %v14269_v18, %v3933_v11  ;;  %v4047_v49 = vadd.f32 %v4046_v48, %v4018_v9  ;;  %v3936_v18 = vadd.f32 %v14275_v31, %v3907_v53  ;;  %vm961_vm15 = vcmp.gt.f32.partialorder %v14470_v59, 0.5 }
 0x385   : > { %v14411_v36 = vpop.f32.mrf.mxu3  ;;  %v946_v35 = vmul.f32 8.0, %v938_v6  ;;  %v14488_v9 = vsel %vm961_vm15, 1.0, %v17337_v44  ;;  %vm985_vm8 = vcmp.lt.f32.partialorder %v14470_v59, 6.5 }
 0x386   : > { %v3991_v22 = vadd.f32 %v14312_v61, %v3962_v24  ;;  %v4076_v48 = vadd.f32 %v4075_v13, %v4047_v49  ;;  %v3965_v19 = vadd.f32 %v14280_v26, %v3936_v18  ;;  %17348 = vst [vmem:[#allocation64_spill] sm:$0xff] %v14488_v9  ;;  %v4051_v13 = vpop.f32.mrf.mxu1  ;;  %v4761_v26 = vld [vmem:[#allocation14 + $0xf8] sm:$0xff] }
 0x387   : > { %v14491_v53 = vsub.f32 %v14445_v46, %v946_v35  ;;  %4762 = vmatpush.msra.mxu1 %v4761_v26 }
 0x388   : > { %v4022_v43 = vpop.f32.mrf.mxu0  ;;  %v4020_v61 = vadd.f32 %v4019_v50, %v3991_v22 }
 0x389   : > { %vm962_vm1 = vcmp.gt.f32.partialorder %v14491_v53, 0.5  ;;  %vm986_vm9 = vcmp.lt.f32.partialorder %v14491_v53, 6.5 }
 0x38a   : > { %v4049_v50 = vadd.f32 %v4048_v29, %v4020_v61  ;;  %v4760_v29 = vld [vmem:[#allocation14 + $0xf0] sm:$0xff]  ;;  %v14507_v18 = vsel %vm962_vm1, 1.0, %v17337_v44 }
 0x38b   : > { %4763 = vmatpush.msra.mxu1 %v4760_v29  ;;  %17350 = vst [vmem:[#allocation32_spill] sm:$0xff] %v14507_v18  ;;  %v4756_v61 = vld [vmem:[#allocation14 + $0xd0] sm:$0xff] }
 0x38d   : > { %v4099_v60 = vpop.f32.mrf.mxu3 }
 0x38e   : > { %v4100_v42 = vadd.f32 %v4099_v60, %v4071_v51  ;;  %v14467_v60 = vsel %vm960_vm13, 1.0, %v17337_v44 }
 0x38f   : > { %17346 = vst [vmem:[#allocation63_spill] sm:$0xff] %v14467_v60  ;;  %v3500_v15 = vmul.f32 %v14467_v60, %v14185_v7  ;;  %v4153_v7 = vmul.f32 %v14481_v23, %v14230_v10  ;;  %v3501_v10 = vmul.f32 %v14488_v9, %v14193_v56 }
 0x390   : > { %v4159_v8 = vadd.f32 %v4151_v28, %v4100_v42  ;;  %v4077_v28 = vpop.f32.mrf.mxu2  ;;  %v4024_v49 = vpop.f32.mrf.mxu0 }
 0x391   : > { %v3909_v62 = vadd.f32 %v14284_v3, %v3500_v15  ;;  %v3912_v21 = vadd.f32 %v14302_v37, %v3501_v10 }
 0x392   : > { %v4171_v41 = vadd.f32 %v14460_v1, %v4159_v8 }
 0x393   : > { %v3938_v3 = vadd.f32 %v14289_v20, %v3909_v62 }
 0x394   : > { %v4179_v11 = vmax.f32 %v4171_v41, 0.0  ;;  %v4759_v41 = vld [vmem:[#allocation14 + $0xe8] sm:$0xff] }
 0x395   : > { %v4101_v32 = vpop.f32.mrf.mxu3  ;;  %v3967_v20 = vadd.f32 %v14295_v57, %v3938_v3  ;;  %4764 = vmatpush.msra.mxu1 %v4759_v41  ;;  %v3941_v57 = vadd.f32 %v14310_v63, %v3912_v21  ;;  %v17352_v3 = vld [vmem:[#allocation48_spill] sm:$0xff] }
 0x396   : > { %v4102_v51 = vadd.f32 %v4101_v32, %v4073_v45  ;;  %v3994_v32 = vadd.f32 %v14334_v58, %v3965_v19  ;;  %v4078_v58 = vadd.f32 %v4077_v28, %v4049_v50  ;;  %v4758_v28 = vld [vmem:[#allocation14 + $0xe0] sm:$0xff]  ;;  %v4155_v50 = vmul.f32 %v14517_v54, %v14247_v5 }
 0x397   : > { %v3996_v15 = vadd.f32 %v14364_v55, %v3967_v20  ;;  %4765 = vmatpush.msra.mxu1 %v4758_v28  ;;  %v3970_v63 = vadd.f32 %v14322_v17, %v3941_v57  ;;  %v4753_v17 = vld [vmem:[#allocation14 + $0xb8] sm:$0xff]  ;;  %v14527_v5 = vsel %vm984_vm7, 1.0, %v17337_v44 }
 0x398   : > { %v4160_v42 = vadd.f32 %v4152_v4, %v4102_v51  ;;  %v4080_v51 = vpop.f32.mrf.mxu2  ;;  %v14499_v4 = vsel %vm982_vm0, 1.0, %v17337_v44  ;;  %v4023_v6 = vadd.f32 %v4022_v43, %v3994_v32  ;;  %v4053_v43 = vpop.f32.mrf.mxu1  ;;  %v4754_v32 = vld [vmem:[#allocation14 + $0xc0] sm:$0xff]  ;;  %17354 = vst [vmem:[#allocation60_spill] sm:$0xff] %v14527_v5  ;;  %v17355_v20 = vld [vmem:[#allocation46_spill] sm:$0xff]  ;;  %v4156_v28 = vmul.f32 %v14527_v5, %v17356_v33 }
 0x399   : > { %17349 = vst [vmem:[#allocation58_spill] sm:$0xff] %v14499_v4  ;;  %v4154_v56 = vmul.f32 %v14499_v4, %v14237_v12  ;;  %v4025_v19 = vadd.f32 %v4024_v49, %v3996_v15  ;;  %v3999_v10 = vadd.f32 %v17352_v3, %v3970_v63  ;;  %v17360_v3 = vld [vmem:[#allocation35_spill] sm:$0xff]  ;;  %v4595_v33 = vld [vmem:[#allocation14 + $0x78] sm:$0xff] }
 0x39a   : > { %v4172_v27 = vadd.f32 %v14460_v1, %v4160_v42  ;;  %4596 = vmatpush.msra.mxu3 %v4595_v33 }
 0x39b   : > { %v4054_v26 = vadd.f32 %v4053_v43, %v4025_v19 }
 0x39c   : > { %v4180_v8 = vmax.f32 %v4172_v27, 0.0  ;;  %v4052_v27 = vadd.f32 %v4051_v13, %v4023_v6 }
 0x39d   : > { %v4104_v31 = vpop.f32.mrf.mxu3 }
 0x39e   : > { %v4187_v14 = vpack.c.bf16 %v4180_v8, %v4179_v11  ;;  %v4105_v45 = vadd.f32 %v4104_v31, %v4076_v48  ;;  %v4757_v48 = vld [vmem:[#allocation14 + $0xd8] sm:$0xff]  ;;  %v3502_v11 = vmul.f32 %v14507_v18, %v14199_v47  ;;  %v4755_v8 = vld [vmem:[#allocation14 + $0xc8] sm:$0xff]  ;;  %v4081_v55 = vadd.f32 %v4080_v51, %v4052_v27  ;;  %v4750_v27 = vld [vmem:[#allocation14 + $0xa0] sm:$0xff] }
 0x39f   : > { %4766 = vmatpush.msra.mxu1 %v4757_v48  ;;  %v4749_v48 = vld [vmem:[#allocation14 + $0x98] sm:$0xff] }
 0x3a0   : > { %v4161_v24 = vadd.f32 %v4153_v7, %v4105_v45  ;;  %4263 = vmatmul.bf16.vlgmr.msrb.gmra.mxu0 %v4187_v14  ;;  %4374 = vmatmul.bf16.vlgmr.msrb.gmra.mxu1 %v4187_v14  ;;  %v3914_v7 = vadd.f32 %v14328_v34, %v3502_v11  ;;  %v17353_v34 = vld [vmem:[#allocation41_spill] sm:$0xff]  ;;  %v4056_v6 = vpop.f32.mrf.mxu1 }
 0x3a1   : > { %4491 = vmatmul.bf16.vlgmr.msrb.gmra.mxu2 %v4187_v14  ;;  %4767 = vmatpush.msra.mxu1 %v4756_v61  ;;  %v4082_v14 = vpop.f32.mrf.mxu2  ;;  %v4748_v11 = vld [vmem:[#allocation14 + $0x90] sm:$0xff] }
 0x3a2   : > { %v4173_v37 = vadd.f32 %v14460_v1, %v4161_v24  ;;  %v4027_v24 = vpop.f32.mrf.mxu0  ;;  %v3943_v29 = vadd.f32 %v17353_v34, %v3914_v7  ;;  %v4083_v21 = vadd.f32 %v4082_v14, %v4054_v26  ;;  %v14543_v26 = vsel %vm986_vm9, 1.0, %v17337_v44 }
 0x3a3   : > { %4768 = vmatpush.msra.mxu1 %v4755_v8  ;;  %v4028_v49 = vadd.f32 %v4027_v24, %v3999_v10  ;;  %v14537_v8 = vsel %vm985_vm8, 1.0, %v17337_v44  ;;  %17359 = vst [vmem:[#allocation30_spill] sm:$0xff] %v14543_v26  ;;  %v17361_v10 = vrot.slane %v17360_v3, 1 }
 0x3a4   : > { %v4181_v31 = vmax.f32 %v4173_v37, 0.0  ;;  %17357 = vst [vmem:[#allocation27_spill] sm:$0xff] %v14537_v8 }
 0x3a5   : > { %v4106_v22 = vpop.f32.mrf.mxu3  ;;  %4769 = vmatpush.msra.mxu1 %v4754_v32  ;;  %v4057_v37 = vadd.f32 %v4056_v6, %v4028_v49 }
 0x3a6   : > { %v4107_v42 = vadd.f32 %v4106_v22, %v4078_v58  ;;  %v4752_v58 = vld [vmem:[#allocation14 + $0xb0] sm:$0xff]  ;;  %v4751_v22 = vld [vmem:[#allocation14 + $0xa8] sm:$0xff] }
 0x3a7   : > { %4770 = vmatpush.msra.mxu1 %v4753_v17 }
 0x3a8   : > { %v4162_v35 = vadd.f32 %v4154_v56, %v4107_v42  ;;  %v3972_v42 = vadd.f32 %v17355_v20, %v3943_v29  ;;  %v4058_v63 = vpop.f32.mrf.mxu1  ;;  %v17362_v20 = vld [vmem:[#allocation34_spill] sm:$0xff] }
 0x3a9   : > { %4771 = vmatpush.msra.mxu1 %v4752_v58  ;;  %v4085_v15 = vpop.f32.mrf.mxu2 }
 0x3aa   : > { %v4174_v12 = vadd.f32 %v14460_v1, %v4162_v35  ;;  %v4001_v35 = vadd.f32 %v14411_v36, %v3972_v42  ;;  %v17363_v42 = vld [vmem:[#allocation36_spill] sm:$0xff] }
 0x3ab   : > { %4772 = vmatpush.msra.mxu1 %v4751_v22 }
 0x3ac   : > { %v4182_v62 = vmax.f32 %v4174_v12, 0.0  ;;  %v4029_v12 = vpop.f32.mrf.mxu0 }
 0x3ad   : > { %v4109_v45 = vpop.f32.mrf.mxu3  ;;  %4773 = vmatpush.msra.mxu1 %v4750_v27  ;;  %v4030_v19 = vadd.f32 %v4029_v12, %v4001_v35  ;;  %v4593_v27 = vld [vmem:[#allocation14 + $0x68] sm:$0xff]  ;;  %v4590_v35 = vld [vmem:[#allocation14 + $0x50] sm:$0xff]  ;;  %v4587_v12 = vld [vmem:[#allocation14 + $0x38] sm:$0xff] }
 0x3ae   : > { %v4110_v13 = vadd.f32 %v4109_v45, %v4081_v55  ;;  %v4188_v47 = vpack.c.bf16 %v4182_v62, %v4181_v31  ;;  %v4086_v55 = vadd.f32 %v4085_v15, %v4057_v37  ;;  %v4747_v62 = vld [vmem:[#allocation14 + $0x88] sm:$0xff]  ;;  %v4592_v15 = vld [vmem:[#allocation14 + $0x60] sm:$0xff]  ;;  %v4591_v37 = vld [vmem:[#allocation14 + $0x58] sm:$0xff] }
 0x3af   : > { %4774 = vmatpush.msra.mxu1 %v4749_v48  ;;  %v17358_v45 = vld [vmem:[#allocation28_spill] sm:$0xff]  ;;  %v17366_v48 = vld [vmem:[#allocation42_spill] sm:$0xff] }
 0x3b0   : > { %v4163_v51 = vadd.f32 %v4155_v50, %v4110_v13  ;;  %4268 = vmatmul.bf16.gmra.mxu0 %v4188_v47  ;;  %4379 = vmatmul.bf16.gmra.mxu1 %v4188_v47  ;;  %v4157_v7 = vmul.f32 %v14537_v8, %v17358_v45  ;;  %v4746_v50 = vld [vmem:[#allocation14 + $0x80] sm:$0xff] }
 0x3b1   : > { %4496 = vmatmul.bf16.gmra.mxu2 %v4188_v47  ;;  %4775 = vmatpush.msra.mxu1 %v4748_v11  ;;  %v4059_v47 = vadd.f32 %v4058_v63, %v4030_v19  ;;  %v4087_v24 = vpop.f32.mrf.mxu2  ;;  %v4585_v11 = vld [vmem:[#allocation14 + $0x28] sm:$0xff]  ;;  %v4584_v19 = vld [vmem:[#allocation14 + $0x20] sm:$0xff]  ;;  %v17368_v63 = vld [vmem:[#allocation45_spill] sm:$0xff] }
 0x3b2   : > { %v4175_v57 = vadd.f32 %v14460_v1, %v4163_v51  ;;  %v4150_v51 = vsel %vm17113_vm3, %v17361_v10, 0.0 }
 0x3b3   : > { %4776 = vmatpush.msra.mxu1 %v4747_v62  ;;  %v4088_v17 = vadd.f32 %v4087_v24, %v4059_v47  ;;  %v4158_v29 = vmul.f32 %v14543_v26, %v4150_v51  ;;  %v4581_v62 = vld [vmem:[#allocation14 + $0x8] sm:$0xff]  ;;  %v17371_v24 = vld [vmem:[#allocation51_spill] sm:$0xff] }
 0x3b4   : > { %v4183_v59 = vmax.f32 %v4175_v57, 0.0  ;;  %v4589_v57 = vld [vmem:[#allocation14 + $0x48] sm:$0xff] }
 0x3b5   : > { %v4111_v41 = vpop.f32.mrf.mxu3  ;;  %4777 = vmatpush.msra.mxu1 %v4746_v50  ;;  %v17370_v50 = vld [vmem:[#allocation49_spill] sm:$0xff] }
 0x3b6   : > { %v4112_v56 = vadd.f32 %v4111_v41, %v4083_v21 }
 0x3b8   : > { %v4164_v43 = vadd.f32 %v4156_v28, %v4112_v56  ;;  %v17364_v56 = vld [vmem:[#allocation38_spill] sm:$0xff]  ;;  %v4594_v28 = vld [vmem:[#allocation14 + $0x70] sm:$0xff] }
 0x3b9   : > { %4597 = vmatpush.msra.mxu3 %v4594_v28 }
 0x3ba   : > { %v4176_v61 = vadd.f32 %v14460_v1, %v4164_v43  ;;  %v4588_v43 = vld [vmem:[#allocation14 + $0x40] sm:$0xff] }
 0x3bb   : > { %4598 = vmatpush.msra.mxu3 %v4593_v27  ;;  %v17373_v27 = vld [vmem:[#allocation26_spill] sm:$0xff] }
 0x3bc   : > { %v4184_v31 = vmax.f32 %v4176_v61, 0.0  ;;  %v4586_v61 = vld [vmem:[#allocation14 + $0x30] sm:$0xff] }
 0x3bd   : > { %v4114_v36 = vpop.f32.mrf.mxu3  ;;  %4599 = vmatpush.msra.mxu3 %v4592_v15 }
 0x3be   : > { %v4115_v14 = vadd.f32 %v4114_v36, %v4086_v55  ;;  %v4189_v13 = vpack.c.bf16 %v4184_v31, %v4183_v59  ;;  %v17367_v55 = vld [vmem:[#allocation43_spill] sm:$0xff]  ;;  %v4583_v59 = vld [vmem:[#allocation14 + $0x18] sm:$0xff]  ;;  %v4582_v31 = vld [vmem:[#allocation14 + $0x10] sm:$0xff] }
 0x3bf   : > { %4600 = vmatpush.msra.mxu3 %v4591_v37  ;;  %v4580_v36 = vld [vmem:[#allocation14] sm:$0xff] }
 0x3c0   : > { %v4165_v32 = vadd.f32 %v4157_v7, %v4115_v14  ;;  %4273 = vmatmul.bf16.gmra.mxu0 %v4189_v13  ;;  %4384 = vmatmul.bf16.gmra.mxu1 %v4189_v13  ;;  %v17369_v14 = vld [vmem:[#allocation47_spill] sm:$0xff] }
 0x3c1   : > { %4501 = vmatmul.bf16.gmra.mxu2 %v4189_v13  ;;  %4601 = vmatpush.msra.mxu3 %v4590_v35 }
 0x3c2   : > { %v4177_v53 = vadd.f32 %v14460_v1, %v4165_v32 }
 0x3c3   : > { %4602 = vmatpush.msra.mxu3 %v4589_v57 }
 0x3c4   : > { %v4185_v49 = vmax.f32 %v4177_v53, 0.0  ;;  %v17372_v53 = vld [vmem:[#allocation54_spill] sm:$0xff] }
 0x3c5   : > { %v4116_v34 = vpop.f32.mrf.mxu3  ;;  %4603 = vmatpush.msra.mxu3 %v4588_v43 }
 0x3c6   : > { %v4117_v58 = vadd.f32 %v4116_v34, %v4088_v17 }
 0x3c7   : > { %4604 = vmatpush.msra.mxu3 %v4587_v12 }
 0x3c8   : > { %v4166_v6 = vadd.f32 %v4158_v29, %v4117_v58 }
 0x3c9   : > { %4605 = vmatpush.msra.mxu3 %v4586_v61 }
 0x3ca   : > { %v4178_v21 = vadd.f32 %v14460_v1, %v4166_v6  ;;  %v17365_v1 = vld [vmem:[#allocation40_spill] sm:$0xff] }
 0x3cb   : > { %4606 = vmatpush.msra.mxu3 %v4585_v11  ;;  %v17375_v11 = vld [vmem:[#allocation53_spill] sm:$0xff] }
 0x3cc   : > { %v4186_v22 = vmax.f32 %v4178_v21, 0.0 }
 0x3cd   : > { %4607 = vmatpush.msra.mxu3 %v4584_v19 }
 0x3ce   : > { %v4190_v41 = vpack.c.bf16 %v4186_v22, %v4185_v49  ;;  %v14568_v49 = vld [vmem:[%s16997_s13] ss:$0 sm:$0xff] }
 0x3cf   : > { %4608 = vmatpush.msra.mxu3 %v4583_v59 }
 0x3d0   : > { %4278 = vmatmul.bf16.gmra.mxu0 %v4190_v41  ;;  %4389 = vmatmul.bf16.gmra.mxu1 %v4190_v41 }
 0x3d1   : > { %4506 = vmatmul.bf16.gmra.mxu2 %v4190_v41  ;;  %4609 = vmatpush.msra.mxu3 %v4582_v31 }
 0x3d3   : > { %4610 = vmatpush.msra.mxu3 %v4581_v62 }
 0x3d5   : > { %4611 = vmatpush.msra.mxu3 %v4580_v36 }
 0x3e0   : > { %4778 = vmatmul.f32.vlgmr.msra.gmra.mxu1 %v17362_v20 }
 0x3e8   : > { %4781 = vmatmul.f32.gmra.mxu1 %v17363_v42 }
 0x3f0   : > { %4784 = vmatmul.f32.gmra.mxu1 %v17364_v56 }
 0x3f8   : > { %4787 = vmatmul.f32.gmra.mxu1 %v17365_v1 }
 0x400   : > { %4790 = vmatmul.f32.gmra.mxu1 %v17366_v48 }
 0x408   : > { %4793 = vmatmul.f32.gmra.mxu1 %v17367_v55 }
 0x410   : > { %4796 = vmatmul.f32.gmra.mxu1 %v17368_v63 }
 0x418   : > { %4799 = vmatmul.f32.gmra.mxu1 %v17369_v14 }
 0x41d   : > { %v4264_v45 = vpop.f32.mrf.mxu0  ;;  %v4375_v7 = vpop.f32.mrf.mxu1 }
 0x41e   : > { %v4403_v13 = vrot.slane %v4264_v45, 7  ;;  %v4520_v17 = vrot.slane %v4375_v7, 1 }
 0x420   : > { %4802 = vmatmul.f32.gmra.mxu1 %v17370_v50  ;;  %v4426_v47 = vsel %vm17111_vm5, 0.0, %v4403_v13 }
 0x421   : > { %v4427_v3 = vmul.f32 %v17371_v24, %v4426_v47 }
 0x424   : > { %v4492_v32 = vpop.f32.mrf.mxu2 }
 0x425   : > { %v4266_v10 = vpop.f32.mrf.mxu0  ;;  %v4377_v51 = vpop.f32.mrf.mxu1  ;;  %v4493_v6 = vadd.f32 %v4492_v32, %v4427_v3 }
 0x426   : > { %v4404_v34 = vrot.slane %v4266_v10, 7  ;;  %v4521_v29 = vrot.slane %v4377_v51, 1 }
 0x428   : > { %v4522_v58 = vsel %vm17113_vm3, %v4520_v17, %v4521_v29  ;;  %4805 = vmatmul.f32.gmra.mxu1 %v17372_v53  ;;  %v4405_v22 = vsel %vm17111_vm5, %v4403_v13, %v4404_v34  ;;  %v17377_v17 = vld [vmem:[#allocation66_spill] sm:$0xff] }
 0x429   : > { %v4544_v21 = vmul.f32 %v14430_v39, %v4522_v58  ;;  %v4428_v15 = vmul.f32 %v17373_v27, %v4405_v22 }
 0x42b   : > { %v4552_v41 = vadd.f32 %v4544_v21, %v4493_v6 }
 0x42c   : > { %v4494_v33 = vpop.f32.mrf.mxu2 }
 0x42d   : > { %v4564_v28 = vadd.f32 %v14568_v49, %v4552_v41  ;;  %v4269_v37 = vpop.f32.mrf.mxu0  ;;  %v4380_v35 = vpop.f32.mrf.mxu1  ;;  %v4495_v19 = vadd.f32 %v4494_v33, %v4428_v15 }
 0x42e   : > { %v4406_v57 = vrot.slane %v4269_v37, 7  ;;  %v4523_v43 = vrot.slane %v4380_v35, 1 }
 0x42f   : > { %v14573_v12 = vmax.f32 %v4564_v28, 0.0 }
 0x430   : > { %v4524_v61 = vsel %vm17113_vm3, %v4521_v29, %v4523_v43  ;;  %4808 = vmatmul.f32.gmra.mxu1 %v17375_v11  ;;  %v4407_v31 = vsel %vm17111_vm5, %v4404_v34, %v4406_v57 }
 0x431   : > { %17374 = vst [vmem:[#allocation33_spill] sm:$0xff] %v14573_v12  ;;  %v4545_v59 = vmul.f32 %v14454_v40, %v4524_v61  ;;  %4612 = vmatmul.f32.vlgmr.msra.gmra.mxu3 %v14573_v12  ;;  %v4429_v7 = vmul.f32 %v14401_v2, %v4407_v31 }
 0x433   : > { %v4553_v62 = vadd.f32 %v4545_v59, %v4495_v19 }
 0x434   : > { %v4497_v36 = vpop.f32.mrf.mxu2 }
 0x435   : > { %v4565_v45 = vadd.f32 %v14568_v49, %v4553_v62  ;;  %v14582_v13 = vpop.f32.mrf.mxu0  ;;  %v4382_v47 = vpop.f32.mrf.mxu1  ;;  %v4498_v29 = vadd.f32 %v4497_v36, %v4429_v7 }
 0x436   : > { %v17072_v32 = vrot.slane %v14582_v13, 7  ;;  %v4525_v3 = vrot.slane %v4382_v47, 1 }
 0x437   : > { %v14585_v10 = vmax.f32 %v4565_v45, 0.0 }
 0x438   : > { %v4526_v51 = vsel %vm17113_vm3, %v4523_v43, %v4525_v3  ;;  %4811 = vmatmul.f32.gmra.mxu1 %v17377_v17  ;;  %v4409_v58 = vsel %vm17111_vm5, %v4406_v57, %v17072_v32 }
 0x439   : > { %17376 = vst [vmem:[#allocation48_spill] sm:$0xff] %v14585_v10  ;;  %v4546_v34 = vmul.f32 %v14481_v23, %v4526_v51  ;;  %4615 = vmatmul.f32.gmra.mxu3 %v14585_v10  ;;  %v4430_v41 = vmul.f32 %v14424_v30, %v4409_v58  ;;  %v4883_v30 = vmul.f32 0.041666668, %v14445_v46 }
 0x43b   : > { %v4554_v6 = vadd.f32 %v4546_v34, %v4498_v29 }
 0x43c   : > { %v4499_v21 = vpop.f32.mrf.mxu2 }
 0x43d   : > { %v4566_v22 = vadd.f32 %v14568_v49, %v4554_v6  ;;  %v4274_v33 = vpop.f32.mrf.mxu0  ;;  %v4385_v28 = vpop.f32.mrf.mxu1  ;;  %v4500_v43 = vadd.f32 %v4499_v21, %v4430_v41 }
 0x43e   : > { %v4527_v15 = vrot.slane %v4385_v28, 1  ;;  %v4410_v28 = vrot.slane %v4274_v33, 7 }
 0x43f   : > { %v14596_v37 = vmax.f32 %v4566_v22, 0.0 }
 0x440   : > { %v4528_v35 = vsel %vm17113_vm3, %v4525_v3, %v4527_v15 }
 0x441   : > { %17378 = vst [vmem:[#allocation41_spill] sm:$0xff] %v14596_v37  ;;  %v4547_v61 = vmul.f32 %v14499_v4, %v4528_v35  ;;  %4618 = vmatmul.f32.gmra.mxu3 %v14596_v37 }
 0x443   : > { %v4555_v19 = vadd.f32 %v4547_v61, %v4500_v43 }
 0x444   : > { %v4502_v57 = vpop.f32.mrf.mxu2 }
 0x445   : > { %v4567_v59 = vadd.f32 %v14568_v49, %v4555_v19  ;;  %v4276_v31 = vpop.f32.mrf.mxu0  ;;  %v4387_v62 = vpop.f32.mrf.mxu1 }
 0x446   : > { %v4412_v51 = vrot.slane %v4276_v31, 7 }
 0x447   : > { %v14602_v36 = vmax.f32 %v4567_v59, 0.0  ;;  %v4529_v59 = vrot.slane %v4387_v62, 1  ;;  %v17380_v62 = vrot.slane %v14582_v13, 7 }
 0x448   : > { %v4413_v31 = vsel %vm17111_vm5, %v4410_v28, %v4412_v51 }
 0x449   : > { %17379 = vst [vmem:[#allocation46_spill] sm:$0xff] %v14602_v36  ;;  %4621 = vmatmul.f32.gmra.mxu3 %v14602_v36 }
 0x44a   : > { %4827 = vmatpush.xpose.msrb.mxu3 %v14602_v36 }
 0x44c   : > { %v4504_v45 = vpop.f32.mrf.mxu2 }
 0x44d   : > { %v4279_v7 = vpop.f32.mrf.mxu0  ;;  %v4390_v47 = vpop.f32.mrf.mxu1 }
 0x44e   : > { %4828 = vmatpush.xpose.msrb.mxu3 %v14596_v37  ;;  %v4414_v3 = vrot.slane %v4279_v7, 7  ;;  %v4531_v6 = vrot.slane %v4390_v47, 1 }
 0x450   : > { %v4415_v21 = vsel %vm17111_vm5, %v4412_v51, %v4414_v3  ;;  %v4411_v51 = vsel %vm17111_vm5, %v17380_v62, %v4410_v28 }
 0x451   : > { %v4433_v61 = vmul.f32 %v14488_v9, %v4415_v21 }
 0x452   : > { %4829 = vmatpush.xpose.msrb.mxu3 %v14585_v10 }
 0x454   : > { %v4507_v29 = vpop.f32.mrf.mxu2 }
 0x455   : > { %v4281_v34 = vpop.f32.mrf.mxu0  ;;  %v4392_v58 = vpop.f32.mrf.mxu1  ;;  %v4508_v32 = vadd.f32 %v4507_v29, %v4433_v61 }
 0x456   : > { %v4416_v22 = vrot.slane %v4281_v34, 7  ;;  %v4533_v41 = vrot.slane %v4392_v58, 1  ;;  %4830 = vmatpush.xpose.msrb.mxu3 %v14573_v12  ;;  %v4532_v34 = vsel %vm17113_vm3, %v4529_v59, %v4531_v6  ;;  %v4432_v58 = vmul.f32 %v14467_v60, %v4413_v31 }
 0x457   : > { %v4431_v31 = vmul.f32 %v14440_v16, %v4411_v51  ;;  %v5171_v51 = vld [vmem:[#allocation14 + $0x178] sm:$0xff]  ;;  %v4882_v60 = vmul.f32 0.041666668, %v14416_v38  ;;  %v14699_v16 = vadd.s32 88, %v14278_v25 }
 0x458   : > { %v4534_v35 = vsel %vm17113_vm3, %v4531_v6, %v4533_v41  ;;  %v4417_v43 = vsel %vm17111_vm5, %v4414_v3, %v4416_v22  ;;  %v4543_v7 = vsel %vm17113_vm3, %v4533_v41, 0.0  ;;  %v4549_v41 = vmul.f32 %v14527_v5, %v4532_v34  ;;  %5172 = vmatpush.msrb.mxu0 %v5171_v51  ;;  %v5321_v51 = vld [vmem:[#allocation14 + $0x1f0] sm:$0xff] }
 0x459   : > { %v4434_v19 = vmul.f32 %v14507_v18, %v4417_v43  ;;  %v4550_v47 = vmul.f32 %v14537_v8, %v4534_v35  ;;  %v4551_v3 = vmul.f32 %v14543_v26, %v4543_v7  ;;  %v4530_v6 = vsel %vm17113_vm3, %v4527_v15, %v4529_v59 }
 0x45a   : > { %5806 = vmatpush.xpose.msra.mxu3 %v14602_v36  ;;  %v4505_v29 = vadd.f32 %v4504_v45, %v4432_v58  ;;  %v4880_v26 = vmul.f32 0.041666668, %v14370_v52  ;;  %v4881_v5 = vmul.f32 0.041666668, %v14397_v0  ;;  %v4894_v27 = vfloor.f32 %v4882_v60 }
 0x45b   : > { %v4558_v35 = vadd.f32 %v4550_v47, %v4508_v32  ;;  %v4503_v32 = vadd.f32 %v4502_v57, %v4431_v31  ;;  %v5167_v31 = vld [vmem:[#allocation14 + $0x158] sm:$0xff] }
 0x45c   : > { %v4509_v33 = vpop.f32.mrf.mxu2  ;;  %v4557_v7 = vadd.f32 %v4549_v41, %v4505_v29  ;;  %v5170_v41 = vld [vmem:[#allocation14 + $0x170] sm:$0xff]  ;;  %v4906_v60 = vmul.f32 24.0, %v4894_v27 }
 0x45d   : > { %v4510_v21 = vadd.f32 %v4509_v33, %v4434_v19  ;;  %v4779_v22 = vpop.f32.mrf.mxu1  ;;  %v4548_v19 = vmul.f32 %v14517_v54, %v4530_v6  ;;  %v4570_v13 = vadd.f32 %v14568_v49, %v4558_v35  ;;  %v5169_v35 = vld [vmem:[#allocation14 + $0x168] sm:$0xff]  ;;  %5173 = vmatpush.msrb.mxu0 %v5170_v41  ;;  %v5166_v29 = vld [vmem:[#allocation14 + $0x150] sm:$0xff] }
 0x45e   : > { %5807 = vmatpush.xpose.msra.mxu3 %v14596_v37  ;;  %v4569_v45 = vadd.f32 %v14568_v49, %v4557_v7  ;;  %v5320_v41 = vld [vmem:[#allocation14 + $0x1e8] sm:$0xff] }
 0x45f   : > { %4831 = vmatmul.f32.vlgmr.msrb.gmra.mxu3 %v4779_v22  ;;  %v4559_v43 = vadd.f32 %v4551_v3, %v4510_v21  ;;  %v4556_v59 = vadd.f32 %v4548_v19, %v4503_v32  ;;  %v14638_v47 = vmax.f32 %v4570_v13, 0.0  ;;  %5174 = vmatpush.msrb.mxu0 %v5169_v35  ;;  %v5164_v19 = vld [vmem:[#allocation14 + $0x140] sm:$0xff]  ;;  %v5163_v13 = vld [vmem:[#allocation14 + $0x138] sm:$0xff]  ;;  %v5162_v32 = vld [vmem:[#allocation14 + $0x130] sm:$0xff] }
 0x460   : > { %v14643_v33 = vmax.f32 %v4569_v45, 0.0  ;;  %v5319_v35 = vld [vmem:[#allocation14 + $0x1e0] sm:$0xff] }
 0x461   : > { %v4571_v61 = vadd.f32 %v14568_v49, %v4559_v43  ;;  %17382 = vst [vmem:[#allocation28_spill] sm:$0xff] %v14638_v47  ;;  %v4568_v34 = vadd.f32 %v14568_v49, %v4556_v59  ;;  %v5168_v43 = vld [vmem:[#allocation14 + $0x160] sm:$0xff] }
 0x462   : > { %5808 = vmatpush.xpose.msra.mxu3 %v14585_v10  ;;  %17383 = vst [vmem:[#allocation35_spill] sm:$0xff] %v14643_v33  ;;  %5175 = vmatpush.msrb.mxu0 %v5168_v43  ;;  %v5160_v59 = vld [vmem:[#allocation14 + $0x120] sm:$0xff] }
 0x463   : > { %v14632_v28 = vmax.f32 %v4571_v61, 0.0  ;;  %v14647_v58 = vmax.f32 %v4568_v34, 0.0  ;;  %v5165_v61 = vld [vmem:[#allocation14 + $0x148] sm:$0xff]  ;;  %v5159_v34 = vld [vmem:[#allocation14 + $0x118] sm:$0xff] }
 0x464   : > { %5176 = vmatpush.msrb.mxu0 %v5167_v31  ;;  %v5317_v31 = vld [vmem:[#allocation14 + $0x1d0] sm:$0xff] }
 0x465   : > { %17381 = vst [vmem:[#allocation25_spill] sm:$0xff] %v14632_v28  ;;  %5364 = vmatpush.xpose.msrb.mxu2 %v14632_v28  ;;  %5539 = vmatpush.xpose.msrb.mxu1 %v14632_v28  ;;  %v4782_v15 = vpop.f32.mrf.mxu1 }
 0x466   : > { %5809 = vmatpush.xpose.msra.mxu3 %v14573_v12  ;;  %17384 = vst [vmem:[#allocation67_spill] sm:$0xff] %v14647_v58  ;;  %5177 = vmatpush.msrb.mxu0 %v5166_v29  ;;  %v5316_v29 = vld [vmem:[#allocation14 + $0x1c8] sm:$0xff] }
 0x467   : > { %4834 = vmatmul.f32.gmra.mxu3 %v4782_v15  ;;  %v5161_v15 = vld [vmem:[#allocation14 + $0x128] sm:$0xff] }
 0x468   : > { %5178 = vmatpush.msrb.mxu0 %v5165_v61  ;;  %v5315_v61 = vld [vmem:[#allocation14 + $0x1c0] sm:$0xff] }
 0x469   : > { %5365 = vmatpush.xpose.msrb.mxu2 %v14638_v47  ;;  %5540 = vmatpush.xpose.msrb.mxu1 %v14638_v47 }
 0x46a   : > { %5179 = vmatpush.msrb.mxu0 %v5164_v19 }
 0x46c   : > { %5180 = vmatpush.msrb.mxu0 %v5163_v13  ;;  %v5313_v13 = vld [vmem:[#allocation14 + $0x1b0] sm:$0xff] }
 0x46d   : > { %5366 = vmatpush.xpose.msrb.mxu2 %v14643_v33  ;;  %5541 = vmatpush.xpose.msrb.mxu1 %v14643_v33  ;;  %v4785_v57 = vpop.f32.mrf.mxu1 }
 0x46e   : > { %5181 = vmatpush.msrb.mxu0 %v5162_v32  ;;  %v5312_v32 = vld [vmem:[#allocation14 + $0x1a8] sm:$0xff] }
 0x46f   : > { %4837 = vmatmul.f32.gmra.mxu3 %v4785_v57  ;;  %v5158_v57 = vld [vmem:[#allocation14 + $0x110] sm:$0xff] }
 0x470   : > { %5182 = vmatpush.msrb.mxu0 %v5161_v15  ;;  %v5311_v15 = vld [vmem:[#allocation14 + $0x1a0] sm:$0xff] }
 0x471   : > { %5367 = vmatpush.xpose.msrb.mxu2 %v14647_v58  ;;  %5542 = vmatpush.xpose.msrb.mxu1 %v14647_v58 }
 0x472   : > { %5183 = vmatpush.msrb.mxu0 %v5160_v59 }
 0x474   : > { %5184 = vmatpush.msrb.mxu0 %v5159_v34  ;;  %v5309_v34 = vld [vmem:[#allocation14 + $0x190] sm:$0xff] }
 0x475   : > { %v4788_v3 = vpop.f32.mrf.mxu1 }
 0x476   : > { %5185 = vmatpush.msrb.mxu0 %v5158_v57  ;;  %v5308_v57 = vld [vmem:[#allocation14 + $0x188] sm:$0xff] }
 0x477   : > { %4840 = vmatmul.f32.gmra.mxu3 %v4788_v3  ;;  %v5157_v3 = vld [vmem:[#allocation14 + $0x108] sm:$0xff] }
 0x478   : > { %5186 = vmatpush.msrb.mxu0 %v5157_v3  ;;  %v5307_v3 = vld [vmem:[#allocation14 + $0x180] sm:$0xff] }
 0x47d   : > { %v4791_v21 = vpop.f32.mrf.mxu1 }
 0x47f   : > { %4843 = vmatmul.f32.gmra.mxu3 %v4791_v21  ;;  %v5156_v21 = vld [vmem:[#allocation14 + $0x100] sm:$0xff] }
 0x480   : > { %5187 = vmatpush.msrb.mxu0 %v5156_v21  ;;  %v5473_v21 = vld [vmem:[#allocation14 + $0x278] sm:$0xff] }
 0x485   : > { %v4794_v22 = vpop.f32.mrf.mxu1 }
 0x487   : > { %4846 = vmatmul.f32.gmra.mxu3 %v4794_v22 }
 0x48d   : > { %v4797_v49 = vpop.f32.mrf.mxu1 }
 0x48f   : > { %4849 = vmatmul.f32.gmra.mxu3 %v4797_v49 }
 0x495   : > { %v4800_v62 = vpop.f32.mrf.mxu1 }
 0x497   : > { %4852 = vmatmul.f32.gmra.mxu3 %v4800_v62  ;;  %v5322_v62 = vld [vmem:[#allocation14 + $0x1f8] sm:$0xff] }
 0x49d   : > { %v4803_v6 = vpop.f32.mrf.mxu1 }
 0x49f   : > { %4855 = vmatmul.f32.gmra.mxu3 %v4803_v6  ;;  %v5318_v6 = vld [vmem:[#allocation14 + $0x1d8] sm:$0xff] }
 0x4a5   : > { %v4806_v7 = vpop.f32.mrf.mxu1 }
 0x4a7   : > { %4858 = vmatmul.f32.gmra.mxu3 %v4806_v7  ;;  %v5314_v7 = vld [vmem:[#allocation14 + $0x1b8] sm:$0xff] }
 0x4ad   : > { %v4809_v45 = vpop.f32.mrf.mxu1 }
 0x4af   : > { %4861 = vmatmul.f32.gmra.mxu3 %v4809_v45  ;;  %v5310_v45 = vld [vmem:[#allocation14 + $0x198] sm:$0xff] }
 0x4b4   : > { %v4613_v22 = vpop.f32.mrf.mxu3 }
 0x4b5   : > { %4641 = vmatmul.f32.vlgmr.msra.gmra.mxu0 %v4613_v22  ;;  %v4812_v49 = vpop.f32.mrf.mxu1  ;;  %v5472_v22 = vld [vmem:[#allocation14 + $0x270] sm:$0xff] }
 0x4b6   : > { %5323 = vmatpush.msra.mxu0 %v5322_v62  ;;  %v5470_v62 = vld [vmem:[#allocation14 + $0x260] sm:$0xff] }
 0x4b7   : > { %4864 = vmatmul.f32.gmra.mxu3 %v4812_v49  ;;  %v5471_v49 = vld [vmem:[#allocation14 + $0x268] sm:$0xff] }
 0x4b8   : > { %5324 = vmatpush.msra.mxu0 %v5321_v51  ;;  %v5469_v51 = vld [vmem:[#allocation14 + $0x258] sm:$0xff] }
 0x4ba   : > { %5325 = vmatpush.msra.mxu0 %v5320_v41  ;;  %v5468_v41 = vld [vmem:[#allocation14 + $0x250] sm:$0xff] }
 0x4bc   : > { %v4616_v43 = vpop.f32.mrf.mxu3  ;;  %5326 = vmatpush.msra.mxu0 %v5319_v35 }
 0x4bd   : > { %4644 = vmatmul.f32.gmra.mxu0 %v4616_v43  ;;  %v5467_v43 = vld [vmem:[#allocation14 + $0x248] sm:$0xff] }
 0x4be   : > { %5327 = vmatpush.msra.mxu0 %v5318_v6  ;;  %v5466_v6 = vld [vmem:[#allocation14 + $0x240] sm:$0xff] }
 0x4c0   : > { %5328 = vmatpush.msra.mxu0 %v5317_v31  ;;  %v5465_v31 = vld [vmem:[#allocation14 + $0x238] sm:$0xff] }
 0x4c2   : > { %5329 = vmatpush.msra.mxu0 %v5316_v29  ;;  %v5464_v29 = vld [vmem:[#allocation14 + $0x230] sm:$0xff] }
 0x4c4   : > { %v4619_v19 = vpop.f32.mrf.mxu3  ;;  %5330 = vmatpush.msra.mxu0 %v5315_v61 }
 0x4c5   : > { %4647 = vmatmul.f32.gmra.mxu0 %v4619_v19  ;;  %v5463_v19 = vld [vmem:[#allocation14 + $0x228] sm:$0xff] }
 0x4c6   : > { %5331 = vmatpush.msra.mxu0 %v5314_v7  ;;  %v5462_v7 = vld [vmem:[#allocation14 + $0x220] sm:$0xff] }
 0x4c8   : > { %5332 = vmatpush.msra.mxu0 %v5313_v13  ;;  %v5461_v13 = vld [vmem:[#allocation14 + $0x218] sm:$0xff] }
 0x4ca   : > { %5333 = vmatpush.msra.mxu0 %v5312_v32  ;;  %v5460_v32 = vld [vmem:[#allocation14 + $0x210] sm:$0xff] }
 0x4cc   : > { %v4622_v59 = vpop.f32.mrf.mxu3  ;;  %5334 = vmatpush.msra.mxu0 %v5311_v15 }
 0x4cd   : > { %4650 = vmatmul.f32.gmra.mxu0 %v4622_v59  ;;  %v5459_v59 = vld [vmem:[#allocation14 + $0x208] sm:$0xff] }
 0x4ce   : > { %5335 = vmatpush.msra.mxu0 %v5310_v45  ;;  %v5458_v45 = vld [vmem:[#allocation14 + $0x200] sm:$0xff] }
 0x4d0   : > { %5336 = vmatpush.msra.mxu0 %v5309_v34 }
 0x4d2   : > { %5337 = vmatpush.msra.mxu0 %v5308_v57 }
 0x4d4   : > { %5338 = vmatpush.msra.mxu0 %v5307_v3 }
 0x4d5   : > { %5188 = vmatmul.f32.vlgmr.msrb.gmra.mxu0 %v14647_v58 }
 0x4d6   : > { %5474 = vmatpush.msrb.mxu0 %v5473_v21 }
 0x4d8   : > { %5475 = vmatpush.msrb.mxu0 %v5472_v22  ;;  %v17385_v22 = vlaneseq }
 0x4da   : > { %5476 = vmatpush.msrb.mxu0 %v5471_v49  ;;  %v4655_v49 = vand.u32 127, %v17385_v22 }
 0x4dc   : > { %5477 = vmatpush.msrb.mxu0 %v5470_v62  ;;  %v17386_v62 = vld [vmem:[#allocation31_spill] sm:$0xff] }
 0x4dd   : > { %5191 = vmatmul.f32.gmra.mxu0 %v14643_v33 }
 0x4de   : > { %5478 = vmatpush.msrb.mxu0 %v5469_v51  ;;  %v4876_v51 = vmul.f32 0.041666668, %v17386_v62 }
 0x4e0   : > { %5479 = vmatpush.msrb.mxu0 %v5468_v41  ;;  %v14677_v41 = vadd.s32 72, %v14278_v25  ;;  %v4888_v22 = vfloor.f32 %v4876_v51 }
 0x4e2   : > { %v14653_v35 = vpop.f32.mrf.mxu3  ;;  %5480 = vmatpush.msrb.mxu0 %v5467_v43  ;;  %v17387_v43 = vld [vmem:[#allocation29_spill] sm:$0xff]  ;;  %v4873_v8 = vcvt.s32.f32 %v14677_v41  ;;  %v4900_v41 = vmul.f32 24.0, %v4888_v22 }
 0x4e4   : > { %5481 = vmatpush.msrb.mxu0 %v5466_v6  ;;  %v4877_v6 = vmul.f32 0.041666668, %v17387_v43  ;;  %v4885_v23 = vmul.f32 0.041666668, %v4873_v8 }
 0x4e5   : > { %5194 = vmatmul.f32.gmra.mxu0 %v14638_v47 }
 0x4e6   : > { %5482 = vmatpush.msrb.mxu0 %v5465_v31  ;;  %v14681_v31 = vadd.s32 64, %v14278_v25  ;;  %v4889_v18 = vfloor.f32 %v4877_v6  ;;  %v4892_v6 = vfloor.f32 %v4880_v26 }
 0x4e8   : > { %5483 = vmatpush.msrb.mxu0 %v5464_v29  ;;  %v17388_v29 = vld [vmem:[#allocation50_spill] sm:$0xff]  ;;  %v4872_v9 = vcvt.s32.f32 %v14681_v31  ;;  %v4901_v2 = vmul.f32 24.0, %v4889_v18  ;;  %v4893_v31 = vfloor.f32 %v4881_v5 }
 0x4ea   : > { %v14656_v61 = vpop.f32.mrf.mxu3  ;;  %5484 = vmatpush.msrb.mxu0 %v5463_v19  ;;  %v4878_v19 = vmul.f32 0.041666668, %v17388_v29  ;;  %v4913_v26 = vsub.f32 %v17387_v43, %v4901_v2  ;;  %v17394_v2 = vmov 0  ;;  %v17398_v43 = vmov 0 }
 0x4ec   : > { %5485 = vmatpush.msrb.mxu0 %v5462_v7  ;;  %v14685_v7 = vadd.s32 80, %v14278_v25  ;;  %v4890_v54 = vfloor.f32 %v4878_v19  ;;  %v4884_v19 = vmul.f32 0.041666668, %v4872_v9  ;;  %vm14731_vm13 = vcmp.lt.f32.partialorder %v4913_v26, 17.5 }
 0x4ed   : > { %5197 = vmatmul.f32.gmra.mxu0 %v14632_v28  ;;  %v17399_v43 = vsel %vm14731_vm13, 4294967295, %v17398_v43 }
 0x4ee   : > { %5486 = vmatpush.msrb.mxu0 %v5461_v13  ;;  %v14687_v13 = vcvt.s32.f32 %v4655_v49  ;;  %v4874_v49 = vcvt.s32.f32 %v14685_v7  ;;  %v4902_v40 = vmul.f32 24.0, %v4890_v54  ;;  %v4875_v7 = vcvt.s32.f32 %v14699_v16 }
 0x4ef   : > { %v4896_v5 = vfloor.f32 %v4884_v19  ;;  %v17392_v16 = vmov 0 }
 0x4f0   : > { %5487 = vmatpush.msrb.mxu0 %v5460_v32  ;;  %17389 = vst [vmem:[#allocation29_spill] sm:$0xff] %v14687_v13  ;;  %v17390_v32 = vld [vmem:[#allocation56_spill] sm:$0xff]  ;;  %v4924_v4 = vmul.f32 0.125, %v14687_v13  ;;  %v4886_v39 = vmul.f32 0.041666668, %v4874_v49 }
 0x4f1   : > { %v14712_v28 = vmul.f32 0.041666668, %v4875_v7 }
 0x4f2   : > { %v14659_v15 = vpop.f32.mrf.mxu3  ;;  %5488 = vmatpush.msrb.mxu0 %v5459_v59  ;;  %v4879_v59 = vmul.f32 0.041666668, %v17390_v32  ;;  %v14705_v25 = vfloor.f32 %v4924_v4  ;;  %v4898_v44 = vfloor.f32 %v4886_v39 }
 0x4f4   : > { %5489 = vmatpush.msrb.mxu0 %v5458_v45  ;;  %v4891_v51 = vfloor.f32 %v4879_v59  ;;  %17391 = vst [vmem:[#allocation50_spill] sm:$0xff] %v14705_v25  ;;  %vm14715_vm10 = vcmp.eq.f32.partialorder %v4888_v22, %v14705_v25  ;;  %vm14726_vm12 = vcmp.eq.f32.partialorder %v4889_v18, %v14705_v25  ;;  %vm14736_vm14 = vcmp.eq.f32.partialorder %v4890_v54, %v14705_v25 }
 0x4f5   : > { %5339 = vmatmul.f32.vlgmr.msra.gmra.mxu0 %v14573_v12  ;;  %v4904_v12 = vmul.f32 24.0, %v4892_v6  ;;  %v17393_v16 = vsel %vm14715_vm10, 4294967295, %v17392_v16  ;;  %v17402_v18 = vmov 0  ;;  %v17404_v54 = vmov 0 }
 0x4f6   : > { %v4903_v24 = vmul.f32 24.0, %v4891_v51  ;;  %vm14752_vm1 = vcmp.eq.f32.partialorder %v4891_v51, %v14705_v25  ;;  %vm14766_vm8 = vcmp.eq.f32.partialorder %v4892_v6, %v14705_v25  ;;  %vm14779_vm5 = vcmp.eq.f32.partialorder %v4893_v31, %v14705_v25 }
 0x4f7   : > { %v4916_v39 = vsub.f32 %v14370_v52, %v4904_v12  ;;  %v4910_v52 = vmul.f32 24.0, %v4898_v44  ;;  %v4899_v12 = vfloor.f32 %v14712_v28  ;;  %v17405_v54 = vsel %vm14752_vm1, 4294967295, %v17404_v54 }
 0x4f8   : > { %v17410_v28 = vmov 0  ;;  %v17414_v51 = vmov 0  ;;  %vm14792_vm7 = vcmp.eq.f32.partialorder %v4894_v27, %v14705_v25  ;;  %v17418_v6 = vmov 0 }
 0x4f9   : > { %vm14770_vm9 = vcmp.lt.f32.partialorder %v4916_v39, 17.5  ;;  %v4911_v19 = vmul.f32 24.0, %v4899_v12  ;;  %v17422_v27 = vmov 0 }
 0x4fa   : > { %v14662_v34 = vpop.f32.mrf.mxu3  ;;  %v17411_v28 = vsel %vm14770_vm9, 4294967295, %v17410_v28  ;;  %vm4934_vm9 = vcmp.eq.f32.partialorder %v4896_v5, %v14705_v25 }
 0x4fd   : > { %5342 = vmatmul.f32.gmra.mxu0 %v14585_v10  ;;  %v4897_v10 = vfloor.f32 %v4885_v23 }
 0x4ff   : > { %v4909_v23 = vmul.f32 24.0, %v4897_v10  ;;  %vm4935_vm1 = vcmp.eq.f32.partialorder %v4897_v10, %v14705_v25  ;;  %v17424_v10 = vmov 0 }
 0x501   : > { %v4921_v22 = vsub.f32 %v4873_v8, %v4909_v23  ;;  %v17416_v8 = vmov 0 }
 0x502   : > { %v14665_v57 = vpop.f32.mrf.mxu3  ;;  %v17417_v8 = vsel %vm14792_vm7, 4294967295, %v17416_v8 }
 0x505   : > { %5345 = vmatmul.f32.gmra.mxu0 %v14596_v37  ;;  %v4912_v37 = vsub.f32 %v17386_v62, %v4900_v41 }
 0x507   : > { %vm14721_vm11 = vcmp.lt.f32.partialorder %v4912_v37, 17.5 }
 0x508   : > { %v17395_v2 = vsel %vm14721_vm11, 4294967295, %v17394_v2 }
 0x509   : > { %vm17426_vm0 = vnez %v17395_v2 }
 0x50a   : > { %v14668_v3 = vpop.f32.mrf.mxu3 }
 0x50d   : > { %5348 = vmatmul.f32.gmra.mxu0 %v14602_v36  ;;  %v4895_v36 = vfloor.f32 %v4883_v30  ;;  %v4915_v30 = vsub.f32 %v17390_v32, %v4903_v24  ;;  %v17400_v24 = vmov 0  ;;  %v4918_v32 = vsub.f32 %v14416_v38, %v4906_v60 }
 0x50e   : > { %v17401_v24 = vsel %vm14736_vm14, 4294967295, %v17400_v24  ;;  %vm4947_vm14 = vcmp.lt.f32.partialorder %v4921_v22, 17.5 }
 0x50f   : > { %v4907_v4 = vmul.f32 24.0, %v4895_v36  ;;  %vm14756_vm6 = vcmp.lt.f32.partialorder %v4915_v30, 17.5  ;;  %vm14796_vm4 = vcmp.lt.f32.partialorder %v4918_v32, 17.5  ;;  %v17441_v30 = vmov 0 }
 0x510   : > { %v17419_v6 = vsel %vm14796_vm4, 4294967295, %v17418_v6  ;;  %vm17427_vm4 = vmand %vm14715_vm10, %vm17426_vm0  ;;  %vm17436_vm10 = vnez %v17411_v28 }
 0x511   : > { %v14839_v26 = vsel %vm17427_vm4, %v14653_v35, -1e+30  ;;  %vm17433_vm4 = vnez %v17399_v43 }
 0x512   : > { %v14671_v21 = vpop.f32.mrf.mxu3 }
 0x515   : > { %5490 = vmatmul.f32.vlgmr.msrb.gmra.mxu0 %v17362_v20  ;;  %v4914_v20 = vsub.f32 %v17388_v29, %v4902_v40  ;;  %v17396_v40 = vmov 0  ;;  %v4908_v29 = vmul.f32 24.0, %v4896_v5 }
 0x516   : > { %v17397_v40 = vsel %vm14726_vm12, 4294967295, %v17396_v40  ;;  %vm4936_vm12 = vcmp.eq.f32.partialorder %v4898_v44, %v14705_v25 }
 0x517   : > { %vm14741_vm15 = vcmp.lt.f32.partialorder %v4914_v20, 17.5  ;;  %v4919_v20 = vsub.f32 %v14445_v46, %v4907_v4  ;;  %v17412_v46 = vmov 0  ;;  %v4920_v41 = vsub.f32 %v4872_v9, %v4908_v29 }
 0x518   : > { %v17403_v18 = vsel %vm14741_vm15, 4294967295, %v17402_v18  ;;  %v17413_v46 = vsel %vm14779_vm5, 4294967295, %v17412_v46  ;;  %vm14805_vm15 = vcmp.eq.f32.partialorder %v4895_v36, %v14705_v25  ;;  %v17420_v9 = vmov 0 }
 0x519   : > { %v17421_v9 = vsel %vm14805_vm15, 4294967295, %v17420_v9  ;;  %vm14809_vm3 = vcmp.lt.f32.partialorder %v4919_v20, 17.5  ;;  %v4923_v36 = vsub.f32 %v4875_v7, %v4911_v19  ;;  %v17429_v7 = vmov 0 }
 0x51a   : > { %v14690_v45 = vpop.f32.mrf.mxu3  ;;  %v17423_v27 = vsel %vm14809_vm3, 4294967295, %v17422_v27 }
 0x51d   : > { %5493 = vmatmul.f32.gmra.mxu0 %v17363_v42  ;;  %v4905_v42 = vmul.f32 24.0, %v4893_v31  ;;  %v4922_v31 = vsub.f32 %v4874_v49, %v4910_v52 }
 0x51f   : > { %v4917_v37 = vsub.f32 %v14397_v0, %v4905_v42  ;;  %v17406_v0 = vmov 0  ;;  %v17408_v42 = vmov 0  ;;  %vm4948_vm11 = vcmp.lt.f32.partialorder %v4922_v31, 17.5 }
 0x520   : > { %v17407_v0 = vsel %vm14756_vm6, 4294967295, %v17406_v0  ;;  %v17409_v42 = vsel %vm14766_vm8, 4294967295, %v17408_v42  ;;  %vm4946_vm8 = vcmp.lt.f32.partialorder %v4920_v41, 17.5  ;;  %vm14829_vm6 = vmand %vm4935_vm1, %vm4947_vm14  ;;  %vm17432_vm1 = vnez %v17397_v40 }
 0x521   : > { %vm14783_vm2 = vcmp.lt.f32.partialorder %v4917_v37, 17.5  ;;  %v17425_v10 = vsel %vm14829_vm6, 4294967295, %v17424_v10  ;;  %vm14849_vm14 = vmand %vm4934_vm9, %vm4946_vm8  ;;  %vm17435_vm7 = vnez %v17409_v42  ;;  %vm17438_vm8 = vnez %v17417_v8 }
 0x522   : > { %v14707_v59 = vpop.f32.mrf.mxu3  ;;  %v17415_v51 = vsel %vm14783_vm2, 4294967295, %v17414_v51  ;;  %vm17428_vm13 = vmand %vm14779_vm5, %vm14783_vm2  ;;  %v17430_v7 = vsel %vm14849_vm14, 4294967295, %v17429_v7  ;;  %vm17439_vm9 = vnez %v17419_v6 }
 0x523   : > { %v14847_v44 = vsel %vm17428_vm13, %v14668_v3, -1e+30  ;;  %17431 = vst [vmem:[#allocation56_spill] sm:$0xff] %v17430_v7  ;;  %vm17434_vm0 = vmand %vm17432_vm1, %vm17433_vm4 }
 0x524   : > { %v14859_v35 = vsel %vm17434_vm0, %v14656_v61, -1e+30  ;;  %vm17437_vm13 = vmand %vm17435_vm7, %vm17436_vm10 }
 0x525   : > { %5496 = vmatmul.f32.gmra.mxu0 %v17364_v56  ;;  %v14867_v3 = vsel %vm17437_vm13, %v14665_v57, -1e+30  ;;  %vm17440_vm2 = vmand %vm17438_vm8, %vm17439_vm9  ;;  %vm4937_vm13 = vcmp.eq.f32.partialorder %v4899_v12, %v14705_v25 }
 0x526   : > { %v14875_v60 = vsel %vm17440_vm2, %v14671_v21, -1e+30  ;;  %vm14877_vm5 = vmand %vm4936_vm12, %vm4948_vm11  ;;  %vm4949_vm2 = vcmp.lt.f32.partialorder %v4923_v36, 17.5  ;;  %vm17445_vm11 = vnez %v17401_v24  ;;  %vm17446_vm12 = vnez %v17403_v18 }
 0x527   : > { %v17442_v30 = vsel %vm14877_vm5, 4294967295, %v17441_v30  ;;  %vm17444_vm0 = vmand %vm14805_vm15, %vm14809_vm3  ;;  %vm17448_vm3 = vnez %v17405_v54 }
 0x528   : > { %17443 = vst [vmem:[#allocation68_spill] sm:$0xff] %v17442_v30  ;;  %v14887_v61 = vsel %vm17444_vm0, %v14690_v45, -1e+30  ;;  %vm17447_vm9 = vmand %vm17445_vm11, %vm17446_vm12  ;;  %vm17449_vm0 = vnez %v17407_v0  ;;  %v4657_v30 = vmul.f32 0.041666668, %v14687_v13 }
 0x529   : > { %v14900_v21 = vsel %vm17447_vm9, %v14659_v15, -1e+30  ;;  %vm17450_vm15 = vmand %vm17448_vm3, %vm17449_vm0  ;;  %v14918_v15 = vsel %vm14849_vm14, %v14707_v59, -1e+30 }
 0x52a   : > { %v4859_v38 = vpop.f32.mrf.mxu3  ;;  %v14908_v45 = vsel %vm17450_vm15, %v14662_v34, -1e+30  ;;  %vm14932_vm0 = vmand %vm4937_vm13, %vm4949_vm2 }
 0x52b   : > { %v14891_v57 = vsel %vm14829_vm6, %v4859_v38, -1e+30  ;;  %vm17451_vm6 = vcmask 261120  }
 0x52c   : > { %v5005_v4 = vsel %vm17451_vm6, %v14847_v44, -inf  ;;  %vm17452_vm8 = vmmov %vm17451_vm6  ;;  %v5009_v29 = vsel %vm17451_vm6, %v14887_v61, -inf }
 0x52d   : > { %5499 = vmatmul.f32.gmra.mxu0 %v17365_v1  ;;  %v5003_v39 = vsel %vm17452_vm8, %v14867_v3, -inf  ;;  %vm17453_vm15 = vmmov %vm17451_vm6 }
 0x52e   : > { %v5000_v34 = vsel %vm17453_vm15, %v14859_v35, -inf  ;;  %vm17454_vm9 = vmmov %vm17451_vm6 }
 0x52f   : > { %v5007_v37 = vsel %vm17454_vm9, %v14875_v60, -inf  ;;  %vm17455_vm8 = vmmov %vm17451_vm6  ;;  %v5006_v20 = vmax.f32 %v5000_v34, %v5005_v4  ;;  %v17525_v24 = vld [vmem:[#allocation68_spill] sm:$0xff] }
 0x530   : > { %v5013_v32 = vsel %vm17455_vm8, %v14891_v57, -inf  ;;  %vm17458_vm14 = vmmov %vm17451_vm6 }
 0x531   : > { %v4999_v59 = vsel %vm17458_vm14, %v14839_v26, -inf  ;;  %v5014_v62 = vmax.f32 %v5006_v20, %v5013_v32 }
 0x532   : > { %v4862_v49 = vpop.f32.mrf.mxu3  ;;  %v4642_v5 = vpop.f32.mrf.mxu0  ;;  %v5004_v22 = vmax.f32 %v4999_v59, %v5003_v39 }
 0x533   : > { %v14922_v23 = vsel %vm14877_vm5, %v4862_v49, -1e+30  ;;  %vm17459_vm5 = vmmov %vm17451_vm6 }
 0x534   : > { %v5001_v12 = vsel %vm17459_vm5, %v14900_v21, -inf  ;;  %vm17460_vm15 = vmmov %vm17459_vm5 }
 0x535   : > { %5502 = vmatmul.f32.gmra.mxu0 %v17366_v48  ;;  %v5002_v38 = vsel %vm17460_vm15, %v14908_v45, -inf  ;;  %vm17461_vm9 = vmmov %vm17459_vm5  ;;  %v5008_v36 = vmax.f32 %v5001_v12, %v5007_v37  ;;  %vm17160_vm15 = vcmask 785408  }
 0x536   : > { %v5011_v41 = vsel %vm17461_vm9, %v14918_v15, -inf  ;;  %vm17462_vm6 = vmmov %vm17459_vm5  ;;  %v5010_v49 = vmax.f32 %v5002_v38, %v5009_v29  ;;  %v14954_v29 = vfloor.f32 %v4657_v30  ;;  %v17464_v38 = vld [vmem:[#allocation39_spill] sm:$0xff]  ;;  %v17467_v30 = vld [vmem:[#allocation57_spill] sm:$0xff] }
 0x537   : > { %v5015_v31 = vsel %vm17462_vm6, %v14922_v23, -inf  ;;  %v5012_v34 = vmax.f32 %v5004_v22, %v5011_v41  ;;  %v17465_v22 = vld [vmem:[#allocation37_spill] sm:$0xff]  ;;  %vm17468_vm9 = vmmov %vm17459_vm5 }
 0x538   : > { %v5016_v39 = vmax.f32 %v5008_v36, %v5015_v31  ;;  %17463 = vst [vmem:[#allocation69_spill] sm:$0xff] %v14954_v29  ;;  %vm17163_vm14 = vcmp.eq.f32.partialorder %v17464_v38, %v14954_v29  ;;  %vm17162_vm13 = vcmp.eq.f32.partialorder %v17465_v22, %v14954_v29  ;;  %vm17159_vm8 = vcmp.eq.f32.partialorder %v17467_v30, %v14954_v29  ;;  %vm17469_vm6 = vmmov %vm17459_vm5 }
 0x539   : > { %v5019_v1 = vmax.f32 %v5012_v34, %v5014_v62  ;;  %v17466_v62 = vld [vmem:[#allocation44_spill] sm:$0xff]  ;;  %v14973_v31 = vsel %vm17162_vm13, %v4642_v5, -1e+30 }
 0x53a   : > { %v4865_v19 = vpop.f32.mrf.mxu3  ;;  %v4645_v56 = vpop.f32.mrf.mxu0  ;;  %vm17161_vm2 = vcmp.eq.f32.partialorder %v17466_v62, %v14954_v29  ;;  %v4670_v5 = vsel %vm17160_vm15, %v14973_v31, -inf }
 0x53b   : > { %v14948_v48 = vsel %vm14932_vm0, %v4865_v19, -1e+30 }
 0x53c   : > { %v5017_v4 = vsel %vm17459_vm5, %v14948_v48, -inf }
 0x53d   : > { %v5018_v59 = vmax.f32 %v5010_v49, %v5017_v4  ;;  %5505 = vmatmul.f32.gmra.mxu0 %v17367_v55 }
 0x53f   : > { %v5020_v7 = vmax.f32 %v5016_v39, %v5018_v59 }
 0x541   : > { %v5021_v37 = vmax.f32 %v5019_v1, %v5020_v7  ;;  %v14966_v1 = vsel %vm17163_vm14, %v4645_v56, -1e+30 }
 0x542   : > { %v4648_v12 = vpop.f32.mrf.mxu0  ;;  %v4671_v56 = vsel %vm17160_vm15, %v14966_v1, -inf }
 0x543   : > { %v5022_v32 = vrot.slane %v5021_v37, 4  ;;  %v14978_v19 = vsel %vm17161_vm2, %v4648_v12, -1e+30 }
 0x544   : > { %v4672_v39 = vsel %vm17160_vm15, %v14978_v19, -inf }
 0x545   : > { %v5023_v20 = vmax.f32 %v5021_v37, %v5022_v32  ;;  %5508 = vmatmul.f32.gmra.mxu0 %v17368_v63  ;;  %v4674_v37 = vmax.f32 %v4670_v5, %v4671_v56 }
 0x547   : > { %v5024_v41 = vrot.slane %v5023_v20, 2 }
 0x549   : > { %v5025_v7 = vmax.f32 %v5023_v20, %v5024_v41 }
 0x54a   : > { %v4651_v49 = vpop.f32.mrf.mxu0 }
 0x54b   : > { %v5026_v36 = vrot.slane %v5025_v7, 1  ;;  %v14985_v4 = vsel %vm17159_vm8, %v4651_v49, -1e+30 }
 0x54c   : > { %v4673_v59 = vsel %vm17160_vm15, %v14985_v4, -inf }
 0x54d   : > { %v14989_v34 = vmax.f32 %v5025_v7, %v5026_v36  ;;  %v4675_v32 = vmax.f32 %v4672_v39, %v4673_v59  ;;  %5511 = vmatmul.f32.gmra.mxu0 %v17369_v14 }
 0x54f   : > { %v5028_v12 = vsub.f32 %v14839_v26, %v14989_v34  ;;  %v5029_v20 = vsub.f32 %v14859_v35, %v14989_v34  ;;  %v5030_v41 = vsub.f32 %v14900_v21, %v14989_v34  ;;  %v4676_v7 = vmax.f32 %v4674_v37, %v4675_v32  ;;  %v5764_v32 = vld [vmem:[#allocation14 + $0x2f8] sm:$0xff] }
 0x550   : > { %v5031_v36 = vsub.f32 %v14908_v45, %v14989_v34  ;;  %v5032_v49 = vsub.f32 %v14867_v3, %v14989_v34  ;;  %v5033_v59 = vsub.f32 %v14847_v44, %v14989_v34  ;;  %v5034_v21 = vsub.f32 %v14875_v60, %v14989_v34 }
 0x551   : > { %v4677_v56 = vrot.slane %v4676_v7, 4  ;;  %v5040_v5 = vmul.f32 1.442695, %v5028_v12  ;;  %v5042_v26 = vmul.f32 1.442695, %v5029_v20  ;;  %v5035_v45 = vsub.f32 %v14887_v61, %v14989_v34 }
 0x552   : > { %v5189_v39 = vpop.f32.mrf.mxu0  ;;  %v5044_v63 = vmul.f32 1.442695, %v5030_v41  ;;  %v5046_v14 = vmul.f32 1.442695, %v5031_v36  ;;  %v5048_v3 = vmul.f32 1.442695, %v5032_v49  ;;  %v5036_v44 = vsub.f32 %v14918_v15, %v14989_v34 }
 0x553   : > { %v4678_v35 = vmax.f32 %v4676_v7, %v4677_v56  ;;  %5217 = vmatmul.f32.vlgmr.msra.gmra.mxu2 %v5189_v39  ;;  %12671 = vpow2.f32 %v5040_v5  ;;  %v5050_v12 = vmul.f32 1.442695, %v5033_v59  ;;  %v5037_v60 = vsub.f32 %v14891_v57, %v14989_v34  ;;  %v5763_v7 = vld [vmem:[#allocation14 + $0x2f0] sm:$0xff]  ;;  %v5762_v15 = vld [vmem:[#allocation14 + $0x2e8] sm:$0xff] }
 0x554   : > { %12673 = vpow2.f32 %v5042_v26  ;;  %5765 = vmatpush.msra.mxu2 %v5764_v32  ;;  %v5052_v41 = vmul.f32 1.442695, %v5034_v21  ;;  %v5038_v61 = vsub.f32 %v14922_v23, %v14989_v34  ;;  %v5054_v36 = vmul.f32 1.442695, %v5035_v45  ;;  %v5761_v21 = vld [vmem:[#allocation14 + $0x2e0] sm:$0xff] }
 0x555   : > { %v4679_v37 = vrot.slane %v4678_v35, 2  ;;  %5514 = vmatmul.f32.gmra.mxu0 %v17370_v50  ;;  %12675 = vpow2.f32 %v5044_v63  ;;  %v5056_v5 = vmul.f32 1.442695, %v5036_v44  ;;  %v5058_v23 = vmul.f32 1.442695, %v5037_v60  ;;  %v5760_v60 = vld [vmem:[#allocation14 + $0x2d8] sm:$0xff] }
 0x556   : > { %12677 = vpow2.f32 %v5046_v14  ;;  %5766 = vmatpush.msra.mxu2 %v5763_v7  ;;  %v5060_v45 = vmul.f32 1.442695, %v5038_v61  ;;  %v5039_v7 = vsub.f32 %v14948_v48, %v14989_v34  ;;  %v5759_v61 = vld [vmem:[#allocation14 + $0x2d0] sm:$0xff]  ;;  %v5758_v48 = vld [vmem:[#allocation14 + $0x2c8] sm:$0xff] }
 0x557   : > { %v4680_v20 = vmax.f32 %v4678_v35, %v4679_v37  ;;  %12679 = vpow2.f32 %v5048_v3 }
 0x558   : > { %12681 = vpow2.f32 %v5050_v12  ;;  %5767 = vmatpush.msra.mxu2 %v5762_v15 }
 0x559   : > { %v15019_v49 = vpop.eup %12671  ;;  %v4681_v63 = vrot.slane %v4680_v20, 1  ;;  %12683 = vpow2.f32 %v5052_v41 }
 0x55a   : > { %v15021_v56 = vpop.eup %12673  ;;  %v5192_v14 = vpop.f32.mrf.mxu0  ;;  %v5064_v57 = vsel %vm17468_vm9, %v15019_v49, 0.0  ;;  %12685 = vpow2.f32 %v5054_v36  ;;  %5768 = vmatpush.msra.mxu2 %v5761_v21  ;;  %vm17470_vm9 = vmmov %vm17459_vm5  ;;  %v5757_v21 = vld [vmem:[#allocation14 + $0x2c0] sm:$0xff] }
 0x55b   : > { %v15025_v39 = vpop.eup %12675  ;;  %v4682_v59 = vmax.f32 %v4680_v20, %v4681_v63  ;;  %5220 = vmatmul.f32.gmra.mxu2 %v5192_v14  ;;  %v5065_v26 = vsel %vm17469_vm6, %v15021_v56, 0.0  ;;  %12687 = vpow2.f32 %v5056_v5  ;;  %vm17471_vm6 = vmmov %vm17459_vm5 }
 0x55c   : > { %v15029_v35 = vpop.eup %12677  ;;  %v5066_v3 = vadd.f32 %v5065_v26, %v5064_v57  ;;  %v5067_v37 = vsel %vm17459_vm5, %v15025_v39, 0.0  ;;  %12689 = vpow2.f32 %v5058_v23  ;;  %5769 = vmatpush.msra.mxu2 %v5760_v60 }
 0x55d   : > { %v4683_v32 = vsub.f32 %v14973_v31, %v4682_v59  ;;  %v4684_v44 = vsub.f32 %v14966_v1, %v4682_v59  ;;  %v4685_v12 = vsub.f32 %v14978_v19, %v4682_v59  ;;  %v4686_v20 = vsub.f32 %v14985_v4, %v4682_v59  ;;  %5517 = vmatmul.f32.gmra.mxu0 %v17372_v53  ;;  %v15038_v41 = vpop.eup %12679 }
 0x55e   : > { %v5068_v36 = vadd.f32 %v5067_v37, %v5066_v3  ;;  %v5069_v31 = vsel %vm17470_vm9, %v15029_v35, 0.0  ;;  %v15044_v4 = vpop.eup %12681  ;;  %12691 = vpow2.f32 %v5060_v45  ;;  %v5071_v34 = vsel %vm17471_vm6, %v15038_v41, 0.0  ;;  %5770 = vmatpush.msra.mxu2 %v5759_v61  ;;  %vm17472_vm9 = vmmov %vm17459_vm5  ;;  %v5755_v61 = vld [vmem:[#allocation14 + $0x2b0] sm:$0xff] }
 0x55f   : > { %v4687_v1 = vmul.f32 1.442695, %v4683_v32  ;;  %v4689_v63 = vmul.f32 1.442695, %v4684_v44  ;;  %v4691_v19 = vmul.f32 1.442695, %v4685_v12  ;;  %v15046_v57 = vpop.eup %12683  ;;  %vm17473_vm6 = vmmov %vm17459_vm5 }
 0x560   : > { %v4693_v14 = vmul.f32 1.442695, %v4686_v20  ;;  %v5070_v15 = vadd.f32 %v5069_v31, %v5068_v36  ;;  %v15050_v5 = vpop.eup %12685  ;;  %v5062_v59 = vmul.f32 1.442695, %v5039_v7  ;;  %v5073_v45 = vsel %vm17459_vm5, %v15044_v4, 0.0  ;;  %5771 = vmatpush.msra.mxu2 %v5758_v48  ;;  %v5756_v44 = vld [vmem:[#allocation14 + $0x2b8] sm:$0xff] }
 0x561   : > { %12693 = vpow2.f32 %v4687_v1  ;;  %v15054_v3 = vpop.eup %12687  ;;  %v5075_v12 = vsel %vm17472_vm9, %v15046_v57, 0.0  ;;  %v5077_v36 = vsel %vm17473_vm6, %v15050_v5, 0.0  ;;  %vm17474_vm9 = vmmov %vm17459_vm5 }
 0x562   : > { %12695 = vpow2.f32 %v4689_v63  ;;  %v5195_v26 = vpop.f32.mrf.mxu0  ;;  %v5072_v23 = vadd.f32 %v5071_v34, %v5070_v15  ;;  %v15056_v32 = vpop.eup %12689  ;;  %5772 = vmatpush.msra.mxu2 %v5757_v21  ;;  %v5754_v15 = vld [vmem:[#allocation14 + $0x2a8] sm:$0xff]  ;;  %v5079_v48 = vsel %vm17459_vm5, %v15054_v3, 0.0  ;;  %vm17475_vm6 = vmmov %vm17459_vm5 }
 0x563   : > { %12697 = vpow2.f32 %v4691_v19  ;;  %5223 = vmatmul.f32.gmra.mxu2 %v5195_v26 }
 0x564   : > { %12699 = vpow2.f32 %v4693_v14  ;;  %v5074_v37 = vadd.f32 %v5073_v45, %v5072_v23  ;;  %v15061_v20 = vpop.eup %12691  ;;  %5773 = vmatpush.msra.mxu2 %v5756_v44  ;;  %v5753_v45 = vld [vmem:[#allocation14 + $0x2a0] sm:$0xff] }
 0x565   : > { %5520 = vmatmul.f32.gmra.mxu0 %v17375_v11  ;;  %12701 = vpow2.f32 %v5062_v59 }
 0x566   : > { %v5076_v60 = vadd.f32 %v5075_v12, %v5074_v37  ;;  %5774 = vmatpush.msra.mxu2 %v5755_v61  ;;  %v5081_v37 = vsel %vm17474_vm9, %v15056_v32, 0.0  ;;  %v5752_v61 = vld [vmem:[#allocation14 + $0x298] sm:$0xff] }
 0x567   : > { %v15063_v7 = vpop.eup %12693 }
 0x568   : > { %v15067_v31 = vpop.eup %12695  ;;  %v4695_v1 = vsel %vm17160_vm15, %v15063_v7, 0.0  ;;  %v5078_v63 = vadd.f32 %v5077_v36, %v5076_v60  ;;  %5775 = vmatpush.msra.mxu2 %v5754_v15 }
 0x569   : > { %v15071_v19 = vpop.eup %12697  ;;  %v4696_v14 = vsel %vm17160_vm15, %v15067_v31, 0.0 }
 0x56a   : > { %v15077_v34 = vpop.eup %12699  ;;  %v4697_v59 = vadd.f32 %v4696_v14, %v4695_v1  ;;  %v5198_v26 = vpop.f32.mrf.mxu0  ;;  %v5080_v23 = vadd.f32 %v5079_v48, %v5078_v63  ;;  %v4698_v21 = vsel %vm17160_vm15, %v15071_v19, 0.0  ;;  %v5083_v1 = vsel %vm17475_vm6, %v15061_v20, 0.0  ;;  %5776 = vmatpush.msra.mxu2 %v5753_v45 }
 0x56b   : > { %5226 = vmatmul.f32.gmra.mxu2 %v5198_v26  ;;  %v15083_v44 = vpop.eup %12701  ;;  %v4700_v36 = vsel %vm17160_vm15, %v15077_v34, 0.0  ;;  %v5751_v26 = vld [vmem:[#allocation14 + $0x290] sm:$0xff] }
 0x56c   : > { %v4699_v12 = vadd.f32 %v4698_v21, %v4697_v59  ;;  %v5082_v60 = vadd.f32 %v5081_v37, %v5080_v23  ;;  %v5085_v48 = vsel %vm17459_vm5, %v15083_v44, 0.0  ;;  %5777 = vmatpush.msra.mxu2 %v5752_v61  ;;  %v5750_v37 = vld [vmem:[#allocation14 + $0x288] sm:$0xff] }
 0x56d   : > { %5523 = vmatmul.f32.gmra.mxu0 %v17377_v17  ;;  %v5749_v17 = vld [vmem:[#allocation14 + $0x280] sm:$0xff] }
 0x56e   : > { %v4701_v63 = vadd.f32 %v4700_v36, %v4699_v12  ;;  %v5084_v14 = vadd.f32 %v5083_v1, %v5082_v60  ;;  %5778 = vmatpush.msra.mxu2 %v5751_v26 }
 0x570   : > { %v4702_v11 = vrot.slane %v4701_v63, 4  ;;  %v5086_v15 = vadd.f32 %v5085_v48, %v5084_v14  ;;  %5779 = vmatpush.msra.mxu2 %v5750_v37 }
 0x572   : > { %v4703_v59 = vadd.f32 %v4702_v11, %v4701_v63  ;;  %v5340_v23 = vpop.f32.mrf.mxu0  ;;  %v5087_v21 = vrot.slane %v5086_v15, 4  ;;  %5780 = vmatpush.msra.mxu2 %v5749_v17 }
 0x573   : > { %5368 = vmatmul.f32.vlgmr.msrb.gmra.mxu2 %v5340_v23 }
 0x574   : > { %v4704_v50 = vrot.slane %v4703_v59, 2  ;;  %v5088_v53 = vadd.f32 %v5087_v21, %v5086_v15 }
 0x576   : > { %v4705_v12 = vadd.f32 %v4704_v50, %v4703_v59  ;;  %v5089_v45 = vrot.slane %v5088_v53, 2 }
 0x578   : > { %v4706_v60 = vrot.slane %v4705_v12, 1  ;;  %v5090_v36 = vadd.f32 %v5089_v45, %v5088_v53 }
 0x57a   : > { %v4707_v1 = vadd.f32 %v4706_v60, %v4705_v12  ;;  %v5343_v55 = vpop.f32.mrf.mxu0  ;;  %v5091_v13 = vrot.slane %v5090_v36, 1 }
 0x57b   : > { %5371 = vmatmul.f32.gmra.mxu2 %v5343_v55 }
 0x57c   : > { %12703 = vrcp.f32 %v4707_v1  ;;  %v5092_v11 = vadd.f32 %v5091_v13, %v5090_v36  ;;  %v4719_v23 = vand.u32 2147483648, %v4707_v1  ;;  %v4717_v17 = vand.u32 2147483647, %v4707_v1 }
 0x57d   : > { %vm4713_vm5 = vweird.f32 %v4707_v1 }
 0x57e   : > { %12705 = vrcp.f32 %v5092_v11  ;;  %v5102_v53 = vand.u32 2147483647, %v5092_v11  ;;  %v5104_v21 = vand.u32 2147483648, %v5092_v11  ;;  %v4720_v12 = vor.u32 1.1754944e-38, %v4719_v23 }
 0x57f   : > { %vm5098_vm15 = vweird.f32 %v5092_v11  ;;  %vm4718_vm2 = vcmp.eq.f32.partialorder %v4717_v17, 8.507059e+37 }
 0x580   : > { %vm5103_vm14 = vcmp.eq.f32.partialorder %v5102_v53, 8.507059e+37  ;;  %v5105_v36 = vor.u32 1.1754944e-38, %v5104_v21 }
 0x582   : > { %v12704_v61 = vpop.eup %12703  ;;  %v5346_v63 = vpop.f32.mrf.mxu0 }
 0x583   : > { %5374 = vmatmul.f32.gmra.mxu2 %v5346_v63  ;;  %v4709_v14 = vmul.f32 %v12704_v61, %v4707_v1  ;;  %vm4714_vm9 = vweird.f32 %v12704_v61 }
 0x584   : > { %v12706_v48 = vpop.eup %12705  ;;  %vm4715_vm8 = vmor %vm4713_vm5, %vm4714_vm9  ;;  %vm17484_vm9 = vcmp.eq.f32.partialorder %v17464_v38, %v14954_v29  ;;  %vm17486_vm5 = vcmp.eq.f32.partialorder %v17466_v62, %v14954_v29 }
 0x585   : > { %v5094_v26 = vmul.f32 %v12706_v48, %v5092_v11  ;;  %v4710_v15 = vsub.f32 1.0, %v4709_v14  ;;  %vm5099_vm6 = vweird.f32 %v12706_v48 }
 0x586   : > { %vm5100_vm13 = vmor %vm5098_vm15, %vm5099_vm6  ;;  %vm17485_vm6 = vcmp.eq.f32.partialorder %v17465_v22, %v14954_v29 }
 0x587   : > { %v5095_v50 = vsub.f32 1.0, %v5094_v26  ;;  %v4711_v59 = vmul.f32 %v12704_v61, %v4710_v15 }
 0x589   : > { %v5096_v37 = vmul.f32 %v12706_v48, %v5095_v50  ;;  %v4712_v55 = vadd.f32 %v12704_v61, %v4711_v59 }
 0x58a   : > { %v5349_v13 = vpop.f32.mrf.mxu0 }
 0x58b   : > { %5377 = vmatmul.f32.gmra.mxu2 %v5349_v13  ;;  %v5097_v45 = vadd.f32 %v12706_v48, %v5096_v37  ;;  %v4716_v60 = vsel %vm4715_vm8, %v12704_v61, %v4712_v55 }
 0x58c   : > { %v4721_v63 = vsel %vm4718_vm2, %v4720_v12, %v4716_v60 }
 0x58d   : > { %v5101_v14 = vsel %vm5100_vm13, %v12706_v48, %v5097_v45  ;;  %v15093_v26 = vmul.f32 %v15077_v34, %v4721_v63  ;;  %v15096_v15 = vmul.f32 %v15063_v7, %v4721_v63  ;;  %v15099_v1 = vmul.f32 %v15067_v31, %v4721_v63 }
 0x58e   : > { %v5106_v23 = vsel %vm5103_vm14, %v5105_v36, %v5101_v14  ;;  %v15102_v50 = vmul.f32 %v15071_v19, %v4721_v63  ;;  %vm17478_vm14 = vcmask 261120  }
 0x58f   : > { %17476 = vst [vmem:[#allocation39_spill] sm:$0xff] %v15099_v1  ;;  %v5109_v11 = vmul.f32 %v15025_v39, %v5106_v23  ;;  %v5107_v61 = vmul.f32 %v15019_v49, %v5106_v23  ;;  %v5110_v59 = vmul.f32 %v15029_v35, %v5106_v23  ;;  %v5108_v48 = vmul.f32 %v15021_v56, %v5106_v23  ;;  %vm17479_vm13 = vmmov %vm17478_vm14 }
 0x590   : > { %17477 = vst [vmem:[#allocation37_spill] sm:$0xff] %v15102_v50  ;;  %v5111_v34 = vmul.f32 %v15038_v41, %v5106_v23  ;;  %v15110_v7 = vmul.f32 %v15044_v4, %v5106_v23  ;;  %v15113_v31 = vmul.f32 %v15056_v32, %v5106_v23  ;;  %v15116_v17 = vmul.f32 %v15046_v57, %v5106_v23  ;;  %vm17480_vm2 = vmmov %vm17479_vm13 }
 0x591   : > { %v5125_v19 = vsel %vm17478_vm14, %v5109_v11, 0.0  ;;  %v5119_v39 = vsel %vm17479_vm13, %v5107_v61, 0.0  ;;  %v15122_v56 = vmul.f32 %v15061_v20, %v5106_v23  ;;  %v15125_v35 = vmul.f32 %v15050_v5, %v5106_v23  ;;  %vm17481_vm8 = vmmov %vm17480_vm2 }
 0x592   : > { %5126 = vadd.xlane.f32.xlu2 %v5125_v19  ;;  %5120 = vadd.xlane.f32.xlu0 %v5119_v39  ;;  %v5491_v49 = vpop.f32.mrf.mxu0  ;;  %v15128_v41 = vmul.f32 %v15083_v44, %v5106_v23  ;;  %v15131_v4 = vmul.f32 %v15054_v3, %v5106_v23  ;;  %v5128_v57 = vsel %vm17480_vm2, %v5110_v59, 0.0  ;;  %v5122_v32 = vsel %vm17481_vm8, %v5108_v48, 0.0  ;;  %vm17482_vm15 = vmmov %vm17480_vm2  ;;  %v17483_v3 = vld [vmem:[#allocation25_spill] sm:$0xff] }
 0x593   : > { %5543 = vmatmul.f32.vlgmr.msrb.gmra.mxu1 %v5491_v49  ;;  %5781 = vmatmul.f32.vlgmr.msra.gmra.mxu2 %v14647_v58  ;;  %v5131_v20 = vsel %vm17482_vm15, %v5111_v34, 0.0  ;;  %vm17487_vm14 = vcmask 785408   ;;  %vm17488_vm13 = vcmp.eq.f32.partialorder %v17467_v30, %v14954_v29 }
 0x594   : > { %vm17489_vm2 = vmmov %vm17487_vm14 }
 0x595   : > { %vm17490_vm8 = vmmov %vm17489_vm2 }
 0x596   : > { %vm17491_vm15 = vmmov %vm17489_vm2 }
 0x59a   : > { %5129 = vadd.xlane.f32.xlu2 %v5128_v57  ;;  %5123 = vadd.xlane.f32.xlu0 %v5122_v32  ;;  %v5494_v53 = vpop.f32.mrf.mxu0 }
 0x59b   : > { %5546 = vmatmul.f32.gmra.mxu1 %v5494_v53  ;;  %5784 = vmatmul.f32.gmra.mxu2 %v14643_v33 }
 0x5a2   : > { %5132 = vadd.xlane.f32.xlu2 %v5131_v20  ;;  %v5497_v5 = vpop.f32.mrf.mxu0 }
 0x5a3   : > { %5549 = vmatmul.f32.gmra.mxu1 %v5497_v5  ;;  %5787 = vmatmul.f32.gmra.mxu2 %v14638_v47 }
 0x5aa   : > { %v5500_v44 = vpop.f32.mrf.mxu0 }
 0x5ab   : > { %5552 = vmatmul.f32.gmra.mxu1 %v5500_v44  ;;  %5790 = vmatmul.f32.gmra.mxu2 %v17483_v3 }
 0x5b2   : > { %v5503_v21 = vpop.f32.mrf.mxu0 }
 0x5b3   : > { %5555 = vmatmul.f32.gmra.mxu1 %v5503_v21 }
 0x5ba   : > { %v5506_v37 = vpop.f32.mrf.mxu0 }
 0x5bb   : > { %5558 = vmatmul.f32.gmra.mxu1 %v5506_v37 }
 0x5c2   : > { %v5509_v55 = vpop.f32.mrf.mxu0 }
 0x5c3   : > { %5561 = vmatmul.f32.gmra.mxu1 %v5509_v55 }
 0x5ca   : > { %v5512_v13 = vpop.f32.mrf.mxu0 }
 0x5cb   : > { %5564 = vmatmul.f32.gmra.mxu1 %v5512_v13 }
 0x5d2   : > { %v5515_v12 = vpop.f32.mrf.mxu0 }
 0x5d3   : > { %5567 = vmatmul.f32.gmra.mxu1 %v5515_v12 }
 0x5d6   : > { %v5218_v45 = vpop.f32.mrf.mxu2 }
 0x5d7   : > { %v5230_v61 = vsel %vm17485_vm6, %v5218_v45, -1e+30  ;;  %vm17166_vm6 = vcmp.eq.f32.partialorder %v17465_v22, %v14705_v25 }
 0x5d8   : > { %v5234_v39 = vsel %vm17489_vm2, %v5230_v61, -inf }
 0x5da   : > { %v5518_v60 = vpop.f32.mrf.mxu0 }
 0x5db   : > { %5570 = vmatmul.f32.gmra.mxu1 %v5518_v60 }
 0x5de   : > { %v5221_v36 = vpop.f32.mrf.mxu2 }
 0x5df   : > { %v5231_v11 = vsel %vm17484_vm9, %v5221_v36, -1e+30  ;;  %vm17170_vm9 = vcmp.eq.f32.partialorder %v17464_v38, %v14705_v25 }
 0x5e0   : > { %v5235_v48 = vsel %vm17487_vm14, %v5231_v11, -inf  ;;  %vm17169_vm14 = vcmp.eq.f32.partialorder %v17467_v30, %v14705_v25 }
 0x5e1   : > { %v5238_v32 = vmax.f32 %v5234_v39, %v5235_v48 }
 0x5e2   : > { %v5521_v63 = vpop.f32.mrf.mxu0 }
 0x5e3   : > { %5573 = vmatmul.f32.gmra.mxu1 %v5521_v63 }
 0x5e6   : > { %v5224_v14 = vpop.f32.mrf.mxu2 }
 0x5e7   : > { %v5232_v59 = vsel %vm17486_vm5, %v5224_v14, -1e+30  ;;  %vm17165_vm5 = vcmp.eq.f32.partialorder %v17466_v62, %v14705_v25 }
 0x5e8   : > { %v5236_v49 = vsel %vm17490_vm8, %v5232_v59, -inf }
 0x5ea   : > { %v5524_v23 = vpop.f32.mrf.mxu0 }
 0x5eb   : > { %5576 = vmatmul.f32.gmra.mxu1 %v5524_v23 }
 0x5ee   : > { %v5227_v34 = vpop.f32.mrf.mxu2 }
 0x5ef   : > { %v5233_v19 = vsel %vm17488_vm13, %v5227_v34, -1e+30  ;;  %vm17492_vm13 = vmmov %vm17489_vm2  ;;  %vm17493_vm2 = vcmask 261120  }
 0x5f0   : > { %v5237_v57 = vsel %vm17491_vm15, %v5233_v19, -inf  ;;  %vm17494_vm15 = vmmov %vm17493_vm2 }
 0x5f1   : > { %v5239_v53 = vmax.f32 %v5236_v49, %v5237_v57 }
 0x5f3   : > { %v5240_v20 = vmax.f32 %v5238_v32, %v5239_v53 }
 0x5f5   : > { %v5241_v5 = vrot.slane %v5240_v20, 4 }
 0x5f6   : > { %v5369_v44 = vpop.f32.mrf.mxu2 }
 0x5f7   : > { %v5242_v21 = vmax.f32 %v5240_v20, %v5241_v5 }
 0x5f9   : > { %v5243_v37 = vrot.slane %v5242_v21, 2 }
 0x5fb   : > { %v5244_v55 = vmax.f32 %v5242_v21, %v5243_v37 }
 0x5fd   : > { %v5245_v13 = vrot.slane %v5244_v55, 1 }
 0x5fe   : > { %v5372_v12 = vpop.f32.mrf.mxu2 }
 0x5ff   : > { %v5246_v45 = vmax.f32 %v5244_v55, %v5245_v13 }
 0x601   : > { %v5248_v60 = vsub.f32 %v5231_v11, %v5246_v45  ;;  %v5249_v36 = vsub.f32 %v5232_v59, %v5246_v45  ;;  %v5250_v63 = vsub.f32 %v5233_v19, %v5246_v45  ;;  %v5247_v14 = vsub.f32 %v5230_v61, %v5246_v45 }
 0x602   : > { %v5386_v61 = vsel %vm17170_vm9, %v5372_v12, -1e+30 }
 0x603   : > { %v5253_v23 = vmul.f32 1.442695, %v5248_v60  ;;  %v5255_v34 = vmul.f32 1.442695, %v5249_v36  ;;  %v5251_v47 = vmul.f32 1.442695, %v5247_v14 }
 0x604   : > { %v5257_v3 = vmul.f32 1.442695, %v5250_v63  ;;  %v5390_v49 = vsel %vm17493_vm2, %v5386_v61, -inf }
 0x605   : > { %12707 = vpow2.f32 %v5253_v23 }
 0x606   : > { %v5375_v48 = vpop.f32.mrf.mxu2  ;;  %12709 = vpow2.f32 %v5255_v34 }
 0x607   : > { %12711 = vpow2.f32 %v5251_v47  ;;  %v5385_v47 = vsel %vm17166_vm6, %v5369_v44, -1e+30  ;;  %vm17496_vm6 = vmmov %vm17493_vm2 }
 0x608   : > { %12713 = vpow2.f32 %v5257_v3  ;;  %v5387_v3 = vsel %vm17165_vm5, %v5375_v48, -1e+30  ;;  %v5389_v5 = vsel %vm17494_vm15, %v5385_v47, -inf  ;;  %vm17495_vm5 = vmmov %vm17493_vm2 }
 0x609   : > { %v5391_v44 = vsel %vm17495_vm5, %v5387_v3, -inf  ;;  %v5393_v13 = vmax.f32 %v5389_v5, %v5390_v49  ;;  %vm17498_vm2 = vmmov %vm17490_vm8 }
 0x60a   : > { %vm17499_vm15 = vmmov %vm17495_vm5 }
 0x60b   : > { %v15161_v11 = vpop.eup %12707  ;;  %vm17501_vm9 = vmmov %vm17495_vm5 }
 0x60c   : > { %v15168_v59 = vpop.eup %12709  ;;  %v5260_v19 = vsel %vm17492_vm13, %v15161_v11, 0.0  ;;  %vm17497_vm13 = vmmov %vm17490_vm8 }
 0x60d   : > { %v15178_v39 = vpop.eup %12711  ;;  %v5262_v45 = vsel %vm17497_vm13, %v15168_v59, 0.0 }
 0x60e   : > { %v5378_v57 = vpop.f32.mrf.mxu2  ;;  %v5259_v53 = vsel %vm17490_vm8, %v15178_v39, 0.0  ;;  %v15186_v20 = vpop.eup %12713 }
 0x60f   : > { %v5388_v32 = vsel %vm17169_vm14, %v5378_v57, -1e+30  ;;  %v5261_v55 = vadd.f32 %v5260_v19, %v5259_v53  ;;  %v5264_v36 = vsel %vm17498_vm2, %v15186_v20, 0.0  ;;  %vm17500_vm14 = vmmov %vm17495_vm5 }
 0x610   : > { %v5392_v21 = vsel %vm17496_vm6, %v5388_v32, -inf  ;;  %v15191_v37 = vpop.f32.mrf.mxu1 }
 0x611   : > { %v5394_v12 = vmax.f32 %v5391_v44, %v5392_v21  ;;  %v5263_v60 = vadd.f32 %v5262_v45, %v5261_v55 }
 0x613   : > { %v5395_v63 = vmax.f32 %v5393_v13, %v5394_v12  ;;  %v5265_v14 = vadd.f32 %v5264_v36, %v5263_v60 }
 0x615   : > { %v5396_v23 = vrot.slane %v5395_v63, 4  ;;  %v5266_v48 = vrot.slane %v5265_v14, 4 }
 0x616   : > { %v5782_v34 = vpop.f32.mrf.mxu2 }
 0x617   : > { %v5397_v57 = vmax.f32 %v5395_v63, %v5396_v23  ;;  %5810 = vmatmul.f32.vlgmr.msra.gmra.mxu3 %v5782_v34  ;;  %v5267_v58 = vadd.f32 %v5266_v48, %v5265_v14 }
 0x618   : > { %v15197_v33 = vpop.f32.mrf.mxu1 }
 0x619   : > { %v5398_v19 = vrot.slane %v5397_v57, 2  ;;  %v5268_v49 = vrot.slane %v5267_v58, 2 }
 0x61b   : > { %v5399_v53 = vmax.f32 %v5397_v57, %v5398_v19  ;;  %v5269_v5 = vadd.f32 %v5268_v49, %v5267_v58 }
 0x61d   : > { %v5400_v44 = vrot.slane %v5399_v53, 1  ;;  %v5270_v55 = vrot.slane %v5269_v5, 1 }
 0x61e   : > { %v5785_v21 = vpop.f32.mrf.mxu2 }
 0x61f   : > { %v5401_v45 = vmax.f32 %v5399_v53, %v5400_v44  ;;  %5813 = vmatmul.f32.gmra.mxu3 %v5785_v21  ;;  %v5271_v13 = vadd.f32 %v5270_v55, %v5269_v5 }
 0x620   : > { %v15199_v50 = vpop.f32.mrf.mxu1 }
 0x621   : > { %v5402_v12 = vsub.f32 %v5385_v47, %v5401_v45  ;;  %v5404_v60 = vsub.f32 %v5387_v3, %v5401_v45  ;;  %v5405_v36 = vsub.f32 %v5388_v32, %v5401_v45  ;;  %12715 = vrcp.f32 %v5271_v13 }
 0x622   : > { %v5403_v34 = vsub.f32 %v5386_v61, %v5401_v45  ;;  %v5283_v3 = vand.u32 2147483648, %v5271_v13  ;;  %v5281_v44 = vand.u32 2147483647, %v5271_v13  ;;  %vm5277_vm8 = vweird.f32 %v5271_v13 }
 0x623   : > { %v5406_v63 = vmul.f32 1.442695, %v5402_v12  ;;  %v5410_v23 = vmul.f32 1.442695, %v5404_v60  ;;  %v5412_v48 = vmul.f32 1.442695, %v5405_v36 }
 0x624   : > { %v5408_v14 = vmul.f32 1.442695, %v5403_v34  ;;  %vm5282_vm2 = vcmp.eq.f32.partialorder %v5281_v44, 8.507059e+37 }
 0x625   : > { %12717 = vpow2.f32 %v5406_v63  ;;  %v5284_v63 = vor.u32 1.1754944e-38, %v5283_v3 }
 0x626   : > { %v5788_v57 = vpop.f32.mrf.mxu2  ;;  %12719 = vpow2.f32 %v5410_v23 }
 0x627   : > { %5816 = vmatmul.f32.gmra.mxu3 %v5788_v57  ;;  %v12716_v58 = vpop.eup %12715  ;;  %12721 = vpow2.f32 %v5408_v14 }
 0x628   : > { %v15201_v19 = vpop.f32.mrf.mxu1  ;;  %v5273_v49 = vmul.f32 %v12716_v58, %v5271_v13  ;;  %12723 = vpow2.f32 %v5412_v48  ;;  %vm5278_vm6 = vweird.f32 %v12716_v58 }
 0x629   : > { %vm5279_vm13 = vmor %vm5277_vm8, %vm5278_vm6  ;;  %vm17503_vm8 = vnez %v17413_v46 }
 0x62a   : > { %v5274_v47 = vsub.f32 1.0, %v5273_v49 }
 0x62b   : > { %v12718_v53 = vpop.eup %12717 }
 0x62c   : > { %v12720_v32 = vpop.eup %12719  ;;  %v5275_v5 = vmul.f32 %v12716_v58, %v5274_v47  ;;  %v5414_v61 = vsel %vm17495_vm5, %v12718_v53, 0.0 }
 0x62d   : > { %v12722_v21 = vpop.eup %12721  ;;  %v5417_v14 = vsel %vm17500_vm14, %v12720_v32, 0.0 }
 0x62e   : > { %v5791_v55 = vpop.f32.mrf.mxu2  ;;  %v5276_v45 = vadd.f32 %v12716_v58, %v5275_v5  ;;  %v5415_v12 = vsel %vm17499_vm15, %v12722_v21, 0.0  ;;  %v12724_v60 = vpop.eup %12723  ;;  %vm17504_vm15 = vnez %v17415_v51  ;;  %v17523_v51 = vld [vmem:[#allocation56_spill] sm:$0xff] }
 0x62f   : > { %5819 = vmatmul.f32.gmra.mxu3 %v5791_v55  ;;  %v5416_v23 = vadd.f32 %v5415_v12, %v5414_v61  ;;  %v5419_v49 = vsel %vm17501_vm9, %v12724_v60, 0.0 }
 0x630   : > { %v5556_v36 = vpop.f32.mrf.mxu1  ;;  %v5280_v34 = vsel %vm5279_vm13, %v12716_v58, %v5276_v45  ;;  %vm17505_vm13 = vmand %vm17503_vm8, %vm17504_vm15  ;;  %vm17511_vm8 = vnez %v17417_v8  ;;  %vm17512_vm15 = vnez %v17419_v6 }
 0x631   : > { %v5285_v48 = vsel %vm5282_vm2, %v5284_v63, %v5280_v34  ;;  %v5418_v57 = vadd.f32 %v5417_v14, %v5416_v23  ;;  %vm17506_vm2 = vnez %v17393_v16 }
 0x632   : > { %v15208_v47 = vmul.f32 %v15178_v39, %v5285_v48  ;;  %v15211_v13 = vmul.f32 %v15161_v11, %v5285_v48  ;;  %v15214_v5 = vmul.f32 %v15168_v59, %v5285_v48  ;;  %v15217_v3 = vmul.f32 %v15186_v20, %v5285_v48 }
 0x633   : > { %v5420_v55 = vadd.f32 %v5419_v49, %v5418_v57 }
 0x634   : > { %17502 = vst [vmem:[#allocation44_spill] sm:$0xff] %v15211_v13 }
 0x635   : > { %v5421_v58 = vrot.slane %v5420_v55, 4 }
 0x637   : > { %v5422_v61 = vadd.f32 %v5421_v58, %v5420_v55 }
 0x638   : > { %v5559_v44 = vpop.f32.mrf.mxu1 }
 0x639   : > { %v5423_v45 = vrot.slane %v5422_v61, 2 }
 0x63b   : > { %v5424_v12 = vadd.f32 %v5423_v45, %v5422_v61 }
 0x63d   : > { %v5425_v63 = vrot.slane %v5424_v12, 1 }
 0x63f   : > { %v5426_v34 = vadd.f32 %v5425_v63, %v5424_v12 }
 0x640   : > { %v5562_v23 = vpop.f32.mrf.mxu1 }
 0x641   : > { %12725 = vrcp.f32 %v5426_v34  ;;  %v5438_v13 = vand.u32 2147483648, %v5426_v34  ;;  %v5436_v57 = vand.u32 2147483647, %v5426_v34  ;;  %vm5432_vm14 = vweird.f32 %v5426_v34 }
 0x643   : > { %v5439_v48 = vor.u32 1.1754944e-38, %v5438_v13  ;;  %vm5437_vm5 = vcmp.eq.f32.partialorder %v5436_v57, 8.507059e+37 }
 0x647   : > { %v12726_v39 = vpop.eup %12725 }
 0x648   : > { %v5565_v14 = vpop.f32.mrf.mxu1  ;;  %v5428_v11 = vmul.f32 %v12726_v39, %v5426_v34  ;;  %vm5433_vm9 = vweird.f32 %v12726_v39  ;;  %v5585_v34 = vsel %vm17505_vm13, %v5559_v44, -1e+30  ;;  %vm17513_vm13 = vmand %vm17511_vm8, %vm17512_vm15  ;;  %vm17524_vm8 = vnez %v17523_v51 }
 0x649   : > { %vm5434_vm6 = vmor %vm5432_vm14, %vm5433_vm9  ;;  %vm17507_vm9 = vnez %v17395_v2  ;;  %v5586_v16 = vsel %vm17513_vm13, %v5562_v23, -1e+30  ;;  %vm17526_vm15 = vnez %v17525_v24 }
 0x64a   : > { %v5429_v1 = vsub.f32 1.0, %v5428_v11  ;;  %vm17508_vm14 = vmand %vm17506_vm2, %vm17507_vm9  ;;  %vm17514_vm2 = vnez %v17421_v9  ;;  %vm17515_vm9 = vnez %v17423_v27 }
 0x64c   : > { %v5430_v59 = vmul.f32 %v12726_v39, %v5429_v1 }
 0x64e   : > { %v5431_v49 = vadd.f32 %v12726_v39, %v5430_v59 }
 0x650   : > { %v5568_v20 = vpop.f32.mrf.mxu1  ;;  %v5435_v55 = vsel %vm5434_vm6, %v12726_v39, %v5431_v49  ;;  %vm17509_vm6 = vmand %vm17432_vm1, %vm17433_vm4  ;;  %vm17517_vm1 = vnez %v17425_v10 }
 0x651   : > { %v5440_v58 = vsel %vm5437_vm5, %v5439_v48, %v5435_v55  ;;  %vm17510_vm5 = vmand %vm17435_vm7, %vm17436_vm10  ;;  %vm17519_vm7 = vnez %v17407_v0  ;;  %v15279_v8 = vsel %vm17524_vm8, %v5568_v20, -1e+30 }
 0x652   : > { %v15219_v61 = vmul.f32 %v12722_v21, %v5440_v58  ;;  %v15221_v45 = vmul.f32 %v12718_v53, %v5440_v58  ;;  %v15223_v12 = vmul.f32 %v12720_v32, %v5440_v58  ;;  %v15225_v63 = vmul.f32 %v12724_v60, %v5440_v58  ;;  %vm17518_vm10 = vmand %vm17445_vm11, %vm17446_vm12 }
 0x653   : > { %v5580_v53 = vsel %vm17508_vm14, %v15191_v37, -1e+30  ;;  %v5581_v32 = vsel %vm17509_vm6, %v15197_v33, -1e+30  ;;  %v5584_v46 = vsel %vm17510_vm5, %v5556_v36, -1e+30  ;;  %vm17516_vm14 = vmand %vm17514_vm2, %vm17515_vm9 }
 0x654   : > { %v5587_v2 = vsel %vm17516_vm14, %v5565_v14, -1e+30  ;;  %v5582_v40 = vsel %vm17518_vm10, %v15199_v50, -1e+30  ;;  %vm17520_vm4 = vmand %vm17448_vm3, %vm17519_vm7  ;;  %vm17521_vm6 = vcmask 261120  }
 0x655   : > { %v5583_v43 = vsel %vm17520_vm4, %v15201_v19, -1e+30  ;;  %v5598_v42 = vsel %vm17521_vm6, %v5585_v34, -inf  ;;  %vm17522_vm5 = vmmov %vm17521_vm6 }
 0x656   : > { %v5596_v28 = vsel %vm17522_vm5, %v5584_v46, -inf  ;;  %vm17527_vm11 = vmmov %vm17522_vm5 }
 0x657   : > { %v5593_v6 = vsel %vm17527_vm11, %v5581_v32, -inf  ;;  %vm17528_vm12 = vmmov %vm17522_vm5 }
 0x658   : > { %v5571_v11 = vpop.f32.mrf.mxu1  ;;  %v5600_v54 = vsel %vm17528_vm12, %v5586_v16, -inf  ;;  %vm17529_vm13 = vmmov %vm17522_vm5  ;;  %v5599_v50 = vmax.f32 %v5593_v6, %v5598_v42 }
 0x659   : > { %v15261_v33 = vsel %vm17517_vm1, %v5571_v11, -1e+30  ;;  %v5602_v0 = vsel %vm17529_vm13, %v5587_v2, -inf  ;;  %vm17530_vm3 = vmmov %vm17522_vm5 }
 0x65a   : > { %v5606_v9 = vsel %vm17530_vm3, %v15261_v33, -inf  ;;  %vm17531_vm2 = vmmov %vm17530_vm3 }
 0x65b   : > { %v5592_v27 = vsel %vm17531_vm2, %v5580_v53, -inf  ;;  %vm17532_vm9 = vmmov %vm17531_vm2  ;;  %v5607_v23 = vmax.f32 %v5599_v50, %v5606_v9 }
 0x65c   : > { %v5594_v10 = vsel %vm17532_vm9, %v5582_v40, -inf  ;;  %vm17533_vm14 = vmmov %vm17531_vm2  ;;  %v5597_v19 = vmax.f32 %v5592_v27, %v5596_v28 }
 0x65d   : > { %v5595_v37 = vsel %vm17533_vm14, %v5583_v43, -inf  ;;  %vm17534_vm1 = vmmov %vm17531_vm2  ;;  %v5601_v13 = vmax.f32 %v5594_v10, %v5600_v54  ;;  %vm17549_vm14 = vcmp.eq.f32.partialorder %v17464_v38, %v14705_v25 }
 0x65e   : > { %v5604_v21 = vsel %vm17534_vm1, %v15279_v8, -inf  ;;  %vm17535_vm10 = vmmov %vm17534_vm1  ;;  %v5603_v44 = vmax.f32 %v5595_v37, %v5602_v0 }
 0x65f   : > { %vm17536_vm7 = vmmov %vm17534_vm1  ;;  %v5605_v59 = vmax.f32 %v5597_v19, %v5604_v21 }
 0x660   : > { %v5574_v1 = vpop.f32.mrf.mxu1 }
 0x661   : > { %v15283_v18 = vsel %vm17526_vm15, %v5574_v1, -1e+30  ;;  %v5612_v20 = vmax.f32 %v5605_v59, %v5607_v23 }
 0x662   : > { %v5608_v60 = vsel %vm17535_vm10, %v15283_v18, -inf  ;;  %vm17551_vm10 = vcmp.eq.f32.partialorder %v17466_v62, %v14705_v25 }
 0x663   : > { %v5609_v57 = vmax.f32 %v5601_v13, %v5608_v60 }
 0x668   : > { %v5577_v36 = vpop.f32.mrf.mxu1 }
 0x669   : > { %v5591_v39 = vsel %vm14932_vm0, %v5577_v36, -1e+30  ;;  %vm17537_vm0 = vmmov %vm17534_vm1  ;;  %vm17550_vm1 = vcmp.eq.f32.partialorder %v17465_v22, %v14705_v25 }
 0x66a   : > { %v5610_v14 = vsel %vm17536_vm7, %v5591_v39, -inf  ;;  %vm17538_vm4 = vmmov %vm17537_vm0 }
 0x66b   : > { %v5611_v49 = vmax.f32 %v5603_v44, %v5610_v14  ;;  %vm17539_vm6 = vmmov %vm17537_vm0 }
 0x66c   : > { %vm17540_vm5 = vmmov %vm17537_vm0 }
 0x66d   : > { %v5613_v48 = vmax.f32 %v5609_v57, %v5611_v49  ;;  %vm17541_vm8 = vmmov %vm17537_vm0 }
 0x66e   : > { %vm17542_vm15 = vmmov %vm17537_vm0 }
 0x66f   : > { %v5614_v55 = vmax.f32 %v5612_v20, %v5613_v48  ;;  %vm17543_vm11 = vmmov %vm17537_vm0 }
 0x670   : > { %vm17544_vm12 = vmmov %vm17537_vm0 }
 0x671   : > { %v5615_v58 = vrot.slane %v5614_v55, 4  ;;  %vm17545_vm13 = vmmov %vm17537_vm0 }
 0x672   : > { %vm17546_vm3 = vmmov %vm17537_vm0 }
 0x673   : > { %v5616_v11 = vmax.f32 %v5614_v55, %v5615_v58  ;;  %vm17547_vm2 = vmmov %vm17537_vm0 }
 0x674   : > { %vm17548_vm9 = vmmov %vm17537_vm0 }
 0x675   : > { %v5617_v1 = vrot.slane %v5616_v11, 2  ;;  %vm17552_vm7 = vmmov %vm17537_vm0 }
 0x677   : > { %v5618_v42 = vmax.f32 %v5616_v11, %v5617_v1 }
 0x679   : > { %v5619_v28 = vrot.slane %v5618_v42, 1 }
 0x67b   : > { %v5620_v51 = vmax.f32 %v5618_v42, %v5619_v28 }
 0x67d   : > { %v5621_v24 = vsub.f32 %v5580_v53, %v5620_v51  ;;  %v5622_v6 = vsub.f32 %v5581_v32, %v5620_v51  ;;  %v5623_v54 = vsub.f32 %v5582_v40, %v5620_v51  ;;  %v5624_v0 = vsub.f32 %v5583_v43, %v5620_v51 }
 0x67e   : > { %v5625_v52 = vsub.f32 %v5584_v46, %v5620_v51  ;;  %v5626_v50 = vsub.f32 %v5585_v34, %v5620_v51  ;;  %v5627_v19 = vsub.f32 %v5586_v16, %v5620_v51  ;;  %v5628_v60 = vsub.f32 %v5587_v2, %v5620_v51 }
 0x67f   : > { %v5633_v9 = vmul.f32 1.442695, %v5621_v24  ;;  %v5635_v27 = vmul.f32 1.442695, %v5622_v6  ;;  %v5637_v10 = vmul.f32 1.442695, %v5623_v54  ;;  %v5629_v13 = vsub.f32 %v15279_v8, %v5620_v51 }
 0x680   : > { %v5639_v37 = vmul.f32 1.442695, %v5624_v0  ;;  %v5641_v21 = vmul.f32 1.442695, %v5625_v52  ;;  %v5643_v36 = vmul.f32 1.442695, %v5626_v50  ;;  %v5630_v40 = vsub.f32 %v15261_v33, %v5620_v51 }
 0x681   : > { %12727 = vpow2.f32 %v5633_v9  ;;  %v5645_v53 = vmul.f32 1.442695, %v5627_v19  ;;  %v5647_v34 = vmul.f32 1.442695, %v5628_v60  ;;  %v5631_v8 = vsub.f32 %v15283_v18, %v5620_v51 }
 0x682   : > { %12729 = vpow2.f32 %v5635_v27  ;;  %v5649_v23 = vmul.f32 1.442695, %v5629_v13  ;;  %v5632_v57 = vsub.f32 %v5591_v39, %v5620_v51  ;;  %v5651_v49 = vmul.f32 1.442695, %v5630_v40 }
 0x683   : > { %12731 = vpow2.f32 %v5637_v10  ;;  %v5653_v58 = vmul.f32 1.442695, %v5631_v8 }
 0x684   : > { %12733 = vpow2.f32 %v5639_v37  ;;  %v5655_v42 = vmul.f32 1.442695, %v5632_v57 }
 0x685   : > { %12735 = vpow2.f32 %v5641_v21 }
 0x686   : > { %12737 = vpow2.f32 %v5643_v36 }
 0x687   : > { %v15301_v32 = vpop.eup %12727  ;;  %12739 = vpow2.f32 %v5645_v53 }
 0x688   : > { %v15303_v46 = vpop.eup %12729  ;;  %v5657_v16 = vsel %vm17537_vm0, %v15301_v32, 0.0  ;;  %12741 = vpow2.f32 %v5647_v34  ;;  %vm17553_vm0 = vcmp.eq.f32.partialorder %v17467_v30, %v14705_v25 }
 0x689   : > { %v15308_v43 = vpop.eup %12731  ;;  %v5658_v2 = vsel %vm17538_vm4, %v15303_v46, 0.0  ;;  %12743 = vpow2.f32 %v5649_v23  ;;  %vm17554_vm4 = vmmov %vm17547_vm2 }
 0x68a   : > { %v15312_v44 = vpop.eup %12733  ;;  %v5659_v14 = vadd.f32 %v5658_v2, %v5657_v16  ;;  %v5660_v33 = vsel %vm17539_vm6, %v15308_v43, 0.0  ;;  %12745 = vpow2.f32 %v5651_v49  ;;  %vm17555_vm6 = vmmov %vm17547_vm2 }
 0x68b   : > { %v15317_v59 = vpop.eup %12735  ;;  %v5662_v48 = vsel %vm17540_vm5, %v15312_v44, 0.0  ;;  %12747 = vpow2.f32 %v5653_v58  ;;  %vm17556_vm5 = vmmov %vm17547_vm2 }
 0x68c   : > { %v5661_v20 = vadd.f32 %v5660_v33, %v5659_v14  ;;  %v15321_v55 = vpop.eup %12737  ;;  %v5664_v11 = vsel %vm17541_vm8, %v15317_v59, 0.0  ;;  %12749 = vpow2.f32 %v5655_v42 }
 0x68d   : > { %v15325_v1 = vpop.eup %12739  ;;  %v5666_v39 = vsel %vm17542_vm15, %v15321_v55, 0.0 }
 0x68e   : > { %v5663_v18 = vadd.f32 %v5662_v48, %v5661_v20  ;;  %v15329_v51 = vpop.eup %12741  ;;  %v5668_v6 = vsel %vm17543_vm11, %v15325_v1, 0.0 }
 0x68f   : > { %v15333_v54 = vpop.eup %12743  ;;  %v5670_v52 = vsel %vm17544_vm12, %v15329_v51, 0.0 }
 0x690   : > { %v5665_v28 = vadd.f32 %v5664_v11, %v5663_v18  ;;  %v15337_v9 = vpop.eup %12745  ;;  %v5672_v10 = vsel %vm17545_vm13, %v15333_v54, 0.0  ;;  %vm17557_vm13 = vmmov %vm17547_vm2 }
 0x691   : > { %v15341_v50 = vpop.eup %12747  ;;  %v5674_v21 = vsel %vm17546_vm3, %v15337_v9, 0.0  ;;  %vm17558_vm3 = vmmov %vm17547_vm2 }
 0x692   : > { %v5667_v24 = vadd.f32 %v5666_v39, %v5665_v28  ;;  %v12750_v60 = vpop.eup %12749  ;;  %v5676_v13 = vsel %vm17547_vm2, %v15341_v50, 0.0 }
 0x693   : > { %v5678_v40 = vsel %vm17548_vm9, %v12750_v60, 0.0  ;;  %vm17559_vm9 = vmmov %vm17547_vm2 }
 0x694   : > { %v5669_v0 = vadd.f32 %v5668_v6, %v5667_v24 }
 0x696   : > { %v5671_v27 = vadd.f32 %v5670_v52, %v5669_v0 }
 0x698   : > { %v5673_v37 = vadd.f32 %v5672_v10, %v5671_v27 }
 0x69a   : > { %v5811_v19 = vpop.f32.mrf.mxu3  ;;  %v5675_v36 = vadd.f32 %v5674_v21, %v5673_v37 }
 0x69b   : > { %v5823_v48 = vsel %vm17550_vm1, %v5811_v19, -1e+30  ;;  %vm17561_vm1 = vmmov %vm17547_vm2 }
 0x69c   : > { %v5677_v53 = vadd.f32 %v5676_v13, %v5675_v36  ;;  %v5827_v39 = vsel %vm17554_vm4, %v5823_v48, -inf }
 0x69e   : > { %v5679_v34 = vadd.f32 %v5678_v40, %v5677_v53 }
 0x6a0   : > { %v5680_v16 = vrot.slane %v5679_v34, 4 }
 0x6a2   : > { %v5814_v2 = vpop.f32.mrf.mxu3  ;;  %v5681_v8 = vadd.f32 %v5680_v16, %v5679_v34 }
 0x6a3   : > { %v5824_v20 = vsel %vm17549_vm14, %v5814_v2, -1e+30  ;;  %vm17560_vm14 = vmmov %vm17547_vm2 }
 0x6a4   : > { %v5682_v23 = vrot.slane %v5681_v8, 2  ;;  %v5828_v18 = vsel %vm17552_vm7, %v5824_v20, -inf  ;;  %vm17563_vm7 = vmmov %vm17561_vm1 }
 0x6a5   : > { %v5831_v6 = vmax.f32 %v5827_v39, %v5828_v18 }
 0x6a6   : > { %v5683_v14 = vadd.f32 %v5682_v23, %v5681_v8 }
 0x6a8   : > { %v5684_v33 = vrot.slane %v5683_v14, 1 }
 0x6aa   : > { %v5817_v57 = vpop.f32.mrf.mxu3  ;;  %v5685_v49 = vadd.f32 %v5684_v33, %v5683_v14 }
 0x6ab   : > { %v5825_v58 = vsel %vm17551_vm10, %v5817_v57, -1e+30  ;;  %vm17562_vm10 = vmmov %vm17561_vm1 }
 0x6ac   : > { %12751 = vrcp.f32 %v5685_v49  ;;  %v5829_v38 = vsel %vm17555_vm6, %v5825_v58, -inf  ;;  %v5697_v27 = vand.u32 2147483648, %v5685_v49  ;;  %v5695_v37 = vand.u32 2147483647, %v5685_v49 }
 0x6ad   : > { %vm5691_vm15 = vweird.f32 %v5685_v49 }
 0x6ae   : > { %v5698_v36 = vor.u32 1.1754944e-38, %v5697_v27  ;;  %vm5696_vm12 = vcmp.eq.f32.partialorder %v5695_v37, 8.507059e+37 }
 0x6b2   : > { %v5820_v11 = vpop.f32.mrf.mxu3  ;;  %v12752_v42 = vpop.eup %12751 }
 0x6b3   : > { %v5826_v28 = vsel %vm17553_vm0, %v5820_v11, -1e+30  ;;  %v5687_v22 = vmul.f32 %v12752_v42, %v5685_v49  ;;  %vm5692_vm8 = vweird.f32 %v12752_v42  ;;  %vm17564_vm0 = vmmov %vm17561_vm1 }
 0x6b4   : > { %v5830_v24 = vsel %vm17556_vm5, %v5826_v28, -inf  ;;  %vm5693_vm11 = vmor %vm5691_vm15, %vm5692_vm8 }
 0x6b5   : > { %v5832_v0 = vmax.f32 %v5829_v38, %v5830_v24  ;;  %v5688_v52 = vsub.f32 1.0, %v5687_v22  ;;  %vm17565_vm4 = vmmov %vm17564_vm0 }
 0x6b6   : > { %vm17566_vm6 = vmmov %vm17564_vm0 }
 0x6b7   : > { %v5833_v62 = vmax.f32 %v5831_v6, %v5832_v0  ;;  %v5689_v10 = vmul.f32 %v12752_v42, %v5688_v52  ;;  %vm17567_vm5 = vmmov %vm17564_vm0 }
 0x6b8   : > { %vm17568_vm8 = vmmov %vm17564_vm0 }
 0x6b9   : > { %v5834_v19 = vrot.slane %v5833_v62, 4  ;;  %v5690_v21 = vadd.f32 %v12752_v42, %v5689_v10  ;;  %v4659_v10 = vmul.f32 24.0, %v14954_v29  ;;  %vm17569_vm15 = vmmov %vm17564_vm0 }
 0x6bb   : > { %v5835_v30 = vmax.f32 %v5833_v62, %v5834_v19  ;;  %v5694_v13 = vsel %vm5693_vm11, %v12752_v42, %v5690_v21  ;;  %v5149_v21 = vsel %vm17569_vm15, %v15122_v56, 0.0  ;;  %vm17570_vm11 = vmmov %vm17564_vm0 }
 0x6bc   : > { %v5699_v40 = vsel %vm5696_vm12, %v5698_v36, %v5694_v13  ;;  %vm17571_vm12 = vmmov %vm17564_vm0 }
 0x6bd   : > { %v5836_v53 = vrot.slane %v5835_v30, 2  ;;  %v5705_v34 = vmul.f32 %v15321_v55, %v5699_v40  ;;  %v5702_v16 = vmul.f32 %v15308_v43, %v5699_v40  ;;  %v5700_v2 = vmul.f32 %v15301_v32, %v5699_v40 }
 0x6be   : > { %v5706_v8 = vmul.f32 %v15325_v1, %v5699_v40  ;;  %v5701_v14 = vmul.f32 %v15303_v46, %v5699_v40  ;;  %v5703_v33 = vmul.f32 %v15312_v44, %v5699_v40  ;;  %v5707_v57 = vmul.f32 %v15329_v51, %v5699_v40 }
 0x6bf   : > { %v5837_v23 = vmax.f32 %v5835_v30, %v5836_v53  ;;  %v5727_v49 = vsel %vm17557_vm13, %v5705_v34, 0.0  ;;  %v5718_v18 = vsel %vm17558_vm3, %v5702_v16, 0.0  ;;  %v5712_v11 = vsel %vm17547_vm2, %v5700_v2, 0.0  ;;  %v17572_v53 = vld [vmem:[#allocation29_spill] sm:$0xff]  ;;  %vm17574_vm3 = vmmov %vm17564_vm0 }
 0x6c0   : > { %5728 = vadd.xlane.f32.xlu2 %v5727_v49  ;;  %5719 = vadd.xlane.f32.xlu0 %v5718_v18  ;;  %v5704_v32 = vmul.f32 %v15317_v59, %v5699_v40  ;;  %v5711_v43 = vmul.f32 %v12750_v60, %v5699_v40  ;;  %v5708_v1 = vmul.f32 %v15333_v54, %v5699_v40  ;;  %v5730_v0 = vsel %vm17559_vm9, %v5706_v8, 0.0  ;;  %vm17575_vm2 = vmmov %vm17564_vm0 }
 0x6c1   : > { %v5838_v55 = vrot.slane %v5837_v23, 1  ;;  %5713 = vadd.xlane.f32.xlu1 %v5712_v11  ;;  %v15377_v46 = vmul.f32 %v15337_v9, %v5699_v40  ;;  %v15380_v51 = vmul.f32 %v15341_v50, %v5699_v40  ;;  %v5134_v59 = vsel %vm17560_vm14, %v15110_v7, 0.0  ;;  %vm17576_vm9 = vmmov %vm17564_vm0 }
 0x6c2   : > { %v5715_v54 = vsel %vm17561_vm1, %v5701_v14, 0.0  ;;  %v5733_v30 = vsel %vm17570_vm11, %v5707_v57, 0.0  ;;  %v5724_v13 = vsel %vm17571_vm12, %v5704_v32, 0.0  ;;  %v15413_v40 = vsub.f32 %v17572_v53, %v4659_v10  ;;  %vm17578_vm14 = vmmov %vm17564_vm0 }
 0x6c3   : > { %v5839_v44 = vmax.f32 %v5837_v23, %v5838_v55  ;;  %v5745_v8 = vsel %vm17574_vm3, %v5711_v43, 0.0  ;;  %v5736_v56 = vsel %vm17575_vm2, %v5708_v1, 0.0  ;;  %v5140_v14 = vsel %vm17576_vm9, %v15125_v35, 0.0  ;;  %vm17585_vm15 = vmmov %vm17575_vm2 }
 0x6c4   : > { %17573 = vst [vmem:[#allocation57_spill] sm:$0xff] %v15413_v40  ;;  %vm4726_vm13 = vcmp.lt.f32.partialorder %v15413_v40, 17.5  ;;  %v5152_v55 = vsel %vm17578_vm14, %v15128_v41, 0.0  ;;  %vm17579_vm1 = vcmask 785408   ;;  %vm17590_vm9 = vmmov %vm17575_vm2 }
 0x6c5   : > { %v5841_v42 = vsub.f32 %v5824_v20, %v5839_v44  ;;  %v5842_v39 = vsub.f32 %v5825_v58, %v5839_v44  ;;  %v5843_v38 = vsub.f32 %v5826_v28, %v5839_v44  ;;  %v5840_v24 = vsub.f32 %v5823_v48, %v5839_v44 }
 0x6c6   : > { %v5146_v20 = vsel %vm17562_vm10, %v15113_v31, 0.0  ;;  %v5137_v48 = vsel %vm17563_vm7, %v15116_v17, 0.0  ;;  %v5721_v58 = vsel %vm17564_vm0, %v5703_v33, 0.0  ;;  %v17577_v33 = vmov 0.0   ;;  %vm17580_vm10 = vmmov %vm17564_vm0 }
 0x6c7   : > { %v5846_v22 = vmul.f32 1.442695, %v5841_v42  ;;  %v5848_v6 = vmul.f32 1.442695, %v5842_v39  ;;  %v5844_v60 = vmul.f32 1.442695, %v5840_v24  ;;  %vm17581_vm7 = vmmov %vm17579_vm1 }
 0x6c8   : > { %5731 = vadd.xlane.f32.xlu2 %v5730_v0  ;;  %5135 = vadd.xlane.f32.xlu0 %v5134_v59  ;;  %v5850_v9 = vmul.f32 1.442695, %v5843_v38  ;;  %v15421_v57 = vsel %vm4726_vm13, 1.0, %v17577_v33  ;;  %v5143_v43 = vsel %vm17580_vm10, %v15131_v4, 0.0  ;;  %vm17582_vm0 = vmmov %vm17579_vm1 }
 0x6c9   : > { %12753 = vpow2.f32 %v5846_v22  ;;  %5716 = vadd.xlane.f32.xlu1 %v5715_v54  ;;  %v4732_v18 = vmul.f32 %v15421_v57, %v15093_v26  ;;  %v5290_v1 = vmul.f32 %v15421_v57, %v15208_v47  ;;  %v4729_v26 = vmul.f32 %v15421_v57, %v15096_v15  ;;  %v17584_v47 = vld [vmem:[#allocation44_spill] sm:$0xff]  ;;  %vm17586_vm11 = vmmov %vm17582_vm0 }
 0x6ca   : > { %12755 = vpow2.f32 %v5848_v6  ;;  %v5291_v6 = vmul.f32 %v15421_v57, %v17584_v47  ;;  %vm17587_vm13 = vmmov %vm17575_vm2  ;;  %v12328_v47 = vld [vmem:[#allocation7 + $0x154] sm:$0xf] }
 0x6cb   : > { %12757 = vpow2.f32 %v5844_v60  ;;  %v4742_v32 = vsel %vm17579_vm1, %v4732_v18, 0.0  ;;  %v5294_v39 = vsel %vm17581_vm7, %v5290_v1, 0.0  ;;  %v4733_v41 = vsel %vm17582_vm0, %v4729_v26, 0.0  ;;  %vm17589_vm3 = vmmov %vm17582_vm0  ;;  %v11200_v1 = vld [vmem:[#allocation7 + $0x168] sm:$0xf0] }
 0x6cc   : > { %12759 = vpow2.f32 %v5850_v9  ;;  %v5448_v60 = vsel %vm17585_vm15, %v15219_v61, 0.0  ;;  %v5742_v54 = vsel %vm17587_vm13, %v15380_v51, 0.0  ;;  %vm17591_vm14 = vmmov %vm17582_vm0  ;;  %v11126_v26 = vld [vmem:[#allocation7 + $0xd0] sm:$0xf] }
 0x6cd   : > { %vm17592_vm1 = vmmov %vm17575_vm2 }
 0x6ce   : > { %vm17594_vm10 = vmmov %vm17582_vm0 }
 0x6cf   : > { %v15386_v50 = vpop.eup %12753  ;;  %vm17595_vm7 = vmmov %vm17582_vm0 }
 0x6d0   : > { %v15392_v7 = vpop.eup %12755  ;;  %5147 = vadd.xlane.f32.xlu2 %v5146_v20  ;;  %5138 = vadd.xlane.f32.xlu0 %v5137_v48  ;;  %v5853_v28 = vsel %vm17565_vm4, %v15386_v50, 0.0  ;;  %vm17583_vm4 = vmmov %vm17575_vm2  ;;  %v17588_v20 = vld [vmem:[#allocation39_spill] sm:$0xff] }
 0x6d1   : > { %v15397_v52 = vpop.eup %12757  ;;  %5722 = vadd.xlane.f32.xlu1 %v5721_v58  ;;  %v5855_v17 = vsel %vm17567_vm5, %v15392_v7, 0.0  ;;  %v5739_v38 = vsel %vm17583_vm4, %v15377_v46, 0.0  ;;  %v5297_v46 = vsel %vm17586_vm11, %v5291_v6, 0.0  ;;  %v4730_v48 = vmul.f32 %v15421_v57, %v17588_v20  ;;  %v11192_v6 = vld [vmem:[#allocation7 + $0x158] sm:$0xf0]  ;;  %vm17596_vm0 = vmmov %vm17592_vm1 }
 0x6d2   : > { %v5852_v62 = vsel %vm17566_vm6, %v15397_v52, 0.0  ;;  %v15401_v27 = vpop.eup %12759  ;;  %v11195_v20 = vor.u32 %v12328_v47, %v11192_v6  ;;  %vm17597_vm4 = vmmov %vm17596_vm0  ;;  %v11160_v6 = vld [vmem:[#allocation7 + $0x118] sm:$0xf0]  ;;  %vm17614_vm11 = vcmask 1045504  }
 0x6d3   : > { %v5854_v31 = vadd.f32 %v5853_v28, %v5852_v62  ;;  %v5857_v19 = vsel %vm17568_vm8, %v15401_v27, 0.0  ;;  %v5292_v28 = vmul.f32 %v15421_v57, %v15214_v5  ;;  %v4736_v62 = vsel %vm17589_vm3, %v4730_v48, 0.0  ;;  %v12310_v48 = vld [vmem:[#allocation7 + $0xc4] sm:$0xf] }
 0x6d5   : > { %v5856_v37 = vadd.f32 %v5855_v17, %v5854_v31  ;;  %v5300_v10 = vsel %vm17591_vm14, %v5292_v28, 0.0 }
 0x6d7   : > { %v5858_v36 = vadd.f32 %v5857_v19, %v5856_v37  ;;  %v12316_v19 = vld [vmem:[#allocation7 + $0xf4] sm:$0xf] }
 0x6d8   : > { %5150 = vadd.xlane.f32.xlu2 %v5149_v21  ;;  %5734 = vadd.xlane.f32.xlu0 %v5733_v30  ;;  %v11144_v21 = vld [vmem:[#allocation7 + $0xf8] sm:$0xf0]  ;;  %v11206_v30 = vld [vmem:[#allocation7 + $0x170] sm:$0xf] }
 0x6d9   : > { %5725 = vadd.xlane.f32.xlu1 %v5724_v13  ;;  %v5859_v34 = vrot.slane %v5858_v36, 4 }
 0x6db   : > { %v5860_v16 = vadd.f32 %v5859_v34, %v5858_v36  ;;  %v11147_v36 = vor.u32 %v12316_v19, %v11144_v21  ;;  %v12332_v34 = vld [vmem:[#allocation7 + $0x174] sm:$0xf]  ;;  %v11112_v19 = vld [vmem:[#allocation7 + $0xb8] sm:$0xf0] }
 0x6dd   : > { %v5861_v2 = vrot.slane %v5860_v16, 2  ;;  %6133 = vmatpush.bf16.msrb.mxu3 %v11147_v36  ;;  %v11176_v36 = vld [vmem:[#allocation7 + $0x138] sm:$0xf0] }
 0x6df   : > { %v5862_v23 = vadd.f32 %v5861_v2, %v5860_v16  ;;  %v11208_v16 = vld [vmem:[#allocation7 + $0x178] sm:$0xf0]  ;;  %v11134_v2 = vld [vmem:[#allocation7 + $0xe0] sm:$0xf] }
 0x6e0   : > { %5746 = vadd.xlane.f32.xlu2 %v5745_v8  ;;  %5737 = vadd.xlane.f32.xlu0 %v5736_v56  ;;  %v11211_v8 = vor.u32 %v12332_v34, %v11208_v16  ;;  %v12315_v56 = vld [vmem:[#allocation7 + $0xe4] sm:$0xf0] }
 0x6e1   : > { %5141 = vadd.xlane.f32.xlu1 %v5140_v14  ;;  %v5863_v49 = vrot.slane %v5862_v23, 1  ;;  %v11136_v14 = vld [vmem:[#allocation7 + $0xe8] sm:$0xf0] }
 0x6e2   : > { %6308 = vmatpush.bf16.msra.mxu1 %v11211_v8 }
 0x6e3   : > { %v5864_v11 = vadd.f32 %v5863_v49, %v5862_v23  ;;  %v12314_v23 = vld [vmem:[#allocation7 + $0xe4] sm:$0xf]  ;;  %v17593_v49 = vld [vmem:[#allocation37_spill] sm:$0xff] }
 0x6e4   : > { %v4731_v18 = vmul.f32 %v15421_v57, %v17593_v49  ;;  %v12307_v49 = vld [vmem:[#allocation7 + $0xa4] sm:$0xf0] }
 0x6e5   : > { %12761 = vrcp.f32 %v5864_v11  ;;  %v5876_v22 = vand.u32 2147483648, %v5864_v11  ;;  %vm5870_vm5 = vweird.f32 %v5864_v11  ;;  %v5874_v15 = vand.u32 2147483647, %v5864_v11 }
 0x6e7   : > { %v5877_v59 = vor.u32 1.1754944e-38, %v5876_v22  ;;  %vm5875_vm12 = vcmp.eq.f32.partialorder %v5874_v15, 8.507059e+37  ;;  %v12329_v22 = vld [vmem:[#allocation7 + $0x154] sm:$0xf0]  ;;  %v4739_v15 = vsel %vm17594_vm10, %v4731_v18, 0.0 }
 0x6e8   : > { %5153 = vadd.xlane.f32.xlu0 %v5152_v55  ;;  %4743 = vadd.xlane.f32.xlu2 %v4742_v32  ;;  %v11198_v55 = vld [vmem:[#allocation7 + $0x160] sm:$0xf]  ;;  %v12331_v32 = vld [vmem:[#allocation7 + $0x164] sm:$0xf0] }
 0x6e9   : > { %5144 = vadd.xlane.f32.xlu1 %v5143_v43  ;;  %v12330_v43 = vld [vmem:[#allocation7 + $0x164] sm:$0xf]  ;;  %v11166_v18 = vld [vmem:[#allocation7 + $0x120] sm:$0xf] }
 0x6eb   : > { %v12762_v35 = vpop.eup %12761 }
 0x6ec   : > { %v5866_v44 = vmul.f32 %v12762_v35, %v5864_v11  ;;  %vm5871_vm6 = vweird.f32 %v12762_v35  ;;  %v11135_v11 = vor.u32 %v12315_v56, %v11134_v2  ;;  %v5451_v56 = vsel %vm17597_vm4, %v15223_v12, 0.0 }
 0x6ed   : > { %vm5872_vm8 = vmor %vm5870_vm5, %vm5871_vm6 }
 0x6ee   : > { %v5867_v42 = vsub.f32 1.0, %v5866_v44  ;;  %v12313_v44 = vld [vmem:[#allocation7 + $0xd4] sm:$0xf0]  ;;  %vm17598_vm6 = vmmov %vm17596_vm0 }
 0x6ef   : > { %vm17599_vm5 = vmmov %vm17596_vm0 }
 0x6f0   : > { %5295 = vadd.xlane.f32.xlu2 %v5294_v39  ;;  %4734 = vadd.xlane.f32.xlu0 %v4733_v41  ;;  %v5868_v4 = vmul.f32 %v12762_v35, %v5867_v42  ;;  %v11199_v42 = vor.u32 %v12331_v32, %v11198_v55  ;;  %v11203_v39 = vor.u32 %v12330_v43, %v11200_v1  ;;  %v12312_v41 = vld [vmem:[#allocation7 + $0xd4] sm:$0xf]  ;;  %v15475_v55 = vpop.xlane.xlu2 %5126  ;;  %v11168_v1 = vld [vmem:[#allocation7 + $0x128] sm:$0xf0] }
 0x6f1   : > { %5740 = vadd.xlane.f32.xlu1 %v5739_v38  ;;  %v11128_v38 = vld [vmem:[#allocation7 + $0xd8] sm:$0xf0] }
 0x6f2   : > { %v5869_v24 = vadd.f32 %v12762_v35, %v5868_v4  ;;  %v11190_v4 = vld [vmem:[#allocation7 + $0x150] sm:$0xf]  ;;  %6309 = vmatpush.bf16.msra.mxu1 %v11203_v39  ;;  %v11096_v39 = vld [vmem:[#allocation7 + $0x98] sm:$0xf0] }
 0x6f4   : > { %v5873_v0 = vsel %vm5872_vm8, %v12762_v35, %v5869_v24  ;;  %v11139_v35 = vor.u32 %v12314_v23, %v11136_v14  ;;  %v11127_v24 = vor.u32 %v12313_v44, %v11126_v26  ;;  %v11102_v14 = vld [vmem:[#allocation7 + $0xa0] sm:$0xf]  ;;  %v11094_v26 = vld [vmem:[#allocation7 + $0x90] sm:$0xf]  ;;  %v12305_v44 = vld [vmem:[#allocation7 + $0x94] sm:$0xf0] }
 0x6f5   : > { %v15445_v9 = vsel %vm5875_vm12, %v5877_v59, %v5873_v0  ;;  %v11118_v0 = vld [vmem:[#allocation7 + $0xc0] sm:$0xf]  ;;  %v12311_v59 = vld [vmem:[#allocation7 + $0xc4] sm:$0xf0]  ;;  %vm17612_vm8 = vcmask 1046528   ;;  %vm17615_vm12 = vmmov %vm17614_vm11 }
 0x6f6   : > { %v5879_v58 = vmul.f32 %v15397_v52, %v15445_v9  ;;  %v5880_v61 = vmul.f32 %v15386_v50, %v15445_v9  ;;  %v5881_v51 = vmul.f32 %v15392_v7, %v15445_v9  ;;  %v11142_v52 = vld [vmem:[#allocation7 + $0xf0] sm:$0xf]  ;;  %v12317_v50 = vld [vmem:[#allocation7 + $0xf4] sm:$0xf0]  ;;  %6134 = vmatpush.bf16.msrb.mxu3 %v11139_v35  ;;  %v11119_v28 = vor.u32 %v12311_v59, %v11118_v0  ;;  %v12322_v35 = vld [vmem:[#allocation7 + $0x124] sm:$0xf] }
 0x6f7   : > { %v11143_v5 = vor.u32 %v12317_v50, %v11142_v52  ;;  %v12333_v7 = vld [vmem:[#allocation7 + $0x174] sm:$0xf0]  ;;  %6310 = vmatpush.bf16.msra.mxu1 %v11195_v20  ;;  %v12308_v50 = vld [vmem:[#allocation7 + $0xb4] sm:$0xf]  ;;  %v5882_v34 = vmul.f32 %v15401_v27, %v15445_v9  ;;  %v11103_v27 = vor.u32 %v12307_v49, %v11102_v14  ;;  %v11104_v9 = vld [vmem:[#allocation7 + $0xa8] sm:$0xf0]  ;;  %v11171_v12 = vor.u32 %v12322_v35, %v11168_v1 }
 0x6f8   : > { %5449 = vadd.xlane.f32.xlu2 %v5448_v60  ;;  %5298 = vadd.xlane.f32.xlu0 %v5297_v46  ;;  %v5883_v31 = vsel %vm17575_vm2, %v5879_v58, 0.0  ;;  %v5886_v17 = vsel %vm17590_vm9, %v5880_v61, 0.0  ;;  %v5889_v37 = vsel %vm17592_vm1, %v5881_v51, 0.0  ;;  %v11207_v13 = vor.u32 %v12333_v7, %v11206_v30  ;;  %v11120_v58 = vld [vmem:[#allocation7 + $0xc8] sm:$0xf0]  ;;  %v17603_v49 = vld [vmem:[#allocation38_spill] sm:$0xff]  ;;  %vm17613_vm15 = vmmov %vm17612_vm8 }
 0x6f9   : > { %5743 = vadd.xlane.f32.xlu1 %v5742_v54  ;;  %6094 = vmatpush.bf16.msrb.mxu2 %v11143_v5  ;;  %v5293_v60 = vmul.f32 %v15421_v57, %v15217_v3  ;;  %v11131_v46 = vor.u32 %v12312_v41, %v11128_v38  ;;  %v11191_v54 = vor.u32 %v12329_v22, %v11190_v4  ;;  %v11182_v61 = vld [vmem:[#allocation7 + $0x140] sm:$0xf]  ;;  %v12327_v51 = vld [vmem:[#allocation7 + $0x144] sm:$0xf0]  ;;  %v11174_v5 = vld [vmem:[#allocation7 + $0x130] sm:$0xf] }
 0x6fa   : > { %6269 = vmatpush.bf16.msra.mxu0 %v11207_v13  ;;  %v11123_v3 = vor.u32 %v12310_v48, %v11120_v58  ;;  %v11183_v57 = vor.u32 %v12327_v51, %v11182_v61  ;;  %v12325_v30 = vld [vmem:[#allocation7 + $0x134] sm:$0xf0]  ;;  %v12324_v7 = vld [vmem:[#allocation7 + $0x134] sm:$0xf]  ;;  %v5445_v13 = vsel %vm17596_vm0, %v15221_v45, 0.0  ;;  %v11115_v16 = vor.u32 %v12308_v50, %v11112_v19  ;;  %v5121_v61 = vpop.xlane.xlu0 %5120  ;;  %vm17616_vm13 = vmmov %vm17612_vm8 }
 0x6fb   : > { %6135 = vmatpush.bf16.msrb.mxu3 %v11131_v46  ;;  %v11175_v2 = vor.u32 %v12325_v30, %v11174_v5  ;;  %v11179_v8 = vor.u32 %v12324_v7, %v11176_v36  ;;  %v5892_v23 = vsel %vm17598_vm6, %v5882_v34, 0.0  ;;  %v12306_v45 = vld [vmem:[#allocation7 + $0xa4] sm:$0xf]  ;;  %v11095_v41 = vor.u32 %v12305_v44, %v11094_v26  ;;  %v11158_v4 = vld [vmem:[#allocation7 + $0x110] sm:$0xf]  ;;  %v17600_v50 = vld [vmem:[#allocation34_spill] sm:$0xff] }
 0x6fc   : > { %v11107_v32 = vor.u32 %v12306_v45, %v11104_v9  ;;  %v12320_v22 = vld [vmem:[#allocation7 + $0x114] sm:$0xf]  ;;  %v5454_v0 = vsel %vm17599_vm5, %v15225_v63, 0.0  ;;  %v11086_v59 = vld [vmem:[#allocation7 + $0x80] sm:$0xf]  ;;  %v5895_v19 = vadd.f32 %v5121_v61, %v17600_v50  ;;  %v17601_v5 = vld [vmem:[#allocation36_spill] sm:$0xff]  ;;  %v5897_v45 = vadd.f32 %v15475_v55, %v17603_v49 }
 0x6fd   : > { %6095 = vmatpush.bf16.msrb.mxu2 %v11135_v11  ;;  %v12323_v11 = vld [vmem:[#allocation7 + $0x124] sm:$0xf0]  ;;  %v12302_v46 = vld [vmem:[#allocation7 + $0x84] sm:$0xf]  ;;  %v11088_v20 = vld [vmem:[#allocation7 + $0x88] sm:$0xf0] }
 0x6fe   : > { %6270 = vmatpush.bf16.msra.mxu0 %v11199_v42  ;;  %v11167_v43 = vor.u32 %v12323_v11, %v11166_v18  ;;  %v12304_v42 = vld [vmem:[#allocation7 + $0x94] sm:$0xf]  ;;  %v11150_v48 = vld [vmem:[#allocation7 + $0x100] sm:$0xf]  ;;  %v12319_v58 = vld [vmem:[#allocation7 + $0x104] sm:$0xf0]  ;;  %v11091_v51 = vor.u32 %v12302_v46, %v11088_v20 }
 0x6ff   : > { %6136 = vmatpush.bf16.msrb.mxu3 %v11123_v3  ;;  %v11099_v38 = vor.u32 %v12304_v42, %v11096_v39  ;;  %v11270_v35 = vld [vmem:[#allocation7 + $0x70] sm:$0xf]  ;;  %v12301_v1 = vld [vmem:[#allocation7 + $0x74] sm:$0xf0]  ;;  %v12300_v26 = vld [vmem:[#allocation7 + $0x74] sm:$0xf] }
 0x700   : > { %5884 = vadd.xlane.f32.xlu2 %v5883_v31  ;;  %5887 = vadd.xlane.f32.xlu0 %v5886_v17  ;;  %v11184_v31 = vld [vmem:[#allocation7 + $0x148] sm:$0xf0]  ;;  %v11110_v17 = vld [vmem:[#allocation7 + $0xb0] sm:$0xf]  ;;  %v11271_v44 = vor.u32 %v12301_v1, %v11270_v35  ;;  %v11272_v42 = vld [vmem:[#allocation7 + $0x78] sm:$0xf0] }
 0x701   : > { %4737 = vadd.xlane.f32.xlu1 %v4736_v62  ;;  %6096 = vmatpush.bf16.msrb.mxu2 %v11127_v24  ;;  %v12326_v62 = vld [vmem:[#allocation7 + $0x144] sm:$0xf]  ;;  %v12321_v24 = vld [vmem:[#allocation7 + $0x114] sm:$0xf0]  ;;  %v11262_v46 = vld [vmem:[#allocation7 + $0x60] sm:$0xf] }
 0x702   : > { %6271 = vmatpush.bf16.msra.mxu0 %v11191_v54  ;;  %v11187_v52 = vor.u32 %v12326_v62, %v11184_v31  ;;  %v11159_v47 = vor.u32 %v12321_v24, %v11158_v4  ;;  %v11151_v62 = vor.u32 %v12319_v58, %v11150_v48  ;;  %v12318_v31 = vld [vmem:[#allocation7 + $0x104] sm:$0xf]  ;;  %v5124_v63 = vpop.xlane.xlu0 %5123  ;;  %v17604_v4 = vld [vmem:[#allocation42_spill] sm:$0xff]  ;;  %v11264_v61 = vld [vmem:[#allocation7 + $0x68] sm:$0xf0] }
 0x703   : > { %6137 = vmatpush.bf16.msrb.mxu3 %v11115_v16  ;;  %v12298_v58 = vld [vmem:[#allocation7 + $0x64] sm:$0xf]  ;;  %v17607_v50 = vld [vmem:[#allocation45_spill] sm:$0xff]  ;;  %vm17617_vm3 = vmmov %vm17612_vm8 }
 0x704   : > { %6311 = vmatpush.bf16.msra.mxu1 %v11187_v52  ;;  %vm17618_vm2 = vmmov %vm17614_vm11 }
 0x705   : > { %6097 = vmatpush.bf16.msrb.mxu2 %v11119_v28  ;;  %v5130_v28 = vpop.xlane.xlu2 %5129  ;;  %vm17619_vm9 = vmmov %vm17618_vm2 }
 0x706   : > { %6272 = vmatpush.bf16.msra.mxu0 %v11183_v57  ;;  %vm17620_vm14 = vmmov %vm17617_vm3 }
 0x707   : > { %6138 = vmatpush.bf16.msrb.mxu3 %v11107_v32  ;;  %vm17621_vm1 = vmmov %vm17617_vm3 }
 0x708   : > { %5301 = vadd.xlane.f32.xlu2 %v5300_v10  ;;  %5890 = vadd.xlane.f32.xlu0 %v5889_v37  ;;  %v12309_v10 = vld [vmem:[#allocation7 + $0xb4] sm:$0xf0]  ;;  %v5303_v37 = vsel %vm17595_vm7, %v5293_v60, 0.0  ;;  %v12303_v60 = vld [vmem:[#allocation7 + $0x84] sm:$0xf0]  ;;  %vm17622_vm10 = vmmov %vm17618_vm2 }
 0x709   : > { %4740 = vadd.xlane.f32.xlu1 %v4739_v15  ;;  %v11111_v21 = vor.u32 %v12309_v10, %v11110_v17  ;;  %6312 = vmatpush.bf16.msra.mxu1 %v11179_v8  ;;  %v11163_v15 = vor.u32 %v12320_v22, %v11160_v6  ;;  %v11087_v54 = vor.u32 %v12303_v60, %v11086_v59  ;;  %v11152_v17 = vld [vmem:[#allocation7 + $0x108] sm:$0xf0]  ;;  %v17605_v22 = vld [vmem:[#allocation43_spill] sm:$0xff]  ;;  %vm17623_vm7 = vmmov %vm17618_vm2 }
 0x70a   : > { %6273 = vmatpush.bf16.msra.mxu0 %v11175_v2  ;;  %v11155_v10 = vor.u32 %v12318_v31, %v11152_v17  ;;  %v17606_v17 = vld [vmem:[#allocation47_spill] sm:$0xff]  ;;  %vm17624_vm0 = vmmov %vm17621_vm1 }
 0x70b   : > { %6098 = vmatpush.bf16.msrb.mxu2 %v11111_v21  ;;  %6139 = vmatpush.bf16.msrb.mxu3 %v11099_v38  ;;  %v5896_v21 = vadd.f32 %v5124_v63, %v17601_v5  ;;  %v13132_v38 = vmov 0   ;;  %v11254_v63 = vld [vmem:[#allocation7 + $0x50] sm:$0xf]  ;;  %vm17625_vm4 = vmmov %vm17624_vm0 }
 0x70c   : > { %12663 = vset.pattern.permute.xlu1 %v13132_v38  ;;  %12662 = vset.pattern.permute.xlu0 %v13132_v38  ;;  %vm17626_vm6 = vmmov %vm17624_vm0 }
 0x70d   : > { %6313 = vmatpush.bf16.msra.mxu1 %v11171_v12  ;;  %12664 = vset.pattern.permute.xlu2 %v13132_v38  ;;  %v12291_v38 = vld [vmem:[#allocation7 + $0x24] sm:$0xf0]  ;;  %vm17627_vm5 = vmmov %vm17624_vm0 }
 0x70e   : > { %6274 = vmatpush.bf16.msra.mxu0 %v11167_v43 }
 0x70f   : > { %6099 = vmatpush.bf16.msrb.mxu2 %v11103_v27  ;;  %6140 = vmatpush.bf16.msrb.mxu3 %v11091_v51 }
 0x710   : > { %5304 = vadd.xlane.f32.xlu2 %v5303_v37  ;;  %v5133_v37 = vpop.xlane.xlu2 %5132 }
 0x711   : > { %5446 = vadd.xlane.f32.xlu1 %v5445_v13  ;;  %6314 = vmatpush.bf16.msra.mxu1 %v11163_v15  ;;  %v5899_v24 = vadd.f32 %v5133_v37, %v17604_v4  ;;  %v12297_v37 = vld [vmem:[#allocation7 + $0x54] sm:$0xf0]  ;;  %v12290_v4 = vld [vmem:[#allocation7 + $0x24] sm:$0xf] }
 0x712   : > { %6275 = vmatpush.bf16.msra.mxu0 %v11159_v47 }
 0x713   : > { %6100 = vmatpush.bf16.msrb.mxu2 %v11095_v41  ;;  %v11275_v41 = vor.u32 %v12300_v26, %v11272_v42  ;;  %v11240_v26 = vld [vmem:[#allocation7 + $0x38] sm:$0xf0] }
 0x715   : > { %6315 = vmatpush.bf16.msra.mxu1 %v11155_v10  ;;  %6562 = vmatpush.bf16.msra.mxu3 %v11275_v41  ;;  %v11230_v41 = vld [vmem:[#allocation7 + $0x20] sm:$0xf] }
 0x716   : > { %6276 = vmatpush.bf16.msra.mxu0 %v11151_v62 }
 0x717   : > { %6101 = vmatpush.bf16.msrb.mxu2 %v11087_v54  ;;  %v12299_v54 = vld [vmem:[#allocation7 + $0x64] sm:$0xf0] }
 0x718   : > { %5452 = vadd.xlane.f32.xlu2 %v5451_v56  ;;  %v11263_v20 = vor.u32 %v12299_v54, %v11262_v46  ;;  %v12288_v54 = vld [vmem:[#allocation7 + $0x14] sm:$0xf] }
 0x719   : > { %5893 = vadd.xlane.f32.xlu1 %v5892_v23  ;;  %v17602_v23 = vld [vmem:[#allocation40_spill] sm:$0xff] }
 0x71a   : > { %v5898_v14 = vadd.f32 %v5130_v28, %v17602_v23  ;;  %v11267_v28 = vor.u32 %v12298_v58, %v11264_v61  ;;  %v12295_v23 = vld [vmem:[#allocation7 + $0x44] sm:$0xf0]  ;;  %v17608_v58 = vld [vmem:[#allocation54_spill] sm:$0xff] }
 0x71b   : > { %6523 = vmatpush.bf16.msra.mxu2 %v11271_v44 }
 0x71c   : > { %6563 = vmatpush.bf16.msra.mxu3 %v11267_v28  ;;  %v17609_v28 = vld [vmem:[#allocation49_spill] sm:$0xff] }
 0x71f   : > { %6524 = vmatpush.bf16.msra.mxu2 %v11263_v20  ;;  %v11224_v20 = vld [vmem:[#allocation7 + $0x18] sm:$0xf0] }
 0x720   : > { %5455 = vadd.xlane.f32.xlu2 %v5454_v0 }
 0x733   : > { %v5729_v3 = vpop.xlane.xlu2 %5728  ;;  %v5720_v57 = vpop.xlane.xlu0 %5719 }
 0x734   : > { %v5714_v52 = vpop.xlane.xlu1 %5713  ;;  %v5909_v32 = vadd.f32 %v5897_v45, %v5720_v57  ;;  %v11255_v57 = vor.u32 %v12297_v37, %v11254_v63  ;;  %v11248_v45 = vld [vmem:[#allocation7 + $0x48] sm:$0xf0] }
 0x735   : > { %v5907_v13 = vadd.f32 %v5895_v19, %v5714_v52  ;;  %v11256_v52 = vld [vmem:[#allocation7 + $0x58] sm:$0xf0] }
 0x736   : > { %6525 = vmatpush.bf16.msra.mxu2 %v11255_v57  ;;  %v11214_v57 = vld [vmem:[#allocation7] sm:$0xf] }
 0x73b   : > { %v15481_v30 = vpop.xlane.xlu2 %5731  ;;  %v5136_v7 = vpop.xlane.xlu0 %5135 }
 0x73c   : > { %v5717_v36 = vpop.xlane.xlu1 %5716  ;;  %v5900_v47 = vadd.f32 %v5136_v7, %v17605_v22  ;;  %v11231_v22 = vor.u32 %v12291_v38, %v11230_v41 }
 0x73d   : > { %v5908_v34 = vadd.f32 %v5896_v21, %v5717_v36 }
 0x73e   : > { %v5912_v60 = vadd.f32 %v5900_v47, %v5729_v3  ;;  %v12296_v3 = vld [vmem:[#allocation7 + $0x54] sm:$0xf]  ;;  %v11232_v47 = vld [vmem:[#allocation7 + $0x28] sm:$0xf0] }
 0x73f   : > { %v15483_v16 = vpack.c.bf16 %v5908_v34, %v5907_v13  ;;  %v11259_v5 = vor.u32 %v12296_v3, %v11256_v52  ;;  %v11235_v46 = vor.u32 %v12290_v4, %v11232_v47  ;;  %v11227_v3 = vor.u32 %v12288_v54, %v11224_v20  ;;  %v12357_v4 = vld [vmem:[#allocation8 + $0xb8] sm:$0xff] }
 0x740   : > { %7068 = vmatpush.bf16.msrb.mxu0 %v12357_v4 }
 0x741   : > { %6102 = vmatmul.bf16.vlgmr.msrb.gmra.mxu2 %v15483_v16  ;;  %6141 = vmatmul.bf16.vlgmr.msrb.gmra.mxu3 %v15483_v16 }
 0x742   : > { %6277 = vmatmul.bf16.vlgmr.msra.gmra.mxu0 %v15483_v16  ;;  %6316 = vmatmul.bf16.vlgmr.msra.gmra.mxu1 %v15483_v16 }
 0x743   : > { %v15489_v2 = vpop.xlane.xlu2 %5147  ;;  %v5139_v8 = vpop.xlane.xlu0 %5138  ;;  %6564 = vmatpush.bf16.msra.mxu3 %v11259_v5  ;;  %v12286_v5 = vld [vmem:[#allocation7 + $0x4] sm:$0xf] }
 0x744   : > { %v5723_v56 = vpop.xlane.xlu1 %5722  ;;  %v5901_v19 = vadd.f32 %v5139_v8, %v17607_v50  ;;  %v11238_v8 = vld [vmem:[#allocation7 + $0x30] sm:$0xf]  ;;  %v5904_v61 = vadd.f32 %v15489_v2, %v17608_v58 }
 0x745   : > { %v5910_v27 = vadd.f32 %v5898_v14, %v5723_v56  ;;  %v11246_v56 = vld [vmem:[#allocation7 + $0x40] sm:$0xf]  ;;  %v12294_v14 = vld [vmem:[#allocation7 + $0x44] sm:$0xf] }
 0x746   : > { %v5913_v34 = vadd.f32 %v5901_v19, %v15481_v30  ;;  %v11247_v49 = vor.u32 %v12295_v23, %v11246_v56  ;;  %v12292_v30 = vld [vmem:[#allocation7 + $0x34] sm:$0xf]  ;;  %v12287_v19 = vld [vmem:[#allocation7 + $0x4] sm:$0xf0] }
 0x747   : > { %v15496_v43 = vpack.c.bf16 %v5910_v27, %v5909_v32 }
 0x748   : > { %6526 = vmatpush.bf16.msra.mxu2 %v11247_v49  ;;  %v17611_v49 = vld [vmem:[#allocation66_spill] sm:$0xff] }
 0x74b   : > { %v15494_v9 = vpop.xlane.xlu2 %5150  ;;  %v5735_v18 = vpop.xlane.xlu0 %5734 }
 0x74c   : > { %v5726_v11 = vpop.xlane.xlu1 %5725 }
 0x74d   : > { %v5911_v6 = vadd.f32 %v5899_v24, %v5726_v11  ;;  %v11251_v11 = vor.u32 %v12294_v14, %v11248_v45 }
 0x74f   : > { %v15514_v48 = vpack.c.bf16 %v5912_v60, %v5911_v6  ;;  %6565 = vmatpush.bf16.msra.mxu3 %v11251_v11  ;;  %v11222_v6 = vld [vmem:[#allocation7 + $0x10] sm:$0xf]  ;;  %v12289_v60 = vld [vmem:[#allocation7 + $0x14] sm:$0xf0] }
 0x751   : > { %6107 = vmatmul.bf16.gmra.mxu2 %v15496_v43  ;;  %6146 = vmatmul.bf16.gmra.mxu3 %v15496_v43 }
 0x752   : > { %6282 = vmatmul.bf16.gmra.mxu0 %v15496_v43  ;;  %6321 = vmatmul.bf16.gmra.mxu1 %v15496_v43 }
 0x753   : > { %v15502_v55 = vpop.xlane.xlu2 %5746  ;;  %v15504_v12 = vpop.xlane.xlu0 %5737 }
 0x754   : > { %v5142_v39 = vpop.xlane.xlu1 %5141 }
 0x755   : > { %v5902_v10 = vadd.f32 %v5142_v39, %v17606_v17  ;;  %v11243_v39 = vor.u32 %v12292_v30, %v11240_v26  ;;  %v11223_v17 = vor.u32 %v12289_v60, %v11222_v6  ;;  %v12356_v60 = vld [vmem:[#allocation8 + $0xb0] sm:$0xff] }
 0x756   : > { %7069 = vmatpush.bf16.msrb.mxu0 %v12356_v60 }
 0x757   : > { %v5914_v21 = vadd.f32 %v5902_v10, %v5735_v18  ;;  %v12293_v18 = vld [vmem:[#allocation7 + $0x34] sm:$0xf0]  ;;  %6566 = vmatpush.bf16.msra.mxu3 %v11243_v39 }
 0x758   : > { %v11239_v1 = vor.u32 %v12293_v18, %v11238_v8 }
 0x759   : > { %v15527_v27 = vpack.c.bf16 %v5914_v21, %v5913_v34  ;;  %v11216_v21 = vld [vmem:[#allocation7 + $0x8] sm:$0xf0] }
 0x75a   : > { %6527 = vmatpush.bf16.msra.mxu2 %v11239_v1 }
 0x75b   : > { %v15508_v15 = vpop.xlane.xlu0 %5153  ;;  %v15510_v0 = vpop.xlane.xlu2 %4743  ;;  %6567 = vmatpush.bf16.msra.mxu3 %v11235_v46  ;;  %v12364_v46 = vld [vmem:[#allocation8 + $0xf0] sm:$0xff] }
 0x75c   : > { %v15512_v59 = vpop.xlane.xlu1 %5144  ;;  %v5906_v45 = vadd.f32 %v15508_v15, %v17611_v49  ;;  %v12361_v49 = vld [vmem:[#allocation8 + $0xd8] sm:$0xff] }
 0x75e   : > { %6528 = vmatpush.bf16.msra.mxu2 %v11231_v22 }
 0x75f   : > { %6568 = vmatpush.bf16.msra.mxu3 %v11227_v3  ;;  %v12380_v3 = vld [vmem:[#allocation8 + $0x170] sm:$0xff] }
 0x761   : > { %6112 = vmatmul.bf16.gmra.mxu2 %v15514_v48  ;;  %6151 = vmatmul.bf16.gmra.mxu3 %v15514_v48 }
 0x762   : > { %6287 = vmatmul.bf16.gmra.mxu0 %v15514_v48  ;;  %6326 = vmatmul.bf16.gmra.mxu1 %v15514_v48 }
 0x763   : > { %v15520_v51 = vpop.xlane.xlu2 %5295  ;;  %v4735_v62 = vpop.xlane.xlu0 %4734  ;;  %6529 = vmatpush.bf16.msra.mxu2 %v11223_v17 }
 0x764   : > { %v5741_v31 = vpop.xlane.xlu1 %5740 }
 0x765   : > { %v5916_v10 = vadd.f32 %v5904_v61, %v5741_v31  ;;  %v11219_v31 = vor.u32 %v12286_v5, %v11216_v21  ;;  %v12363_v5 = vld [vmem:[#allocation8 + $0xe8] sm:$0xff] }
 0x766   : > { %v12371_v21 = vld [vmem:[#allocation8 + $0x128] sm:$0xff] }
 0x767   : > { %6569 = vmatpush.bf16.msra.mxu3 %v11219_v31  ;;  %v12370_v31 = vld [vmem:[#allocation8 + $0x120] sm:$0xff] }
 0x76b   : > { %v5450_v7 = vpop.xlane.xlu2 %5449  ;;  %v5299_v36 = vpop.xlane.xlu0 %5298 }
 0x76c   : > { %v15524_v13 = vpop.xlane.xlu1 %5743  ;;  %v5924_v52 = vadd.f32 %v5450_v7, %v5299_v36 }
 0x771   : > { %6117 = vmatmul.bf16.gmra.mxu2 %v15527_v27  ;;  %6156 = vmatmul.bf16.gmra.mxu3 %v15527_v27 }
 0x772   : > { %6292 = vmatmul.bf16.gmra.mxu0 %v15527_v27  ;;  %6331 = vmatmul.bf16.gmra.mxu1 %v15527_v27 }
 0x773   : > { %v5885_v32 = vpop.xlane.xlu2 %5884  ;;  %v5888_v35 = vpop.xlane.xlu0 %5887 }
 0x774   : > { %v5919_v44 = vadd.f32 %v5885_v32, %v4735_v62  ;;  %v4738_v42 = vpop.xlane.xlu1 %4737  ;;  %v5903_v62 = vadd.f32 %v15512_v59, %v17609_v28  ;;  %v11215_v59 = vor.u32 %v12287_v19, %v11214_v57  ;;  %v5918_v32 = vadd.f32 %v5906_v45, %v15502_v55  ;;  %v12355_v19 = vld [vmem:[#allocation8 + $0xa8] sm:$0xff]  ;;  %v12369_v45 = vld [vmem:[#allocation8 + $0x118] sm:$0xff] }
 0x775   : > { %v5920_v24 = vadd.f32 %v5888_v35, %v4738_v42  ;;  %7070 = vmatpush.bf16.msrb.mxu0 %v12355_v19 }
 0x776   : > { %5929 = vperm.xlu0 %12662, %v5919_v44   ;;  %v5915_v34 = vadd.f32 %v5903_v62, %v15504_v12  ;;  %6530 = vmatpush.bf16.msra.mxu2 %v11215_v59  ;;  %v17610_v12 = vld [vmem:[#allocation53_spill] sm:$0xff]  ;;  %v12362_v59 = vld [vmem:[#allocation8 + $0xe0] sm:$0xff] }
 0x777   : > { %5934 = vperm.xlu1 %12663, %v5920_v24   ;;  %v5905_v14 = vadd.f32 %v15494_v9, %v17610_v12  ;;  %v12365_v24 = vld [vmem:[#allocation8 + $0xf8] sm:$0xff] }
 0x778   : > { %v5979_v2 = vpack.c.bf16 %v5916_v10, %v5915_v34  ;;  %7107 = vmatpush.bf16.msrb.mxu1 %v12365_v24  ;;  %v12373_v10 = vld [vmem:[#allocation8 + $0x138] sm:$0xff] }
 0x779   : > { %v5917_v11 = vadd.f32 %v5905_v14, %v15524_v13  ;;  %v12353_v14 = vld [vmem:[#allocation8 + $0x98] sm:$0xff] }
 0x77a   : > { %7275 = vmatpush.bf16.msrb.mxu2 %v12373_v10 }
 0x77b   : > { %v5302_v63 = vpop.xlane.xlu2 %5301  ;;  %v5891_v37 = vpop.xlane.xlu0 %5890  ;;  %v5980_v1 = vpack.c.bf16 %v5918_v32, %v5917_v11  ;;  %v12377_v11 = vld [vmem:[#allocation8 + $0x158] sm:$0xff]  ;;  %v12352_v32 = vld [vmem:[#allocation8 + $0x90] sm:$0xff] }
 0x77c   : > { %v4741_v50 = vpop.xlane.xlu1 %4740  ;;  %7108 = vmatpush.bf16.msrb.mxu1 %v12364_v46 }
 0x77d   : > { %v5921_v56 = vadd.f32 %v5891_v37, %v4741_v50  ;;  %v12372_v37 = vld [vmem:[#allocation8 + $0x130] sm:$0xff] }
 0x77e   : > { %5954 = vperm.xlu0 %12662, %v5924_v52   ;;  %7276 = vmatpush.bf16.msrb.mxu2 %v12372_v37  ;;  %v12359_v37 = vld [vmem:[#allocation8 + $0xc8] sm:$0xff] }
 0x77f   : > { %5939 = vperm.xlu1 %12663, %v5921_v56   ;;  %v12379_v56 = vld [vmem:[#allocation8 + $0x168] sm:$0xff] }
 0x780   : > { %7109 = vmatpush.bf16.msrb.mxu1 %v12363_v5 }
 0x781   : > { %6122 = vmatmul.bf16.gmra.mxu2 %v5979_v2  ;;  %6161 = vmatmul.bf16.gmra.mxu3 %v5979_v2 }
 0x782   : > { %6297 = vmatmul.bf16.gmra.mxu0 %v5979_v2  ;;  %6336 = vmatmul.bf16.gmra.mxu1 %v5979_v2 }
 0x783   : > { %v5305_v23 = vpop.xlane.xlu2 %5304  ;;  %7277 = vmatpush.bf16.msrb.mxu2 %v12371_v21  ;;  %v12375_v21 = vld [vmem:[#allocation8 + $0x148] sm:$0xff] }
 0x784   : > { %v5447_v7 = vpop.xlane.xlu1 %5446  ;;  %7110 = vmatpush.bf16.msrb.mxu1 %v12362_v59 }
 0x785   : > { %v5923_v36 = vadd.f32 %v5447_v7, %v15520_v51 }
 0x787   : > { %5949 = vperm.xlu1 %12663, %v5923_v36   ;;  %7278 = vmatpush.bf16.msrb.mxu2 %v12370_v31 }
 0x788   : > { %7111 = vmatpush.bf16.msrb.mxu1 %v12361_v49 }
 0x78b   : > { %v5453_v8 = vpop.xlane.xlu2 %5452  ;;  %7279 = vmatpush.bf16.msrb.mxu2 %v12369_v45 }
 0x78c   : > { %v5925_v18 = vadd.f32 %v5453_v8, %v5302_v63  ;;  %v5894_v30 = vpop.xlane.xlu1 %5893  ;;  %v12381_v63 = vld [vmem:[#allocation8 + $0x178] sm:$0xff] }
 0x78d   : > { %v5922_v35 = vadd.f32 %v5894_v30, %v15510_v0  ;;  %7314 = vmatpush.bf16.msrb.mxu3 %v12381_v63  ;;  %v12351_v63 = vld [vmem:[#allocation8 + $0x88] sm:$0xff] }
 0x78f   : > { %5944 = vperm.xlu2 %12664, %v5922_v35   ;;  %5959 = vperm.xlu1 %12663, %v5925_v18   ;;  %v12360_v35 = vld [vmem:[#allocation8 + $0xd0] sm:$0xff] }
 0x790   : > { %7112 = vmatpush.bf16.msrb.mxu1 %v12360_v35 }
 0x791   : > { %6127 = vmatmul.bf16.gmra.mxu2 %v5980_v1  ;;  %6166 = vmatmul.bf16.gmra.mxu3 %v5980_v1 }
 0x792   : > { %6302 = vmatmul.bf16.gmra.mxu0 %v5980_v1  ;;  %6341 = vmatmul.bf16.gmra.mxu1 %v5980_v1 }
 0x793   : > { %v5456_v9 = vpop.xlane.xlu2 %5455  ;;  %7315 = vmatpush.bf16.msrb.mxu3 %v12380_v3  ;;  %v12367_v3 = vld [vmem:[#allocation8 + $0x108] sm:$0xff] }
 0x794   : > { %v5926_v51 = vadd.f32 %v5456_v9, %v5305_v23  ;;  %v12378_v23 = vld [vmem:[#allocation8 + $0x160] sm:$0xff]  ;;  %v12376_v9 = vld [vmem:[#allocation8 + $0x150] sm:$0xff]  ;;  %7113 = vmatpush.bf16.msrb.mxu1 %v12359_v37 }
 0x796   : > { %5964 = vperm.xlu0 %12662, %v5926_v51  }
 0x797   : > { %7316 = vmatpush.bf16.msrb.mxu3 %v12379_v56  ;;  %v12350_v56 = vld [vmem:[#allocation8 + $0x80] sm:$0xff] }
 0x79b   : > { %7317 = vmatpush.bf16.msrb.mxu3 %v12378_v23  ;;  %v12366_v23 = vld [vmem:[#allocation8 + $0x100] sm:$0xff] }
 0x79f   : > { %7318 = vmatpush.bf16.msrb.mxu3 %v12377_v11 }
 0x7a1   : > { %6531 = vmatmul.bf16.vlgmr.msra.gmra.mxu2 %v15483_v16  ;;  %6570 = vmatmul.bf16.vlgmr.msra.gmra.mxu3 %v15483_v16 }
 0x7a3   : > { %7319 = vmatpush.bf16.msrb.mxu3 %v12376_v9 }
 0x7a7   : > { %7320 = vmatpush.bf16.msrb.mxu3 %v12375_v21 }
 0x7b1   : > { %6536 = vmatmul.bf16.gmra.mxu2 %v15496_v43  ;;  %6575 = vmatmul.bf16.gmra.mxu3 %v15496_v43 }
 0x7bf   : > { %v15586_v6 = vpop.f32.mrf.mxu0  ;;  %v15588_v54 = vpop.f32.mrf.mxu1 }
 0x7c1   : > { %6541 = vmatmul.bf16.gmra.mxu2 %v15514_v48  ;;  %6580 = vmatmul.bf16.gmra.mxu3 %v15514_v48 }
 0x7c4   : > { %v15552_v55 = vpop.f32.mrf.mxu2  ;;  %v15554_v15 = vpop.f32.mrf.mxu3 }
 0x7c5   : > { %v6371_v51 = vrot.slane %v15552_v55, 1  ;;  %v6374_v4 = vrot.slane %v15554_v15, 1  ;;  %v6625_v55 = vrot.slane %v15586_v6, 2  ;;  %v6628_v15 = vrot.slane %v15588_v54, 2 }
 0x7c7   : > { %v15594_v61 = vpop.f32.mrf.mxu0  ;;  %v15596_v28 = vpop.f32.mrf.mxu1 }
 0x7c8   : > { %v6626_v24 = vrot.slane %v15594_v61, 2  ;;  %v6629_v60 = vrot.slane %v15596_v28, 2  ;;  %v6721_v28 = vld [vmem:[%s16991_s7] sm:$0x3] }
 0x7c9   : > { %v15637_v45 = vperm.slane %v6721_v28, 0 }
 0x7ca   : > { %v6627_v6 = vsel %vm17614_vm11, %v6625_v55, %v6626_v24  ;;  %v6630_v54 = vsel %vm17615_vm12, %v6628_v15, %v6629_v60  ;;  %vm17630_vm11 = vmmov %vm17624_vm0 }
 0x7cb   : > { %vm17631_vm12 = vmmov %vm17624_vm0 }
 0x7cc   : > { %v15556_v0 = vpop.f32.mrf.mxu2  ;;  %v15558_v13 = vpop.f32.mrf.mxu3 }
 0x7cd   : > { %v6372_v18 = vrot.slane %v15556_v0, 1  ;;  %v6375_v30 = vrot.slane %v15558_v13, 1 }
 0x7cf   : > { %v15602_v57 = vpop.f32.mrf.mxu0  ;;  %v15608_v34 = vpop.f32.mrf.mxu1  ;;  %v6373_v0 = vsel %vm17612_vm8, %v6371_v51, %v6372_v18  ;;  %v6376_v13 = vsel %vm17613_vm15, %v6374_v4, %v6375_v30  ;;  %vm17628_vm8 = vmmov %vm17618_vm2 }
 0x7d0   : > { %vm17629_vm15 = vmmov %vm17618_vm2 }
 0x7d1   : > { %6546 = vmatmul.bf16.gmra.mxu2 %v15527_v27  ;;  %6585 = vmatmul.bf16.gmra.mxu3 %v15527_v27 }
 0x7d4   : > { %v15562_v16 = vpop.f32.mrf.mxu2  ;;  %v15564_v26 = vpop.f32.mrf.mxu3 }
 0x7d5   : > { %v6377_v59 = vrot.slane %v15562_v16, 1  ;;  %v6379_v31 = vrot.slane %v15564_v26, 1  ;;  %v6631_v16 = vrot.slane %v15602_v57, 2  ;;  %v6633_v26 = vrot.slane %v15608_v34, 2 }
 0x7d7   : > { %v15610_v7 = vpop.f32.mrf.mxu0  ;;  %v15616_v8 = vpop.f32.mrf.mxu1  ;;  %v6378_v51 = vsel %vm17616_vm13, %v6372_v18, %v6377_v59  ;;  %v6632_v57 = vsel %vm17618_vm2, %v6626_v24, %v6631_v16  ;;  %v6634_v34 = vsel %vm17619_vm9, %v6629_v60, %v6633_v26  ;;  %vm17632_vm13 = vmmov %vm17624_vm0 }
 0x7d8   : > { %v6637_v24 = vrot.slane %v15616_v8, 2  ;;  %vm17634_vm9 = vmmov %vm17618_vm2 }
 0x7da   : > { %v6638_v8 = vsel %vm17623_vm7, %v6633_v26, %v6637_v24  ;;  %vm17638_vm7 = vmmov %vm17624_vm0 }
 0x7dc   : > { %v15566_v43 = vpop.f32.mrf.mxu2  ;;  %v15568_v44 = vpop.f32.mrf.mxu3 }
 0x7dd   : > { %v6381_v55 = vrot.slane %v15566_v43, 1  ;;  %v6383_v15 = vrot.slane %v15568_v44, 1 }
 0x7df   : > { %v15628_v19 = vpop.f32.mrf.mxu0  ;;  %v15641_v35 = vpop.f32.mrf.mxu1  ;;  %v6382_v43 = vsel %vm17620_vm14, %v6377_v59, %v6381_v55  ;;  %v6384_v44 = vsel %vm17621_vm1, %v6379_v31, %v6383_v15  ;;  %vm17635_vm14 = vmmov %vm17624_vm0 }
 0x7e0   : > { %v6639_v26 = vrot.slane %v15628_v19, 2  ;;  %vm17636_vm1 = vmmov %vm17624_vm0 }
 0x7e1   : > { %6551 = vmatmul.bf16.gmra.mxu2 %v5979_v2  ;;  %6590 = vmatmul.bf16.gmra.mxu3 %v5979_v2  ;;  %v12354_v2 = vld [vmem:[#allocation8 + $0xa0] sm:$0xff] }
 0x7e2   : > { %7071 = vmatpush.bf16.msrb.mxu0 %v12354_v2  ;;  %v12358_v2 = vld [vmem:[#allocation8 + $0xc0] sm:$0xff] }
 0x7e3   : > { %7114 = vmatpush.bf16.msrb.mxu1 %v12358_v2 }
 0x7e4   : > { %v15570_v48 = vpop.f32.mrf.mxu2  ;;  %v15572_v42 = vpop.f32.mrf.mxu3 }
 0x7e5   : > { %v6385_v59 = vrot.slane %v15570_v48, 1 }
 0x7e6   : > { %7072 = vmatpush.bf16.msrb.mxu0 %v12353_v14  ;;  %v12374_v14 = vld [vmem:[#allocation8 + $0x140] sm:$0xff] }
 0x7e7   : > { %7321 = vmatpush.bf16.msrb.mxu3 %v12374_v14  ;;  %v15659_v21 = vpop.f32.mrf.mxu1 }
 0x7ea   : > { %7073 = vmatpush.bf16.msrb.mxu0 %v12352_v32  ;;  %v15639_v32 = vperm.slane %v6721_v28, 1 }
 0x7ec   : > { %v15574_v39 = vpop.f32.mrf.mxu2  ;;  %v15576_v41 = vpop.f32.mrf.mxu3 }
 0x7ee   : > { %7074 = vmatpush.bf16.msrb.mxu0 %v12351_v63  ;;  %v15651_v63 = vpop.f32.mrf.mxu0 }
 0x7f1   : > { %6556 = vmatmul.bf16.gmra.mxu2 %v5980_v1  ;;  %6595 = vmatmul.bf16.gmra.mxu3 %v5980_v1  ;;  %v12368_v1 = vld [vmem:[#allocation8 + $0x110] sm:$0xff] }
 0x7f2   : > { %7280 = vmatpush.bf16.msrb.mxu2 %v12368_v1  ;;  %7075 = vmatpush.bf16.msrb.mxu0 %v12350_v56 }
 0x7f4   : > { %v15578_v27 = vpop.f32.mrf.mxu2  ;;  %v15580_v38 = vpop.f32.mrf.mxu3 }
 0x7f6   : > { %7281 = vmatpush.bf16.msrb.mxu2 %v12367_v3 }
 0x7fa   : > { %7282 = vmatpush.bf16.msrb.mxu2 %v12366_v23 }
 0x7fc   : > { %v15582_v22 = vpop.f32.mrf.mxu2  ;;  %v15584_v47 = vpop.f32.mrf.mxu3 }
 0x804   : > { %v15590_v20 = vpop.f32.mrf.mxu2  ;;  %v15592_v58 = vpop.f32.mrf.mxu3 }
 0x80c   : > { %v15598_v62 = vpop.f32.mrf.mxu2  ;;  %v15600_v17 = vpop.f32.mrf.mxu3 }
 0x814   : > { %v15604_v52 = vpop.f32.mrf.mxu2  ;;  %v15606_v50 = vpop.f32.mrf.mxu3 }
 0x81c   : > { %v15612_v36 = vpop.f32.mrf.mxu2  ;;  %v15614_v12 = vpop.f32.mrf.mxu3 }
 0x824   : > { %v6532_v46 = vpop.f32.mrf.mxu2  ;;  %v6571_v10 = vpop.f32.mrf.mxu3 }
 0x825   : > { %v6533_v61 = vadd.f32 %v6532_v46, %v6373_v0  ;;  %v6572_v5 = vadd.f32 %v6571_v10, %v6376_v13  ;;  %v6380_v0 = vsel %vm17617_vm3, %v6375_v30, %v6379_v31  ;;  %vm17633_vm3 = vmmov %vm17624_vm0 }
 0x827   : > { %v6697_v49 = vadd.f32 %v6627_v6, %v6533_v61  ;;  %v6698_v11 = vadd.f32 %v6630_v54, %v6572_v5  ;;  %v6635_v5 = vrot.slane %v15610_v7, 2 }
 0x829   : > { %v6727_v1 = vadd.f32 %v15637_v45, %v6697_v49  ;;  %v6728_v9 = vadd.f32 %v15639_v32, %v6698_v11  ;;  %v6636_v7 = vsel %vm17622_vm10, %v6631_v16, %v6635_v5  ;;  %vm17637_vm10 = vmmov %vm17624_vm0 }
 0x82b   : > { %v6751_v61 = vmax.f32 %v6727_v1, 0.0  ;;  %v6752_v18 = vmax.f32 %v6728_v9, 0.0 }
 0x82c   : > { %v6534_v4 = vpop.f32.mrf.mxu2  ;;  %v6573_v46 = vpop.f32.mrf.mxu3 }
 0x82d   : > { %v6535_v13 = vadd.f32 %v6534_v4, %v6378_v51  ;;  %v6574_v10 = vadd.f32 %v6573_v46, %v6380_v0  ;;  %v6799_v2 = vrot.slane %v6751_v61, 1  ;;  %v6802_v6 = vrot.slane %v6752_v18, 1 }
 0x82e   : > { %v6387_v46 = vrot.slane %v15572_v42, 1 }
 0x82f   : > { %v6699_v37 = vadd.f32 %v6632_v57, %v6535_v13  ;;  %v6700_v3 = vadd.f32 %v6634_v34, %v6574_v10  ;;  %v15669_v10 = vpop.f32.mrf.mxu0  ;;  %v6641_v34 = vrot.slane %v15641_v35, 2 }
 0x830   : > { %v6388_v48 = vsel %vm17627_vm5, %v6383_v15, %v6387_v46  ;;  %v6391_v15 = vrot.slane %v15576_v41, 1  ;;  %vm17642_vm5 = vmmov %vm17636_vm1 }
 0x831   : > { %v6729_v28 = vadd.f32 %v15637_v45, %v6699_v37  ;;  %v6730_v30 = vadd.f32 %v15639_v32, %v6700_v3  ;;  %v6642_v19 = vsel %vm17629_vm15, %v6637_v24, %v6641_v34  ;;  %v6645_v24 = vrot.slane %v15659_v21, 2  ;;  %vm17644_vm15 = vmmov %vm17636_vm1 }
 0x833   : > { %v6753_v60 = vmax.f32 %v6729_v28, 0.0  ;;  %v6754_v56 = vmax.f32 %v6730_v30, 0.0  ;;  %v6386_v28 = vsel %vm17626_vm6, %v6381_v55, %v6385_v59  ;;  %vm17641_vm6 = vmmov %vm17636_vm1 }
 0x834   : > { %v6537_v54 = vpop.f32.mrf.mxu2  ;;  %v6576_v23 = vpop.f32.mrf.mxu3 }
 0x835   : > { %v6800_v14 = vrot.slane %v6753_v60, 1  ;;  %v6803_v49 = vrot.slane %v6754_v56, 1  ;;  %v6538_v11 = vadd.f32 %v6537_v54, %v6382_v43  ;;  %v6577_v1 = vadd.f32 %v6576_v23, %v6384_v44 }
 0x836   : > { %v6640_v54 = vsel %vm17628_vm8, %v6635_v5, %v6639_v26  ;;  %v6643_v5 = vrot.slane %v15651_v63, 2  ;;  %vm17643_vm8 = vmmov %vm17636_vm1 }
 0x837   : > { %v6801_v9 = vsel %vm17624_vm0, %v6799_v2, %v6800_v14  ;;  %v6804_v51 = vsel %vm17625_vm4, %v6802_v6, %v6803_v49  ;;  %v6701_v4 = vadd.f32 %v6636_v7, %v6538_v11  ;;  %v6702_v0 = vadd.f32 %v6638_v8, %v6577_v1  ;;  %vm17639_vm0 = vmmov %vm17618_vm2 }
 0x838   : > { %v6871_v31 = vmax.f32 %v6751_v61, %v6801_v9  ;;  %v6872_v13 = vmax.f32 %v6752_v18, %v6804_v51  ;;  %v15677_v61 = vpop.f32.mrf.mxu1  ;;  %v6389_v11 = vrot.slane %v15574_v39, 1  ;;  %vm17640_vm4 = vmmov %vm17639_vm0 }
 0x839   : > { %v6731_v57 = vadd.f32 %v15637_v45, %v6701_v4  ;;  %v6732_v16 = vadd.f32 %v15639_v32, %v6702_v0 }
 0x83a   : > { %v6390_v41 = vsel %vm17632_vm13, %v6385_v59, %v6389_v11  ;;  %v6646_v59 = vsel %vm17634_vm9, %v6641_v34, %v6645_v24  ;;  %v6647_v34 = vrot.slane %v15669_v10, 2  ;;  %vm17647_vm13 = vmmov %vm17636_vm1 }
 0x83b   : > { %v6755_v37 = vmax.f32 %v6731_v57, 0.0  ;;  %v6756_v3 = vmax.f32 %v6732_v16, 0.0  ;;  %vm17650_vm9 = vmmov %vm17636_vm1 }
 0x83c   : > { %v6539_v30 = vpop.f32.mrf.mxu2  ;;  %v6578_v42 = vpop.f32.mrf.mxu3 }
 0x83d   : > { %v6805_v18 = vrot.slane %v6755_v37, 1  ;;  %v6807_v2 = vrot.slane %v6756_v3, 1  ;;  %v6540_v6 = vadd.f32 %v6539_v30, %v6386_v28  ;;  %v6579_v43 = vadd.f32 %v6578_v42, %v6388_v48 }
 0x83e   : > { %v6393_v42 = vrot.slane %v15578_v27, 1 }
 0x83f   : > { %v6806_v35 = vsel %vm17630_vm11, %v6800_v14, %v6805_v18  ;;  %v6808_v44 = vsel %vm17631_vm12, %v6803_v49, %v6807_v2  ;;  %v6703_v23 = vadd.f32 %v6640_v54, %v6540_v6  ;;  %v6704_v55 = vadd.f32 %v6642_v19, %v6579_v43  ;;  %v15693_v49 = vpop.f32.mrf.mxu0  ;;  %vm17645_vm11 = vmmov %vm17639_vm0 }
 0x840   : > { %v6873_v1 = vmax.f32 %v6753_v60, %v6806_v35  ;;  %v6874_v7 = vmax.f32 %v6754_v56, %v6808_v44  ;;  %v6392_v56 = vsel %vm17633_vm3, %v6387_v46, %v6391_v15  ;;  %v15703_v16 = vpop.f32.mrf.mxu1  ;;  %v6395_v6 = vrot.slane %v15580_v38, 1  ;;  %vm17646_vm12 = vmmov %vm17639_vm0 }
 0x841   : > { %v6733_v8 = vadd.f32 %v15637_v45, %v6703_v23  ;;  %v6734_v9 = vadd.f32 %v15639_v32, %v6704_v55  ;;  %v6649_v35 = vrot.slane %v15677_v61, 2  ;;  %vm17648_vm3 = vmmov %vm17636_vm1 }
 0x842   : > { %v15689_v51 = vpack.c.bf16 %v6873_v1, %v6871_v31  ;;  %v15691_v14 = vpack.c.bf16 %v6874_v7, %v6872_v13  ;;  %v6644_v13 = vsel %vm17618_vm2, %v6639_v26, %v6643_v5  ;;  %vm17649_vm2 = vmmov %vm17636_vm1 }
 0x843   : > { %v6757_v4 = vmax.f32 %v6733_v8, 0.0  ;;  %v6758_v39 = vmax.f32 %v6734_v9, 0.0  ;;  %v6648_v8 = vsel %vm17639_vm0, %v6643_v5, %v6647_v34  ;;  %v6650_v10 = vsel %vm17640_vm4, %v6645_v24, %v6649_v35 }
 0x844   : > { %v6542_v60 = vpop.f32.mrf.mxu2  ;;  %v6581_v0 = vpop.f32.mrf.mxu3  ;;  %7076 = vmatmul.bf16.vlgmr.msrb.gmra.mxu0 %v15689_v51  ;;  %7115 = vmatmul.bf16.vlgmr.msrb.gmra.mxu1 %v15691_v14  ;;  %v6651_v24 = vrot.slane %v15693_v49, 2 }
 0x845   : > { %v6809_v63 = vrot.slane %v6757_v4, 1  ;;  %v6811_v21 = vrot.slane %v6758_v39, 1  ;;  %v6543_v31 = vadd.f32 %v6542_v60, %v6390_v41  ;;  %v6582_v57 = vadd.f32 %v6581_v0, %v6392_v56  ;;  %7283 = vmatmul.bf16.vlgmr.msrb.gmra.mxu2 %v15689_v51  ;;  %7322 = vmatmul.bf16.vlgmr.msrb.gmra.mxu3 %v15691_v14 }
 0x846   : > { %v6397_v60 = vrot.slane %v15582_v22, 1 }
 0x847   : > { %v6705_v46 = vadd.f32 %v6644_v13, %v6543_v31  ;;  %v6706_v28 = vadd.f32 %v6646_v59, %v6582_v57  ;;  %v6810_v30 = vsel %vm17635_vm14, %v6805_v18, %v6809_v63  ;;  %v6812_v48 = vsel %vm17636_vm1, %v6807_v2, %v6811_v21  ;;  %v15715_v1 = vpop.f32.mrf.mxu0  ;;  %vm17651_vm14 = vmmov %vm17639_vm0 }
 0x848   : > { %v6875_v43 = vmax.f32 %v6755_v37, %v6810_v30  ;;  %v6876_v54 = vmax.f32 %v6756_v3, %v6812_v48  ;;  %v6394_v18 = vsel %vm17637_vm10, %v6389_v11, %v6393_v42  ;;  %v6396_v2 = vsel %vm17638_vm7, %v6391_v15, %v6395_v6  ;;  %v15723_v31 = vpop.f32.mrf.mxu1  ;;  %vm17652_vm1 = vmmov %vm17639_vm0 }
 0x849   : > { %v6735_v19 = vadd.f32 %v15637_v45, %v6705_v46  ;;  %v6736_v26 = vadd.f32 %v15639_v32, %v6706_v28  ;;  %v6399_v15 = vrot.slane %v15584_v47, 1  ;;  %v6653_v13 = vrot.slane %v15703_v16, 2  ;;  %vm17653_vm10 = vmmov %vm17649_vm2 }
 0x84a   : > { %v6398_v47 = vsel %vm17643_vm8, %v6393_v42, %v6397_v60  ;;  %v6652_v48 = vsel %vm17645_vm11, %v6647_v34, %v6651_v24  ;;  %vm17654_vm7 = vmmov %vm17649_vm2 }
 0x84b   : > { %v6759_v44 = vmax.f32 %v6735_v19, 0.0  ;;  %v6760_v23 = vmax.f32 %v6736_v26, 0.0  ;;  %v6654_v42 = vsel %vm17646_vm12, %v6649_v35, %v6653_v13  ;;  %v6655_v35 = vrot.slane %v15715_v1, 2  ;;  %vm17655_vm0 = vmmov %vm17649_vm2 }
 0x84c   : > { %v6544_v55 = vpop.f32.mrf.mxu2  ;;  %v6583_v27 = vpop.f32.mrf.mxu3  ;;  %vm17656_vm4 = vmmov %vm17655_vm0 }
 0x84d   : > { %v6813_v38 = vrot.slane %v6759_v44, 1  ;;  %v6815_v37 = vrot.slane %v6760_v23, 1  ;;  %v6545_v3 = vadd.f32 %v6544_v55, %v6394_v18  ;;  %v6584_v7 = vadd.f32 %v6583_v27, %v6396_v2  ;;  %vm17659_vm8 = vmmov %vm17655_vm0 }
 0x84e   : > { %v6401_v18 = vrot.slane %v15590_v20, 1  ;;  %v6403_v55 = vrot.slane %v15592_v58, 1  ;;  %vm17661_vm11 = vmmov %vm17655_vm0 }
 0x84f   : > { %v6707_v9 = vadd.f32 %v6648_v8, %v6545_v3  ;;  %v6708_v61 = vadd.f32 %v6650_v10, %v6584_v7  ;;  %v6814_v41 = vsel %vm17641_vm6, %v6809_v63, %v6813_v38  ;;  %v6816_v11 = vsel %vm17642_vm5, %v6811_v21, %v6815_v37  ;;  %vm17657_vm6 = vmmov %vm17652_vm1 }
 0x850   : > { %v6877_v56 = vmax.f32 %v6757_v4, %v6814_v41  ;;  %v6878_v0 = vmax.f32 %v6758_v39, %v6816_v11  ;;  %v6400_v39 = vsel %vm17644_vm15, %v6395_v6, %v6399_v15  ;;  %v6657_v7 = vrot.slane %v15723_v31, 2  ;;  %v15755_v8 = vpop.f32.mrf.mxu1  ;;  %v12341_v41 = vld [vmem:[#allocation8 + $0x38] sm:$0xff]  ;;  %vm17658_vm5 = vmmov %vm17652_vm1 }
 0x851   : > { %v6737_v57 = vadd.f32 %v15637_v45, %v6707_v9  ;;  %v6738_v5 = vadd.f32 %v15639_v32, %v6708_v61  ;;  %v6402_v58 = vsel %vm17649_vm2, %v6397_v60, %v6401_v18  ;;  %v12349_v11 = vld [vmem:[#allocation8 + $0x78] sm:$0xff]  ;;  %7497 = vmatpush.bf16.msra.mxu0 %v12341_v41  ;;  %vm17660_vm15 = vmmov %vm17655_vm0 }
 0x852   : > { %v15729_v59 = vpack.c.bf16 %v6877_v56, %v6875_v43  ;;  %v15731_v63 = vpack.c.bf16 %v6878_v0, %v6876_v54  ;;  %v15741_v43 = vpop.f32.mrf.mxu0  ;;  %v6405_v56 = vrot.slane %v15598_v62, 1  ;;  %v6656_v0 = vsel %vm17651_vm14, %v6651_v24, %v6655_v35  ;;  %7536 = vmatpush.bf16.msra.mxu1 %v12349_v11  ;;  %v12397_v11 = vld [vmem:[#allocation11 + $0x74] sm:$0xf0]  ;;  %vm17662_vm12 = vmmov %vm17652_vm1 }
 0x853   : > { %v6761_v21 = vmax.f32 %v6737_v57, 0.0  ;;  %v6762_v22 = vmax.f32 %v6738_v5, 0.0  ;;  %v6658_v60 = vsel %vm17652_vm1, %v6653_v13, %v6657_v7  ;;  %v6659_v13 = vrot.slane %v15741_v43, 2  ;;  %vm17665_vm2 = vmmov %vm17655_vm0 }
 0x854   : > { %v6547_v4 = vpop.f32.mrf.mxu2  ;;  %v6586_v46 = vpop.f32.mrf.mxu3  ;;  %7081 = vmatmul.bf16.gmra.mxu0 %v15729_v59  ;;  %7120 = vmatmul.bf16.gmra.mxu1 %v15731_v63  ;;  %vm17667_vm14 = vmmov %vm17655_vm0 }
 0x855   : > { %v6817_v28 = vrot.slane %v6761_v21, 1  ;;  %v6819_v49 = vrot.slane %v6762_v22, 1  ;;  %v6548_v30 = vadd.f32 %v6547_v4, %v6398_v47  ;;  %v6587_v16 = vadd.f32 %v6586_v46, %v6400_v39  ;;  %7288 = vmatmul.bf16.gmra.mxu2 %v15729_v59  ;;  %7327 = vmatmul.bf16.gmra.mxu3 %v15731_v63 }
 0x856   : > { %v6407_v47 = vrot.slane %v15600_v17, 1 }
 0x857   : > { %v6709_v6 = vadd.f32 %v6652_v48, %v6548_v30  ;;  %v6710_v54 = vadd.f32 %v6654_v42, %v6587_v16  ;;  %v6818_v19 = vsel %vm17647_vm13, %v6813_v38, %v6817_v28  ;;  %v6820_v26 = vsel %vm17648_vm3, %v6815_v37, %v6819_v49  ;;  %vm17663_vm13 = vmmov %vm17655_vm0 }
 0x858   : > { %v6879_v2 = vmax.f32 %v6759_v44, %v6818_v19  ;;  %v6880_v27 = vmax.f32 %v6760_v23, %v6820_v26  ;;  %v6404_v23 = vsel %vm17650_vm9, %v6399_v15, %v6403_v55  ;;  %v6406_v48 = vsel %vm17655_vm0, %v6401_v18, %v6405_v56  ;;  %vm17664_vm3 = vmmov %vm17652_vm1 }
 0x859   : > { %v15748_v3 = vadd.f32 %v15637_v45, %v6709_v6  ;;  %v15751_v34 = vadd.f32 %v15639_v32, %v6710_v54  ;;  %v6409_v6 = vrot.slane %v15604_v52, 1  ;;  %v6411_v54 = vrot.slane %v15606_v50, 1  ;;  %vm17666_vm9 = vmmov %vm17655_vm0  ;;  %v12337_v50 = vld [vmem:[#allocation8 + $0x18] sm:$0xff] }
 0x85a   : > { %v15771_v46 = vpop.f32.mrf.mxu0  ;;  %v6408_v26 = vsel %vm17656_vm4, %v6403_v55, %v6407_v47  ;;  %v12340_v55 = vld [vmem:[#allocation8 + $0x30] sm:$0xff]  ;;  %vm17668_vm1 = vmmov %vm17655_vm0 }
 0x85b   : > { %v6763_v38 = vmax.f32 %v15748_v3, 0.0  ;;  %v6764_v20 = vmax.f32 %v15751_v34, 0.0  ;;  %v6663_v42 = vrot.slane %v15771_v46, 2  ;;  %7498 = vmatpush.bf16.msra.mxu0 %v12340_v55  ;;  %v11510_v34 = vld [vmem:[#allocation11 + $0x50] sm:$0xf]  ;;  %vm17671_vm4 = vmmov %vm17655_vm0 }
 0x85c   : > { %v6549_v44 = vpop.f32.mrf.mxu2  ;;  %v6588_v37 = vpop.f32.mrf.mxu3 }
 0x85d   : > { %v6821_v10 = vrot.slane %v6763_v38, 1  ;;  %v6823_v1 = vrot.slane %v6764_v20, 1  ;;  %v6550_v9 = vadd.f32 %v6549_v44, %v6402_v58  ;;  %v6589_v61 = vadd.f32 %v6588_v37, %v6404_v23  ;;  %v12348_v37 = vld [vmem:[#allocation8 + $0x70] sm:$0xff] }
 0x85e   : > { %7537 = vmatpush.bf16.msra.mxu1 %v12348_v37  ;;  %v12392_v37 = vld [vmem:[#allocation11 + $0x54] sm:$0xf] }
 0x85f   : > { %v6711_v31 = vadd.f32 %v6656_v0, %v6550_v9  ;;  %v6712_v57 = vadd.f32 %v6658_v60, %v6589_v61  ;;  %v6822_v15 = vsel %vm17653_vm10, %v6817_v28, %v6821_v10  ;;  %v6824_v5 = vsel %vm17654_vm7, %v6819_v49, %v6823_v1  ;;  %v11526_v9 = vld [vmem:[#allocation11 + $0x70] sm:$0xf]  ;;  %v12396_v0 = vld [vmem:[#allocation11 + $0x74] sm:$0xf]  ;;  %v11528_v60 = vld [vmem:[#allocation11 + $0x78] sm:$0xf0] }
 0x860   : > { %v6881_v4 = vmax.f32 %v6761_v21, %v6822_v15  ;;  %v6882_v39 = vmax.f32 %v6762_v22, %v6824_v5  ;;  %v6661_v28 = vrot.slane %v15755_v8, 2  ;;  %v6660_v61 = vsel %vm17657_vm6, %v6655_v35, %v6659_v13  ;;  %v12390_v8 = vld [vmem:[#allocation11 + $0x44] sm:$0xf]  ;;  %vm17669_vm10 = vmmov %vm17664_vm3 }
 0x861   : > { %v15774_v30 = vadd.f32 %v15637_v45, %v6711_v31  ;;  %v15777_v24 = vadd.f32 %v15639_v32, %v6712_v57  ;;  %vm17670_vm7 = vmmov %vm17664_vm3 }
 0x862   : > { %v15781_v16 = vpack.c.bf16 %v6881_v4, %v6879_v2  ;;  %v15783_v49 = vpack.c.bf16 %v6882_v39, %v6880_v27  ;;  %v15798_v27 = vpop.f32.mrf.mxu1  ;;  %v6662_v41 = vsel %vm17658_vm5, %v6657_v7, %v6661_v28  ;;  %v11518_v4 = vld [vmem:[#allocation11 + $0x60] sm:$0xf]  ;;  %v12395_v39 = vld [vmem:[#allocation11 + $0x64] sm:$0xf0]  ;;  %v15852_v43 = vpop.f32.mrf.mxu0  ;;  %vm17672_vm6 = vmmov %vm17655_vm0 }
 0x863   : > { %v6765_v21 = vmax.f32 %v15774_v30, 0.0  ;;  %v6766_v22 = vmax.f32 %v15777_v24, 0.0  ;;  %v11519_v3 = vor.u32 %v12395_v39, %v11518_v4  ;;  %vm17673_vm5 = vmmov %vm17655_vm0 }
 0x864   : > { %v6552_v19 = vpop.f32.mrf.mxu2  ;;  %v6591_v2 = vpop.f32.mrf.mxu3  ;;  %7086 = vmatmul.bf16.gmra.mxu0 %v15781_v16  ;;  %7125 = vmatmul.bf16.gmra.mxu1 %v15783_v49 }
 0x865   : > { %v15802_v18 = vrot.slane %v6765_v21, 1  ;;  %v15806_v58 = vrot.slane %v6766_v22, 1  ;;  %v6553_v44 = vadd.f32 %v6552_v19, %v6406_v48  ;;  %v6592_v23 = vadd.f32 %v6591_v2, %v6408_v26  ;;  %7293 = vmatmul.bf16.gmra.mxu2 %v15781_v16  ;;  %7332 = vmatmul.bf16.gmra.mxu3 %v15783_v49  ;;  %v12394_v48 = vld [vmem:[#allocation11 + $0x64] sm:$0xf]  ;;  %v11520_v2 = vld [vmem:[#allocation11 + $0x68] sm:$0xf0] }
 0x866   : > { %v11527_v19 = vor.u32 %v12397_v11, %v11526_v9  ;;  %v11531_v26 = vor.u32 %v12396_v0, %v11528_v60  ;;  %v12338_v11 = vld [vmem:[#allocation8 + $0x20] sm:$0xff]  ;;  %v6410_v0 = vsel %vm17661_vm11, %v6405_v56, %v6409_v6  ;;  %vm17676_vm11 = vmmov %vm17655_vm0 }
 0x867   : > { %v6713_v31 = vadd.f32 %v6660_v61, %v6553_v44  ;;  %v6714_v57 = vadd.f32 %v6662_v41, %v6592_v23  ;;  %v6826_v15 = vsel %vm17659_vm8, %v6821_v10, %v15802_v18  ;;  %v6828_v5 = vsel %vm17660_vm15, %v6823_v1, %v15806_v58  ;;  %v12339_v44 = vld [vmem:[#allocation8 + $0x28] sm:$0xff]  ;;  %v11512_v41 = vld [vmem:[#allocation11 + $0x58] sm:$0xf0]  ;;  %vm17674_vm8 = vmmov %vm17664_vm3 }
 0x868   : > { %v6883_v35 = vmax.f32 %v6763_v38, %v6826_v15  ;;  %v6884_v7 = vmax.f32 %v6764_v20, %v6828_v5  ;;  %v12347_v23 = vld [vmem:[#allocation8 + $0x68] sm:$0xff]  ;;  %v6665_v10 = vrot.slane %v15798_v27, 2  ;;  %7823 = vmatpush.bf16.msra.mxu2 %v11527_v19  ;;  %7852 = vmatpush.bf16.msra.mxu3 %v11531_v26  ;;  %v11523_v38 = vor.u32 %v12394_v48, %v11520_v2  ;;  %v12393_v20 = vld [vmem:[#allocation11 + $0x54] sm:$0xf0]  ;;  %v12346_v5 = vld [vmem:[#allocation8 + $0x60] sm:$0xff] }
 0x869   : > { %v15826_v1 = vadd.f32 %v15637_v45, %v6713_v31  ;;  %v15829_v55 = vadd.f32 %v15639_v32, %v6714_v57  ;;  %7499 = vmatpush.bf16.msra.mxu0 %v12339_v44  ;;  %v6664_v31 = vsel %vm17662_vm12, %v6659_v13, %v6663_v42  ;;  %v6412_v57 = vsel %vm17663_vm13, %v6407_v47, %v6411_v54  ;;  %v11502_v48 = vld [vmem:[#allocation11 + $0x40] sm:$0xf]  ;;  %v12391_v19 = vld [vmem:[#allocation11 + $0x44] sm:$0xf0]  ;;  %vm17675_vm15 = vmmov %vm17664_vm3 }
 0x86a   : > { %7538 = vmatpush.bf16.msra.mxu1 %v12347_v23  ;;  %v6666_v17 = vsel %vm17664_vm3, %v6661_v28, %v6665_v10  ;;  %v11511_v47 = vor.u32 %v12393_v20, %v11510_v34  ;;  %v11515_v13 = vor.u32 %v12392_v37, %v11512_v41  ;;  %v15859_v26 = vpop.f32.mrf.mxu1  ;;  %v6413_v28 = vrot.slane %v15612_v36, 1  ;;  %vm17677_vm12 = vmmov %vm17655_vm0 }
 0x86b   : > { %v6767_v9 = vmax.f32 %v15826_v1, 0.0  ;;  %v6768_v61 = vmax.f32 %v15829_v55, 0.0  ;;  %v6667_v20 = vrot.slane %v15852_v43, 2  ;;  %v11503_v37 = vor.u32 %v12391_v19, %v11502_v48  ;;  %v11496_v48 = vld [vmem:[#allocation11 + $0x38] sm:$0xf0]  ;;  %v12334_v43 = vld [vmem:[#allocation8] sm:$0xff]  ;;  %vm17678_vm13 = vmmov %vm17655_vm0 }
 0x86c   : > { %v6554_v60 = vpop.f32.mrf.mxu2  ;;  %v6593_v15 = vpop.f32.mrf.mxu3  ;;  %7824 = vmatpush.bf16.msra.mxu2 %v11519_v3  ;;  %7853 = vmatpush.bf16.msra.mxu3 %v11523_v38  ;;  %v6415_v3 = vrot.slane %v15614_v12, 1  ;;  %v6669_v41 = vrot.slane %v15859_v26, 2  ;;  %v12385_v55 = vld [vmem:[#allocation11 + $0x14] sm:$0xf0]  ;;  %vm17679_vm3 = vmmov %vm17655_vm0 }
 0x86d   : > { %v6829_v62 = vrot.slane %v6767_v9, 1  ;;  %v6831_v56 = vrot.slane %v6768_v61, 1  ;;  %v6555_v4 = vadd.f32 %v6554_v60, %v6410_v0  ;;  %v6594_v39 = vadd.f32 %v6593_v15, %v6412_v57  ;;  %7500 = vmatpush.bf16.msra.mxu0 %v12338_v11  ;;  %v11504_v60 = vld [vmem:[#allocation11 + $0x48] sm:$0xf0] }
 0x86e   : > { %7539 = vmatpush.bf16.msra.mxu1 %v12346_v5  ;;  %v11507_v30 = vor.u32 %v12390_v8, %v11504_v60  ;;  %v6696_v36 = vsel %vm17675_vm15, %v6669_v41, 0.0  ;;  %vm17698_vm15 = vmmov %vm17655_vm0 }
 0x86f   : > { %v6715_v2 = vadd.f32 %v6664_v31, %v6555_v4  ;;  %v6716_v44 = vadd.f32 %v6666_v17, %v6594_v39  ;;  %v6830_v23 = vsel %vm17665_vm2, %v15802_v18, %v6829_v62  ;;  %v6832_v0 = vsel %vm17666_vm9, %v15806_v58, %v6831_v56  ;;  %v11494_v4 = vld [vmem:[#allocation11 + $0x30] sm:$0xf]  ;;  %vm17680_vm2 = vmmov %vm17655_vm0 }
 0x870   : > { %v6885_v38 = vmax.f32 %v6765_v21, %v6830_v23  ;;  %v6886_v34 = vmax.f32 %v6766_v22, %v6832_v0  ;;  %7825 = vmatpush.bf16.msra.mxu2 %v11511_v47  ;;  %7854 = vmatpush.bf16.msra.mxu3 %v11515_v13  ;;  %v6414_v22 = vsel %vm17667_vm14, %v6409_v6, %v6413_v28  ;;  %v12389_v47 = vld [vmem:[#allocation11 + $0x34] sm:$0xf0]  ;;  %v12388_v13 = vld [vmem:[#allocation11 + $0x34] sm:$0xf]  ;;  %v11486_v0 = vld [vmem:[#allocation11 + $0x20] sm:$0xf] }
 0x871   : > { %v15873_v18 = vadd.f32 %v15637_v45, %v6715_v2  ;;  %v15876_v58 = vadd.f32 %v15639_v32, %v6716_v44  ;;  %v6668_v39 = vsel %vm17669_vm10, %v6663_v42, %v6667_v20  ;;  %v6670_v17 = vsel %vm17670_vm7, %v6665_v10, %v6669_v41  ;;  %7501 = vmatpush.bf16.msra.mxu0 %v12337_v50  ;;  %v12336_v42 = vld [vmem:[#allocation8 + $0x10] sm:$0xff]  ;;  %vm17681_vm9 = vmmov %vm17655_vm0 }
 0x872   : > { %v15879_v11 = vpack.c.bf16 %v6885_v38, %v6883_v35  ;;  %v15881_v31 = vpack.c.bf16 %v6886_v34, %v6884_v7  ;;  %v6416_v35 = vsel %vm17668_vm1, %v6411_v54, %v6415_v3  ;;  %v12345_v54 = vld [vmem:[#allocation8 + $0x58] sm:$0xff]  ;;  %v12344_v23 = vld [vmem:[#allocation8 + $0x50] sm:$0xff]  ;;  %v11495_v8 = vor.u32 %v12389_v47, %v11494_v4  ;;  %v12387_v38 = vld [vmem:[#allocation11 + $0x24] sm:$0xf0] }
 0x873   : > { %v6769_v24 = vmax.f32 %v15873_v18, 0.0  ;;  %v6770_v21 = vmax.f32 %v15876_v58, 0.0  ;;  %7540 = vmatpush.bf16.msra.mxu1 %v12345_v54  ;;  %v11499_v60 = vor.u32 %v12388_v13, %v11496_v48  ;;  %v12386_v34 = vld [vmem:[#allocation11 + $0x24] sm:$0xf]  ;;  %v6442_v50 = vsel %vm17673_vm5, %v6415_v3, 0.0  ;;  %v12343_v4 = vld [vmem:[#allocation8 + $0x48] sm:$0xff]  ;;  %vm17688_vm14 = vmmov %vm17655_vm0 }
 0x874   : > { %v6557_v57 = vpop.f32.mrf.mxu2  ;;  %v6596_v7 = vpop.f32.mrf.mxu3  ;;  %7091 = vmatmul.bf16.gmra.mxu0 %v15879_v11  ;;  %7130 = vmatmul.bf16.gmra.mxu1 %v15881_v31  ;;  %v6695_v48 = vsel %vm17674_vm8, %v6667_v20, 0.0  ;;  %v12383_v20 = vld [vmem:[#allocation11 + $0x4] sm:$0xf0]  ;;  %vm17691_vm1 = vmmov %vm17670_vm7 }
 0x875   : > { %v15899_v15 = vrot.slane %v6769_v24, 1  ;;  %v15903_v52 = vrot.slane %v6770_v21, 1  ;;  %v6558_v6 = vadd.f32 %v6557_v57, %v6414_v22  ;;  %v6597_v5 = vadd.f32 %v6596_v7, %v6416_v35  ;;  %7298 = vmatmul.bf16.gmra.mxu2 %v15879_v11  ;;  %7337 = vmatmul.bf16.gmra.mxu3 %v15881_v31  ;;  %v11478_v22 = vld [vmem:[#allocation11 + $0x10] sm:$0xf]  ;;  %v12384_v35 = vld [vmem:[#allocation11 + $0x14] sm:$0xf]  ;;  %vm17692_vm10 = vmmov %vm17655_vm0 }
 0x876   : > { %7826 = vmatpush.bf16.msra.mxu2 %v11503_v37  ;;  %7855 = vmatpush.bf16.msra.mxu3 %v11507_v30  ;;  %v11488_v37 = vld [vmem:[#allocation11 + $0x28] sm:$0xf0]  ;;  %v11487_v30 = vor.u32 %v12387_v38, %v11486_v0  ;;  %v11480_v7 = vld [vmem:[#allocation11 + $0x18] sm:$0xf0]  ;;  %v11479_v12 = vor.u32 %v12385_v55, %v11478_v22  ;;  %v5935_v22 = vpop.permute.xlu1 %5934  ;;  %v5930_v55 = vpop.permute.xlu0 %5929  ;;  %vm17693_vm7 = vmmov %vm17691_vm1 }
 0x877   : > { %v6717_v19 = vadd.f32 %v6668_v39, %v6558_v6  ;;  %v6718_v2 = vadd.f32 %v6670_v17, %v6597_v5  ;;  %v6834_v44 = vsel %vm17655_vm0, %v6829_v62, %v15899_v15  ;;  %v6836_v46 = vsel %vm17671_vm4, %v6831_v56, %v15903_v52  ;;  %7502 = vmatpush.bf16.msra.mxu0 %v12336_v42  ;;  %v12382_v42 = vld [vmem:[#allocation11 + $0x4] sm:$0xf]  ;;  %vm17694_vm4 = vmmov %vm17691_vm1 }
 0x878   : > { %v6887_v27 = vmax.f32 %v6767_v9, %v6834_v44  ;;  %v6888_v10 = vmax.f32 %v6768_v61, %v6836_v46  ;;  %v11491_v1 = vor.u32 %v12386_v34, %v11488_v37  ;;  %v12335_v9 = vld [vmem:[#allocation8 + $0x8] sm:$0xff]  ;;  %v6441_v6 = vsel %vm17672_vm6, %v6413_v28, 0.0  ;;  %7541 = vmatpush.bf16.msra.mxu1 %v12344_v23  ;;  %v11470_v46 = vld [vmem:[#allocation11] sm:$0xf]  ;;  %vm17695_vm6 = vmmov %vm17655_vm0 }
 0x879   : > { %v15926_v62 = vadd.f32 %v15637_v45, %v6717_v19  ;;  %v15929_v56 = vadd.f32 %v15639_v32, %v6718_v2  ;;  %v11483_v28 = vor.u32 %v12384_v35, %v11480_v7  ;;  %v11472_v23 = vld [vmem:[#allocation11 + $0x8] sm:$0xf0]  ;;  %v11471_v38 = vor.u32 %v12383_v20, %v11470_v46  ;;  %v12408_v46 = vld [vmem:[#allocation11 + $0xd4] sm:$0xf]  ;;  %v11640_v20 = vld [vmem:[#allocation11 + $0xd8] sm:$0xf0] }
 0x87a   : > { %7827 = vmatpush.bf16.msra.mxu2 %v11495_v8  ;;  %7856 = vmatpush.bf16.msra.mxu3 %v11499_v60  ;;  %v12342_v60 = vld [vmem:[#allocation8 + $0x40] sm:$0xff]  ;;  %v11475_v58 = vor.u32 %v12382_v42, %v11472_v23  ;;  %v17682_v35 = vld [vmem:[#allocation48_spill] sm:$0xff]  ;;  %v11643_v42 = vor.u32 %v12408_v46, %v11640_v20  ;;  %vm17696_vm5 = vmmov %vm17691_vm1 }
 0x87b   : > { %v6771_v61 = vmax.f32 %v15926_v62, 0.0  ;;  %v6772_v57 = vmax.f32 %v15929_v56, 0.0  ;;  %7503 = vmatpush.bf16.msra.mxu0 %v12335_v9  ;;  %v5968_v7 = vadd.f32 %v5935_v22, %v17682_v35  ;;  %v11614_v22 = vld [vmem:[#allocation11 + $0xa0] sm:$0xf]  ;;  %v12402_v35 = vld [vmem:[#allocation11 + $0xa4] sm:$0xf]  ;;  %vm17697_vm8 = vmmov %vm17655_vm0 }
 0x87c   : > { %v6559_v5 = vpop.f32.mrf.mxu2  ;;  %v6598_v54 = vpop.f32.mrf.mxu3  ;;  %7542 = vmatpush.bf16.msra.mxu1 %v12343_v4  ;;  %v12399_v46 = vld [vmem:[#allocation11 + $0x84] sm:$0xf0]  ;;  %v12398_v20 = vld [vmem:[#allocation11 + $0x84] sm:$0xf] }
 0x87d   : > { %v6837_v39 = vrot.slane %v6771_v61, 1  ;;  %v6839_v17 = vrot.slane %v6772_v57, 1  ;;  %v6560_v47 = vadd.f32 %v6559_v5, %v6441_v6  ;;  %v6599_v13 = vadd.f32 %v6598_v54, %v6442_v50  ;;  %v11654_v5 = vld [vmem:[#allocation11 + $0xf0] sm:$0xf]  ;;  %v12413_v50 = vld [vmem:[#allocation11 + $0xf4] sm:$0xf0] }
 0x87e   : > { %7828 = vmatpush.bf16.msra.mxu2 %v11487_v30  ;;  %7857 = vmatpush.bf16.msra.mxu3 %v11491_v1  ;;  %v12412_v54 = vld [vmem:[#allocation11 + $0xf4] sm:$0xf]  ;;  %v11655_v4 = vor.u32 %v12413_v50, %v11654_v5  ;;  %v12401_v5 = vld [vmem:[#allocation11 + $0x94] sm:$0xf0]  ;;  %v5955_v50 = vpop.permute.xlu0 %5954 }
 0x87f   : > { %v6719_v3 = vadd.f32 %v6695_v48, %v6560_v47  ;;  %v6720_v19 = vadd.f32 %v6696_v36, %v6599_v13  ;;  %v6838_v2 = vsel %vm17676_vm11, %v15899_v15, %v6837_v39  ;;  %v6840_v44 = vsel %vm17677_vm12, %v15903_v52, %v6839_v17  ;;  %7504 = vmatpush.bf16.msra.mxu0 %v12334_v43  ;;  %v5940_v47 = vpop.permute.xlu1 %5939  ;;  %v11646_v13 = vld [vmem:[#allocation11 + $0xe0] sm:$0xf]  ;;  %v12411_v48 = vld [vmem:[#allocation11 + $0xe4] sm:$0xf0]  ;;  %v12410_v36 = vld [vmem:[#allocation11 + $0xe4] sm:$0xf] }
 0x880   : > { %v6889_v26 = vmax.f32 %v6769_v24, %v6838_v2  ;;  %v6890_v41 = vmax.f32 %v6770_v21, %v6840_v44  ;;  %7543 = vmatpush.bf16.msra.mxu1 %v12342_v60  ;;  %v17684_v2 = vld [vmem:[#allocation41_spill] sm:$0xff]  ;;  %v12406_v60 = vld [vmem:[#allocation11 + $0xc4] sm:$0xf]  ;;  %vm17699_vm11 = vmmov %vm17655_vm0 }
 0x881   : > { %v6749_v0 = vadd.f32 %v15637_v45, %v6719_v3  ;;  %v6750_v15 = vadd.f32 %v15639_v32, %v6720_v19  ;;  %v5945_v3 = vpop.permute.xlu2 %5944  ;;  %v5969_v44 = vadd.f32 %v5940_v47, %v17684_v2  ;;  %v12400_v47 = vld [vmem:[#allocation11 + $0x94] sm:$0xf]  ;;  %v12427_v2 = vld [vmem:[#allocation11 + $0x164] sm:$0xf0]  ;;  %vm17700_vm12 = vmmov %vm17655_vm0 }
 0x882   : > { %v15955_v8 = vpack.c.bf16 %v6889_v26, %v6887_v27  ;;  %v15957_v52 = vpack.c.bf16 %v6890_v41, %v6888_v10  ;;  %7829 = vmatpush.bf16.msra.mxu2 %v11479_v12  ;;  %7858 = vmatpush.bf16.msra.mxu3 %v11483_v28  ;;  %v11647_v12 = vor.u32 %v12411_v48, %v11646_v13  ;;  %v11638_v28 = vld [vmem:[#allocation11 + $0xd0] sm:$0xf]  ;;  %v17685_v26 = vld [vmem:[#allocation46_spill] sm:$0xff]  ;;  %v17687_v48 = vld [vmem:[#allocation35_spill] sm:$0xff] }
 0x883   : > { %v6773_v18 = vmax.f32 %v6749_v0, 0.0  ;;  %v6774_v24 = vmax.f32 %v6750_v15, 0.0  ;;  %v5970_v41 = vadd.f32 %v5945_v3, %v17685_v26  ;;  %v11630_v0 = vld [vmem:[#allocation11 + $0xc0] sm:$0xf]  ;;  %v12407_v15 = vld [vmem:[#allocation11 + $0xc4] sm:$0xf0] }
 0x884   : > { %7096 = vmatmul.bf16.gmra.mxu0 %v15955_v8  ;;  %7135 = vmatmul.bf16.gmra.mxu1 %v15957_v52  ;;  %v11608_v13 = vld [vmem:[#allocation11 + $0x98] sm:$0xf0] }
 0x885   : > { %7303 = vmatmul.bf16.gmra.mxu2 %v15955_v8  ;;  %7342 = vmatmul.bf16.gmra.mxu3 %v15957_v52  ;;  %v6841_v45 = vrot.slane %v6773_v18, 1  ;;  %v6843_v32 = vrot.slane %v6774_v24, 1  ;;  %v15985_v23 = vpack.c.bf16 %v5970_v41, %v5969_v44  ;;  %v11600_v41 = vld [vmem:[#allocation11 + $0x88] sm:$0xf0] }
 0x886   : > { %7830 = vmatpush.bf16.msra.mxu2 %v11471_v38  ;;  %7859 = vmatpush.bf16.msra.mxu3 %v11475_v58  ;;  %v11631_v38 = vor.u32 %v12407_v15, %v11630_v0  ;;  %v12429_v58 = vld [vmem:[#allocation11 + $0x174] sm:$0xf0]  ;;  %v11584_v0 = vld [vmem:[#allocation11 + $0x168] sm:$0xf0]  ;;  %v11603_v15 = vor.u32 %v12398_v20, %v11600_v41 }
 0x887   : > { %v6842_v21 = vsel %vm17678_vm13, %v6837_v39, %v6841_v45  ;;  %v6869_v27 = vsel %vm17679_vm3, %v6841_v45, 0.0  ;;  %v6844_v10 = vsel %vm17680_vm2, %v6839_v17, %v6843_v32  ;;  %v6870_v34 = vsel %vm17681_vm9, %v6843_v32, 0.0  ;;  %v11656_v39 = vld [vmem:[#allocation11 + $0xf8] sm:$0xf0]  ;;  %vm17702_vm13 = vmmov %vm17655_vm0 }
 0x888   : > { %v6891_v37 = vmax.f32 %v6771_v61, %v6842_v21  ;;  %v6893_v62 = vmax.f32 %v6773_v18, %v6869_v27  ;;  %v6892_v56 = vmax.f32 %v6772_v57, %v6844_v10  ;;  %v6894_v30 = vmax.f32 %v6774_v24, %v6870_v34  ;;  %v17683_v61 = vld [vmem:[#allocation33_spill] sm:$0xff]  ;;  %v11632_v18 = vld [vmem:[#allocation11 + $0xc8] sm:$0xf0]  ;;  %v12405_v27 = vld [vmem:[#allocation11 + $0xb4] sm:$0xf0] }
 0x889   : > { %v5967_v6 = vadd.f32 %v5930_v55, %v17683_v61  ;;  %v11659_v17 = vor.u32 %v12412_v54, %v11656_v39  ;;  %v11590_v24 = vld [vmem:[#allocation11 + $0x170] sm:$0xf]  ;;  %v11635_v45 = vor.u32 %v12406_v60, %v11632_v18  ;;  %v12404_v10 = vld [vmem:[#allocation11 + $0xb4] sm:$0xf]  ;;  %v12403_v55 = vld [vmem:[#allocation11 + $0xa4] sm:$0xf0] }
 0x88a   : > { %v15967_v1 = vpack.c.bf16 %v6893_v62, %v6891_v37  ;;  %v15969_v9 = vpack.c.bf16 %v6894_v30, %v6892_v56  ;;  %8213 = vmatpush.bf16.msrb.mxu2 %v11655_v4  ;;  %v11591_v32 = vor.u32 %v12429_v58, %v11590_v24  ;;  %v11622_v21 = vld [vmem:[#allocation11 + $0xb0] sm:$0xf]  ;;  %v12428_v37 = vld [vmem:[#allocation11 + $0x174] sm:$0xf]  ;;  %v11592_v62 = vld [vmem:[#allocation11 + $0x178] sm:$0xf0]  ;;  %v5950_v56 = vpop.permute.xlu1 %5949 }
 0x88b   : > { %v15977_v57 = vpack.c.bf16 %v5968_v7, %v5967_v6  ;;  %8242 = vmatpush.bf16.msrb.mxu3 %v11659_v17  ;;  %v11595_v30 = vor.u32 %v12428_v37, %v11592_v62  ;;  %v11615_v7 = vor.u32 %v12403_v55, %v11614_v22  ;;  %v11616_v61 = vld [vmem:[#allocation11 + $0xa8] sm:$0xf0]  ;;  %v11606_v6 = vld [vmem:[#allocation11 + $0x90] sm:$0xf]  ;;  %v17686_v4 = vld [vmem:[#allocation67_spill] sm:$0xff] }
 0x88c   : > { %7995 = vmatpush.bf16.msrb.mxu0 %v11591_v32  ;;  %v11619_v54 = vor.u32 %v12402_v35, %v11616_v61  ;;  %v5971_v39 = vadd.f32 %v5950_v56, %v17686_v4  ;;  %v11607_v17 = vor.u32 %v12401_v5, %v11606_v6  ;;  %vm17704_vm3 = vmmov %vm17655_vm0 }
 0x88d   : > { %8024 = vmatpush.bf16.msrb.mxu1 %v11595_v30  ;;  %v17689_v30 = vld [vmem:[#allocation25_spill] sm:$0xff]  ;;  %vm17705_vm2 = vmmov %vm17691_vm1 }
 0x88e   : > { %8214 = vmatpush.bf16.msrb.mxu2 %v11647_v12  ;;  %vm17706_vm9 = vmmov %vm17655_vm0 }
 0x892   : > { %v5960_v37 = vpop.permute.xlu1 %5959 }
 0x894   : > { %7101 = vmatmul.bf16.gmra.mxu0 %v15967_v1  ;;  %7140 = vmatmul.bf16.gmra.mxu1 %v15969_v9 }
 0x895   : > { %7308 = vmatmul.bf16.gmra.mxu2 %v15967_v1  ;;  %7347 = vmatmul.bf16.gmra.mxu3 %v15969_v9 }
 0x8a4   : > { %7505 = vmatmul.bf16.vlgmr.msra.gmra.mxu0 %v15689_v51  ;;  %7544 = vmatmul.bf16.vlgmr.msra.gmra.mxu1 %v15691_v14  ;;  %v11648_v51 = vld [vmem:[#allocation11 + $0xe8] sm:$0xf0]  ;;  %v12409_v14 = vld [vmem:[#allocation11 + $0xd4] sm:$0xf0] }
 0x8a5   : > { %7831 = vmatmul.bf16.vlgmr.msra.gmra.mxu2 %v15977_v57  ;;  %7860 = vmatmul.bf16.vlgmr.msra.gmra.mxu3 %v15977_v57  ;;  %v11651_v19 = vor.u32 %v12410_v36, %v11648_v51  ;;  %v11639_v43 = vor.u32 %v12409_v14, %v11638_v28  ;;  %v5972_v36 = vadd.f32 %v5955_v50, %v17687_v48  ;;  %v12423_v48 = vld [vmem:[#allocation11 + $0x144] sm:$0xf0] }
 0x8a6   : > { %v11611_v14 = vor.u32 %v12400_v47, %v11608_v13  ;;  %v11566_v13 = vld [vmem:[#allocation11 + $0x140] sm:$0xf] }
 0x8a7   : > { %8243 = vmatpush.bf16.msrb.mxu3 %v11651_v19  ;;  %8215 = vmatpush.bf16.msrb.mxu2 %v11639_v43  ;;  %v15993_v3 = vpack.c.bf16 %v5972_v36, %v5971_v39  ;;  %v11582_v19 = vld [vmem:[#allocation11 + $0x160] sm:$0xf]  ;;  %v11567_v36 = vor.u32 %v12423_v48, %v11566_v13 }
 0x8a8   : > { %v11583_v44 = vor.u32 %v12427_v2, %v11582_v19  ;;  %v11598_v43 = vld [vmem:[#allocation11 + $0x80] sm:$0xf]  ;;  %v12421_v2 = vld [vmem:[#allocation11 + $0x134] sm:$0xf0] }
 0x8a9   : > { %v11599_v26 = vor.u32 %v12399_v46, %v11598_v43  ;;  %v11560_v43 = vld [vmem:[#allocation11 + $0x138] sm:$0xf0] }
 0x8aa   : > { %7996 = vmatpush.bf16.msrb.mxu0 %v11583_v44  ;;  %v12420_v44 = vld [vmem:[#allocation11 + $0x134] sm:$0xf] }
 0x8ab   : > { %8244 = vmatpush.bf16.msrb.mxu3 %v11643_v42  ;;  %8216 = vmatpush.bf16.msrb.mxu2 %v11631_v38  ;;  %v12426_v42 = vld [vmem:[#allocation11 + $0x164] sm:$0xf] }
 0x8af   : > { %8245 = vmatpush.bf16.msrb.mxu3 %v11635_v45  ;;  %v5965_v45 = vpop.permute.xlu0 %5964 }
 0x8b0   : > { %v5974_v22 = vadd.f32 %v5965_v45, %v17689_v30  ;;  %v11542_v45 = vld [vmem:[#allocation11 + $0x110] sm:$0xf] }
 0x8b4   : > { %7510 = vmatmul.bf16.gmra.mxu0 %v15729_v59  ;;  %7549 = vmatmul.bf16.gmra.mxu1 %v15731_v63  ;;  %v11623_v59 = vor.u32 %v12405_v27, %v11622_v21  ;;  %v11624_v63 = vld [vmem:[#allocation11 + $0xb8] sm:$0xf0]  ;;  %v11574_v27 = vld [vmem:[#allocation11 + $0x150] sm:$0xf] }
 0x8b5   : > { %7836 = vmatmul.bf16.gmra.mxu2 %v15985_v23  ;;  %7865 = vmatmul.bf16.gmra.mxu3 %v15985_v23  ;;  %v11627_v34 = vor.u32 %v12404_v10, %v11624_v63  ;;  %v12424_v63 = vld [vmem:[#allocation11 + $0x154] sm:$0xf] }
 0x8b6   : > { %8217 = vmatpush.bf16.msrb.mxu2 %v11623_v59  ;;  %v12425_v59 = vld [vmem:[#allocation11 + $0x154] sm:$0xf0] }
 0x8b7   : > { %8246 = vmatpush.bf16.msrb.mxu3 %v11627_v34  ;;  %v11575_v10 = vor.u32 %v12425_v59, %v11574_v27  ;;  %v11576_v34 = vld [vmem:[#allocation11 + $0x158] sm:$0xf0]  ;;  %v12417_v27 = vld [vmem:[#allocation11 + $0x114] sm:$0xf0] }
 0x8b8   : > { %v11579_v62 = vor.u32 %v12424_v63, %v11576_v34  ;;  %v12416_v63 = vld [vmem:[#allocation11 + $0x114] sm:$0xf]  ;;  %v11544_v34 = vld [vmem:[#allocation11 + $0x118] sm:$0xf0] }
 0x8b9   : > { %7997 = vmatpush.bf16.msrb.mxu0 %v11575_v10  ;;  %v11543_v10 = vor.u32 %v12417_v27, %v11542_v45 }
 0x8ba   : > { %8218 = vmatpush.bf16.msrb.mxu2 %v11615_v7  ;;  %v17690_v7 = vld [vmem:[#allocation28_spill] sm:$0xff] }
 0x8bb   : > { %8247 = vmatpush.bf16.msrb.mxu3 %v11619_v54  ;;  %v5973_v61 = vadd.f32 %v5960_v37, %v17690_v7  ;;  %v11547_v7 = vor.u32 %v12416_v63, %v11544_v34 }
 0x8bd   : > { %v16004_v4 = vpack.c.bf16 %v5974_v22, %v5973_v61  ;;  %7998 = vmatpush.bf16.msrb.mxu0 %v11567_v36 }
 0x8be   : > { %8219 = vmatpush.bf16.msrb.mxu2 %v11607_v17 }
 0x8bf   : > { %8248 = vmatpush.bf16.msrb.mxu3 %v11611_v14 }
 0x8c1   : > { %v7077_v12 = vpop.f32.mrf.mxu0  ;;  %v7116_v51 = vpop.f32.mrf.mxu1 }
 0x8c2   : > { %v7117_v28 = vadd.f32 %v7116_v51, %v7077_v12  ;;  %8220 = vmatpush.bf16.msrb.mxu2 %v11599_v26  ;;  %v12422_v12 = vld [vmem:[#allocation11 + $0x144] sm:$0xf]  ;;  %v11568_v51 = vld [vmem:[#allocation11 + $0x148] sm:$0xf0]  ;;  %v11563_v26 = vor.u32 %v12420_v44, %v11560_v43 }
 0x8c3   : > { %8249 = vmatpush.bf16.msrb.mxu3 %v11603_v15  ;;  %v11571_v19 = vor.u32 %v12422_v12, %v11568_v51 }
 0x8c4   : > { %7515 = vmatmul.bf16.gmra.mxu0 %v15781_v16  ;;  %7554 = vmatmul.bf16.gmra.mxu1 %v15783_v49  ;;  %v11587_v16 = vor.u32 %v12426_v42, %v11584_v0  ;;  %v7365_v32 = vrot.slane %v7117_v28, 1  ;;  %v11558_v28 = vld [vmem:[#allocation11 + $0x130] sm:$0xf] }
 0x8c5   : > { %7841 = vmatmul.bf16.gmra.mxu2 %v15993_v3  ;;  %7870 = vmatmul.bf16.gmra.mxu3 %v15993_v3 }
 0x8c6   : > { %8025 = vmatpush.bf16.msrb.mxu1 %v11587_v16 }
 0x8c8   : > { %v7284_v60 = vpop.f32.mrf.mxu2  ;;  %v7323_v49 = vpop.f32.mrf.mxu3 }
 0x8c9   : > { %v7324_v38 = vadd.f32 %v7323_v49, %v7284_v60  ;;  %v7079_v18 = vpop.f32.mrf.mxu0  ;;  %v7118_v24 = vpop.f32.mrf.mxu1  ;;  %v11550_v49 = vld [vmem:[#allocation11 + $0x120] sm:$0xf] }
 0x8ca   : > { %v7119_v58 = vadd.f32 %v7118_v24, %v7079_v18  ;;  %8026 = vmatpush.bf16.msrb.mxu1 %v11579_v62  ;;  %v12418_v24 = vld [vmem:[#allocation11 + $0x124] sm:$0xf] }
 0x8cb   : > { %v7587_v39 = vrot.slane %v7324_v38, 2  ;;  %v12419_v38 = vld [vmem:[#allocation11 + $0x124] sm:$0xf0] }
 0x8cc   : > { %v7366_v21 = vrot.slane %v7119_v58, 1  ;;  %v11551_v18 = vor.u32 %v12419_v38, %v11550_v49  ;;  %v11552_v58 = vld [vmem:[#allocation11 + $0x128] sm:$0xf0] }
 0x8ce   : > { %v16000_v56 = vsel %vm17688_vm14, %v7365_v32, %v7366_v21  ;;  %8027 = vmatpush.bf16.msrb.mxu1 %v11571_v19  ;;  %vm17707_vm14 = vmmov %vm17691_vm1 }
 0x8d0   : > { %v7286_v55 = vpop.f32.mrf.mxu2  ;;  %v7325_v35 = vpop.f32.mrf.mxu3 }
 0x8d1   : > { %v7326_v6 = vadd.f32 %v7325_v35, %v7286_v55  ;;  %v7082_v5 = vpop.f32.mrf.mxu0  ;;  %v7121_v50 = vpop.f32.mrf.mxu1 }
 0x8d2   : > { %v7122_v54 = vadd.f32 %v7121_v50, %v7082_v5  ;;  %8028 = vmatpush.bf16.msrb.mxu1 %v11563_v26  ;;  %v11534_v5 = vld [vmem:[#allocation11 + $0x100] sm:$0xf]  ;;  %v12415_v50 = vld [vmem:[#allocation11 + $0x104] sm:$0xf0] }
 0x8d3   : > { %v7588_v17 = vrot.slane %v7326_v6, 2 }
 0x8d4   : > { %v7368_v47 = vrot.slane %v7122_v54, 1  ;;  %7520 = vmatmul.bf16.gmra.mxu0 %v15879_v11  ;;  %7559 = vmatmul.bf16.gmra.mxu1 %v15881_v31  ;;  %v11559_v31 = vor.u32 %v12421_v2, %v11558_v28  ;;  %v11535_v54 = vor.u32 %v12415_v50, %v11534_v5 }
 0x8d5   : > { %7846 = vmatmul.bf16.gmra.mxu2 %v16004_v4  ;;  %7875 = vmatmul.bf16.gmra.mxu3 %v16004_v4  ;;  %v16011_v14 = vsel %vm17691_vm1, %v7587_v39, %v7588_v17  ;;  %v12414_v39 = vld [vmem:[#allocation11 + $0x104] sm:$0xf]  ;;  %vm17708_vm1 = vmmov %vm17655_vm0 }
 0x8d6   : > { %v16014_v11 = vsel %vm17692_vm10, %v7366_v21, %v7368_v47  ;;  %7999 = vmatpush.bf16.msrb.mxu0 %v11559_v31  ;;  %v11555_v21 = vor.u32 %v12418_v24, %v11552_v58  ;;  %vm17709_vm10 = vmmov %vm17705_vm2 }
 0x8d8   : > { %v7289_v46 = vpop.f32.mrf.mxu2  ;;  %v7328_v20 = vpop.f32.mrf.mxu3  ;;  %8029 = vmatpush.bf16.msrb.mxu1 %v11555_v21 }
 0x8d9   : > { %v7329_v41 = vadd.f32 %v7328_v20, %v7289_v46  ;;  %v7084_v42 = vpop.f32.mrf.mxu0  ;;  %v7123_v0 = vpop.f32.mrf.mxu1 }
 0x8da   : > { %v7124_v15 = vadd.f32 %v7123_v0, %v7084_v42  ;;  %8000 = vmatpush.bf16.msrb.mxu0 %v11551_v18 }
 0x8db   : > { %v7590_v16 = vrot.slane %v7329_v41, 2 }
 0x8dc   : > { %v7370_v60 = vrot.slane %v7124_v15, 1  ;;  %8030 = vmatpush.bf16.msrb.mxu1 %v11547_v7 }
 0x8dd   : > { %v16017_v32 = vsel %vm17693_vm7, %v7588_v17, %v7590_v16  ;;  %v11536_v17 = vld [vmem:[#allocation11 + $0x108] sm:$0xf0]  ;;  %vm17710_vm7 = vmmov %vm17655_vm0 }
 0x8de   : > { %v16020_v59 = vsel %vm17655_vm0, %v7368_v47, %v7370_v60  ;;  %8001 = vmatpush.bf16.msrb.mxu0 %v11543_v10  ;;  %v11539_v13 = vor.u32 %v12414_v39, %v11536_v17  ;;  %vm17711_vm0 = vmmov %vm17705_vm2 }
 0x8e0   : > { %v7291_v37 = vpop.f32.mrf.mxu2  ;;  %v7330_v62 = vpop.f32.mrf.mxu3  ;;  %8031 = vmatpush.bf16.msrb.mxu1 %v11539_v13 }
 0x8e1   : > { %v7331_v30 = vadd.f32 %v7330_v62, %v7291_v37  ;;  %v7087_v22 = vpop.f32.mrf.mxu0  ;;  %v7126_v55 = vpop.f32.mrf.mxu1 }
 0x8e2   : > { %v7127_v35 = vadd.f32 %v7126_v55, %v7087_v22  ;;  %8002 = vmatpush.bf16.msrb.mxu0 %v11535_v54 }
 0x8e3   : > { %v7592_v61 = vrot.slane %v7331_v30, 2 }
 0x8e4   : > { %v7372_v6 = vrot.slane %v7127_v35, 1  ;;  %7525 = vmatmul.bf16.gmra.mxu0 %v15955_v8  ;;  %7564 = vmatmul.bf16.gmra.mxu1 %v15957_v52 }
 0x8e5   : > { %8221 = vmatmul.bf16.vlgmr.msrb.gmra.mxu2 %v15977_v57  ;;  %8250 = vmatmul.bf16.vlgmr.msrb.gmra.mxu3 %v15977_v57  ;;  %v16027_v47 = vsel %vm17694_vm4, %v7590_v16, %v7592_v61  ;;  %vm17712_vm4 = vmmov %vm17708_vm1 }
 0x8e6   : > { %v16030_v48 = vsel %vm17695_vm6, %v7370_v60, %v7372_v6  ;;  %vm17713_vm6 = vmmov %vm17708_vm1 }
 0x8e8   : > { %v7294_v8 = vpop.f32.mrf.mxu2  ;;  %v7333_v52 = vpop.f32.mrf.mxu3 }
 0x8e9   : > { %v16032_v36 = vadd.f32 %v7333_v52, %v7294_v8  ;;  %v7089_v12 = vpop.f32.mrf.mxu0  ;;  %v7128_v51 = vpop.f32.mrf.mxu1 }
 0x8ea   : > { %v7129_v28 = vadd.f32 %v7128_v51, %v7089_v12 }
 0x8eb   : > { %v7594_v19 = vrot.slane %v16032_v36, 2 }
 0x8ec   : > { %v7374_v2 = vrot.slane %v7129_v28, 1  ;;  %v16108_v28 = vld [vmem:[%s17701_s23] ss:$0 sm:$0xff] }
 0x8ed   : > { %v16038_v44 = vsel %vm17696_vm5, %v7592_v61, %v7594_v19  ;;  %vm17714_vm5 = vmmov %vm17711_vm0 }
 0x8ee   : > { %v16041_v43 = vsel %vm17697_vm8, %v7372_v6, %v7374_v2  ;;  %vm17715_vm8 = vmmov %vm17708_vm1 }
 0x8f0   : > { %v16043_v31 = vpop.f32.mrf.mxu2  ;;  %v16045_v46 = vpop.f32.mrf.mxu3 }
 0x8f1   : > { %v7092_v20 = vpop.f32.mrf.mxu0  ;;  %v7131_v26 = vpop.f32.mrf.mxu1 }
 0x8f2   : > { %v7132_v41 = vadd.f32 %v7131_v26, %v7092_v20 }
 0x8f4   : > { %v7376_v42 = vrot.slane %v7132_v41, 1  ;;  %7530 = vmatmul.bf16.gmra.mxu0 %v15967_v1  ;;  %7569 = vmatmul.bf16.gmra.mxu1 %v15969_v9 }
 0x8f5   : > { %8226 = vmatmul.bf16.gmra.mxu2 %v15985_v23  ;;  %8255 = vmatmul.bf16.gmra.mxu3 %v15985_v23 }
 0x8f6   : > { %v16052_v0 = vsel %vm17698_vm15, %v7374_v2, %v7376_v42  ;;  %vm17717_vm15 = vmmov %vm17711_vm0 }
 0x8f8   : > { %v7299_v15 = vpop.f32.mrf.mxu2  ;;  %v7338_v16 = vpop.f32.mrf.mxu3 }
 0x8f9   : > { %v16054_v60 = vadd.f32 %v7338_v16, %v7299_v15  ;;  %v7094_v49 = vpop.f32.mrf.mxu0  ;;  %v7133_v38 = vpop.f32.mrf.mxu1 }
 0x8fa   : > { %v7134_v18 = vadd.f32 %v7133_v38, %v7094_v49 }
 0x8fc   : > { %v7378_v24 = vrot.slane %v7134_v18, 1 }
 0x8fe   : > { %v16057_v58 = vsel %vm17699_vm11, %v7376_v42, %v7378_v24  ;;  %vm17718_vm11 = vmmov %vm17708_vm1 }
 0x900   : > { %v16059_v1 = vpop.f32.mrf.mxu2  ;;  %v16061_v9 = vpop.f32.mrf.mxu3 }
 0x901   : > { %v7097_v45 = vpop.f32.mrf.mxu0  ;;  %v7136_v21 = vpop.f32.mrf.mxu1 }
 0x902   : > { %v16063_v27 = vadd.f32 %v7136_v21, %v7097_v45 }
 0x904   : > { %v7380_v10 = vrot.slane %v16063_v27, 1  ;;  %8003 = vmatmul.bf16.vlgmr.msrb.gmra.mxu0 %v15977_v57  ;;  %8032 = vmatmul.bf16.vlgmr.msrb.gmra.mxu1 %v15977_v57 }
 0x905   : > { %8231 = vmatmul.bf16.gmra.mxu2 %v15993_v3  ;;  %8260 = vmatmul.bf16.gmra.mxu3 %v15993_v3 }
 0x906   : > { %v16073_v63 = vsel %vm17700_vm12, %v7378_v24, %v7380_v10  ;;  %vm17719_vm12 = vmmov %vm17708_vm1 }
 0x908   : > { %v7304_v34 = vpop.f32.mrf.mxu2  ;;  %v7343_v37 = vpop.f32.mrf.mxu3 }
 0x909   : > { %v16075_v62 = vadd.f32 %v7343_v37, %v7304_v34  ;;  %v16077_v30 = vpop.f32.mrf.mxu0  ;;  %v16079_v22 = vpop.f32.mrf.mxu1 }
 0x910   : > { %v16081_v55 = vpop.f32.mrf.mxu2  ;;  %v16083_v57 = vpop.f32.mrf.mxu3 }
 0x911   : > { %v7102_v35 = vpop.f32.mrf.mxu0  ;;  %v7141_v7 = vpop.f32.mrf.mxu1 }
 0x912   : > { %v16085_v61 = vadd.f32 %v7141_v7, %v7102_v35 }
 0x914   : > { %8008 = vmatmul.bf16.gmra.mxu0 %v15985_v23  ;;  %8037 = vmatmul.bf16.gmra.mxu1 %v15985_v23 }
 0x915   : > { %8236 = vmatmul.bf16.gmra.mxu2 %v16004_v4  ;;  %8265 = vmatmul.bf16.gmra.mxu3 %v16004_v4 }
 0x918   : > { %v7309_v6 = vpop.f32.mrf.mxu2  ;;  %v7348_v5 = vpop.f32.mrf.mxu3 }
 0x919   : > { %v16091_v50 = vadd.f32 %v7348_v5, %v7309_v6  ;;  %v16093_v54 = vpop.f32.mrf.mxu0  ;;  %v16095_v39 = vpop.f32.mrf.mxu1 }
 0x920   : > { %v16097_v17 = vpop.f32.mrf.mxu2  ;;  %v16099_v13 = vpop.f32.mrf.mxu3 }
 0x921   : > { %v7506_v8 = vpop.f32.mrf.mxu0  ;;  %v7545_v52 = vpop.f32.mrf.mxu1 }
 0x922   : > { %v7507_v23 = vadd.f32 %v7506_v8, %v16000_v56 }
 0x924   : > { %v7546_v12 = vadd.f32 %v7545_v52, %v7507_v23  ;;  %8013 = vmatmul.bf16.gmra.mxu0 %v15993_v3  ;;  %8042 = vmatmul.bf16.gmra.mxu1 %v15993_v3 }
 0x926   : > { %v7623_v51 = vadd.f32 %v16011_v14, %v7546_v12 }
 0x928   : > { %v16110_v2 = vpop.f32.mrf.mxu2  ;;  %v16112_v20 = vpop.f32.mrf.mxu3  ;;  %v7639_v42 = vadd.f32 %v16108_v28, %v7623_v51 }
 0x929   : > { %v7508_v26 = vpop.f32.mrf.mxu0  ;;  %v7547_v41 = vpop.f32.mrf.mxu1 }
 0x92a   : > { %v7509_v56 = vadd.f32 %v7508_v26, %v16014_v11  ;;  %v7651_v16 = vmax.f32 %v7639_v42, 0.0 }
 0x92c   : > { %v7548_v15 = vadd.f32 %v7547_v41, %v7509_v56  ;;  %v7675_v34 = vrot.slane %v7651_v16, 1 }
 0x92e   : > { %v7624_v3 = vadd.f32 %v16017_v32, %v7548_v15 }
 0x930   : > { %v7640_v14 = vadd.f32 %v16108_v28, %v7624_v3  ;;  %v16118_v49 = vpop.f32.mrf.mxu2  ;;  %v16120_v38 = vpop.f32.mrf.mxu3 }
 0x931   : > { %v7511_v18 = vpop.f32.mrf.mxu0  ;;  %v7550_v24 = vpop.f32.mrf.mxu1 }
 0x932   : > { %v7512_v45 = vadd.f32 %v7511_v18, %v16020_v59  ;;  %v7652_v21 = vmax.f32 %v7640_v14, 0.0 }
 0x934   : > { %v7551_v37 = vadd.f32 %v7550_v24, %v7512_v45  ;;  %8018 = vmatmul.bf16.gmra.mxu0 %v16004_v4  ;;  %8047 = vmatmul.bf16.gmra.mxu1 %v16004_v4  ;;  %v7676_v11 = vrot.slane %v7652_v21, 1 }
 0x936   : > { %v7625_v32 = vadd.f32 %v16027_v47, %v7551_v37  ;;  %v7677_v35 = vsel %vm17702_vm13, %v7675_v34, %v7676_v11  ;;  %v7336_v47 = vadd.f32 %v16045_v46, %v16043_v31  ;;  %vm17721_vm13 = vmmov %vm17708_vm1 }
 0x937   : > { %v16127_v7 = vmax.f32 %v7651_v16, %v7677_v35 }
 0x938   : > { %v7641_v6 = vadd.f32 %v16108_v28, %v7625_v32  ;;  %v16130_v5 = vpop.f32.mrf.mxu2  ;;  %v16132_v23 = vpop.f32.mrf.mxu3  ;;  %v7596_v3 = vrot.slane %v7336_v47, 2 }
 0x939   : > { %17703 = vst [vmem:[#allocation56_spill] sm:$0xff] %v16127_v7  ;;  %v7513_v8 = vpop.f32.mrf.mxu0  ;;  %v7552_v59 = vpop.f32.mrf.mxu1 }
 0x93a   : > { %v7653_v52 = vmax.f32 %v7641_v6, 0.0  ;;  %v7514_v12 = vadd.f32 %v7513_v8, %v16030_v48 }
 0x93c   : > { %v7678_v51 = vrot.slane %v7653_v52, 1  ;;  %v7553_v4 = vadd.f32 %v7552_v59, %v7514_v12 }
 0x93e   : > { %v7626_v26 = vadd.f32 %v16038_v44, %v7553_v4  ;;  %v7679_v41 = vsel %vm17704_vm3, %v7676_v11, %v7678_v51  ;;  %v7597_v44 = vsel %vm17705_vm2, %v7594_v19, %v7596_v3  ;;  %v7341_v19 = vadd.f32 %v16061_v9, %v16059_v1  ;;  %vm17722_vm3 = vmmov %vm17711_vm0 }
 0x93f   : > { %v16139_v56 = vmax.f32 %v7652_v21, %v7679_v41  ;;  %vm17723_vm2 = vmmov %vm17708_vm1 }
 0x940   : > { %v7642_v42 = vadd.f32 %v16108_v28, %v7626_v26  ;;  %v16142_v15 = vpop.f32.mrf.mxu2  ;;  %v16145_v24 = vpop.f32.mrf.mxu3  ;;  %v7600_v41 = vrot.slane %v7341_v19, 2 }
 0x941   : > { %v7516_v16 = vpop.f32.mrf.mxu0  ;;  %v7555_v14 = vpop.f32.mrf.mxu1 }
 0x942   : > { %v7517_v48 = vadd.f32 %v7516_v16, %v16041_v43  ;;  %v7654_v18 = vmax.f32 %v7642_v42, 0.0  ;;  %v7598_v43 = vrot.slane %v16054_v60, 2 }
 0x944   : > { %v7556_v45 = vadd.f32 %v7555_v14, %v7517_v48  ;;  %v7680_v31 = vrot.slane %v7654_v18, 1  ;;  %v7599_v12 = vsel %vm17707_vm14, %v7596_v3, %v7598_v43  ;;  %v7601_v3 = vsel %vm17709_vm10, %v7598_v43, %v7600_v41  ;;  %vm17727_vm10 = vmmov %vm17723_vm2 }
 0x945   : > { %vm17725_vm14 = vcmask 1040384  }
 0x946   : > { %v7627_v46 = vadd.f32 %v7597_v44, %v7556_v45  ;;  %v7681_v21 = vsel %vm17706_vm9, %v7678_v51, %v7680_v31  ;;  %vm17724_vm9 = vmmov %vm17708_vm1 }
 0x947   : > { %v16151_v34 = vmax.f32 %v7653_v52, %v7681_v21 }
 0x948   : > { %v7643_v37 = vadd.f32 %v16108_v28, %v7627_v46  ;;  %v16154_v11 = vpop.f32.mrf.mxu2  ;;  %v16161_v52 = vpop.f32.mrf.mxu3  ;;  %v7602_v46 = vrot.slane %v16075_v62, 2  ;;  %v16192_v62 = vadd.f32 %v16083_v57, %v16081_v55 }
 0x949   : > { %v7518_v32 = vpop.f32.mrf.mxu0  ;;  %v7557_v35 = vpop.f32.mrf.mxu1 }
 0x94a   : > { %v7655_v6 = vmax.f32 %v7643_v37, 0.0  ;;  %v7519_v8 = vadd.f32 %v7518_v32, %v16052_v0 }
 0x94c   : > { %v7682_v59 = vrot.slane %v7655_v6, 1  ;;  %v7558_v36 = vadd.f32 %v7557_v35, %v7519_v8 }
 0x94e   : > { %v7628_v51 = vadd.f32 %v7599_v12, %v7558_v36  ;;  %v7683_v4 = vsel %vm17708_vm1, %v7680_v31, %v7682_v59  ;;  %v17172_v12 = vrot.slane %v16192_v62, 2  ;;  %vm17726_vm1 = vmmov %vm17725_vm14 }
 0x94f   : > { %v16164_v47 = vmax.f32 %v7654_v18, %v7683_v4 }
 0x950   : > { %v7644_v60 = vadd.f32 %v16108_v28, %v7628_v51  ;;  %v16167_v26 = vpop.f32.mrf.mxu2  ;;  %v16174_v18 = vpop.f32.mrf.mxu3  ;;  %v7605_v27 = vsel %vm17714_vm5, %v7602_v46, %v17172_v12  ;;  %v12456_v12 = vld [vmem:[#allocation13 + $0xd4] sm:$0xf] }
 0x951   : > { %v7521_v0 = vpop.f32.mrf.mxu0  ;;  %v7560_v42 = vpop.f32.mrf.mxu1 }
 0x952   : > { %v7522_v16 = vadd.f32 %v7521_v0, %v16057_v58  ;;  %v7656_v14 = vmax.f32 %v7644_v60, 0.0  ;;  %v7139_v58 = vadd.f32 %v16079_v22, %v16077_v30  ;;  %v7603_v30 = vsel %vm17711_vm0, %v7600_v41, %v7602_v46  ;;  %vm17732_vm0 = vmmov %vm17726_vm1 }
 0x953   : > { %v7384_v41 = vrot.slane %v16085_v61, 1  ;;  %v7606_v0 = vrot.slane %v16091_v50, 2  ;;  %vm17736_vm5 = vmmov %vm17732_vm0 }
 0x954   : > { %v7561_v1 = vadd.f32 %v7560_v42, %v7522_v16  ;;  %v7684_v9 = vrot.slane %v7656_v14, 1 }
 0x956   : > { %v7629_v48 = vadd.f32 %v7601_v3, %v7561_v1  ;;  %v7685_v45 = vsel %vm17710_vm7, %v7682_v59, %v7684_v9  ;;  %v7382_v59 = vrot.slane %v7139_v58, 1  ;;  %v11718_v1 = vld [vmem:[#allocation13 + $0x70] sm:$0xf]  ;;  %v11720_v58 = vld [vmem:[#allocation13 + $0x78] sm:$0xf0]  ;;  %vm17728_vm7 = vmmov %vm17723_vm2 }
 0x957   : > { %v16172_v31 = vmax.f32 %v7655_v6, %v7685_v45  ;;  %v11782_v3 = vld [vmem:[#allocation13 + $0xf0] sm:$0xf]  ;;  %v12444_v45 = vld [vmem:[#allocation13 + $0x74] sm:$0xf] }
 0x958   : > { %v16177_v44 = vadd.f32 %v16108_v28, %v7629_v48  ;;  %v16183_v43 = vpop.f32.mrf.mxu2  ;;  %v7383_v51 = vsel %vm17713_vm6, %v7380_v10, %v7382_v59  ;;  %v16206_v57 = vpop.f32.mrf.mxu3  ;;  %v12461_v48 = vld [vmem:[#allocation13 + $0xf4] sm:$0xf0]  ;;  %vm17735_vm6 = vmmov %vm17732_vm0 }
 0x959   : > { %v7523_v21 = vpop.f32.mrf.mxu0  ;;  %v7562_v37 = vpop.f32.mrf.mxu1 }
 0x95a   : > { %v17171_v32 = vmax.f32 %v16177_v44, 0.0  ;;  %v7524_v35 = vadd.f32 %v7523_v21, %v16073_v63 }
 0x95c   : > { %v16188_v6 = vrot.slane %v17171_v32, 1  ;;  %v7563_v8 = vadd.f32 %v7562_v37, %v7524_v35  ;;  %v11783_v37 = vor.u32 %v12461_v48, %v11782_v3  ;;  %v11723_v35 = vor.u32 %v12444_v45, %v11720_v58  ;;  %v11712_v32 = vld [vmem:[#allocation13 + $0x68] sm:$0xf0] }
 0x95d   : > { %v16221_v3 = vadd.f32 %v16095_v39, %v16093_v54  ;;  %v11776_v58 = vld [vmem:[#allocation13 + $0xe8] sm:$0xf0] }
 0x95e   : > { %v7630_v22 = vadd.f32 %v7603_v30, %v7563_v8  ;;  %v7687_v36 = vsel %vm17712_vm4, %v7684_v9, %v16188_v6  ;;  %v12445_v9 = vld [vmem:[#allocation13 + $0x74] sm:$0xf0]  ;;  %v12460_v8 = vld [vmem:[#allocation13 + $0xf4] sm:$0xf]  ;;  %v11784_v30 = vld [vmem:[#allocation13 + $0xf8] sm:$0xf0]  ;;  %8634 = vmatpush.bf16.msra.mxu1 %v11783_v37  ;;  %8663 = vmatpush.bf16.msra.mxu2 %v11723_v35 }
 0x95f   : > { %v16197_v19 = vmax.f32 %v7656_v14, %v7687_v36  ;;  %v11719_v10 = vor.u32 %v12445_v9, %v11718_v1  ;;  %v11787_v36 = vor.u32 %v12460_v8, %v11784_v30  ;;  %v12442_v9 = vld [vmem:[#allocation13 + $0x64] sm:$0xf]  ;;  %v12441_v37 = vld [vmem:[#allocation13 + $0x54] sm:$0xf0]  ;;  %vm17733_vm4 = vmmov %vm17732_vm0 }
 0x960   : > { %v16200_v63 = vadd.f32 %v16108_v28, %v7630_v22  ;;  %v16211_v16 = vpop.f32.mrf.mxu2  ;;  %v11710_v22 = vld [vmem:[#allocation13 + $0x60] sm:$0xf]  ;;  %v11715_v45 = vor.u32 %v12442_v9, %v11712_v32 }
 0x961   : > { %v7526_v4 = vpop.f32.mrf.mxu0  ;;  %v7565_v55 = vpop.f32.mrf.mxu1  ;;  %8605 = vmatpush.bf16.msra.mxu0 %v11719_v10  ;;  %8692 = vmatpush.bf16.msra.mxu3 %v11787_v36 }
 0x962   : > { %v7527_v60 = vadd.f32 %v7526_v4, %v7383_v51  ;;  %v7658_v42 = vmax.f32 %v16200_v63, 0.0  ;;  %v12443_v51 = vld [vmem:[#allocation13 + $0x64] sm:$0xf0]  ;;  %v11774_v4 = vld [vmem:[#allocation13 + $0xe0] sm:$0xf]  ;;  %8664 = vmatpush.bf16.msra.mxu2 %v11715_v45 }
 0x963   : > { %v11711_v46 = vor.u32 %v12443_v51, %v11710_v22  ;;  %v11766_v22 = vld [vmem:[#allocation13 + $0xd0] sm:$0xf]  ;;  %v12457_v51 = vld [vmem:[#allocation13 + $0xd4] sm:$0xf0] }
 0x964   : > { %v7566_v14 = vadd.f32 %v7565_v55, %v7527_v60  ;;  %v12459_v55 = vld [vmem:[#allocation13 + $0xe4] sm:$0xf0]  ;;  %v11767_v39 = vor.u32 %v12457_v51, %v11766_v22 }
 0x965   : > { %v11775_v1 = vor.u32 %v12459_v55, %v11774_v4  ;;  %8606 = vmatpush.bf16.msra.mxu0 %v11711_v46  ;;  %v12440_v4 = vld [vmem:[#allocation13 + $0x54] sm:$0xf]  ;;  %v11704_v55 = vld [vmem:[#allocation13 + $0x58] sm:$0xf0]  ;;  %v17175_v46 = vrot.slane %v16221_v3, 1 }
 0x966   : > { %v7631_v21 = vadd.f32 %v7605_v27, %v7566_v14  ;;  %v12458_v14 = vld [vmem:[#allocation13 + $0xe4] sm:$0xf]  ;;  %v7385_v27 = vsel %vm17715_vm8, %v7382_v59, %v7384_v41  ;;  %v16227_v59 = vpop.f32.mrf.mxu3  ;;  %v11707_v9 = vor.u32 %v12440_v4, %v11704_v55  ;;  %v12439_v51 = vld [vmem:[#allocation13 + $0x44] sm:$0xf0]  ;;  %vm17737_vm8 = vmmov %vm17723_vm2 }
 0x967   : > { %v11779_v30 = vor.u32 %v12458_v14, %v11776_v58  ;;  %8635 = vmatpush.bf16.msra.mxu1 %v11775_v1  ;;  %v7688_v14 = vrot.slane %v7658_v42, 1  ;;  %v17716_v58 = vrot.slane %v16192_v62, 2  ;;  %v12455_v55 = vld [vmem:[#allocation13 + $0xc4] sm:$0xf0] }
 0x968   : > { %v16217_v60 = vadd.f32 %v16108_v28, %v7631_v21  ;;  %v11702_v21 = vld [vmem:[#allocation13 + $0x50] sm:$0xf]  ;;  %8665 = vmatpush.bf16.msra.mxu2 %v11707_v9 }
 0x969   : > { %v7528_v10 = vpop.f32.mrf.mxu0  ;;  %v7567_v48 = vpop.f32.mrf.mxu1  ;;  %v11703_v54 = vor.u32 %v12441_v37, %v11702_v21  ;;  %v7607_v21 = vsel %vm17717_vm15, %v17716_v58, %v7606_v0  ;;  %8693 = vmatpush.bf16.msra.mxu3 %v11779_v30  ;;  %v12454_v58 = vld [vmem:[#allocation13 + $0xc4] sm:$0xf]  ;;  %vm17738_vm15 = vmmov %vm17723_vm2 }
 0x96a   : > { %v7659_v35 = vmax.f32 %v16217_v60, 0.0  ;;  %v7529_v8 = vadd.f32 %v7528_v10, %v7385_v27  ;;  %v11768_v27 = vld [vmem:[#allocation13 + $0xd8] sm:$0xf0]  ;;  %v16238_v10 = vadd.f32 %v16099_v13, %v16097_v17  ;;  %v17720_v13 = vmax.f32 %v16177_v44, 0.0  ;;  %v11694_v44 = vld [vmem:[#allocation13 + $0x40] sm:$0xf] }
 0x96b   : > { %v11771_v1 = vor.u32 %v12456_v12, %v11768_v27  ;;  %8607 = vmatpush.bf16.msra.mxu0 %v11703_v54  ;;  %8636 = vmatpush.bf16.msra.mxu1 %v11767_v39  ;;  %v11758_v54 = vld [vmem:[#allocation13 + $0xc0] sm:$0xf]  ;;  %v11695_v4 = vor.u32 %v12439_v51, %v11694_v44  ;;  %v11688_v44 = vld [vmem:[#allocation13 + $0x38] sm:$0xf0]  ;;  %v12433_v60 = vld [vmem:[#allocation13 + $0x14] sm:$0xf0] }
 0x96c   : > { %v16231_v32 = vrot.slane %v7659_v35, 1  ;;  %v7568_v36 = vadd.f32 %v7567_v48, %v7529_v8  ;;  %v16245_v48 = vpop.f32.mrf.mxu2  ;;  %v7689_v8 = vsel %vm17719_vm12, %v16188_v6, %v7688_v14  ;;  %v17174_v30 = vrot.slane %v16238_v10, 2  ;;  %vm17742_vm12 = vmmov %vm17732_vm0 }
 0x96d   : > { %v16257_v62 = vmax.f32 %v17720_v13, %v7689_v8  ;;  %v7387_v6 = vsel %vm17721_vm13, %v7384_v41, %v17175_v46  ;;  %8694 = vmatpush.bf16.msra.mxu3 %v11771_v1  ;;  %v11759_v27 = vor.u32 %v12455_v55, %v11758_v54  ;;  %v11750_v8 = vld [vmem:[#allocation13 + $0xb0] sm:$0xf]  ;;  %v12452_v54 = vld [vmem:[#allocation13 + $0xb4] sm:$0xf]  ;;  %vm17743_vm13 = vmmov %vm17723_vm2 }
 0x96e   : > { %v7632_v45 = vadd.f32 %v7607_v21, %v7568_v36  ;;  %v7691_v37 = vsel %vm17718_vm11, %v7688_v14, %v16231_v32  ;;  %v12438_v36 = vld [vmem:[#allocation13 + $0x44] sm:$0xf]  ;;  %v11696_v14 = vld [vmem:[#allocation13 + $0x48] sm:$0xf0]  ;;  %v7609_v61 = vsel %vm17722_vm3, %v7606_v0, %v17174_v30  ;;  %v16274_v13 = vpop.f32.mrf.mxu3  ;;  %v11752_v0 = vld [vmem:[#allocation13 + $0xb8] sm:$0xf0] }
 0x96f   : > { %v16253_v17 = vmax.f32 %v7658_v42, %v7691_v37  ;;  %v11760_v21 = vld [vmem:[#allocation13 + $0xc8] sm:$0xf0]  ;;  %8608 = vmatpush.bf16.msra.mxu0 %v11695_v4  ;;  %v11699_v41 = vor.u32 %v12438_v36, %v11696_v14  ;;  %v12437_v37 = vld [vmem:[#allocation13 + $0x34] sm:$0xf0]  ;;  %8637 = vmatpush.bf16.msra.mxu1 %v11759_v27  ;;  %vm17741_vm11 = vmmov %vm17732_vm0 }
 0x970   : > { %v16260_v12 = vadd.f32 %v16108_v28, %v7632_v45  ;;  %v11763_v1 = vor.u32 %v12454_v58, %v11760_v21  ;;  %v11686_v45 = vld [vmem:[#allocation13 + $0x30] sm:$0xf]  ;;  %vm17744_vm3 = vmmov %vm17723_vm2 }
 0x971   : > { %v7531_v63 = vpop.f32.mrf.mxu0  ;;  %v7570_v42 = vpop.f32.mrf.mxu1  ;;  %8666 = vmatpush.bf16.msra.mxu2 %v11699_v41  ;;  %v12435_v41 = vld [vmem:[#allocation13 + $0x24] sm:$0xf0] }
 0x972   : > { %v7532_v22 = vadd.f32 %v7531_v63, %v7387_v6  ;;  %v7660_v39 = vmax.f32 %v16260_v12, 0.0  ;;  %v11687_v63 = vor.u32 %v12437_v37, %v11686_v45  ;;  %8695 = vmatpush.bf16.msra.mxu3 %v11763_v1  ;;  %v11742_v45 = vld [vmem:[#allocation13 + $0xa0] sm:$0xf]  ;;  %v12451_v37 = vld [vmem:[#allocation13 + $0xa4] sm:$0xf0] }
 0x974   : > { %v7571_v9 = vadd.f32 %v7570_v42, %v7532_v22  ;;  %v12453_v42 = vld [vmem:[#allocation13 + $0xb4] sm:$0xf0]  ;;  %v12436_v22 = vld [vmem:[#allocation13 + $0x34] sm:$0xf]  ;;  %v7692_v4 = vrot.slane %v7660_v39, 1  ;;  %v16278_v55 = vpop.f32.mrf.mxu2  ;;  %8609 = vmatpush.bf16.msra.mxu0 %v11687_v63 }
 0x975   : > { %v11751_v51 = vor.u32 %v12453_v42, %v11750_v8  ;;  %v11691_v50 = vor.u32 %v12436_v22, %v11688_v44  ;;  %v12434_v8 = vld [vmem:[#allocation13 + $0x24] sm:$0xf]  ;;  %v11680_v63 = vld [vmem:[#allocation13 + $0x28] sm:$0xf0] }
 0x976   : > { %v7633_v6 = vadd.f32 %v7609_v61, %v7571_v9  ;;  %v11755_v9 = vor.u32 %v12452_v54, %v11752_v0  ;;  %v7693_v58 = vsel %vm17723_vm2, %v16231_v32, %v7692_v4  ;;  %v11678_v61 = vld [vmem:[#allocation13 + $0x20] sm:$0xf]  ;;  %v11743_v32 = vor.u32 %v12451_v37, %v11742_v45  ;;  %v12450_v42 = vld [vmem:[#allocation13 + $0xa4] sm:$0xf]  ;;  %v11744_v44 = vld [vmem:[#allocation13 + $0xa8] sm:$0xf0] }
 0x977   : > { %8638 = vmatpush.bf16.msra.mxu1 %v11751_v51  ;;  %v16292_v1 = vmax.f32 %v7659_v35, %v7693_v58  ;;  %8667 = vmatpush.bf16.msra.mxu2 %v11691_v50  ;;  %v11683_v22 = vor.u32 %v12434_v8, %v11680_v63  ;;  %v11670_v51 = vld [vmem:[#allocation13 + $0x10] sm:$0xf]  ;;  %v11747_v35 = vor.u32 %v12450_v42, %v11744_v44  ;;  %v12449_v0 = vld [vmem:[#allocation13 + $0x94] sm:$0xf0]  ;;  %v12448_v45 = vld [vmem:[#allocation13 + $0x94] sm:$0xf]  ;;  %v16304_v8 = vpop.f32.mrf.mxu3 }
 0x978   : > { %v16281_v36 = vadd.f32 %v16108_v28, %v7633_v6  ;;  %8696 = vmatpush.bf16.msra.mxu3 %v11755_v9  ;;  %v11679_v28 = vor.u32 %v12435_v41, %v11678_v61  ;;  %v11671_v50 = vor.u32 %v12433_v60, %v11670_v51  ;;  %v11734_v54 = vld [vmem:[#allocation13 + $0x90] sm:$0xf]  ;;  %v12432_v9 = vld [vmem:[#allocation13 + $0x14] sm:$0xf]  ;;  %v11672_v41 = vld [vmem:[#allocation13 + $0x18] sm:$0xf0] }
 0x979   : > { %v16283_v27 = vpop.f32.mrf.mxu0  ;;  %v16285_v14 = vpop.f32.mrf.mxu1  ;;  %v11735_v61 = vor.u32 %v12449_v0, %v11734_v54  ;;  %v11736_v37 = vld [vmem:[#allocation13 + $0x98] sm:$0xf0]  ;;  %v11726_v60 = vld [vmem:[#allocation13 + $0x80] sm:$0xf]  ;;  %v12447_v54 = vld [vmem:[#allocation13 + $0x84] sm:$0xf0] }
 0x97a   : > { %v17173_v21 = vmax.f32 %v16281_v36, 0.0  ;;  %8610 = vmatpush.bf16.msra.mxu0 %v11679_v28  ;;  %v11739_v63 = vor.u32 %v12448_v45, %v11736_v37  ;;  %v12430_v0 = vld [vmem:[#allocation13 + $0x4] sm:$0xf]  ;;  %v11728_v45 = vld [vmem:[#allocation13 + $0x88] sm:$0xf0]  ;;  %vm17747_vm2 = vmmov %vm17732_vm0 }
 0x97b   : > { %8639 = vmatpush.bf16.msra.mxu1 %v11743_v32  ;;  %8668 = vmatpush.bf16.msra.mxu2 %v11683_v22  ;;  %v11675_v32 = vor.u32 %v12432_v9, %v11672_v41  ;;  %v12431_v22 = vld [vmem:[#allocation13 + $0x4] sm:$0xf0]  ;;  %v12446_v41 = vld [vmem:[#allocation13 + $0x84] sm:$0xf] }
 0x97c   : > { %v16296_v6 = vrot.slane %v17173_v21, 1  ;;  %8697 = vmatpush.bf16.msra.mxu3 %v11747_v35  ;;  %v16306_v51 = vpop.f32.mrf.mxu2  ;;  %v8069_v35 = vrot.slane %v16110_v2, 7  ;;  %v17729_v21 = vld [vmem:[#allocation51_spill] sm:$0xff] }
 0x97e   : > { %v7695_v58 = vsel %vm17724_vm9, %v7692_v4, %v16296_v6  ;;  %8611 = vmatpush.bf16.msra.mxu0 %v11671_v50  ;;  %v11662_v4 = vld [vmem:[#allocation13] sm:$0xf]  ;;  %v11731_v50 = vor.u32 %v12446_v41, %v11728_v45  ;;  %v8115_v37 = vsel %vm17725_vm14, 0.0, %v8069_v35  ;;  %vm17748_vm9 = vmmov %vm17732_vm0 }
 0x97f   : > { %v16302_v28 = vmax.f32 %v7660_v39, %v7695_v58  ;;  %8640 = vmatpush.bf16.msra.mxu1 %v11735_v61  ;;  %8669 = vmatpush.bf16.msra.mxu2 %v11675_v32  ;;  %v11663_v12 = vor.u32 %v12431_v22, %v11662_v4  ;;  %v11727_v39 = vor.u32 %v12447_v54, %v11726_v60  ;;  %v11664_v58 = vld [vmem:[#allocation13 + $0x8] sm:$0xf0]  ;;  %v8070_v61 = vrot.slane %v16112_v20, 7  ;;  %v16311_v4 = vpop.f32.mrf.mxu3  ;;  %vm17750_vm14 = vmmov %vm17732_vm0 }
 0x980   : > { %8698 = vmatpush.bf16.msra.mxu3 %v11739_v63  ;;  %v11667_v9 = vor.u32 %v12430_v0, %v11664_v58  ;;  %v12509_v58 = vld [vmem:[#allocation13 + $0x274] sm:$0xf0]  ;;  %v8073_v20 = vrot.slane %v16120_v38, 7  ;;  %v8075_v38 = vrot.slane %v16130_v5, 7 }
 0x981   : > { %v8004_v42 = vpop.f32.mrf.mxu0  ;;  %v8033_v44 = vpop.f32.mrf.mxu1  ;;  %v8116_v0 = vsel %vm17726_vm1, 0.0, %v8070_v61  ;;  %vm17751_vm1 = vmmov %vm17732_vm0 }
 0x982   : > { %8612 = vmatpush.bf16.msra.mxu0 %v11663_v12  ;;  %v8287_v22 = vrot.slane %v8004_v42, 1  ;;  %v8290_v60 = vrot.slane %v8033_v44, 1  ;;  %v8071_v12 = vrot.slane %v16118_v49, 7  ;;  %v8117_v42 = vmul.f32 %v17729_v21, %v8115_v37  ;;  %v8367_v49 = vld [vmem:[%s17731_s21] sm:$0x3]  ;;  %s9882_s21 = scalar_lea.hbm %s17862_s24, %s12051_s15 }
 0x983   : > { %8641 = vmatpush.bf16.msra.mxu1 %v11727_v39  ;;  %8670 = vmatpush.bf16.msra.mxu2 %v11667_v9  ;;  %v11846_v39 = vld [vmem:[#allocation13 + $0x270] sm:$0xf]  ;;  %v8118_v44 = vmul.f32 %v17729_v21, %v8116_v0  ;;  %v16333_v25 = vperm.slane %v8367_v49, 0  ;;  %v16335_v33 = vperm.slane %v8367_v49, 1  ;;  %v8079_v49 = vrot.slane %v16142_v15, 7  ;;  %s9886_s17 = sshll.u32 %s9882_s21, 4  ;;  %s9887_s17 = int_to_ptr.hbm [resolvable:$true] %s9886_s17 }
 0x984   : > { %8699 = vmatpush.bf16.msra.mxu3 %v11731_v50  ;;  %v16316_v9 = vpop.f32.mrf.mxu2  ;;  %v11847_v50 = vor.u32 %v12509_v58, %v11846_v39  ;;  %v11838_v39 = vld [vmem:[#allocation13 + $0x260] sm:$0xf]  ;;  %v12507_v58 = vld [vmem:[#allocation13 + $0x264] sm:$0xf0]  ;;  %v8223_v37 = vadd.f32 %v16245_v48, %v8117_v42  ;;  %v11830_v42 = vld [vmem:[#allocation13 + $0x250] sm:$0xf] }
 0x985   : > { %v8252_v0 = vadd.f32 %v16274_v13, %v8118_v44  ;;  %v11839_v46 = vor.u32 %v12507_v58, %v11838_v39  ;;  %v8076_v13 = vsel %vm17735_vm6, %v8071_v12, %v8075_v38  ;;  %v12505_v44 = vld [vmem:[#allocation13 + $0x254] sm:$0xf0]  ;;  %vm17764_vm6 = vmmov %vm17744_vm3  ;;  %s13048_s4 = sshra.s32 %s9887_s17, 4  ;;  %s13049_s4 = int_to_ptr.hbm [resolvable:$true] %s13048_s4 }
 0x986   : > { %8947 = vmatpush.bf16.msrb.mxu0 %v11847_v50  ;;  %v11831_v58 = vor.u32 %v12505_v44, %v11830_v42  ;;  %v8080_v44 = vsel %vm17741_vm11, %v8075_v38, %v8079_v49  ;;  %vm17777_vm11 = vmmov %vm17744_vm3  ;;  %p13055_p7 = scmp.lt.s32.totalorder %s13049_s4, %s17862_s24 }
 0x987   : > { %v16342_v39 = vpop.f32.mrf.mxu3 }
 0x989   : > { %v8006_v32 = vpop.f32.mrf.mxu0  ;;  %v8035_v63 = vpop.f32.mrf.mxu1 }
 0x98a   : > { %v8288_v54 = vrot.slane %v8006_v32, 1  ;;  %v8291_v2 = vrot.slane %v8035_v63, 1  ;;  %v17730_v32 = vld [vmem:[#allocation62_spill] sm:$0xff]  ;;  %8948 = vmatpush.bf16.msrb.mxu0 %v11839_v46 }
 0x98c   : > { %v8289_v41 = vsel %vm17727_vm10, %v8287_v22, %v8288_v54  ;;  %v8292_v45 = vsel %vm17728_vm7, %v8290_v60, %v8291_v2  ;;  %v8077_v22 = vrot.slane %v16132_v23, 7  ;;  %v8072_v60 = vsel %vm17732_vm0, %v8069_v35, %v8071_v12  ;;  %v17734_v35 = vld [vmem:[#allocation26_spill] sm:$0xff]  ;;  %vm17752_vm10 = vmmov %vm17744_vm3 }
 0x98d   : > { %v8335_v63 = vmul.f32 %v17730_v32, %v8289_v41  ;;  %v8336_v30 = vmul.f32 %v17730_v32, %v8292_v45  ;;  %v8074_v41 = vsel %vm17733_vm4, %v8070_v61, %v8073_v20  ;;  %v8119_v29 = vmul.f32 %v17734_v35, %v8072_v60  ;;  %vm17753_vm7 = vmmov %vm17744_vm3 }
 0x98e   : > { %v8120_v48 = vmul.f32 %v17734_v35, %v8074_v41  ;;  %v8078_v61 = vsel %vm17736_vm5, %v8073_v20, %v8077_v22  ;;  %v16350_v20 = vpop.f32.mrf.mxu2  ;;  %8949 = vmatpush.bf16.msrb.mxu0 %v11831_v58  ;;  %vm17761_vm4 = vmmov %vm17744_vm3 }
 0x98f   : > { %v8351_v5 = vadd.f32 %v8335_v63, %v8223_v37  ;;  %v8352_v53 = vadd.f32 %v8336_v30, %v8252_v0  ;;  %v8225_v46 = vadd.f32 %v16278_v55, %v8119_v29  ;;  %v17739_v37 = vld [vmem:[#allocation24_spill] sm:$0xff]  ;;  %v11822_v29 = vld [vmem:[#allocation13 + $0x240] sm:$0xf]  ;;  %vm17769_vm5 = vmmov %vm17732_vm0 }
 0x990   : > { %v8254_v60 = vadd.f32 %v16304_v8, %v8120_v48  ;;  %v12503_v55 = vld [vmem:[#allocation13 + $0x244] sm:$0xf0]  ;;  %v8083_v8 = vrot.slane %v16154_v11, 7 }
 0x991   : > { %v8009_v45 = vpop.f32.mrf.mxu0  ;;  %v8038_v50 = vpop.f32.mrf.mxu1  ;;  %v8373_v41 = vadd.f32 %v16333_v25, %v8351_v5  ;;  %v8374_v15 = vadd.f32 %v16335_v33, %v8352_v53  ;;  %v8085_v5 = vrot.slane %v16161_v52, 7  ;;  %v11814_v52 = vld [vmem:[#allocation13 + $0x230] sm:$0xf] }
 0x992   : > { %v8293_v23 = vrot.slane %v8009_v45, 1  ;;  %v8295_v40 = vrot.slane %v8038_v50, 1  ;;  %v17740_v45 = vld [vmem:[#allocation52_spill] sm:$0xff] }
 0x993   : > { %v8122_v48 = vmul.f32 %v17740_v45, %v8078_v61 }
 0x994   : > { %v8294_v63 = vsel %vm17737_vm8, %v8288_v54, %v8293_v23  ;;  %v8296_v30 = vsel %vm17738_vm15, %v8291_v2, %v8295_v40  ;;  %v8081_v54 = vrot.slane %v16145_v24, 7  ;;  %v8121_v2 = vmul.f32 %v17740_v45, %v8076_v13  ;;  %v11904_v45 = vld [vmem:[#allocation13 + $0x2e8] sm:$0xf0]  ;;  %vm17772_vm8 = vmmov %vm17732_vm0 }
 0x995   : > { %v8337_v0 = vmul.f32 %v17739_v37, %v8294_v63  ;;  %v8338_v12 = vmul.f32 %v17739_v37, %v8296_v30  ;;  %v11823_v63 = vor.u32 %v12503_v55, %v11822_v29  ;;  %v12501_v55 = vld [vmem:[#allocation13 + $0x234] sm:$0xf0]  ;;  %v8257_v53 = vadd.f32 %v16311_v4, %v8122_v48  ;;  %vm17775_vm15 = vmmov %vm17732_vm0 }
 0x996   : > { %v8228_v11 = vadd.f32 %v16306_v51, %v8121_v2  ;;  %v8082_v38 = vsel %vm17742_vm12, %v8077_v22, %v8081_v54  ;;  %v11815_v37 = vor.u32 %v12501_v55, %v11814_v52  ;;  %v16374_v22 = vpop.f32.mrf.mxu3  ;;  %v17181_v2 = vrot.slane %v16174_v18, 7  ;;  %v12508_v52 = vld [vmem:[#allocation13 + $0x274] sm:$0xf]  ;;  %vm17779_vm12 = vmmov %vm17744_vm3 }
 0x997   : > { %v8353_v50 = vadd.f32 %v8337_v0, %v8225_v46  ;;  %v8354_v42 = vadd.f32 %v8338_v12, %v8254_v60  ;;  %v8389_v46 = vmax.f32 %v8373_v41, 0.0  ;;  %v8390_v60 = vmax.f32 %v8374_v15, 0.0  ;;  %8950 = vmatpush.bf16.msrb.mxu0 %v11823_v63  ;;  %v17745_v63 = vld [vmem:[#allocation61_spill] sm:$0xff] }
 0x999   : > { %v8375_v30 = vadd.f32 %v16333_v25, %v8353_v50  ;;  %v8376_v24 = vadd.f32 %v16335_v33, %v8354_v42  ;;  %v8011_v13 = vpop.f32.mrf.mxu0  ;;  %v8040_v58 = vpop.f32.mrf.mxu1 }
 0x99a   : > { %v8297_v0 = vrot.slane %v8011_v13, 1  ;;  %v8299_v12 = vrot.slane %v8040_v58, 1 }
 0x99b   : > { %v8391_v61 = vmax.f32 %v8375_v30, 0.0  ;;  %v8392_v29 = vmax.f32 %v8376_v24, 0.0  ;;  %8951 = vmatpush.bf16.msrb.mxu0 %v11815_v37  ;;  %v17746_v30 = vld [vmem:[#allocation59_spill] sm:$0xff]  ;;  %v12499_v24 = vld [vmem:[#allocation13 + $0x224] sm:$0xf0] }
 0x99c   : > { %v8298_v50 = vsel %vm17743_vm13, %v8293_v23, %v8297_v0  ;;  %v8300_v42 = vsel %vm17744_vm3, %v8295_v40, %v8299_v12  ;;  %v8123_v4 = vmul.f32 %v17746_v30, %v8080_v44  ;;  %v11806_v40 = vld [vmem:[#allocation13 + $0x220] sm:$0xf]  ;;  %v8124_v58 = vmul.f32 %v17746_v30, %v8082_v38  ;;  %v11974_v30 = vld [vmem:[#allocation13 + $0x170] sm:$0xf]  ;;  %vm17783_vm13 = vmmov %vm17744_vm3 }
 0x99d   : > { %v16368_v41 = vpack.c.bf16 %v8391_v61, %v8389_v46  ;;  %v16370_v15 = vpack.c.bf16 %v8392_v29, %v8390_v60  ;;  %v8339_v13 = vmul.f32 %v17745_v63, %v8298_v50  ;;  %v8340_v51 = vmul.f32 %v17745_v63, %v8300_v42  ;;  %v16382_v60 = vpop.f32.mrf.mxu2  ;;  %v12495_v63 = vld [vmem:[#allocation13 + $0x204] sm:$0xf0] }
 0x99e   : > { %v8084_v46 = vsel %vm17747_vm2, %v8079_v49, %v8083_v8  ;;  %v11807_v37 = vor.u32 %v12499_v24, %v11806_v40  ;;  %v8086_v44 = vsel %vm17748_vm9, %v8081_v54, %v8085_v5  ;;  %v8259_v40 = vadd.f32 %v16342_v39, %v8124_v58  ;;  %v11910_v39 = vld [vmem:[#allocation13 + $0x2f0] sm:$0xf]  ;;  %v12525_v58 = vld [vmem:[#allocation13 + $0x2f4] sm:$0xf0]  ;;  %vm17785_vm2 = vmmov %vm17744_vm3 }
 0x99f   : > { %v8355_v48 = vadd.f32 %v8339_v13, %v8228_v11  ;;  %v8356_v23 = vadd.f32 %v8340_v51, %v8257_v53  ;;  %8613 = vmatmul.bf16.vlgmr.msra.gmra.mxu0 %v16368_v41  ;;  %8642 = vmatmul.bf16.vlgmr.msra.gmra.mxu1 %v16370_v15  ;;  %v17749_v53 = vrot.slane %v16167_v26, 7  ;;  %v8230_v13 = vadd.f32 %v16316_v9, %v8123_v4  ;;  %v17754_v4 = vld [vmem:[#allocation58_spill] sm:$0xff]  ;;  %vm17786_vm9 = vmmov %vm17785_vm2 }
 0x9a0   : > { %8671 = vmatmul.bf16.vlgmr.msra.gmra.mxu2 %v16368_v41  ;;  %8700 = vmatmul.bf16.vlgmr.msra.gmra.mxu3 %v16370_v15  ;;  %v8090_v51 = vsel %vm17751_vm1, %v8085_v5, %v17181_v2  ;;  %v17755_v2 = vld [vmem:[#allocation55_spill] sm:$0xff]  ;;  %vm17792_vm1 = vcmask 1045504  }
 0x9a1   : > { %v8088_v11 = vsel %vm17750_vm14, %v8083_v8, %v17749_v53  ;;  %v16391_v61 = vadd.f32 %v16333_v25, %v8355_v48  ;;  %v16394_v38 = vadd.f32 %v16335_v33, %v8356_v23  ;;  %v16396_v49 = vpop.f32.mrf.mxu0  ;;  %v16398_v29 = vpop.f32.mrf.mxu1  ;;  %8952 = vmatpush.bf16.msrb.mxu0 %v11807_v37  ;;  %v11798_v48 = vld [vmem:[#allocation13 + $0x210] sm:$0xf]  ;;  %v12497_v23 = vld [vmem:[#allocation13 + $0x214] sm:$0xf0]  ;;  %v8125_v55 = vmul.f32 %v17755_v2, %v8084_v46  ;;  %vm17790_vm14 = vmmov %vm17785_vm2 }
 0x9a2   : > { %v17182_v54 = vrot.slane %v16396_v49, 1  ;;  %v17184_v50 = vrot.slane %v16398_v29, 1  ;;  %v11799_v53 = vor.u32 %v12497_v23, %v11798_v48  ;;  %v11848_v48 = vld [vmem:[#allocation13 + $0x278] sm:$0xf0]  ;;  %v12524_v23 = vld [vmem:[#allocation13 + $0x2f4] sm:$0xf] }
 0x9a3   : > { %v8393_v42 = vmax.f32 %v16391_v61, 0.0  ;;  %v8394_v9 = vmax.f32 %v16394_v38, 0.0  ;;  %v11912_v61 = vld [vmem:[#allocation13 + $0x2f8] sm:$0xf0]  ;;  %v11851_v46 = vor.u32 %v12508_v52, %v11848_v48  ;;  %v12523_v48 = vld [vmem:[#allocation13 + $0x2e4] sm:$0xf0] }
 0x9a4   : > { %v8302_v24 = vsel %vm17752_vm10, %v8297_v0, %v17182_v54  ;;  %v8304_v37 = vsel %vm17753_vm7, %v8299_v12, %v17184_v50  ;;  %v8126_v0 = vmul.f32 %v17755_v2, %v8086_v44  ;;  %v11911_v12 = vor.u32 %v12525_v58, %v11910_v39  ;;  %v17756_v50 = vld [vmem:[#allocation63_spill] sm:$0xff]  ;;  %v12477_v39 = vld [vmem:[#allocation13 + $0x174] sm:$0xf0]  ;;  %vm17793_vm10 = vmmov %vm17785_vm2 }
 0x9a5   : > { %v8341_v8 = vmul.f32 %v17754_v4, %v8302_v24  ;;  %v8342_v5 = vmul.f32 %v17754_v4, %v8304_v37  ;;  %8953 = vmatpush.bf16.msrb.mxu0 %v11799_v53  ;;  %v16424_v38 = vmul.f32 %v17756_v50, %v8088_v11  ;;  %v16427_v24 = vmul.f32 %v17756_v50, %v8090_v51  ;;  %v16429_v37 = vpop.f32.mrf.mxu3  ;;  %v11790_v4 = vld [vmem:[#allocation13 + $0x200] sm:$0xf]  ;;  %v16445_v50 = vpop.f32.mrf.mxu2  ;;  %vm17794_vm7 = vmmov %vm17785_vm2 }
 0x9a6   : > { %v11915_v53 = vor.u32 %v12524_v23, %v11912_v61  ;;  %v17757_v44 = vrot.slane %v16183_v43, 7  ;;  %8976 = vmatpush.bf16.msrb.mxu1 %v11911_v12  ;;  %v11791_v52 = vor.u32 %v12495_v63, %v11790_v4  ;;  %v11902_v58 = vld [vmem:[#allocation13 + $0x2e0] sm:$0xf]  ;;  %9005 = vmatpush.bf16.msrb.mxu2 %v11851_v46  ;;  %v12522_v4 = vld [vmem:[#allocation13 + $0x2e4] sm:$0xf]  ;;  %v8262_v23 = vadd.f32 %v16374_v22, %v8126_v0  ;;  %v17765_v0 = vld [vmem:[#allocation65_spill] sm:$0xff] }
 0x9a7   : > { %v8357_v54 = vadd.f32 %v8341_v8, %v8230_v13  ;;  %v8358_v35 = vadd.f32 %v8342_v5, %v8259_v40  ;;  %v17758_v8 = vrot.slane %v16167_v26, 7  ;;  %v11975_v26 = vor.u32 %v12477_v39, %v11974_v30  ;;  %v11894_v39 = vld [vmem:[#allocation13 + $0x2d0] sm:$0xf] }
 0x9a8   : > { %9034 = vmatpush.bf16.msrb.mxu3 %v11915_v53  ;;  %v17760_v46 = vrot.slane %v16396_v49, 1 }
 0x9a9   : > { %v8092_v13 = vsel %vm17732_vm0, %v17758_v8, %v17757_v44  ;;  %v8379_v40 = vadd.f32 %v16333_v25, %v8357_v54  ;;  %v8380_v11 = vadd.f32 %v16335_v33, %v8358_v35  ;;  %v16438_v5 = vpop.f32.mrf.mxu0  ;;  %v16440_v51 = vpop.f32.mrf.mxu1  ;;  %v11903_v44 = vor.u32 %v12523_v48, %v11902_v58  ;;  %v12506_v54 = vld [vmem:[#allocation13 + $0x264] sm:$0xf]  ;;  %v11840_v8 = vld [vmem:[#allocation13 + $0x268] sm:$0xf0]  ;;  %8954 = vmatpush.bf16.msrb.mxu0 %v11791_v52  ;;  %v12475_v52 = vld [vmem:[#allocation13 + $0x164] sm:$0xf0] }
 0x9aa   : > { %v8233_v35 = vadd.f32 %v16350_v20, %v8125_v55  ;;  %v11843_v63 = vor.u32 %v12506_v54, %v11840_v8  ;;  %v17759_v61 = vrot.slane %v16438_v5, 1  ;;  %v17762_v53 = vrot.slane %v16440_v51, 1  ;;  %v12504_v54 = vld [vmem:[#allocation13 + $0x254] sm:$0xf]  ;;  %v11832_v8 = vld [vmem:[#allocation13 + $0x258] sm:$0xf0] }
 0x9ab   : > { %v8395_v2 = vmax.f32 %v8379_v40, 0.0  ;;  %v8396_v12 = vmax.f32 %v8380_v11, 0.0  ;;  %v17763_v20 = vrot.slane %v16398_v29, 1  ;;  %v11907_v40 = vor.u32 %v12522_v4, %v11904_v45  ;;  %v11966_v11 = vld [vmem:[#allocation13 + $0x160] sm:$0xf]  ;;  %8977 = vmatpush.bf16.msrb.mxu1 %v11903_v44 }
 0x9ac   : > { %v8306_v30 = vsel %vm17761_vm4, %v17760_v46, %v17759_v61  ;;  %v12521_v61 = vld [vmem:[#allocation13 + $0x2d4] sm:$0xf0]  ;;  %9006 = vmatpush.bf16.msrb.mxu2 %v11843_v63  ;;  %v11967_v29 = vor.u32 %v12475_v52, %v11966_v11  ;;  %v11835_v45 = vor.u32 %v12504_v54, %v11832_v8  ;;  %v12520_v4 = vld [vmem:[#allocation13 + $0x2d4] sm:$0xf]  ;;  %v11896_v46 = vld [vmem:[#allocation13 + $0x2d8] sm:$0xf0] }
 0x9ad   : > { %v8308_v55 = vsel %vm17764_vm6, %v17763_v20, %v17762_v53  ;;  %9303 = vmatpush.bf16.msra.mxu0 %v11975_v26  ;;  %v16458_v58 = vpack.c.bf16 %v8395_v2, %v8393_v42  ;;  %v16460_v22 = vpack.c.bf16 %v8396_v12, %v8394_v9  ;;  %v8343_v48 = vmul.f32 %v17765_v0, %v8306_v30  ;;  %v11958_v53 = vld [vmem:[#allocation13 + $0x150] sm:$0xf]  ;;  %v12473_v12 = vld [vmem:[#allocation13 + $0x154] sm:$0xf0]  ;;  %v11886_v44 = vld [vmem:[#allocation13 + $0x2c0] sm:$0xf] }
 0x9ae   : > { %v8344_v49 = vmul.f32 %v17765_v0, %v8308_v55  ;;  %9035 = vmatpush.bf16.msrb.mxu3 %v11907_v40  ;;  %v11895_v26 = vor.u32 %v12521_v61, %v11894_v39  ;;  %v11899_v9 = vor.u32 %v12520_v4, %v11896_v46  ;;  %v12519_v30 = vld [vmem:[#allocation13 + $0x2c4] sm:$0xf0]  ;;  %v17767_v63 = vrot.slane %v16206_v57, 7  ;;  %v12502_v39 = vld [vmem:[#allocation13 + $0x244] sm:$0xf]  ;;  %v16486_v46 = vpop.f32.mrf.mxu3  ;;  %vm17797_vm4 = vmmov %vm17732_vm0 }
 0x9af   : > { %v8359_v2 = vadd.f32 %v8343_v48, %v8233_v35  ;;  %8618 = vmatmul.bf16.gmra.mxu0 %v16458_v58  ;;  %8647 = vmatmul.bf16.gmra.mxu1 %v16460_v22  ;;  %v17766_v20 = vld [vmem:[#allocation64_spill] sm:$0xff]  ;;  %v17768_v40 = vrot.slane %v16174_v18, 7  ;;  %v17770_v52 = vrot.slane %v16211_v16, 7  ;;  %v11959_v16 = vor.u32 %v12473_v12, %v11958_v53  ;;  %v11950_v8 = vld [vmem:[#allocation13 + $0x140] sm:$0xf]  ;;  %vm17798_vm6 = vmmov %vm17732_vm0 }
 0x9b0   : > { %v8360_v42 = vadd.f32 %v8344_v49, %v8262_v23  ;;  %v8129_v55 = vmul.f32 %v17766_v20, %v8092_v13  ;;  %v17771_v23 = vrot.slane %v16183_v43, 7  ;;  %8676 = vmatmul.bf16.gmra.mxu2 %v16458_v58  ;;  %8705 = vmatmul.bf16.gmra.mxu3 %v16460_v22  ;;  %v11824_v48 = vld [vmem:[#allocation13 + $0x248] sm:$0xf0]  ;;  %v12518_v49 = vld [vmem:[#allocation13 + $0x2c4] sm:$0xf]  ;;  %v11887_v43 = vor.u32 %v12519_v30, %v11886_v44 }
 0x9b1   : > { %v8094_v11 = vsel %vm17769_vm5, %v17768_v40, %v17767_v63  ;;  %v16480_v13 = vadd.f32 %v16333_v25, %v8359_v2  ;;  %v16482_v61 = vpop.f32.mrf.mxu0  ;;  %v16484_v18 = vpop.f32.mrf.mxu1  ;;  %9304 = vmatpush.bf16.msra.mxu0 %v11967_v29  ;;  %8978 = vmatpush.bf16.msrb.mxu1 %v11895_v26  ;;  %v11888_v54 = vld [vmem:[#allocation13 + $0x2c8] sm:$0xf0]  ;;  %v12471_v4 = vld [vmem:[#allocation13 + $0x144] sm:$0xf0]  ;;  %v11827_v2 = vor.u32 %v12502_v39, %v11824_v48  ;;  %v12517_v0 = vld [vmem:[#allocation13 + $0x2b4] sm:$0xf0] }
 0x9b2   : > { %v8096_v35 = vsel %vm17772_vm8, %v17771_v23, %v17770_v52  ;;  %v17192_v63 = vrot.slane %v16482_v61, 1  ;;  %v17194_v40 = vrot.slane %v16484_v18, 1  ;;  %9007 = vmatpush.bf16.msrb.mxu2 %v11835_v45  ;;  %9036 = vmatpush.bf16.msrb.mxu3 %v11899_v9  ;;  %v11891_v52 = vor.u32 %v12518_v49, %v11888_v54  ;;  %v11878_v23 = vld [vmem:[#allocation13 + $0x2b0] sm:$0xf]  ;;  %v12500_v45 = vld [vmem:[#allocation13 + $0x234] sm:$0xf]  ;;  %v8239_v48 = vpop.f32.mrf.mxu2  ;;  %vm17799_vm5 = vmmov %vm17732_vm0 }
 0x9b3   : > { %v8235_v29 = vadd.f32 %v16382_v60, %v16424_v38  ;;  %v8264_v26 = vadd.f32 %v16429_v37, %v16427_v24  ;;  %v17773_v53 = vrot.slane %v16227_v59, 7  ;;  %v17774_v12 = vrot.slane %v16206_v57, 7  ;;  %v11816_v9 = vld [vmem:[#allocation13 + $0x238] sm:$0xf0]  ;;  %v12516_v37 = vld [vmem:[#allocation13 + $0x2b4] sm:$0xf]  ;;  %vm17800_vm8 = vmmov %vm17732_vm0 }
 0x9b4   : > { %v16500_v30 = vadd.f32 %v16335_v33, %v8360_v42  ;;  %v8397_v39 = vmax.f32 %v16480_v13, 0.0  ;;  %v17776_v60 = vrot.slane %v16438_v5, 1  ;;  %v17778_v59 = vrot.slane %v16440_v51, 1  ;;  %v11880_v42 = vld [vmem:[#allocation13 + $0x2b8] sm:$0xf0]  ;;  %v17780_v49 = vld [vmem:[#allocation60_spill] sm:$0xff] }
 0x9b5   : > { %v8098_v44 = vsel %vm17775_vm15, %v17774_v12, %v17773_v53  ;;  %v11951_v24 = vor.u32 %v12471_v4, %v11950_v8  ;;  %9305 = vmatpush.bf16.msra.mxu0 %v11959_v16  ;;  %8979 = vmatpush.bf16.msrb.mxu1 %v11887_v43  ;;  %v11879_v53 = vor.u32 %v12517_v0, %v11878_v23  ;;  %v11942_v5 = vld [vmem:[#allocation13 + $0x130] sm:$0xf]  ;;  %v12469_v12 = vld [vmem:[#allocation13 + $0x134] sm:$0xf0]  ;;  %v12515_v8 = vld [vmem:[#allocation13 + $0x2a4] sm:$0xf0] }
 0x9b6   : > { %v8310_v38 = vsel %vm17777_vm11, %v17776_v60, %v17192_v63  ;;  %v8312_v57 = vsel %vm17779_vm12, %v17778_v59, %v17194_v40  ;;  %v11870_v60 = vld [vmem:[#allocation13 + $0x2a0] sm:$0xf]  ;;  %v17781_v63 = vld [vmem:[#allocation32_spill] sm:$0xff]  ;;  %9008 = vmatpush.bf16.msrb.mxu2 %v11827_v2  ;;  %9037 = vmatpush.bf16.msrb.mxu3 %v11891_v52  ;;  %v11819_v51 = vor.u32 %v12500_v45, %v11816_v9  ;;  %v12498_v4 = vld [vmem:[#allocation13 + $0x224] sm:$0xf] }
 0x9b7   : > { %v8345_v54 = vmul.f32 %v17780_v49, %v8310_v38  ;;  %v8346_v13 = vmul.f32 %v17780_v49, %v8312_v57  ;;  %v8131_v32 = vmul.f32 %v17781_v63, %v8096_v35  ;;  %v11883_v59 = vor.u32 %v12516_v37, %v11880_v42  ;;  %v11808_v40 = vld [vmem:[#allocation13 + $0x228] sm:$0xf0]  ;;  %v16517_v57 = vld [vmem:[#allocation13 + $0x2a4] sm:$0xf]  ;;  %v16521_v0 = vld [vmem:[#allocation13 + $0x120] sm:$0xf] }
 0x9b8   : > { %v8130_v21 = vmul.f32 %v17766_v20, %v8094_v11  ;;  %v16519_v16 = vld [vmem:[#allocation13 + $0x2a8] sm:$0xf0]  ;;  %v8238_v43 = vadd.f32 %v16445_v50, %v8129_v55  ;;  %v8132_v2 = vmul.f32 %v17781_v63, %v8098_v44  ;;  %v11943_v52 = vor.u32 %v12469_v12, %v11942_v5  ;;  %v12467_v23 = vld [vmem:[#allocation13 + $0x124] sm:$0xf0]  ;;  %v11862_v45 = vld [vmem:[#allocation13 + $0x290] sm:$0xf] }
 0x9b9   : > { %v8361_v38 = vadd.f32 %v8345_v54, %v8235_v29  ;;  %v8362_v7 = vadd.f32 %v8346_v13, %v8264_v26  ;;  %v8240_v35 = vadd.f32 %v8239_v48, %v8131_v32  ;;  %v12513_v9 = vld [vmem:[#allocation13 + $0x294] sm:$0xf0]  ;;  %v8398_v37 = vmax.f32 %v16500_v30, 0.0  ;;  %v8021_v26 = vpop.f32.mrf.mxu0  ;;  %v8050_v42 = vpop.f32.mrf.mxu1  ;;  %9306 = vmatpush.bf16.msra.mxu0 %v11951_v24  ;;  %8980 = vmatpush.bf16.msrb.mxu1 %v11879_v53  ;;  %v12496_v12 = vld [vmem:[#allocation13 + $0x214] sm:$0xf]  ;;  %vm17801_vm15 = vmmov %vm17732_vm0 }
 0x9ba   : > { %v11871_v54 = vor.u32 %v12515_v8, %v11870_v60  ;;  %v8313_v13 = vrot.slane %v8021_v26, 1  ;;  %v8315_v50 = vrot.slane %v8050_v42, 1  ;;  %9009 = vmatpush.bf16.msrb.mxu2 %v11819_v51  ;;  %9038 = vmatpush.bf16.msrb.mxu3 %v11883_v59  ;;  %v11811_v32 = vor.u32 %v12498_v4, %v11808_v40  ;;  %v12465_v26 = vld [vmem:[#allocation13 + $0x114] sm:$0xf0]  ;;  %vm17802_vm11 = vmmov %vm17732_vm0 }
 0x9bb   : > { %v8383_v11 = vadd.f32 %v16333_v25, %v8361_v38  ;;  %v8384_v29 = vadd.f32 %v16335_v33, %v8362_v7  ;;  %v11875_v55 = vor.u32 %v16517_v57, %v16519_v16  ;;  %v11935_v30 = vor.u32 %v12467_v23, %v16521_v0  ;;  %v11800_v7 = vld [vmem:[#allocation13 + $0x218] sm:$0xf0]  ;;  %v8268_v38 = vpop.f32.mrf.mxu3  ;;  %v17787_v57 = vld [vmem:[#allocation27_spill] sm:$0xff]  ;;  %vm17803_vm12 = vmmov %vm17732_vm0 }
 0x9bc   : > { %v11863_v5 = vor.u32 %v12513_v9, %v11862_v45  ;;  %v17782_v24 = vrot.slane %v16482_v61, 1  ;;  %v8333_v60 = vsel %vm17744_vm3, %v8313_v13, 0.0  ;;  %v17784_v51 = vrot.slane %v16484_v18, 1  ;;  %v17788_v0 = vld [vmem:[#allocation30_spill] sm:$0xff]  ;;  %v12512_v61 = vld [vmem:[#allocation13 + $0x294] sm:$0xf]  ;;  %vm17805_vm3 = vmmov %vm17785_vm2 }
 0x9bd   : > { %v8399_v44 = vmax.f32 %v8383_v11, 0.0  ;;  %v8400_v48 = vmax.f32 %v8384_v29, 0.0  ;;  %v8334_v59 = vsel %vm17786_vm9, %v8315_v50, 0.0  ;;  %v8349_v23 = vmul.f32 %v17788_v0, %v8333_v60  ;;  %9307 = vmatpush.bf16.msra.mxu0 %v11943_v52  ;;  %v11864_v45 = vld [vmem:[#allocation13 + $0x298] sm:$0xf0]  ;;  %8981 = vmatpush.bf16.msrb.mxu1 %v11871_v54  ;;  %vm17806_vm9 = vmmov %vm17785_vm2 }
 0x9be   : > { %v8314_v53 = vsel %vm17783_vm13, %v17782_v24, %v8313_v13  ;;  %v8316_v40 = vsel %vm17785_vm2, %v17784_v51, %v8315_v50  ;;  %v8350_v11 = vmul.f32 %v17788_v0, %v8334_v59  ;;  %9010 = vmatpush.bf16.msrb.mxu2 %v11811_v32  ;;  %v11803_v18 = vor.u32 %v12496_v12, %v11800_v7  ;;  %v11926_v29 = vld [vmem:[#allocation13 + $0x110] sm:$0xf]  ;;  %v12511_v52 = vld [vmem:[#allocation13 + $0x284] sm:$0xf0]  ;;  %v12494_v13 = vld [vmem:[#allocation13 + $0x204] sm:$0xf] }
 0x9bf   : > { %v16539_v8 = vpack.c.bf16 %v8399_v44, %v8397_v39  ;;  %v16541_v4 = vpack.c.bf16 %v8400_v48, %v8398_v37  ;;  %v8347_v16 = vmul.f32 %v17787_v57, %v8314_v53  ;;  %v8348_v9 = vmul.f32 %v17787_v57, %v8316_v40  ;;  %v11854_v39 = vld [vmem:[#allocation13 + $0x280] sm:$0xf]  ;;  %v11792_v50 = vld [vmem:[#allocation13 + $0x208] sm:$0xf0]  ;;  %9039 = vmatpush.bf16.msrb.mxu3 %v11875_v55  ;;  %v12463_v53 = vld [vmem:[#allocation13 + $0x104] sm:$0xf0] }
 0x9c0   : > { %v8267_v37 = vadd.f32 %v16486_v46, %v8130_v21  ;;  %v8269_v42 = vadd.f32 %v8268_v38, %v8132_v2  ;;  %v8365_v48 = vadd.f32 %v8349_v23, %v8240_v35  ;;  %v11867_v54 = vor.u32 %v12512_v61, %v11864_v45  ;;  %v12510_v46 = vld [vmem:[#allocation13 + $0x284] sm:$0xf]  ;;  %v11856_v2 = vld [vmem:[#allocation13 + $0x288] sm:$0xf0]  ;;  %v11918_v24 = vld [vmem:[#allocation13 + $0x100] sm:$0xf] }
 0x9c1   : > { %8623 = vmatmul.bf16.gmra.mxu0 %v16539_v8  ;;  %8652 = vmatmul.bf16.gmra.mxu1 %v16541_v4  ;;  %v8363_v44 = vadd.f32 %v8347_v16, %v8238_v43  ;;  %v11927_v21 = vor.u32 %v12465_v26, %v11926_v29  ;;  %v11855_v7 = vor.u32 %v12511_v52, %v11854_v39  ;;  %v17789_v43 = vrot.slane %v16221_v3, 1  ;;  %vm17804_vm13 = vmmov %vm17732_vm0 }
 0x9c2   : > { %8681 = vmatmul.bf16.gmra.mxu2 %v16539_v8  ;;  %8710 = vmatmul.bf16.gmra.mxu3 %v16541_v4  ;;  %v8364_v32 = vadd.f32 %v8348_v9, %v8267_v37  ;;  %v8366_v12 = vadd.f32 %v8350_v11, %v8269_v42  ;;  %v11795_v38 = vor.u32 %v12494_v13, %v11792_v50  ;;  %v17795_v42 = vmax.f32 %v16281_v36, 0.0  ;;  %v12038_v13 = vld [vmem:[#allocation13 + $0x1f0] sm:$0xf]  ;;  %v12493_v50 = vld [vmem:[#allocation13 + $0x1f4] sm:$0xf0] }
 0x9c3   : > { %9308 = vmatpush.bf16.msra.mxu0 %v11935_v30  ;;  %8982 = vmatpush.bf16.msrb.mxu1 %v11863_v5  ;;  %v7400_v35 = vsel %vm17790_vm14, %v17789_v43, 0.0  ;;  %v8385_v51 = vadd.f32 %v16333_v25, %v8363_v44  ;;  %v8387_v55 = vadd.f32 %v16333_v25, %v8365_v48  ;;  %v11859_v30 = vor.u32 %v12510_v46, %v11856_v2  ;;  %v12476_v44 = vld [vmem:[#allocation13 + $0x174] sm:$0xf]  ;;  %v12030_v46 = vld [vmem:[#allocation13 + $0x1e0] sm:$0xf]  ;;  %vm17807_vm14 = vmmov %vm17785_vm2 }
 0x9c4   : > { %9011 = vmatpush.bf16.msrb.mxu2 %v11803_v18  ;;  %v7534_v60 = vadd.f32 %v16283_v27, %v7400_v35  ;;  %v8386_v40 = vadd.f32 %v16335_v33, %v8364_v32  ;;  %v8388_v5 = vadd.f32 %v16335_v33, %v8366_v12  ;;  %9040 = vmatpush.bf16.msrb.mxu3 %v11867_v54  ;;  %v17791_v25 = vrot.slane %v16238_v10, 2  ;;  %v11976_v54 = vld [vmem:[#allocation13 + $0x178] sm:$0xf0]  ;;  %v12492_v32 = vld [vmem:[#allocation13 + $0x1f4] sm:$0xf] }
 0x9c5   : > { %v11919_v59 = vor.u32 %v12463_v53, %v11918_v24  ;;  %v8401_v16 = vmax.f32 %v8385_v51, 0.0  ;;  %v8403_v23 = vmax.f32 %v8387_v55, 0.0  ;;  %v12039_v48 = vor.u32 %v12493_v50, %v12038_v13  ;;  %v12491_v2 = vld [vmem:[#allocation13 + $0x1e4] sm:$0xf0]  ;;  %v11968_v24 = vld [vmem:[#allocation13 + $0x168] sm:$0xf0] }
 0x9c6   : > { %v7573_v3 = vadd.f32 %v16285_v14, %v7534_v60  ;;  %v8402_v61 = vmax.f32 %v8386_v40, 0.0  ;;  %v8404_v27 = vmax.f32 %v8388_v5, 0.0  ;;  %v7622_v45 = vsel %vm17792_vm1, %v17791_v25, 0.0  ;;  %v12763_v14 = vld [vmem:[%s17701_s23] ss:$0 sm:$0xff]  ;;  %vm17808_vm1 = vmmov %vm17785_vm2 }
 0x9c7   : > { %9309 = vmatpush.bf16.msra.mxu0 %v11927_v21  ;;  %8983 = vmatpush.bf16.msrb.mxu1 %v11855_v7  ;;  %v16564_v11 = vpack.c.bf16 %v8403_v23, %v8401_v16  ;;  %v11979_v12 = vor.u32 %v12476_v44, %v11976_v54  ;;  %v12474_v7 = vld [vmem:[#allocation13 + $0x164] sm:$0xf]  ;;  %v12032_v43 = vld [vmem:[#allocation13 + $0x1e8] sm:$0xf0]  ;;  %v12022_v35 = vld [vmem:[#allocation13 + $0x1d0] sm:$0xf] }
 0x9c8   : > { %9012 = vmatpush.bf16.msrb.mxu2 %v11795_v38  ;;  %9041 = vmatpush.bf16.msrb.mxu3 %v11859_v30  ;;  %v7634_v9 = vadd.f32 %v7622_v45, %v7573_v3  ;;  %v16566_v33 = vpack.c.bf16 %v8404_v27, %v8402_v61  ;;  %v12031_v38 = vor.u32 %v12491_v2, %v12030_v46  ;;  %v12490_v53 = vld [vmem:[#allocation13 + $0x1e4] sm:$0xf]  ;;  %v12489_v60 = vld [vmem:[#allocation13 + $0x1d4] sm:$0xf0]  ;;  %v12472_v55 = vld [vmem:[#allocation13 + $0x154] sm:$0xf] }
 0x9c9   : > { %v11971_v36 = vor.u32 %v12474_v7, %v11968_v24  ;;  %v12035_v51 = vor.u32 %v12490_v53, %v12032_v43  ;;  %v11960_v30 = vld [vmem:[#allocation13 + $0x158] sm:$0xf0]  ;;  %v12488_v40 = vld [vmem:[#allocation13 + $0x1d4] sm:$0xf]  ;;  %v12014_v16 = vld [vmem:[#allocation13 + $0x1c0] sm:$0xf] }
 0x9ca   : > { %v7650_v18 = vadd.f32 %v12763_v14, %v7634_v9  ;;  %v12024_v5 = vld [vmem:[#allocation13 + $0x1d8] sm:$0xf0]  ;;  %v11963_v3 = vor.u32 %v12472_v55, %v11960_v30  ;;  %v12487_v23 = vld [vmem:[#allocation13 + $0x1c4] sm:$0xf0]  ;;  %v12470_v61 = vld [vmem:[#allocation13 + $0x144] sm:$0xf] }
 0x9cb   : > { %9310 = vmatpush.bf16.msra.mxu0 %v11919_v59  ;;  %9332 = vmatpush.bf16.msra.mxu1 %v12039_v48  ;;  %v12023_v59 = vor.u32 %v12489_v60, %v12022_v35  ;;  %v11952_v27 = vld [vmem:[#allocation13 + $0x148] sm:$0xf0]  ;;  %v12486_v25 = vld [vmem:[#allocation13 + $0x1c4] sm:$0xf]  ;;  %v12485_v14 = vld [vmem:[#allocation13 + $0x1b4] sm:$0xf0] }
 0x9cc   : > { %v7662_v10 = vmax.f32 %v7650_v18, 0.0  ;;  %9361 = vmatpush.bf16.msra.mxu2 %v11979_v12  ;;  %v12016_v45 = vld [vmem:[#allocation13 + $0x1c8] sm:$0xf0]  ;;  %v11955_v9 = vor.u32 %v12470_v61, %v11952_v27  ;;  %v12482_v50 = vld [vmem:[#allocation13 + $0x1a4] sm:$0xf] }
 0x9cd   : > { %v11936_v13 = vld [vmem:[#allocation13 + $0x128] sm:$0xf0]  ;;  %v11990_v54 = vld [vmem:[#allocation13 + $0x190] sm:$0xf]  ;;  %v12464_v12 = vld [vmem:[#allocation13 + $0x114] sm:$0xf] }
 0x9ce   : > { %v7696_v29 = vrot.slane %v7662_v10, 1  ;;  %v12480_v46 = vld [vmem:[#allocation13 + $0x194] sm:$0xf]  ;;  %v11992_v2 = vld [vmem:[#allocation13 + $0x198] sm:$0xf0] }
 0x9cf   : > { %9333 = vmatpush.bf16.msra.mxu1 %v12031_v38  ;;  %v11982_v24 = vld [vmem:[#allocation13 + $0x180] sm:$0xf]  ;;  %v12479_v53 = vld [vmem:[#allocation13 + $0x184] sm:$0xf0]  ;;  %v12462_v43 = vld [vmem:[#allocation13 + $0x104] sm:$0xf] }
 0x9d0   : > { %v7710_v26 = vsel %vm17793_vm10, %v7696_v29, 0.0  ;;  %v7697_v39 = vsel %vm17794_vm7, %v16296_v6, %v7696_v29  ;;  %v12040_v6 = vld [vmem:[#allocation13 + $0x1f8] sm:$0xf0]  ;;  %9362 = vmatpush.bf16.msra.mxu2 %v11971_v36  ;;  %v12484_v29 = vld [vmem:[#allocation13 + $0x1b4] sm:$0xf]  ;;  %v11983_v36 = vor.u32 %v12479_v53, %v11982_v24  ;;  %vm17809_vm10 = vmmov %vm17808_vm1 }
 0x9d1   : > { %8628 = vmatmul.bf16.gmra.mxu0 %v16564_v11  ;;  %8657 = vmatmul.bf16.gmra.mxu1 %v16566_v33  ;;  %v7722_v37 = vmax.f32 %v7662_v10, %v7710_v26  ;;  %v7721_v52 = vmax.f32 %v17795_v42, %v7697_v39  ;;  %v12043_v21 = vor.u32 %v12492_v32, %v12040_v6  ;;  %v11944_v10 = vld [vmem:[#allocation13 + $0x138] sm:$0xf0]  ;;  %v12483_v42 = vld [vmem:[#allocation13 + $0x1a4] sm:$0xf0]  ;;  %v12481_v6 = vld [vmem:[#allocation13 + $0x194] sm:$0xf0] }
 0x9d2   : > { %8686 = vmatmul.bf16.gmra.mxu2 %v16564_v11  ;;  %8715 = vmatmul.bf16.gmra.mxu3 %v16566_v33  ;;  %v17796_v32 = vld [vmem:[#allocation56_spill] sm:$0xff]  ;;  %v11991_v7 = vor.u32 %v12481_v6, %v11990_v54  ;;  %v12478_v60 = vld [vmem:[#allocation13 + $0x184] sm:$0xf]  ;;  %vm17810_vm7 = vmmov %vm17808_vm1 }
 0x9d3   : > { %9390 = vmatpush.bf16.msra.mxu3 %v12043_v21  ;;  %9334 = vmatpush.bf16.msra.mxu1 %v12023_v59  ;;  %v11928_v21 = vld [vmem:[#allocation13 + $0x118] sm:$0xf0]  ;;  %v11920_v35 = vld [vmem:[#allocation13 + $0x108] sm:$0xf0] }
 0x9d4   : > { %9363 = vmatpush.bf16.msra.mxu2 %v11963_v3  ;;  %v11931_v38 = vor.u32 %v12464_v12, %v11928_v21  ;;  %v11923_v55 = vor.u32 %v12462_v43, %v11920_v35 }
 0x9d7   : > { %9391 = vmatpush.bf16.msra.mxu3 %v12035_v51  ;;  %v11984_v51 = vld [vmem:[#allocation13 + $0x188] sm:$0xf0] }
 0x9d8   : > { %9364 = vmatpush.bf16.msra.mxu2 %v11955_v9  ;;  %v11987_v30 = vor.u32 %v12478_v60, %v11984_v51 }
 0x9e1   : > { %8955 = vmatmul.bf16.vlgmr.msrb.gmra.mxu0 %v16368_v41  ;;  %8984 = vmatmul.bf16.vlgmr.msrb.gmra.mxu1 %v16370_v15 }
 0x9e2   : > { %9013 = vmatmul.bf16.vlgmr.msrb.gmra.mxu2 %v16368_v41  ;;  %9042 = vmatmul.bf16.vlgmr.msrb.gmra.mxu3 %v16370_v15 }
 0x9e3   : > { %9566 = vmatpush.msrb.mxu0 %v7722_v37  ;;  %v11998_v37 = vld [vmem:[#allocation13 + $0x1a0] sm:$0xf] }
 0x9e4   : > { %v11999_v44 = vor.u32 %v12483_v42, %v11998_v37 }
 0x9e5   : > { %9567 = vmatpush.msrb.mxu0 %v7721_v52  ;;  %v12466_v52 = vld [vmem:[#allocation13 + $0x124] sm:$0xf] }
 0x9e6   : > { %v11939_v48 = vor.u32 %v12466_v52, %v11936_v13 }
 0x9e7   : > { %9568 = vmatpush.msrb.mxu0 %v16302_v28  ;;  %v12027_v28 = vor.u32 %v12488_v40, %v12024_v5 }
 0x9e9   : > { %9569 = vmatpush.msrb.mxu0 %v16292_v1  ;;  %9392 = vmatpush.bf16.msra.mxu3 %v12027_v28  ;;  %v12015_v1 = vor.u32 %v12487_v23, %v12014_v16 }
 0x9eb   : > { %9570 = vmatpush.msrb.mxu0 %v16253_v17  ;;  %v12019_v17 = vor.u32 %v12486_v25, %v12016_v45  ;;  %9335 = vmatpush.bf16.msra.mxu1 %v12015_v1 }
 0x9ed   : > { %9571 = vmatpush.msrb.mxu0 %v16257_v62  ;;  %v12006_v62 = vld [vmem:[#allocation13 + $0x1b0] sm:$0xf]  ;;  %9393 = vmatpush.bf16.msra.mxu3 %v12019_v17 }
 0x9ee   : > { %v12007_v18 = vor.u32 %v12485_v14, %v12006_v62 }
 0x9ef   : > { %9572 = vmatpush.msrb.mxu0 %v16197_v19  ;;  %v12468_v19 = vld [vmem:[#allocation13 + $0x134] sm:$0xf] }
 0x9f0   : > { %v11947_v26 = vor.u32 %v12468_v19, %v11944_v10  ;;  %9336 = vmatpush.bf16.msra.mxu1 %v12007_v18 }
 0x9f1   : > { %9573 = vmatpush.msrb.mxu0 %v16172_v31  ;;  %8989 = vmatmul.bf16.gmra.mxu1 %v16460_v22  ;;  %v12008_v31 = vld [vmem:[#allocation13 + $0x1b8] sm:$0xf0] }
 0x9f2   : > { %8960 = vmatmul.bf16.gmra.mxu0 %v16458_v58  ;;  %9018 = vmatmul.bf16.gmra.mxu2 %v16458_v58  ;;  %v12011_v39 = vor.u32 %v12484_v29, %v12008_v31 }
 0x9f3   : > { %9047 = vmatmul.bf16.gmra.mxu3 %v16460_v22  ;;  %9574 = vmatpush.msrb.mxu0 %v16164_v47  ;;  %v12000_v47 = vld [vmem:[#allocation13 + $0x1a8] sm:$0xf0] }
 0x9f4   : > { %9365 = vmatpush.bf16.msra.mxu2 %v11947_v26  ;;  %9394 = vmatpush.bf16.msra.mxu3 %v12011_v39 }
 0x9f5   : > { %9575 = vmatpush.msrb.mxu0 %v16151_v34  ;;  %v12003_v34 = vor.u32 %v12482_v50, %v12000_v47  ;;  %9337 = vmatpush.bf16.msra.mxu1 %v11999_v44 }
 0x9f7   : > { %9576 = vmatpush.msrb.mxu0 %v16139_v56  ;;  %v11995_v56 = vor.u32 %v12480_v46, %v11992_v2 }
 0x9f8   : > { %9366 = vmatpush.bf16.msra.mxu2 %v11939_v48  ;;  %9395 = vmatpush.bf16.msra.mxu3 %v12003_v34 }
 0x9f9   : > { %9577 = vmatpush.msrb.mxu0 %v17796_v32  ;;  %9338 = vmatpush.bf16.msra.mxu1 %v11991_v7 }
 0x9fc   : > { %9367 = vmatpush.bf16.msra.mxu2 %v11931_v38  ;;  %9396 = vmatpush.bf16.msra.mxu3 %v11995_v56 }
 0x9fd   : > { %9339 = vmatpush.bf16.msra.mxu1 %v11983_v36 }
 0xa00   : > { %9368 = vmatpush.bf16.msra.mxu2 %v11923_v55  ;;  %9397 = vmatpush.bf16.msra.mxu3 %v11987_v30 }
 0xa01   : > { %8994 = vmatmul.bf16.gmra.mxu1 %v16541_v4 }
 0xa02   : > { %8965 = vmatmul.bf16.gmra.mxu0 %v16539_v8  ;;  %9023 = vmatmul.bf16.gmra.mxu2 %v16539_v8 }
 0xa03   : > { %9052 = vmatmul.bf16.gmra.mxu3 %v16541_v4 }
 0xa11   : > { %8999 = vmatmul.bf16.gmra.mxu1 %v16566_v33 }
 0xa12   : > { %8970 = vmatmul.bf16.gmra.mxu0 %v16564_v11  ;;  %9028 = vmatmul.bf16.gmra.mxu2 %v16564_v11 }
 0xa13   : > { %9057 = vmatmul.bf16.gmra.mxu3 %v16566_v33 }
 0xa1c   : > { %v16606_v40 = vpop.f32.mrf.mxu0  ;;  %v16608_v5 = vpop.f32.mrf.mxu1 }
 0xa21   : > { %9340 = vmatmul.bf16.vlgmr.msra.gmra.mxu1 %v16370_v15 }
 0xa22   : > { %9311 = vmatmul.bf16.vlgmr.msra.gmra.mxu0 %v16368_v41  ;;  %9369 = vmatmul.bf16.vlgmr.msra.gmra.mxu2 %v16368_v41 }
 0xa23   : > { %9398 = vmatmul.bf16.vlgmr.msra.gmra.mxu3 %v16370_v15  ;;  %v16614_v59 = vpop.f32.mrf.mxu2  ;;  %v16616_v3 = vpop.f32.mrf.mxu3 }
 0xa24   : > { %v16618_v28 = vpop.f32.mrf.mxu0  ;;  %v16620_v16 = vpop.f32.mrf.mxu1 }
 0xa2b   : > { %v16622_v23 = vpop.f32.mrf.mxu2  ;;  %v16624_v61 = vpop.f32.mrf.mxu3 }
 0xa2c   : > { %v16626_v27 = vpop.f32.mrf.mxu0  ;;  %v16628_v25 = vpop.f32.mrf.mxu1 }
 0xa31   : > { %9345 = vmatmul.bf16.gmra.mxu1 %v16460_v22 }
 0xa32   : > { %9316 = vmatmul.bf16.gmra.mxu0 %v16458_v58  ;;  %9374 = vmatmul.bf16.gmra.mxu2 %v16458_v58 }
 0xa33   : > { %9403 = vmatmul.bf16.gmra.mxu3 %v16460_v22  ;;  %v8677_v41 = vpop.f32.mrf.mxu2  ;;  %v8706_v15 = vpop.f32.mrf.mxu3 }
 0xa34   : > { %v16634_v45 = vadd.f32 %v8706_v15, %v8677_v41  ;;  %v8621_v1 = vpop.f32.mrf.mxu0  ;;  %v8650_v9 = vpop.f32.mrf.mxu1 }
 0xa35   : > { %v16636_v17 = vadd.f32 %v8650_v9, %v8621_v1 }
 0xa36   : > { %v9087_v31 = vrot.slane %v16634_v45, 7 }
 0xa37   : > { %v9089_v58 = vrot.slane %v16636_v17, 7 }
 0xa3b   : > { %v8679_v62 = vpop.f32.mrf.mxu2  ;;  %v8708_v14 = vpop.f32.mrf.mxu3 }
 0xa3c   : > { %v8709_v19 = vadd.f32 %v8708_v14, %v8679_v62 }
 0xa3e   : > { %v8624_v18 = vpop.f32.mrf.mxu0  ;;  %v8653_v10 = vpop.f32.mrf.mxu1  ;;  %v9091_v26 = vrot.slane %v8709_v19, 7 }
 0xa3f   : > { %v8654_v29 = vadd.f32 %v8653_v10, %v8624_v18 }
 0xa40   : > { %v16646_v39 = vsel %vm17732_vm0, %v9087_v31, %v9091_v26  ;;  %vm17811_vm0 = vmmov %vm17808_vm1 }
 0xa41   : > { %v9093_v22 = vrot.slane %v8654_v29, 7  ;;  %9350 = vmatmul.bf16.gmra.mxu1 %v16541_v4 }
 0xa42   : > { %9321 = vmatmul.bf16.gmra.mxu0 %v16539_v8  ;;  %9379 = vmatmul.bf16.gmra.mxu2 %v16539_v8 }
 0xa43   : > { %9408 = vmatmul.bf16.gmra.mxu3 %v16541_v4  ;;  %v16652_v37 = vsel %vm17797_vm4, %v9089_v58, %v9093_v22  ;;  %vm17812_vm4 = vmmov %vm17811_vm0 }
 0xa45   : > { %v8682_v42 = vpop.f32.mrf.mxu2  ;;  %v8711_v52 = vpop.f32.mrf.mxu3 }
 0xa46   : > { %v8712_v13 = vadd.f32 %v8711_v52, %v8682_v42  ;;  %v8626_v50 = vpop.f32.mrf.mxu0  ;;  %v8655_v47 = vpop.f32.mrf.mxu1 }
 0xa47   : > { %v8656_v44 = vadd.f32 %v8655_v47, %v8626_v50 }
 0xa48   : > { %v9095_v48 = vrot.slane %v8712_v13, 7 }
 0xa49   : > { %v9097_v8 = vrot.slane %v8656_v44, 7 }
 0xa4a   : > { %v16655_v54 = vsel %vm17798_vm6, %v9091_v26, %v9095_v48  ;;  %vm17813_vm6 = vmmov %vm17811_vm0 }
 0xa4b   : > { %v16658_v32 = vsel %vm17799_vm5, %v9093_v22, %v9097_v8  ;;  %vm17814_vm5 = vmmov %vm17811_vm0 }
 0xa4d   : > { %v8684_v4 = vpop.f32.mrf.mxu2  ;;  %v8713_v34 = vpop.f32.mrf.mxu3 }
 0xa4e   : > { %v8714_v6 = vadd.f32 %v8713_v34, %v8684_v4  ;;  %v8629_v12 = vpop.f32.mrf.mxu0  ;;  %v8658_v21 = vpop.f32.mrf.mxu1 }
 0xa4f   : > { %v8659_v46 = vadd.f32 %v8658_v21, %v8629_v12 }
 0xa50   : > { %v9099_v2 = vrot.slane %v8714_v6, 7 }
 0xa51   : > { %v9101_v7 = vrot.slane %v8659_v46, 7  ;;  %9355 = vmatmul.bf16.gmra.mxu1 %v16566_v33 }
 0xa52   : > { %9326 = vmatmul.bf16.gmra.mxu0 %v16564_v11  ;;  %9384 = vmatmul.bf16.gmra.mxu2 %v16564_v11  ;;  %v16664_v38 = vsel %vm17800_vm8, %v9095_v48, %v9099_v2 }
 0xa53   : > { %9413 = vmatmul.bf16.gmra.mxu3 %v16566_v33  ;;  %v16668_v56 = vsel %vm17801_vm15, %v9097_v8, %v9101_v7  ;;  %vm17815_vm15 = vmmov %vm17811_vm0 }
 0xa55   : > { %v8687_v24 = vpop.f32.mrf.mxu2  ;;  %v8716_v53 = vpop.f32.mrf.mxu3 }
 0xa56   : > { %v8717_v43 = vadd.f32 %v8716_v53, %v8687_v24  ;;  %v8631_v36 = vpop.f32.mrf.mxu0  ;;  %v8660_v35 = vpop.f32.mrf.mxu1 }
 0xa57   : > { %v8661_v60 = vadd.f32 %v8660_v35, %v8631_v36 }
 0xa58   : > { %v9103_v51 = vrot.slane %v8717_v43, 7 }
 0xa59   : > { %v9105_v55 = vrot.slane %v8661_v60, 7 }
 0xa5a   : > { %v16671_v30 = vsel %vm17802_vm11, %v9099_v2, %v9103_v51  ;;  %vm17817_vm11 = vmmov %vm17800_vm8 }
 0xa5b   : > { %v16674_v11 = vsel %vm17803_vm12, %v9101_v7, %v9105_v55  ;;  %vm17820_vm12 = vmmov %vm17800_vm8 }
 0xa5d   : > { %v8689_v41 = vpop.f32.mrf.mxu2  ;;  %v8718_v15 = vpop.f32.mrf.mxu3 }
 0xa5e   : > { %v8719_v33 = vadd.f32 %v8718_v15, %v8689_v41  ;;  %v8956_v1 = vpop.f32.mrf.mxu0  ;;  %v8985_v9 = vpop.f32.mrf.mxu1 }
 0xa5f   : > { %v8986_v62 = vadd.f32 %v8985_v9, %v8956_v1 }
 0xa60   : > { %v9107_v14 = vrot.slane %v8719_v33, 7 }
 0xa61   : > { %v9435_v52 = vrot.slane %v8986_v62, 1 }
 0xa62   : > { %v16677_v19 = vsel %vm17804_vm13, %v9103_v51, %v9107_v14  ;;  %vm17821_vm13 = vmmov %vm17800_vm8 }
 0xa65   : > { %v9014_v18 = vpop.f32.mrf.mxu2  ;;  %v9043_v10 = vpop.f32.mrf.mxu3 }
 0xa66   : > { %v9044_v29 = vadd.f32 %v9043_v10, %v9014_v18  ;;  %v8958_v26 = vpop.f32.mrf.mxu0  ;;  %v8987_v22 = vpop.f32.mrf.mxu1 }
 0xa67   : > { %v8988_v42 = vadd.f32 %v8987_v22, %v8958_v26 }
 0xa68   : > { %v9438_v34 = vrot.slane %v9044_v29, 1 }
 0xa69   : > { %v9436_v13 = vrot.slane %v8988_v42, 1 }
 0xa6b   : > { %v16680_v50 = vsel %vm17805_vm3, %v9435_v52, %v9436_v13  ;;  %vm17830_vm3 = vmmov %vm17811_vm0 }
 0xa6d   : > { %v9016_v47 = vpop.f32.mrf.mxu2  ;;  %v9045_v44 = vpop.f32.mrf.mxu3 }
 0xa6e   : > { %v9046_v48 = vadd.f32 %v9045_v44, %v9016_v47  ;;  %v8990_v8 = vpop.f32.mrf.mxu1 }
 0xa6f   : > { %v8961_v4 = vpop.f32.mrf.mxu0 }
 0xa70   : > { %v9439_v6 = vrot.slane %v9046_v48, 1  ;;  %v8991_v12 = vadd.f32 %v8990_v8, %v8961_v4 }
 0xa72   : > { %v9441_v21 = vrot.slane %v8991_v12, 1  ;;  %v16683_v46 = vsel %vm17785_vm2, %v9438_v34, %v9439_v6  ;;  %vm17832_vm2 = vmmov %vm17800_vm8 }
 0xa74   : > { %v16686_v2 = vsel %vm17806_vm9, %v9436_v13, %v9441_v21  ;;  %vm17834_vm9 = vmmov %vm17811_vm0 }
 0xa75   : > { %v9019_v7 = vpop.f32.mrf.mxu2 }
 0xa76   : > { %v9048_v24 = vpop.f32.mrf.mxu3  ;;  %v8992_v53 = vpop.f32.mrf.mxu1 }
 0xa77   : > { %v9049_v43 = vadd.f32 %v9048_v24, %v9019_v7  ;;  %v8963_v36 = vpop.f32.mrf.mxu0 }
 0xa78   : > { %v8993_v35 = vadd.f32 %v8992_v53, %v8963_v36 }
 0xa79   : > { %v9443_v60 = vrot.slane %v9049_v43, 1 }
 0xa7a   : > { %v9445_v51 = vrot.slane %v8993_v35, 1  ;;  %v16711_v35 = vadd.f32 %v16608_v5, %v16606_v40  ;;  %v16730_v40 = vadd.f32 %v16616_v3, %v16614_v59 }
 0xa7b   : > { %v16689_v55 = vsel %vm17807_vm14, %v9439_v6, %v9443_v60  ;;  %vm17836_vm14 = vmmov %vm17832_vm2 }
 0xa7c   : > { %v16692_v41 = vsel %vm17808_vm1, %v9441_v21, %v9445_v51  ;;  %vm17837_vm1 = vmmov %vm17811_vm0 }
 0xa7d   : > { %v9021_v15 = vpop.f32.mrf.mxu2 }
 0xa7e   : > { %v9050_v33 = vpop.f32.mrf.mxu3  ;;  %v8995_v1 = vpop.f32.mrf.mxu1 }
 0xa7f   : > { %v9051_v9 = vadd.f32 %v9050_v33, %v9021_v15  ;;  %v8966_v62 = vpop.f32.mrf.mxu0 }
 0xa80   : > { %v8996_v14 = vadd.f32 %v8995_v1, %v8966_v62 }
 0xa81   : > { %v9447_v18 = vrot.slane %v9051_v9, 1  ;;  %v17197_v9 = vrot.slane %v16711_v35, 7 }
 0xa82   : > { %v9449_v10 = vrot.slane %v8996_v14, 1 }
 0xa83   : > { %v16695_v29 = vsel %vm17809_vm10, %v9443_v60, %v9447_v18 }
 0xa84   : > { %v16698_v26 = vsel %vm17810_vm7, %v9445_v51, %v9449_v10 }
 0xa85   : > { %v9024_v22 = vpop.f32.mrf.mxu2 }
 0xa86   : > { %v9053_v42 = vpop.f32.mrf.mxu3  ;;  %v8997_v52 = vpop.f32.mrf.mxu1 }
 0xa87   : > { %v9054_v13 = vadd.f32 %v9053_v42, %v9024_v22  ;;  %v8968_v47 = vpop.f32.mrf.mxu0  ;;  %v17196_v22 = vrot.slane %v16730_v40, 7 }
 0xa88   : > { %v8998_v44 = vadd.f32 %v8997_v52, %v8968_v47 }
 0xa89   : > { %v9451_v48 = vrot.slane %v9054_v13, 1  ;;  %v17816_v13 = vld [vmem:[#allocation51_spill] sm:$0xff] }
 0xa8a   : > { %v9453_v8 = vrot.slane %v8998_v44, 1 }
 0xa8b   : > { %v16701_v4 = vsel %vm17811_vm0, %v9447_v18, %v9451_v48  ;;  %v9125_v18 = vsel %vm17800_vm8, 0.0, %v17197_v9  ;;  %v17824_v9 = vld [vmem:[#allocation61_spill] sm:$0xff]  ;;  %vm17844_vm0 = vmmov %vm17832_vm2 }
 0xa8c   : > { %v16704_v34 = vsel %vm17812_vm4, %v9449_v10, %v9453_v8  ;;  %v9127_v59 = vmul.f32 %v17816_v13, %v9125_v18  ;;  %vm17848_vm8 = vmmov %vm17837_vm1 }
 0xa8d   : > { %v9026_v6 = vpop.f32.mrf.mxu2 }
 0xa8e   : > { %v9055_v12 = vpop.f32.mrf.mxu3  ;;  %v9000_v21 = vpop.f32.mrf.mxu1 }
 0xa8f   : > { %v9056_v7 = vadd.f32 %v9055_v12, %v9026_v6  ;;  %v8971_v24 = vpop.f32.mrf.mxu0  ;;  %v17818_v6 = vld [vmem:[#allocation62_spill] sm:$0xff] }
 0xa90   : > { %v16706_v53 = vadd.f32 %v9000_v21, %v8971_v24  ;;  %v9483_v12 = vmul.f32 %v17818_v6, %v16680_v50  ;;  %v16765_v50 = vadd.f32 %v16624_v61, %v16622_v23 }
 0xa91   : > { %v9455_v43 = vrot.slane %v9056_v7, 1 }
 0xa92   : > { %v17200_v36 = vrot.slane %v16706_v53, 1 }
 0xa93   : > { %v16714_v60 = vsel %vm17813_vm6, %v9451_v48, %v9455_v43  ;;  %v9126_v48 = vsel %vm17817_vm11, 0.0, %v17196_v22 }
 0xa94   : > { %v16719_v51 = vsel %vm17814_vm5, %v9453_v8, %v17200_v36  ;;  %v9128_v7 = vmul.f32 %v17816_v13, %v9126_v48  ;;  %v16769_v13 = vadd.f32 %v16628_v25, %v16626_v27  ;;  %v17822_v27 = vld [vmem:[#allocation52_spill] sm:$0xff]  ;;  %v17825_v36 = vld [vmem:[#allocation58_spill] sm:$0xff] }
 0xa95   : > { %v9029_v15 = vpop.f32.mrf.mxu2 }
 0xa96   : > { %v9058_v33 = vpop.f32.mrf.mxu3  ;;  %v16721_v1 = vpop.f32.mrf.mxu1 }
 0xa97   : > { %v16724_v62 = vadd.f32 %v9058_v33, %v9029_v15  ;;  %v16726_v14 = vpop.f32.mrf.mxu0 }
 0xa99   : > { %v17198_v5 = vrot.slane %v16724_v62, 1 }
 0xa9b   : > { %v16739_v10 = vsel %vm17815_vm15, %v9455_v43, %v17198_v5  ;;  %v9488_v5 = vmul.f32 %v17824_v9, %v16695_v29  ;;  %vm17849_vm15 = vcmask 785408  }
 0xa9d   : > { %v16742_v42 = vpop.f32.mrf.mxu2 }
 0xa9e   : > { %v16744_v52 = vpop.f32.mrf.mxu3  ;;  %v9341_v3 = vpop.f32.mrf.mxu1 }
 0xa9f   : > { %v9312_v47 = vpop.f32.mrf.mxu0 }
 0xaa0   : > { %v9313_v44 = vadd.f32 %v9312_v47, %v9127_v59  ;;  %v9484_v47 = vmul.f32 %v17818_v6, %v16683_v46  ;;  %v17201_v46 = vrot.slane %v16769_v13, 7 }
 0xaa2   : > { %v9342_v8 = vadd.f32 %v9341_v3, %v9313_v44  ;;  %v9090_v61 = vsel %vm17821_vm13, %v17201_v46, %v9089_v58  ;;  %v9489_v58 = vmul.f32 %v17825_v36, %v16698_v26 }
 0xaa4   : > { %v16752_v21 = vadd.f32 %v9483_v12, %v9342_v8  ;;  %v17199_v8 = vrot.slane %v16765_v50, 7 }
 0xaa5   : > { %v9370_v24 = vpop.f32.mrf.mxu2 }
 0xaa6   : > { %v9371_v43 = vadd.f32 %v9370_v24, %v9128_v7  ;;  %v9399_v15 = vpop.f32.mrf.mxu3  ;;  %v16755_v33 = vpop.f32.mrf.mxu1  ;;  %v9088_v23 = vsel %vm17820_vm12, %v17199_v8, %v9087_v31 }
 0xaa7   : > { %v16757_v18 = vpop.f32.mrf.mxu0  ;;  %v9132_v25 = vmul.f32 %v17822_v27, %v9088_v23 }
 0xaa8   : > { %v9400_v59 = vadd.f32 %v9399_v15, %v9371_v43  ;;  %v17823_v43 = vld [vmem:[#allocation59_spill] sm:$0xff] }
 0xaa9   : > { %v9133_v15 = vmul.f32 %v17823_v43, %v9090_v61  ;;  %v9134_v23 = vmul.f32 %v17823_v43, %v16646_v39 }
 0xaaa   : > { %v16761_v22 = vadd.f32 %v9484_v47, %v9400_v59 }
 0xaac   : > { %17819 = vst [vmem:[#allocation68_spill] sm:$0xff] %v16761_v22 }
 0xaad   : > { %v16771_v3 = vpop.f32.mrf.mxu2 }
 0xaae   : > { %v16773_v44 = vpop.f32.mrf.mxu3  ;;  %v16775_v48 = vpop.f32.mrf.mxu1 }
 0xaaf   : > { %v16778_v12 = vpop.f32.mrf.mxu0 }
 0xab5   : > { %v9375_v6 = vpop.f32.mrf.mxu2 }
 0xab6   : > { %v9376_v7 = vadd.f32 %v9375_v6, %v9132_v25  ;;  %v9404_v24 = vpop.f32.mrf.mxu3  ;;  %v9348_v59 = vpop.f32.mrf.mxu1 }
 0xab7   : > { %v9319_v47 = vpop.f32.mrf.mxu0 }
 0xab8   : > { %v9405_v45 = vadd.f32 %v9404_v24, %v9376_v7  ;;  %v9320_v31 = vadd.f32 %v9319_v47, %v9133_v15  ;;  %v17826_v7 = vld [vmem:[#allocation55_spill] sm:$0xff] }
 0xab9   : > { %v9135_v24 = vmul.f32 %v17826_v7, %v16652_v37  ;;  %v9136_v43 = vmul.f32 %v17826_v7, %v16655_v54  ;;  %v9493_v54 = vmul.f32 %v17780_v49, %v16719_v51 }
 0xaba   : > { %v16795_v8 = vadd.f32 %v9488_v5, %v9405_v45  ;;  %v9349_v17 = vadd.f32 %v9348_v59, %v9320_v31  ;;  %v9490_v5 = vmul.f32 %v17825_v36, %v16701_v4  ;;  %v17827_v45 = vld [vmem:[#allocation65_spill] sm:$0xff]  ;;  %v9003_v4 = vadd.f32 %v16721_v1, %v16726_v14 }
 0xabb   : > { %v9491_v31 = vmul.f32 %v17827_v45, %v16704_v34  ;;  %v9492_v34 = vmul.f32 %v17827_v45, %v16714_v60  ;;  %v9061_v1 = vadd.f32 %v16744_v52, %v16742_v42  ;;  %v8646_v60 = vadd.f32 %v16620_v16, %v16618_v28 }
 0xabc   : > { %v16799_v46 = vadd.f32 %v9489_v58, %v9349_v17  ;;  %v9461_v7 = vrot.slane %v9003_v4, 1  ;;  %v17833_v4 = vrot.slane %v16724_v62, 1 }
 0xabd   : > { %v9377_v25 = vpop.f32.mrf.mxu2  ;;  %v9463_v52 = vrot.slane %v9061_v1, 1 }
 0xabe   : > { %v9378_v61 = vadd.f32 %v9377_v25, %v9134_v23  ;;  %v9406_v6 = vpop.f32.mrf.mxu3  ;;  %v9351_v22 = vpop.f32.mrf.mxu1  ;;  %v17828_v23 = vld [vmem:[#allocation63_spill] sm:$0xff] }
 0xabf   : > { %v9322_v29 = vpop.f32.mrf.mxu0  ;;  %v9137_v25 = vmul.f32 %v17828_v23, %v16658_v32  ;;  %v9138_v32 = vmul.f32 %v17828_v23, %v16664_v38  ;;  %v9494_v38 = vmul.f32 %v17780_v49, %v16739_v10  ;;  %v9464_v49 = vsel %vm17834_vm9, %v17833_v4, %v9463_v52 }
 0xac0   : > { %v9407_v15 = vadd.f32 %v9406_v6, %v9378_v61  ;;  %v9323_v59 = vadd.f32 %v9322_v29, %v9135_v24  ;;  %v17835_v10 = vrot.slane %v16711_v35, 7  ;;  %v17840_v35 = vld [vmem:[#allocation57_spill] sm:$0xff] }
 0xac1   : > { %vm9554_vm7 = vcmp.lt.f32.partialorder %v17840_v35, 11.5 }
 0xac2   : > { %v16807_v47 = vadd.f32 %v9490_v5, %v9407_v15  ;;  %v9352_v26 = vadd.f32 %v9351_v22, %v9323_v59 }
 0xac4   : > { %v16811_v39 = vadd.f32 %v9491_v31, %v9352_v26  ;;  %v9139_v26 = vmul.f32 %v17766_v20, %v16668_v56  ;;  %v17829_v31 = vrot.slane %v16706_v53, 1  ;;  %v17831_v56 = vrot.slane %v16769_v13, 7 }
 0xac5   : > { %v9380_v17 = vpop.f32.mrf.mxu2  ;;  %v9140_v53 = vmul.f32 %v17766_v20, %v16671_v30  ;;  %v9141_v13 = vmul.f32 %v17781_v63, %v16674_v11  ;;  %v17838_v20 = vld [vmem:[#allocation31_spill] sm:$0xff]  ;;  %v17839_v30 = vld [vmem:[#allocation69_spill] sm:$0xff]  ;;  %v17843_v11 = vrot.slane %v16730_v40, 7 }
 0xac6   : > { %v9381_v37 = vadd.f32 %v9380_v17, %v9136_v43  ;;  %v9409_v58 = vpop.f32.mrf.mxu3  ;;  %v9353_v61 = vpop.f32.mrf.mxu1  ;;  %v9462_v43 = vsel %vm17830_vm3, %v17829_v31, %v9461_v7  ;;  %vm9553_vm10 = vcmp.eq.f32.partialorder %v17839_v30, %v17838_v20 }
 0xac7   : > { %v9324_v36 = vpop.f32.mrf.mxu0  ;;  %v9495_v16 = vmul.f32 %v17787_v57, %v9462_v43  ;;  %vm9555_vm6 = vmand %vm9553_vm10, %vm9554_vm7  ;;  %v17847_v43 = vmov 0.0   ;;  %vm17857_vm7 = vcmask 523264  }
 0xac8   : > { %v9410_v22 = vadd.f32 %v9409_v58, %v9381_v37  ;;  %v9325_v6 = vadd.f32 %v9324_v36, %v9137_v25  ;;  %v9081_v37 = vrot.slane %v8646_v60, 7 }
 0xaca   : > { %v16821_v24 = vadd.f32 %v9492_v34, %v9410_v22  ;;  %v9354_v29 = vadd.f32 %v9353_v61, %v9325_v6  ;;  %v9086_v23 = vsel %vm17832_vm2, %v9081_v37, %v17831_v56  ;;  %v9082_v36 = vsel %vm17836_vm14, %v17835_v10, %v9081_v37 }
 0xacb   : > { %v9481_v6 = vsel %vm17837_vm1, %v9461_v7, 0.0  ;;  %v9487_v10 = vmul.f32 %v17824_v9, %v16692_v41 }
 0xacc   : > { %v16825_v15 = vadd.f32 %v9493_v54, %v9354_v29  ;;  %v9131_v29 = vmul.f32 %v17822_v27, %v9086_v23  ;;  %v9515_v27 = vld [vmem:[%s17845_s10] sm:$0x3]  ;;  %s13050_s10 = scalar_lea.hbm %s13049_s4, 4 }
 0xacd   : > { %v9382_v14 = vpop.f32.mrf.mxu2  ;;  %p13051_p1 = scmp.ne.s32.totalorder %s13049_s4, %s13050_s10 }
 0xace   : > { %v9383_v5 = vadd.f32 %v9382_v14, %v9138_v32  ;;  %v9411_v59 = vpop.f32.mrf.mxu3  ;;  %v9356_v51 = vpop.f32.mrf.mxu1  ;;  %v9496_v32 = vmul.f32 %v17787_v57, %v9464_v49  ;;  %v17841_v14 = vld [vmem:[#allocation26_spill] sm:$0xff] }
 0xacf   : > { %v9327_v45 = vpop.f32.mrf.mxu0  ;;  %v9129_v60 = vmul.f32 %v17841_v14, %v9082_v36  ;;  %p13052_p5 = pnand %p13051_p1, %p13374_p4 }
 0xad0   : > { %v9412_v17 = vadd.f32 %v9411_v59, %v9383_v5  ;;  %v9328_v42 = vadd.f32 %v9327_v45, %v9139_v26  ;;  %v17842_v5 = vrot.slane %v16765_v50, 7  ;;  %v17846_v26 = vld [vmem:[#allocation29_spill] sm:$0xff]  ;;  %v9497_v45 = vmul.f32 %v17788_v0, %v9481_v6 }
 0xad1   : > { %vm9556_vm4 = vcmp.gt.f32.partialorder %v17846_v26, -0.5  ;;  %v16873_v57 = vadd.f32 -32.0, %v17846_v26  ;;  %v9315_v40 = vadd.f32 %v16757_v18, %v9129_v60  ;;  %p13053_p12 = pneg %p13052_p5 }
 0xad2   : > { %v16840_v58 = vadd.f32 %v9494_v38, %v9412_v17  ;;  %v9357_v28 = vadd.f32 %v9356_v51, %v9328_v42  ;;  %v9084_v7 = vsel %vm17844_vm0, %v17843_v11, %v17842_v5  ;;  %v9318_v51 = vadd.f32 %v16778_v12, %v9131_v29  ;;  %vm9557_vm5 = vmand %vm9555_vm6, %vm9556_vm4 }
 0xad3   : > { %v9558_v17 = vsel %vm9557_vm5, 0.083333336, %v17847_v43  ;;  %v9633_v38 = vmul.f32 0.125, %v16873_v57  ;;  %v9482_v42 = vsel %vm17848_vm8, %v9463_v52, 0.0  ;;  %v9130_v12 = vmul.f32 %v17841_v14, %v9084_v7  ;;  %vm17858_vm0 = vmmov %vm17857_vm7 }
 0xad4   : > { %v9511_v25 = vadd.f32 %v9495_v16, %v9357_v28  ;;  %v9517_v28 = vperm.slane %v9515_v27, 0  ;;  %v9142_v16 = vmul.f32 %v17781_v63, %v16677_v19  ;;  %12044 = vmatmul.msk.f32.vlgmr.msrb.gmra.mxu0 %vm17849_vm15, %v9558_v17  ;;  %v9498_v49 = vmul.f32 %v17788_v0, %v9482_v42  ;;  %vm17860_vm6 = vmmov %vm17858_vm0 }
 0xad5   : > { %v9385_v61 = vpop.f32.mrf.mxu2  ;;  %v9634_v23 = vfloor.f32 %v9633_v38  ;;  %v9344_v52 = vadd.f32 %v16755_v33, %v9315_v40  ;;  %vm9640_vm9 = vcmp.gt.f32.partialorder %v16873_v57, -0.5  ;;  %v17856_v38 = vld [vmem:[#allocation68_spill] sm:$0xff] }
 0xad6   : > { %v9386_v22 = vadd.f32 %v9385_v61, %v9140_v53  ;;  %v9414_v34 = vpop.f32.mrf.mxu3  ;;  %v9358_v59 = vpop.f32.mrf.mxu1  ;;  %v9347_v53 = vadd.f32 %v16775_v48, %v9318_v51  ;;  %v9533_v4 = vadd.f32 %v9517_v28, %v9511_v25  ;;  %v17851_v48 = vld [vmem:[#allocation24_spill] sm:$0xff]  ;;  %v9373_v25 = vadd.f32 %v16771_v3, %v9130_v12  ;;  %v9700_v12 = vld [vmem:[#allocation16 + $0x70] sm:$0xff] }
 0xad7   : > { %v9329_v54 = vpop.f32.mrf.mxu0  ;;  %v9635_v63 = vmul.f32 8.0, %v9634_v23  ;;  %v9485_v29 = vmul.f32 %v17851_v48, %v16686_v2  ;;  %v9529_v9 = vadd.f32 %v9517_v28, %v16811_v39  ;;  %v9486_v14 = vmul.f32 %v17851_v48, %v16689_v55  ;;  %v9746_v48 = vld [vmem:[#allocation16 + $0x1e0] sm:$0xff] }
 0xad8   : > { %v9415_v62 = vadd.f32 %v9414_v34, %v9386_v22  ;;  %v9330_v1 = vadd.f32 %v9329_v54, %v9141_v13  ;;  %v9531_v34 = vadd.f32 %v9517_v28, %v16825_v15  ;;  %v17850_v13 = vld [vmem:[#allocation50_spill] sm:$0xff]  ;;  %v16897_v54 = vperm.slane %v9515_v27, 1 }
 0xad9   : > { %v9582_v6 = vmul.f32 8.0, %v17850_v13  ;;  %v9503_v0 = vadd.f32 %v9487_v10, %v9347_v53  ;;  %v9549_v41 = vmax.f32 %v9533_v4, 0.0  ;;  %v9501_v30 = vadd.f32 %v9485_v29, %v9344_v52  ;;  %v9717_v53 = vld [vmem:[#allocation16 + $0xf8] sm:$0xff]  ;;  %v9716_v4 = vld [vmem:[#allocation16 + $0xf0] sm:$0xff] }
 0xada   : > { %v9512_v50 = vadd.f32 %v9496_v32, %v9415_v62  ;;  %v9359_v31 = vadd.f32 %v9358_v59, %v9330_v1  ;;  %v9527_v62 = vadd.f32 %v9517_v28, %v16799_v46  ;;  %v9636_v15 = vsub.f32 %v16873_v57, %v9635_v63  ;;  %v9697_v52 = vld [vmem:[#allocation16 + $0x58] sm:$0xff]  ;;  %v9748_v10 = vld [vmem:[#allocation16 + $0x1f0] sm:$0xff]  ;;  %v9730_v63 = vld [vmem:[#allocation16 + $0x160] sm:$0xff] }
 0xadb   : > { %v9547_v2 = vmax.f32 %v9531_v34, 0.0  ;;  %v9583_v1 = vsub.f32 %v17846_v26, %v9582_v6  ;;  %v9402_v35 = vadd.f32 %v16773_v44, %v9373_v25  ;;  %v9545_v46 = vmax.f32 %v9529_v9, 0.0  ;;  %v9733_v26 = vld [vmem:[#allocation16 + $0x178] sm:$0xff]  ;;  %v9714_v34 = vld [vmem:[#allocation16 + $0xe0] sm:$0xff]  ;;  %v9695_v6 = vld [vmem:[#allocation16 + $0x48] sm:$0xff] }
 0xadc   : > { %v9513_v37 = vadd.f32 %v9497_v45, %v9359_v31  ;;  %v9534_v3 = vadd.f32 %v16897_v54, %v9512_v50  ;;  %v9525_v60 = vadd.f32 %v9517_v28, %v9503_v0  ;;  %v9532_v5 = vadd.f32 %v16897_v54, %v16840_v58  ;;  %v9713_v29 = vld [vmem:[#allocation16 + $0xd8] sm:$0xff]  ;;  %v9728_v25 = vld [vmem:[#allocation16 + $0x150] sm:$0xff] }
 0xadd   : > { %v9387_v56 = vpop.f32.mrf.mxu2  ;;  %v9543_v11 = vmax.f32 %v9527_v62, 0.0  ;;  %v9523_v7 = vadd.f32 %v9517_v28, %v9501_v30  ;;  %vm16911_vm11 = vcmp.eq.f32.partialorder %v9634_v23, %v17838_v20  ;;  %vm16915_vm12 = vcmp.lt.f32.partialorder %v9636_v15, 7.5  ;;  %v9699_v23 = vld [vmem:[#allocation16 + $0x68] sm:$0xff]  ;;  %v9745_v0 = vld [vmem:[#allocation16 + $0x1d8] sm:$0xff]  ;;  %v9744_v30 = vld [vmem:[#allocation16 + $0x1d0] sm:$0xff] }
 0xade   : > { %v9535_v18 = vadd.f32 %v9517_v28, %v9513_v37  ;;  %v9388_v61 = vadd.f32 %v9387_v56, %v9142_v16  ;;  %v9416_v36 = vpop.f32.mrf.mxu3  ;;  %v9550_v55 = vmax.f32 %v9534_v3, 0.0  ;;  %v9530_v27 = vadd.f32 %v16897_v54, %v16821_v24  ;;  %vm9639_vm2 = vmand %vm16911_vm11, %vm16915_vm12  ;;  %v9693_v9 = vld [vmem:[#allocation16 + $0x38] sm:$0xff]  ;;  %v9711_v62 = vld [vmem:[#allocation16 + $0xc8] sm:$0xff] }
 0xadf   : > { %vm9584_vm13 = vcmp.eq.f32.partialorder %v17850_v13, %v17838_v20  ;;  %vm9585_vm3 = vcmp.lt.f32.partialorder %v9583_v1, 7.5  ;;  %v9502_v58 = vadd.f32 %v9486_v14, %v9402_v35  ;;  %v9521_v45 = vadd.f32 %v9517_v28, %v16752_v21  ;;  %vm9641_vm1 = vmand %vm9639_vm2, %vm9640_vm9  ;;  %v9701_v28 = vld [vmem:[#allocation16 + $0x78] sm:$0xff]  ;;  %v9726_v15 = vld [vmem:[#allocation16 + $0x140] sm:$0xff] }
 0xae0   : > { %v9551_v19 = vmax.f32 %v9535_v18, 0.0  ;;  %v9417_v22 = vadd.f32 %v9416_v36, %v9388_v61  ;;  %v9541_v51 = vmax.f32 %v9525_v60, 0.0  ;;  %v9548_v50 = vmax.f32 %v9532_v5, 0.0  ;;  %vm9586_vm14 = vmand %vm9584_vm13, %vm9585_vm3  ;;  %v9698_v18 = vld [vmem:[#allocation16 + $0x60] sm:$0xff]  ;;  %v9749_v61 = vld [vmem:[#allocation16 + $0x1f8] sm:$0xff] }
 0xae1   : > { %v9528_v31 = vadd.f32 %v16897_v54, %v16807_v47  ;;  %v9539_v21 = vmax.f32 %v9523_v7, 0.0  ;;  %v9546_v24 = vmax.f32 %v9530_v27, 0.0  ;;  %v9526_v47 = vadd.f32 %v16897_v54, %v16795_v8  ;;  %vm9587_vm10 = vmand %vm9586_vm14, %vm9556_vm4  ;;  %v9715_v36 = vld [vmem:[#allocation16 + $0xe8] sm:$0xff]  ;;  %v9729_v13 = vld [vmem:[#allocation16 + $0x158] sm:$0xff] }
 0xae2   : > { %v9514_v33 = vadd.f32 %v9498_v49, %v9417_v22  ;;  %9600 = vmatpush.msrb.mxu1 %v9551_v19  ;;  %9654 = vmatpush.msrb.mxu3 %v9551_v19  ;;  %v9537_v40 = vmax.f32 %v9521_v45, 0.0  ;;  %v9524_v17 = vadd.f32 %v16897_v54, %v9502_v58  ;;  %v9522_v8 = vadd.f32 %v16897_v54, %v17856_v38  ;;  %vm17859_vm4 = vmmov %vm17858_vm0  ;;  %v9731_v49 = vld [vmem:[#allocation16 + $0x168] sm:$0xff]  ;;  %v9696_v19 = vld [vmem:[#allocation16 + $0x50] sm:$0xff] }
 0xae3   : > { %v9544_v57 = vmax.f32 %v9528_v31, 0.0  ;;  %v9542_v20 = vmax.f32 %v9526_v47, 0.0  ;;  %v9642_v42 = vsel %vm9641_vm1, 0.125, %v17847_v43  ;;  %v9588_v37 = vsel %vm9587_vm10, 0.125, %v17847_v43  ;;  %v9732_v43 = vld [vmem:[#allocation16 + $0x170] sm:$0xff]  ;;  %v9747_v22 = vld [vmem:[#allocation16 + $0x1e8] sm:$0xff] }
 0xae4   : > { %v9536_v32 = vadd.f32 %v16897_v54, %v9514_v33  ;;  %9601 = vmatpush.msrb.mxu1 %v9549_v41  ;;  %9655 = vmatpush.msrb.mxu3 %v9549_v41  ;;  %v9540_v16 = vmax.f32 %v9524_v17, 0.0  ;;  %v9538_v56 = vmax.f32 %v9522_v8, 0.0  ;;  %v9694_v54 = vld [vmem:[#allocation16 + $0x40] sm:$0xff]  ;;  %v9712_v33 = vld [vmem:[#allocation16 + $0xd0] sm:$0xff]  ;;  %v9727_v41 = vld [vmem:[#allocation16 + $0x148] sm:$0xff] }
 0xae5   : > { %v9710_v3 = vld [vmem:[#allocation16 + $0xc0] sm:$0xff]  ;;  %v9725_v1 = vld [vmem:[#allocation16 + $0x138] sm:$0xff]  ;;  %v9691_v35 = vld [vmem:[#allocation16 + $0x28] sm:$0xff] }
 0xae6   : > { %v9552_v39 = vmax.f32 %v9536_v32, 0.0  ;;  %9602 = vmatpush.msrb.mxu1 %v9547_v2  ;;  %9656 = vmatpush.msrb.mxu3 %v9547_v2  ;;  %v9692_v32 = vld [vmem:[#allocation16 + $0x30] sm:$0xff]  ;;  %v9743_v2 = vld [vmem:[#allocation16 + $0x1c8] sm:$0xff]  ;;  %v9742_v14 = vld [vmem:[#allocation16 + $0x1c0] sm:$0xff] }
 0xae7   : > { %v9690_v60 = vld [vmem:[#allocation16 + $0x20] sm:$0xff]  ;;  %v9741_v5 = vld [vmem:[#allocation16 + $0x1b8] sm:$0xff]  ;;  %v9723_v7 = vld [vmem:[#allocation16 + $0x128] sm:$0xff] }
 0xae8   : > { %9603 = vmatpush.msrb.mxu1 %v9545_v46  ;;  %9620 = vmatpush.msrb.mxu2 %v9552_v39  ;;  %v9689_v59 = vld [vmem:[#allocation16 + $0x18] sm:$0xff]  ;;  %v9740_v44 = vld [vmem:[#allocation16 + $0x1b0] sm:$0xff]  ;;  %v9722_v27 = vld [vmem:[#allocation16 + $0x120] sm:$0xff] }
 0xae9   : > { %9657 = vmatpush.msrb.mxu3 %v9545_v46  ;;  %9674 = vmatpush.msra.mxu0 %v9552_v39  ;;  %v9709_v39 = vld [vmem:[#allocation16 + $0xb8] sm:$0xff]  ;;  %v9724_v46 = vld [vmem:[#allocation16 + $0x130] sm:$0xff]  ;;  %v9706_v45 = vld [vmem:[#allocation16 + $0xa0] sm:$0xff] }
 0xaea   : > { %9604 = vmatpush.msrb.mxu1 %v9543_v11  ;;  %9621 = vmatpush.msrb.mxu2 %v9550_v55  ;;  %v9688_v58 = vld [vmem:[#allocation16 + $0x10] sm:$0xff]  ;;  %v9705_v31 = vld [vmem:[#allocation16 + $0x98] sm:$0xff]  ;;  %v9703_v17 = vld [vmem:[#allocation16 + $0x88] sm:$0xff] }
 0xaeb   : > { %9658 = vmatpush.msrb.mxu3 %v9543_v11  ;;  %9675 = vmatpush.msra.mxu0 %v9550_v55  ;;  %v9708_v11 = vld [vmem:[#allocation16 + $0xb0] sm:$0xff]  ;;  %v9707_v55 = vld [vmem:[#allocation16 + $0xa8] sm:$0xff]  ;;  %v9765_v47 = vld [vmem:[#allocation16 + $0x278] sm:$0xff] }
 0xaec   : > { %9605 = vmatpush.msrb.mxu1 %v9541_v51  ;;  %9622 = vmatpush.msrb.mxu2 %v9548_v50  ;;  %v9762_v38 = vld [vmem:[#allocation16 + $0x260] sm:$0xff]  ;;  %v9761_v8 = vld [vmem:[#allocation16 + $0x258] sm:$0xff] }
 0xaed   : > { %9659 = vmatpush.msrb.mxu3 %v9541_v51  ;;  %9676 = vmatpush.msra.mxu0 %v9548_v50  ;;  %v9721_v51 = vld [vmem:[#allocation16 + $0x118] sm:$0xff]  ;;  %v9687_v50 = vld [vmem:[#allocation16 + $0x8] sm:$0xff] }
 0xaee   : > { %9606 = vmatpush.msrb.mxu1 %v9539_v21  ;;  %9623 = vmatpush.msrb.mxu2 %v9546_v24 }
 0xaef   : > { %9660 = vmatpush.msrb.mxu3 %v9539_v21  ;;  %9677 = vmatpush.msra.mxu0 %v9546_v24  ;;  %v9720_v21 = vld [vmem:[#allocation16 + $0x110] sm:$0xff]  ;;  %v9686_v24 = vld [vmem:[#allocation16] sm:$0xff] }
 0xaf0   : > { %9607 = vmatpush.msrb.mxu1 %v9537_v40  ;;  %9624 = vmatpush.msrb.mxu2 %v9544_v57 }
 0xaf1   : > { %9661 = vmatpush.msrb.mxu3 %v9537_v40  ;;  %9678 = vmatpush.msra.mxu0 %v9544_v57  ;;  %v9704_v40 = vld [vmem:[#allocation16 + $0x90] sm:$0xff] }
 0xaf2   : > { %9625 = vmatpush.msrb.mxu2 %v9542_v20  ;;  %12045 = vmatmul.msk.f32.vlgmr.msrb.gmra.mxu1 %vm17857_vm7, %v9588_v37  ;;  %v9764_v57 = vld [vmem:[#allocation16 + $0x270] sm:$0xff] }
 0xaf3   : > { %9679 = vmatpush.msra.mxu0 %v9542_v20  ;;  %12048 = vmatmul.msk.f32.vlgmr.msrb.gmra.mxu3 %vm17858_vm0, %v9642_v42  ;;  %v9763_v20 = vld [vmem:[#allocation16 + $0x268] sm:$0xff] }
 0xaf4   : > { %9626 = vmatpush.msrb.mxu2 %v9540_v16  ;;  %9770 = vmatpush.msra.mxu1 %v9701_v28  ;;  %v9758_v28 = vld [vmem:[#allocation16 + $0x240] sm:$0xff] }
 0xaf5   : > { %9680 = vmatpush.msra.mxu0 %v9540_v16  ;;  %9810 = vmatpush.msra.mxu3 %v9733_v26  ;;  %v9757_v16 = vld [vmem:[#allocation16 + $0x238] sm:$0xff]  ;;  %v9702_v26 = vld [vmem:[#allocation16 + $0x80] sm:$0xff] }
 0xaf6   : > { %9627 = vmatpush.msrb.mxu2 %v9538_v56  ;;  %9771 = vmatpush.msra.mxu1 %v9700_v12  ;;  %v9719_v12 = vld [vmem:[#allocation16 + $0x108] sm:$0xff] }
 0xaf7   : > { %9681 = vmatpush.msra.mxu0 %v9538_v56  ;;  %12046 = vmatmul.msk.f32.vlgmr.msrb.gmra.mxu2 %vm17859_vm4, %v9588_v37  ;;  %v9759_v37 = vld [vmem:[#allocation16 + $0x248] sm:$0xff] }
 0xaf8   : > { %12049 = vmatmul.msk.f32.vlgmr.msra.gmra.mxu0 %vm17860_vm6, %v9642_v42  ;;  %9772 = vmatpush.msra.mxu1 %v9699_v23  ;;  %v9760_v42 = vld [vmem:[#allocation16 + $0x250] sm:$0xff]  ;;  %v9739_v56 = vld [vmem:[#allocation16 + $0x1a8] sm:$0xff] }
 0xaf9   : > { %9790 = vmatpush.msra.mxu2 %v9717_v53  ;;  %9811 = vmatpush.msra.mxu3 %v9732_v43  ;;  %v9756_v23 = vld [vmem:[#allocation16 + $0x230] sm:$0xff]  ;;  %v9718_v53 = vld [vmem:[#allocation16 + $0x100] sm:$0xff] }
 0xafa   : > { %9773 = vmatpush.msra.mxu1 %v9698_v18  ;;  %9830 = vmatpush.msrb.mxu0 %v9749_v61  ;;  %v9738_v43 = vld [vmem:[#allocation16 + $0x1a0] sm:$0xff]  ;;  %v9755_v18 = vld [vmem:[#allocation16 + $0x228] sm:$0xff] }
 0xafb   : > { %9791 = vmatpush.msra.mxu2 %v9716_v4  ;;  %9812 = vmatpush.msra.mxu3 %v9731_v49  ;;  %v9737_v4 = vld [vmem:[#allocation16 + $0x198] sm:$0xff]  ;;  %v9754_v49 = vld [vmem:[#allocation16 + $0x220] sm:$0xff] }
 0xafc   : > { %9774 = vmatpush.msra.mxu1 %v9697_v52  ;;  %9831 = vmatpush.msrb.mxu0 %v9748_v10  ;;  %v9736_v52 = vld [vmem:[#allocation16 + $0x190] sm:$0xff]  ;;  %v9753_v10 = vld [vmem:[#allocation16 + $0x218] sm:$0xff] }
 0xafd   : > { %9792 = vmatpush.msra.mxu2 %v9715_v36  ;;  %9813 = vmatpush.msra.mxu3 %v9730_v63  ;;  %v9735_v36 = vld [vmem:[#allocation16 + $0x188] sm:$0xff]  ;;  %v9752_v63 = vld [vmem:[#allocation16 + $0x210] sm:$0xff] }
 0xafe   : > { %9775 = vmatpush.msra.mxu1 %v9696_v19  ;;  %9832 = vmatpush.msrb.mxu0 %v9747_v22  ;;  %v9734_v19 = vld [vmem:[#allocation16 + $0x180] sm:$0xff]  ;;  %v9751_v22 = vld [vmem:[#allocation16 + $0x208] sm:$0xff] }
 0xaff   : > { %9793 = vmatpush.msra.mxu2 %v9714_v34  ;;  %9814 = vmatpush.msra.mxu3 %v9729_v13  ;;  %v9750_v34 = vld [vmem:[#allocation16 + $0x200] sm:$0xff] }
 0xb00   : > { %9776 = vmatpush.msra.mxu1 %v9695_v6  ;;  %9833 = vmatpush.msrb.mxu0 %v9746_v48 }
 0xb01   : > { %9794 = vmatpush.msra.mxu2 %v9713_v29  ;;  %9815 = vmatpush.msra.mxu3 %v9728_v25  ;;  %v12670_v25 = vld [vmem:[%s17861_s30] ss:$0 sm:$0xff]  ;;  %s13054_s30 = scalar_lea.hbm %s17862_s24, 8 }
 0xb02   : > { %9777 = vmatpush.msra.mxu1 %v9694_v54  ;;  %9834 = vmatpush.msrb.mxu0 %v9745_v0  ;;  %p13056_p8 = scmp.lt.s32.totalorder %s13054_s30, %s13050_s10 }
 0xb03   : > { %9795 = vmatpush.msra.mxu2 %v9712_v33  ;;  %9816 = vmatpush.msra.mxu3 %v9727_v41 }
 0xb04   : > { %9778 = vmatpush.msra.mxu1 %v9693_v9  ;;  %9835 = vmatpush.msrb.mxu0 %v9744_v30  ;;  %p13057_p9 = por %p13056_p8, %p13055_p7 }
 0xb05   : > { %9796 = vmatpush.msra.mxu2 %v9711_v62  ;;  %9817 = vmatpush.msra.mxu3 %v9726_v15 }
 0xb06   : > { %9779 = vmatpush.msra.mxu1 %v9692_v32  ;;  %9836 = vmatpush.msrb.mxu0 %v9743_v2  ;;  %p13058_p10 = pnand %p13057_p9, %p13053_p12 }
 0xb07   : > { %9797 = vmatpush.msra.mxu2 %v9710_v3  ;;  %9818 = vmatpush.msra.mxu3 %v9725_v1 }
 0xb08   : > { %9780 = vmatpush.msra.mxu1 %v9691_v35  ;;  %9837 = vmatpush.msrb.mxu0 %v9742_v14 }
 0xb09   : > { %9798 = vmatpush.msra.mxu2 %v9709_v39  ;;  %9819 = vmatpush.msra.mxu3 %v9724_v46 }
 0xb0a   : > { %9781 = vmatpush.msra.mxu1 %v9690_v60  ;;  %9838 = vmatpush.msrb.mxu0 %v9741_v5 }
 0xb0b   : > { %9799 = vmatpush.msra.mxu2 %v9708_v11  ;;  %9820 = vmatpush.msra.mxu3 %v9723_v7 }
 0xb0c   : > { %9782 = vmatpush.msra.mxu1 %v9689_v59  ;;  %9839 = vmatpush.msrb.mxu0 %v9740_v44 }
 0xb0d   : > { %9800 = vmatpush.msra.mxu2 %v9707_v55  ;;  %9821 = vmatpush.msra.mxu3 %v9722_v27 }
 0xb0e   : > { %9783 = vmatpush.msra.mxu1 %v9688_v58  ;;  %9840 = vmatpush.msrb.mxu0 %v9739_v56 }
 0xb0f   : > { %9801 = vmatpush.msra.mxu2 %v9706_v45  ;;  %9822 = vmatpush.msra.mxu3 %v9721_v51 }
 0xb10   : > { %9784 = vmatpush.msra.mxu1 %v9687_v50  ;;  %9841 = vmatpush.msrb.mxu0 %v9738_v43 }
 0xb11   : > { %9802 = vmatpush.msra.mxu2 %v9705_v31  ;;  %9823 = vmatpush.msra.mxu3 %v9720_v21 }
 0xb12   : > { %9785 = vmatpush.msra.mxu1 %v9686_v24  ;;  %9842 = vmatpush.msrb.mxu0 %v9737_v4 }
 0xb13   : > { %9803 = vmatpush.msra.mxu2 %v9704_v40  ;;  %9824 = vmatpush.msra.mxu3 %v9719_v12 }
 0xb14   : > { %9850 = vmatpush.msrb.mxu1 %v9765_v47  ;;  %9843 = vmatpush.msrb.mxu0 %v9736_v52 }
 0xb15   : > { %9804 = vmatpush.msra.mxu2 %v9703_v17  ;;  %9825 = vmatpush.msra.mxu3 %v9718_v53 }
 0xb16   : > { %9851 = vmatpush.msrb.mxu1 %v9764_v57  ;;  %9844 = vmatpush.msrb.mxu0 %v9735_v36 }
 0xb17   : > { %9805 = vmatpush.msra.mxu2 %v9702_v26 }
 0xb18   : > { %9852 = vmatpush.msrb.mxu1 %v9763_v20  ;;  %9845 = vmatpush.msrb.mxu0 %v9734_v19 }
 0xb1a   : > { %9853 = vmatpush.msrb.mxu1 %v9762_v38 }
 0xb1c   : > { %9854 = vmatpush.msrb.mxu1 %v9761_v8 }
 0xb1e   : > { %9855 = vmatpush.msrb.mxu1 %v9760_v42 }
 0xb20   : > { %9856 = vmatpush.msrb.mxu1 %v9759_v37 }
 0xb22   : > { %9857 = vmatpush.msrb.mxu1 %v9758_v28 }
 0xb24   : > { %9858 = vmatpush.msrb.mxu1 %v9757_v16 }
 0xb26   : > { %9859 = vmatpush.msrb.mxu1 %v9756_v23 }
 0xb28   : > { %9860 = vmatpush.msrb.mxu1 %v9755_v18 }
 0xb2a   : > { %9861 = vmatpush.msrb.mxu1 %v9754_v49 }
 0xb2c   : > { %9862 = vmatpush.msrb.mxu1 %v9753_v10 }
 0xb2e   : > { %9863 = vmatpush.msrb.mxu1 %v9752_v63 }
 0xb30   : > { %9864 = vmatpush.msrb.mxu1 %v9751_v22 }
 0xb32   : > { %9865 = vmatpush.msrb.mxu1 %v9750_v34 }
 0xb51   : > { %v9579_v61 = vpop.f32.mrf.mxu0 }
 0xb52   : > { %9786 = vmatmul.f32.vlgmr.msra.gmra.mxu1 %v9579_v61 }
 0xb6f   : > { %v9609_v13 = vpop.f32.mrf.mxu1 }
 0xb70   : > { %9806 = vmatmul.f32.vlgmr.msra.gmra.mxu2 %v9609_v13 }
 0xb75   : > { %v9683_v6 = vpop.f32.mrf.mxu0 }
 0xb76   : > { %v9663_v48 = vpop.f32.mrf.mxu3  ;;  %9866 = vmatmul.f32.vlgmr.msrb.gmra.mxu1 %v9683_v6 }
 0xb77   : > { %9846 = vmatmul.f32.vlgmr.msrb.gmra.mxu0 %v9663_v48 }
 0xb7a   : > { %v9629_v29 = vpop.f32.mrf.mxu2 }
 0xb7b   : > { %9826 = vmatmul.f32.vlgmr.msra.gmra.mxu3 %v9629_v29 }
 0xbcf   : > { %v9787_v54 = vpop.f32.mrf.mxu1 }
 0xbd0   : > { %v9788_v0 = vadd.f32 %v12670_v25, %v9787_v54 }
 0xbf3   : > { %v9807_v33 = vpop.f32.mrf.mxu2  ;;  %v9867_v15 = vpop.f32.mrf.mxu1 }
 0xbf4   : > { %v9808_v41 = vadd.f32 %v9807_v33, %v9788_v0  ;;  %v9847_v30 = vpop.f32.mrf.mxu0 }
 0xbfe   : > { %v9827_v9 = vpop.f32.mrf.mxu3 }
 0xbff   : > { %v9828_v62 = vadd.f32 %v9827_v9, %v9808_v41 }
 0xc01   : > { %v9848_v32 = vadd.f32 %v9847_v30, %v9828_v62 }
 0xc03   : > { %v9868_v2 = vadd.f32 %v9867_v15, %v9848_v32 }
 0xc05   : > { %9870 = vst [vmem:[%s823_s3] sm:$0xf] %v9868_v2 }
 0xc06   : > { %13061 = shalt.err (!%p13058_p10)
}
 0xc07   : > { %12562 = dma.vmem_to_hbm [thread:$0]  (%p13374_p4), %s9885_s22, 64, %s9887_s17, %s9872_s18  }
 0xc08 PF: > { %s9898_s5 = sand.u32 1, %s13104_s2   ;;  %p17863_p13 = scmp.ge.s32.totalorder %s13116_s27, 2 }
 0xc09   : > { %s9899_s0 = scalar_lea.sflag [#allocation4], %s9898_s5 }
 0xc0a   : > { %p12594_p11 = pnand %p17863_p13, %p13378_p6 }
 0xc0c   : > { %p12595_p0 = pneg %p12594_p11 }
 0xc0e   : > { %13099 = dma.done.wait (%p12595_p0), %s9899_s0, 64  }
 0xc0f   : > { %13101 = vsyncadd (%p12595_p0), %s9899_s0, 4294967232  ;;  %p38_p2 = scmp.ge.s32.totalorder %s13348_s1, 4   ;;  %s17864_s2 = smov %s13108_s25 }
 0xc10   : > { %s17865_s25 = smov %s13112_s26  ;;  %s17866_s26 = smov %s13359_s29 }
 0xc11   : > { %s17867_s27 = smov %s13348_s1  ;;  %40 = sbr.rel (!%p38_p2) target bundleno = 28 (0x1c), region = 205 }
 0xc16   :  { %9905 = vsyncpa [#allocation3], 1 }
 0xc17   :  { %9907 = vsyncpa [#allocation3 + $0x1], 1 }
 0xc18   :  { %9908 = vsyncpa [#allocation6], 1 }
 0xc19   :  { %9909 = vsyncpa [#allocation9], 1 }
 0xc1a   :  { %9910 = vsyncpa [#allocation12], 1 }
 0xc1b   :  { %9911 = vsyncpa [#allocation15], 1 }
 0xc1c   :  { %9912 = vsyncpa [#allocation4], 1 }
 0xc1d   :  { %9914 = vsyncpa [#allocation4 + $0x1], 1 }

</bundles_post_ra>
